<compile_context>
chip_gen: v7x
topology: tpu7x:2x2x1
jax: 0.10.0
libtpu: 0.0.40
codegen_flags: <defaults>
</compile_context>

<pallas_src>
import math

import jax
import jax.numpy as jnp
from jax.experimental import pallas as pl
from jax.experimental.pallas import tpu as pltpu

H = 16
W = 16
HW = H * W

# (cin, cout, ksize, pad) for conv1 / conv2 / conv3
_LAYERS = ((2, 16, 9, 4), (16, 32, 5, 2), (32, 1, 5, 2))


def _fused_refine_kernel(x_ref, w1_ref, w2_ref, w3_ref, o_ref):
    """Whole 3-conv network for one batch element; everything stays in VMEM."""

    # Per-kw column masks: mask[dw][0, s] == 1 iff 0 <= (s % W) + dw < W.
    col = jax.lax.broadcasted_iota(jnp.int32, (1, HW), 1) % W
    masks = {dw: ((col + dw >= 0) & (col + dw < W)).astype(jnp.float32)
             for dw in range(-4, 5)}

    def conv_same(act, w_ref, cin, k, pad):
        # H-only "same" padding in flat (lane-dense) layout.  The buffer is
        #   [ off zeros | H*W activation | off zeros ],  off = pad*W + pad,
        # so tap (kh, kw) is simply b[:, kh*W + kw : kh*W + kw + HW].
        off = pad * W + pad
        zeros = jnp.zeros((cin, off), jnp.float32)
        b = jnp.concatenate([zeros, act, zeros], axis=1)

        rows = []
        for kh in range(k):
            for kw in range(k):
                start = kh * W + kw
                tap = b[:, start:start + HW]
                if kw != pad:  # interior column (dw == 0) needs no mask
                    tap = tap * masks[kw - pad]
                rows.append(tap)
        # Ones "channel" folds the bias into the matmul.
        rows.append(jnp.ones((1, HW), jnp.float32))
        slab = jnp.concatenate(rows, axis=0)          # (k*k*cin + 1, HW)

        # Single lane-dense MXU matmul per layer: (cout, K+1) @ (K+1, H*W).
        return jnp.dot(w_ref[...], slab, preferred_element_type=jnp.float32)

    a1 = conv_same(x_ref[...].astype(jnp.float32), w1_ref, 2, 9, 4)
    a2 = conv_same(a1, w2_ref, 16, 5, 2)
    a3 = conv_same(a2, w3_ref, 32, 5, 2)
    o_ref[...] = a3.astype(o_ref.dtype)


def _flatten_conv_params(w, b):
    """(Cout,Cin,KH,KW),(Cout,) -> lane-dense (Cout, KH*KW*Cin + 1).

    Column order is (kh, kw, cin) to match the in-kernel im2col slab; the last
    column is the bias (matched by the ones row appended to the slab).
    """
    cout, cin, kh, kw = w.shape
    w2 = jnp.transpose(w, (0, 2, 3, 1)).reshape(cout, kh * kw * cin)
    return jnp.concatenate([w2, b.reshape(cout, 1)], axis=1).astype(jnp.float32)


def refining_network_pallas(params, x):
    N = x.shape[0]
    assert x.shape[1:] == (2, H, W), x.shape

    wm = [_flatten_conv_params(*params[name])
          for name in ("conv1", "conv2", "conv3")]

    # Flatten spatial in the wrapper so the kernel sees lane-dense (C, 256).
    x_flat = x.reshape(N, 2, HW).astype(jnp.float32)

    flops = 2 * N * HW * sum(co * (ci * k * k + 1) for ci, co, k, _ in _LAYERS)
    bytes_accessed = 4 * (x.size + sum(int(m.size) for m in wm) + N * HW)

    out_flat = pl.pallas_call(
        _fused_refine_kernel,
        out_shape=jax.ShapeDtypeStruct((N, 1, HW), jnp.float32),
        grid=(N,),
        in_specs=[
            pl.BlockSpec((None, 2, HW), lambda n: (n, 0, 0)),
            pl.BlockSpec(wm[0].shape, lambda n: (0, 0)),
            pl.BlockSpec(wm[1].shape, lambda n: (0, 0)),
            pl.BlockSpec(wm[2].shape, lambda n: (0, 0)),
        ],
        out_specs=pl.BlockSpec((None, 1, HW), lambda n: (n, 0, 0)),
        compiler_params=pltpu.CompilerParams(
            dimension_semantics=("parallel",)),
        cost_estimate=pl.CostEstimate(
            flops=flops, transcendentals=0, bytes_accessed=bytes_accessed),
    )(x_flat, *wm)

    return out_flat.reshape(N, 1, H, W)


refining_network_forward = jax.jit(refining_network_pallas)


def _init_conv_params(key, cout, cin, kh, kw):
    """Deterministic PyTorch-style (kaiming-uniform) init for Conv2d."""
    wkey, bkey = jax.random.split(key)
    fan_in = cin * kh * kw
    bound = 1.0 / math.sqrt(fan_in)
    w = jax.random.uniform(wkey, (cout, cin, kh, kw), jnp.float32,
                           minval=-bound, maxval=bound)
    b = jax.random.uniform(bkey, (cout,), jnp.float32,
                           minval=-bound, maxval=bound)
    return w, b


def refining_network_init(key):
    k1, k2, k3 = jax.random.split(key, 3)
    return {
        "conv1": _init_conv_params(k1, 16, 2, 9, 9),
        "conv2": _init_conv_params(k2, 32, 16, 5, 5),
        "conv3": _init_conv_params(k3, 1, 32, 5, 5),
    }


def _reference_forward(params, x):
    """Pure-JAX reference (matches PyTorch refining_network.forward)."""
    out = x
    for name in ("conv1", "conv2", "conv3"):
        w, b = params[name]
        pad = w.shape[-1] // 2
        out = jax.lax.conv_general_dilated(
            out, w, window_strides=(1, 1),
            padding=((pad, pad), (pad, pad)),
            dimension_numbers=("NCHW", "OIHW", "NCHW"),
            precision=jax.lax.Precision.HIGHEST)
        out = out + b.reshape(1, -1, 1, 1)
    return out


if __name__ == "__main__":
    key = jax.random.PRNGKey(0)
    pkey, xkey = jax.random.split(key)

    params = refining_network_init(pkey)
    # Small NCHW input: batch=2, in_channels=2 (as required by conv1), 16x16.
    x = jax.random.normal(xkey, (2, 2, 16, 16), jnp.float32)

    y = refining_network_forward(params, x)
    jax.block_until_ready(y)

    assert y.shape == (2, 1, 16, 16), y.shape
    assert y.dtype == jnp.float32

    # Numerical self-check against a pure-JAX conv reference.
    y_ref = _reference_forward(params, x)
    err = float(jnp.max(jnp.abs(y - y_ref)))
    assert err < 1e-3, f"max abs error vs reference: {err}"

    print("KERNEL_OK")
</pallas_src>

<mosaic_0001>
module attributes {stable_mosaic.version = 11 : i64} {
  func.func @_fused_refine_kernel(%arg0: i32, %arg1: memref<1x2x256xf32, #tpu.memory_space<vmem>>, %arg2: memref<16x163xf32, #tpu.memory_space<vmem>>, %arg3: memref<32x401xf32, #tpu.memory_space<vmem>>, %arg4: memref<1x801xf32, #tpu.memory_space<vmem>>, %arg5: memref<1x1x256xf32, #tpu.memory_space<vmem>>) attributes {dimension_semantics = [#tpu.dimension_semantics<parallel>], iteration_bounds = array<i64: 2>, scalar_prefetch = 0 : i64, scratch_operands = 0 : i64, tpu.core_type = #tpu.core_type<tc>, window_params = [{transform_indices = @transform_0, window_bounds = array<i64: 1, 2, 256>}, {pipeline_mode = #tpu.pipeline_mode<synchronous>, transform_indices = @transform_1, window_bounds = array<i64: 16, 163>}, {pipeline_mode = #tpu.pipeline_mode<synchronous>, transform_indices = @transform_2, window_bounds = array<i64: 32, 401>}, {pipeline_mode = #tpu.pipeline_mode<synchronous>, transform_indices = @transform_3, window_bounds = array<i64: 1, 801>}, {transform_indices = @transform_4, window_bounds = array<i64: 1, 1, 256>}]} {
    %0 = tpu.iota {dimensions = array<i32: 1>} : vector<1x256xi32>
    %c16_i32 = arith.constant 16 : i32
    %c0_i32 = arith.constant 0 : i32
    %1 = arith.cmpi eq, %c16_i32, %c0_i32 : i32
    %c1_i32 = arith.constant 1 : i32
    %2 = arith.select %1, %c1_i32, %c16_i32 : i32
    %3 = vector.broadcast %2 : i32 to vector<1x256xi32>
    %4 = arith.remsi %0, %3 : vector<1x256xi32>
    %c0_i32_0 = arith.constant 0 : i32
    %5 = vector.broadcast %c0_i32_0 : i32 to vector<1x256xi32>
    %6 = arith.cmpi ne, %4, %5 : vector<1x256xi32>
    %c0_i32_1 = arith.constant 0 : i32
    %7 = vector.broadcast %c0_i32_1 : i32 to vector<1x256xi32>
    %8 = arith.cmpi slt, %4, %7 : vector<1x256xi32>
    %c0_i32_2 = arith.constant 0 : i32
    %9 = arith.cmpi slt, %2, %c0_i32_2 : i32
    %10 = vector.broadcast %9 : i1 to vector<1x256xi1>
    %11 = vector.broadcast %10 : vector<1x256xi1> to vector<1x256xi1>
    %12 = arith.xori %8, %11 : vector<1x256xi1>
    %13 = arith.andi %12, %6 : vector<1x256xi1>
    %14 = vector.broadcast %2 : i32 to vector<1x256xi32>
    %15 = arith.addi %4, %14 : vector<1x256xi32>
    %16 = arith.select %13, %15, %4 : vector<1x256xi1>, vector<1x256xi32>
    %c-4_i32 = arith.constant -4 : i32
    %17 = vector.broadcast %c-4_i32 : i32 to vector<1x256xi32>
    %18 = arith.addi %16, %17 : vector<1x256xi32>
    %c0_i32_3 = arith.constant 0 : i32
    %19 = vector.broadcast %c0_i32_3 : i32 to vector<1x256xi32>
    %20 = arith.cmpi sge, %18, %19 : vector<1x256xi32>
    %c-4_i32_4 = arith.constant -4 : i32
    %21 = vector.broadcast %c-4_i32_4 : i32 to vector<1x256xi32>
    %22 = arith.addi %16, %21 : vector<1x256xi32>
    %c16_i32_5 = arith.constant 16 : i32
    %23 = vector.broadcast %c16_i32_5 : i32 to vector<1x256xi32>
    %24 = arith.cmpi slt, %22, %23 : vector<1x256xi32>
    %25 = arith.andi %20, %24 : vector<1x256xi1>
    %26 = arith.extui %25 : vector<1x256xi1> to vector<1x256xi32>
    %27 = arith.sitofp %26 : vector<1x256xi32> to vector<1x256xf32>
    %c-3_i32 = arith.constant -3 : i32
    %28 = vector.broadcast %c-3_i32 : i32 to vector<1x256xi32>
    %29 = arith.addi %16, %28 : vector<1x256xi32>
    %c0_i32_6 = arith.constant 0 : i32
    %30 = vector.broadcast %c0_i32_6 : i32 to vector<1x256xi32>
    %31 = arith.cmpi sge, %29, %30 : vector<1x256xi32>
    %c-3_i32_7 = arith.constant -3 : i32
    %32 = vector.broadcast %c-3_i32_7 : i32 to vector<1x256xi32>
    %33 = arith.addi %16, %32 : vector<1x256xi32>
    %c16_i32_8 = arith.constant 16 : i32
    %34 = vector.broadcast %c16_i32_8 : i32 to vector<1x256xi32>
    %35 = arith.cmpi slt, %33, %34 : vector<1x256xi32>
    %36 = arith.andi %31, %35 : vector<1x256xi1>
    %37 = arith.extui %36 : vector<1x256xi1> to vector<1x256xi32>
    %38 = arith.sitofp %37 : vector<1x256xi32> to vector<1x256xf32>
    %c-2_i32 = arith.constant -2 : i32
    %39 = vector.broadcast %c-2_i32 : i32 to vector<1x256xi32>
    %40 = arith.addi %16, %39 : vector<1x256xi32>
    %c0_i32_9 = arith.constant 0 : i32
    %41 = vector.broadcast %c0_i32_9 : i32 to vector<1x256xi32>
    %42 = arith.cmpi sge, %40, %41 : vector<1x256xi32>
    %c-2_i32_10 = arith.constant -2 : i32
    %43 = vector.broadcast %c-2_i32_10 : i32 to vector<1x256xi32>
    %44 = arith.addi %16, %43 : vector<1x256xi32>
    %c16_i32_11 = arith.constant 16 : i32
    %45 = vector.broadcast %c16_i32_11 : i32 to vector<1x256xi32>
    %46 = arith.cmpi slt, %44, %45 : vector<1x256xi32>
    %47 = arith.andi %42, %46 : vector<1x256xi1>
    %48 = arith.extui %47 : vector<1x256xi1> to vector<1x256xi32>
    %49 = arith.sitofp %48 : vector<1x256xi32> to vector<1x256xf32>
    %c-1_i32 = arith.constant -1 : i32
    %50 = vector.broadcast %c-1_i32 : i32 to vector<1x256xi32>
    %51 = arith.addi %16, %50 : vector<1x256xi32>
    %c0_i32_12 = arith.constant 0 : i32
    %52 = vector.broadcast %c0_i32_12 : i32 to vector<1x256xi32>
    %53 = arith.cmpi sge, %51, %52 : vector<1x256xi32>
    %c-1_i32_13 = arith.constant -1 : i32
    %54 = vector.broadcast %c-1_i32_13 : i32 to vector<1x256xi32>
    %55 = arith.addi %16, %54 : vector<1x256xi32>
    %c16_i32_14 = arith.constant 16 : i32
    %56 = vector.broadcast %c16_i32_14 : i32 to vector<1x256xi32>
    %57 = arith.cmpi slt, %55, %56 : vector<1x256xi32>
    %58 = arith.andi %53, %57 : vector<1x256xi1>
    %59 = arith.extui %58 : vector<1x256xi1> to vector<1x256xi32>
    %60 = arith.sitofp %59 : vector<1x256xi32> to vector<1x256xf32>
    %c1_i32_15 = arith.constant 1 : i32
    %61 = vector.broadcast %c1_i32_15 : i32 to vector<1x256xi32>
    %62 = arith.addi %16, %61 : vector<1x256xi32>
    %c0_i32_16 = arith.constant 0 : i32
    %63 = vector.broadcast %c0_i32_16 : i32 to vector<1x256xi32>
    %64 = arith.cmpi sge, %62, %63 : vector<1x256xi32>
    %c1_i32_17 = arith.constant 1 : i32
    %65 = vector.broadcast %c1_i32_17 : i32 to vector<1x256xi32>
    %66 = arith.addi %16, %65 : vector<1x256xi32>
    %c16_i32_18 = arith.constant 16 : i32
    %67 = vector.broadcast %c16_i32_18 : i32 to vector<1x256xi32>
    %68 = arith.cmpi slt, %66, %67 : vector<1x256xi32>
    %69 = arith.andi %64, %68 : vector<1x256xi1>
    %70 = arith.extui %69 : vector<1x256xi1> to vector<1x256xi32>
    %71 = arith.sitofp %70 : vector<1x256xi32> to vector<1x256xf32>
    %c2_i32 = arith.constant 2 : i32
    %72 = vector.broadcast %c2_i32 : i32 to vector<1x256xi32>
    %73 = arith.addi %16, %72 : vector<1x256xi32>
    %c0_i32_19 = arith.constant 0 : i32
    %74 = vector.broadcast %c0_i32_19 : i32 to vector<1x256xi32>
    %75 = arith.cmpi sge, %73, %74 : vector<1x256xi32>
    %c2_i32_20 = arith.constant 2 : i32
    %76 = vector.broadcast %c2_i32_20 : i32 to vector<1x256xi32>
    %77 = arith.addi %16, %76 : vector<1x256xi32>
    %c16_i32_21 = arith.constant 16 : i32
    %78 = vector.broadcast %c16_i32_21 : i32 to vector<1x256xi32>
    %79 = arith.cmpi slt, %77, %78 : vector<1x256xi32>
    %80 = arith.andi %75, %79 : vector<1x256xi1>
    %81 = arith.extui %80 : vector<1x256xi1> to vector<1x256xi32>
    %82 = arith.sitofp %81 : vector<1x256xi32> to vector<1x256xf32>
    %c3_i32 = arith.constant 3 : i32
    %83 = vector.broadcast %c3_i32 : i32 to vector<1x256xi32>
    %84 = arith.addi %16, %83 : vector<1x256xi32>
    %c0_i32_22 = arith.constant 0 : i32
    %85 = vector.broadcast %c0_i32_22 : i32 to vector<1x256xi32>
    %86 = arith.cmpi sge, %84, %85 : vector<1x256xi32>
    %c3_i32_23 = arith.constant 3 : i32
    %87 = vector.broadcast %c3_i32_23 : i32 to vector<1x256xi32>
    %88 = arith.addi %16, %87 : vector<1x256xi32>
    %c16_i32_24 = arith.constant 16 : i32
    %89 = vector.broadcast %c16_i32_24 : i32 to vector<1x256xi32>
    %90 = arith.cmpi slt, %88, %89 : vector<1x256xi32>
    %91 = arith.andi %86, %90 : vector<1x256xi1>
    %92 = arith.extui %91 : vector<1x256xi1> to vector<1x256xi32>
    %93 = arith.sitofp %92 : vector<1x256xi32> to vector<1x256xf32>
    %c4_i32 = arith.constant 4 : i32
    %94 = vector.broadcast %c4_i32 : i32 to vector<1x256xi32>
    %95 = arith.addi %16, %94 : vector<1x256xi32>
    %c0_i32_25 = arith.constant 0 : i32
    %96 = vector.broadcast %c0_i32_25 : i32 to vector<1x256xi32>
    %97 = arith.cmpi sge, %95, %96 : vector<1x256xi32>
    %c4_i32_26 = arith.constant 4 : i32
    %98 = vector.broadcast %c4_i32_26 : i32 to vector<1x256xi32>
    %99 = arith.addi %16, %98 : vector<1x256xi32>
    %c16_i32_27 = arith.constant 16 : i32
    %100 = vector.broadcast %c16_i32_27 : i32 to vector<1x256xi32>
    %101 = arith.cmpi slt, %99, %100 : vector<1x256xi32>
    %102 = arith.andi %97, %101 : vector<1x256xi1>
    %103 = arith.extui %102 : vector<1x256xi1> to vector<1x256xi32>
    %104 = arith.sitofp %103 : vector<1x256xi32> to vector<1x256xf32>
    %c0 = arith.constant 0 : index
    %c0_28 = arith.constant 0 : index
    %c0_29 = arith.constant 0 : index
    %105 = vector.load %arg1[%c0, %c0_28, %c0_29] : memref<1x2x256xf32, #tpu.memory_space<vmem>>, vector<1x2x256xf32>
    %106 = vector.shape_cast %105 : vector<1x2x256xf32> to vector<2x256xf32>
    %cst = arith.constant 0.000000e+00 : f32
    %107 = vector.broadcast %cst : f32 to vector<2x68xf32>
    %108 = tpu.concatenate %107, %106, %107 in 1 : vector<2x68xf32>, vector<2x256xf32>, vector<2x68xf32> -> vector<2x392xf32>
    %109 = vector.extract_strided_slice %108 {offsets = [0, 0], sizes = [2, 256], strides = [1, 1]} : vector<2x392xf32> to vector<2x256xf32>
    %110 = vector.broadcast %27 : vector<1x256xf32> to vector<2x256xf32>
    %111 = arith.mulf %109, %110 : vector<2x256xf32>
    %112 = vector.extract_strided_slice %108 {offsets = [0, 1], sizes = [2, 256], strides = [1, 1]} : vector<2x392xf32> to vector<2x256xf32>
    %113 = vector.broadcast %38 : vector<1x256xf32> to vector<2x256xf32>
    %114 = arith.mulf %112, %113 : vector<2x256xf32>
    %115 = vector.extract_strided_slice %108 {offsets = [0, 2], sizes = [2, 256], strides = [1, 1]} : vector<2x392xf32> to vector<2x256xf32>
    %116 = vector.broadcast %49 : vector<1x256xf32> to vector<2x256xf32>
    %117 = arith.mulf %115, %116 : vector<2x256xf32>
    %118 = vector.extract_strided_slice %108 {offsets = [0, 3], sizes = [2, 256], strides = [1, 1]} : vector<2x392xf32> to vector<2x256xf32>
    %119 = vector.broadcast %60 : vector<1x256xf32> to vector<2x256xf32>
    %120 = arith.mulf %118, %119 : vector<2x256xf32>
    %121 = vector.extract_strided_slice %108 {offsets = [0, 4], sizes = [2, 256], strides = [1, 1]} : vector<2x392xf32> to vector<2x256xf32>
    %122 = vector.extract_strided_slice %108 {offsets = [0, 5], sizes = [2, 256], strides = [1, 1]} : vector<2x392xf32> to vector<2x256xf32>
    %123 = vector.broadcast %71 : vector<1x256xf32> to vector<2x256xf32>
    %124 = arith.mulf %122, %123 : vector<2x256xf32>
    %125 = vector.extract_strided_slice %108 {offsets = [0, 6], sizes = [2, 256], strides = [1, 1]} : vector<2x392xf32> to vector<2x256xf32>
    %126 = vector.broadcast %82 : vector<1x256xf32> to vector<2x256xf32>
    %127 = arith.mulf %125, %126 : vector<2x256xf32>
    %128 = vector.extract_strided_slice %108 {offsets = [0, 7], sizes = [2, 256], strides = [1, 1]} : vector<2x392xf32> to vector<2x256xf32>
    %129 = vector.broadcast %93 : vector<1x256xf32> to vector<2x256xf32>
    %130 = arith.mulf %128, %129 : vector<2x256xf32>
    %131 = vector.extract_strided_slice %108 {offsets = [0, 8], sizes = [2, 256], strides = [1, 1]} : vector<2x392xf32> to vector<2x256xf32>
    %132 = vector.broadcast %104 : vector<1x256xf32> to vector<2x256xf32>
    %133 = arith.mulf %131, %132 : vector<2x256xf32>
    %134 = vector.extract_strided_slice %108 {offsets = [0, 16], sizes = [2, 256], strides = [1, 1]} : vector<2x392xf32> to vector<2x256xf32>
    %135 = vector.broadcast %27 : vector<1x256xf32> to vector<2x256xf32>
    %136 = arith.mulf %134, %135 : vector<2x256xf32>
    %137 = vector.extract_strided_slice %108 {offsets = [0, 17], sizes = [2, 256], strides = [1, 1]} : vector<2x392xf32> to vector<2x256xf32>
    %138 = vector.broadcast %38 : vector<1x256xf32> to vector<2x256xf32>
    %139 = arith.mulf %137, %138 : vector<2x256xf32>
    %140 = vector.extract_strided_slice %108 {offsets = [0, 18], sizes = [2, 256], strides = [1, 1]} : vector<2x392xf32> to vector<2x256xf32>
    %141 = vector.broadcast %49 : vector<1x256xf32> to vector<2x256xf32>
    %142 = arith.mulf %140, %141 : vector<2x256xf32>
    %143 = vector.extract_strided_slice %108 {offsets = [0, 19], sizes = [2, 256], strides = [1, 1]} : vector<2x392xf32> to vector<2x256xf32>
    %144 = vector.broadcast %60 : vector<1x256xf32> to vector<2x256xf32>
    %145 = arith.mulf %143, %144 : vector<2x256xf32>
    %146 = vector.extract_strided_slice %108 {offsets = [0, 20], sizes = [2, 256], strides = [1, 1]} : vector<2x392xf32> to vector<2x256xf32>
    %147 = vector.extract_strided_slice %108 {offsets = [0, 21], sizes = [2, 256], strides = [1, 1]} : vector<2x392xf32> to vector<2x256xf32>
    %148 = vector.broadcast %71 : vector<1x256xf32> to vector<2x256xf32>
    %149 = arith.mulf %147, %148 : vector<2x256xf32>
    %150 = vector.extract_strided_slice %108 {offsets = [0, 22], sizes = [2, 256], strides = [1, 1]} : vector<2x392xf32> to vector<2x256xf32>
    %151 = vector.broadcast %82 : vector<1x256xf32> to vector<2x256xf32>
    %152 = arith.mulf %150, %151 : vector<2x256xf32>
    %153 = vector.extract_strided_slice %108 {offsets = [0, 23], sizes = [2, 256], strides = [1, 1]} : vector<2x392xf32> to vector<2x256xf32>
    %154 = vector.broadcast %93 : vector<1x256xf32> to vector<2x256xf32>
    %155 = arith.mulf %153, %154 : vector<2x256xf32>
    %156 = vector.extract_strided_slice %108 {offsets = [0, 24], sizes = [2, 256], strides = [1, 1]} : vector<2x392xf32> to vector<2x256xf32>
    %157 = vector.broadcast %104 : vector<1x256xf32> to vector<2x256xf32>
    %158 = arith.mulf %156, %157 : vector<2x256xf32>
    %159 = vector.extract_strided_slice %108 {offsets = [0, 32], sizes = [2, 256], strides = [1, 1]} : vector<2x392xf32> to vector<2x256xf32>
    %160 = vector.broadcast %27 : vector<1x256xf32> to vector<2x256xf32>
    %161 = arith.mulf %159, %160 : vector<2x256xf32>
    %162 = vector.extract_strided_slice %108 {offsets = [0, 33], sizes = [2, 256], strides = [1, 1]} : vector<2x392xf32> to vector<2x256xf32>
    %163 = vector.broadcast %38 : vector<1x256xf32> to vector<2x256xf32>
    %164 = arith.mulf %162, %163 : vector<2x256xf32>
    %165 = vector.extract_strided_slice %108 {offsets = [0, 34], sizes = [2, 256], strides = [1, 1]} : vector<2x392xf32> to vector<2x256xf32>
    %166 = vector.broadcast %49 : vector<1x256xf32> to vector<2x256xf32>
    %167 = arith.mulf %165, %166 : vector<2x256xf32>
    %168 = vector.extract_strided_slice %108 {offsets = [0, 35], sizes = [2, 256], strides = [1, 1]} : vector<2x392xf32> to vector<2x256xf32>
    %169 = vector.broadcast %60 : vector<1x256xf32> to vector<2x256xf32>
    %170 = arith.mulf %168, %169 : vector<2x256xf32>
    %171 = vector.extract_strided_slice %108 {offsets = [0, 36], sizes = [2, 256], strides = [1, 1]} : vector<2x392xf32> to vector<2x256xf32>
    %172 = vector.extract_strided_slice %108 {offsets = [0, 37], sizes = [2, 256], strides = [1, 1]} : vector<2x392xf32> to vector<2x256xf32>
    %173 = vector.broadcast %71 : vector<1x256xf32> to vector<2x256xf32>
    %174 = arith.mulf %172, %173 : vector<2x256xf32>
    %175 = vector.extract_strided_slice %108 {offsets = [0, 38], sizes = [2, 256], strides = [1, 1]} : vector<2x392xf32> to vector<2x256xf32>
    %176 = vector.broadcast %82 : vector<1x256xf32> to vector<2x256xf32>
    %177 = arith.mulf %175, %176 : vector<2x256xf32>
    %178 = vector.extract_strided_slice %108 {offsets = [0, 39], sizes = [2, 256], strides = [1, 1]} : vector<2x392xf32> to vector<2x256xf32>
    %179 = vector.broadcast %93 : vector<1x256xf32> to vector<2x256xf32>
    %180 = arith.mulf %178, %179 : vector<2x256xf32>
    %181 = vector.extract_strided_slice %108 {offsets = [0, 40], sizes = [2, 256], strides = [1, 1]} : vector<2x392xf32> to vector<2x256xf32>
    %182 = vector.broadcast %104 : vector<1x256xf32> to vector<2x256xf32>
    %183 = arith.mulf %181, %182 : vector<2x256xf32>
    %184 = vector.extract_strided_slice %108 {offsets = [0, 48], sizes = [2, 256], strides = [1, 1]} : vector<2x392xf32> to vector<2x256xf32>
    %185 = vector.broadcast %27 : vector<1x256xf32> to vector<2x256xf32>
    %186 = arith.mulf %184, %185 : vector<2x256xf32>
    %187 = vector.extract_strided_slice %108 {offsets = [0, 49], sizes = [2, 256], strides = [1, 1]} : vector<2x392xf32> to vector<2x256xf32>
    %188 = vector.broadcast %38 : vector<1x256xf32> to vector<2x256xf32>
    %189 = arith.mulf %187, %188 : vector<2x256xf32>
    %190 = vector.extract_strided_slice %108 {offsets = [0, 50], sizes = [2, 256], strides = [1, 1]} : vector<2x392xf32> to vector<2x256xf32>
    %191 = vector.broadcast %49 : vector<1x256xf32> to vector<2x256xf32>
    %192 = arith.mulf %190, %191 : vector<2x256xf32>
    %193 = vector.extract_strided_slice %108 {offsets = [0, 51], sizes = [2, 256], strides = [1, 1]} : vector<2x392xf32> to vector<2x256xf32>
    %194 = vector.broadcast %60 : vector<1x256xf32> to vector<2x256xf32>
    %195 = arith.mulf %193, %194 : vector<2x256xf32>
    %196 = vector.extract_strided_slice %108 {offsets = [0, 52], sizes = [2, 256], strides = [1, 1]} : vector<2x392xf32> to vector<2x256xf32>
    %197 = vector.extract_strided_slice %108 {offsets = [0, 53], sizes = [2, 256], strides = [1, 1]} : vector<2x392xf32> to vector<2x256xf32>
    %198 = vector.broadcast %71 : vector<1x256xf32> to vector<2x256xf32>
    %199 = arith.mulf %197, %198 : vector<2x256xf32>
    %200 = vector.extract_strided_slice %108 {offsets = [0, 54], sizes = [2, 256], strides = [1, 1]} : vector<2x392xf32> to vector<2x256xf32>
    %201 = vector.broadcast %82 : vector<1x256xf32> to vector<2x256xf32>
    %202 = arith.mulf %200, %201 : vector<2x256xf32>
    %203 = vector.extract_strided_slice %108 {offsets = [0, 55], sizes = [2, 256], strides = [1, 1]} : vector<2x392xf32> to vector<2x256xf32>
    %204 = vector.broadcast %93 : vector<1x256xf32> to vector<2x256xf32>
    %205 = arith.mulf %203, %204 : vector<2x256xf32>
    %206 = vector.extract_strided_slice %108 {offsets = [0, 56], sizes = [2, 256], strides = [1, 1]} : vector<2x392xf32> to vector<2x256xf32>
    %207 = vector.broadcast %104 : vector<1x256xf32> to vector<2x256xf32>
    %208 = arith.mulf %206, %207 : vector<2x256xf32>
    %209 = vector.extract_strided_slice %108 {offsets = [0, 64], sizes = [2, 256], strides = [1, 1]} : vector<2x392xf32> to vector<2x256xf32>
    %210 = vector.broadcast %27 : vector<1x256xf32> to vector<2x256xf32>
    %211 = arith.mulf %209, %210 : vector<2x256xf32>
    %212 = vector.extract_strided_slice %108 {offsets = [0, 65], sizes = [2, 256], strides = [1, 1]} : vector<2x392xf32> to vector<2x256xf32>
    %213 = vector.broadcast %38 : vector<1x256xf32> to vector<2x256xf32>
    %214 = arith.mulf %212, %213 : vector<2x256xf32>
    %215 = vector.extract_strided_slice %108 {offsets = [0, 66], sizes = [2, 256], strides = [1, 1]} : vector<2x392xf32> to vector<2x256xf32>
    %216 = vector.broadcast %49 : vector<1x256xf32> to vector<2x256xf32>
    %217 = arith.mulf %215, %216 : vector<2x256xf32>
    %218 = vector.extract_strided_slice %108 {offsets = [0, 67], sizes = [2, 256], strides = [1, 1]} : vector<2x392xf32> to vector<2x256xf32>
    %219 = vector.broadcast %60 : vector<1x256xf32> to vector<2x256xf32>
    %220 = arith.mulf %218, %219 : vector<2x256xf32>
    %221 = vector.extract_strided_slice %108 {offsets = [0, 68], sizes = [2, 256], strides = [1, 1]} : vector<2x392xf32> to vector<2x256xf32>
    %222 = vector.extract_strided_slice %108 {offsets = [0, 69], sizes = [2, 256], strides = [1, 1]} : vector<2x392xf32> to vector<2x256xf32>
    %223 = vector.broadcast %71 : vector<1x256xf32> to vector<2x256xf32>
    %224 = arith.mulf %222, %223 : vector<2x256xf32>
    %225 = vector.extract_strided_slice %108 {offsets = [0, 70], sizes = [2, 256], strides = [1, 1]} : vector<2x392xf32> to vector<2x256xf32>
    %226 = vector.broadcast %82 : vector<1x256xf32> to vector<2x256xf32>
    %227 = arith.mulf %225, %226 : vector<2x256xf32>
    %228 = vector.extract_strided_slice %108 {offsets = [0, 71], sizes = [2, 256], strides = [1, 1]} : vector<2x392xf32> to vector<2x256xf32>
    %229 = vector.broadcast %93 : vector<1x256xf32> to vector<2x256xf32>
    %230 = arith.mulf %228, %229 : vector<2x256xf32>
    %231 = vector.extract_strided_slice %108 {offsets = [0, 72], sizes = [2, 256], strides = [1, 1]} : vector<2x392xf32> to vector<2x256xf32>
    %232 = vector.broadcast %104 : vector<1x256xf32> to vector<2x256xf32>
    %233 = arith.mulf %231, %232 : vector<2x256xf32>
    %234 = vector.extract_strided_slice %108 {offsets = [0, 80], sizes = [2, 256], strides = [1, 1]} : vector<2x392xf32> to vector<2x256xf32>
    %235 = vector.broadcast %27 : vector<1x256xf32> to vector<2x256xf32>
    %236 = arith.mulf %234, %235 : vector<2x256xf32>
    %237 = vector.extract_strided_slice %108 {offsets = [0, 81], sizes = [2, 256], strides = [1, 1]} : vector<2x392xf32> to vector<2x256xf32>
    %238 = vector.broadcast %38 : vector<1x256xf32> to vector<2x256xf32>
    %239 = arith.mulf %237, %238 : vector<2x256xf32>
    %240 = vector.extract_strided_slice %108 {offsets = [0, 82], sizes = [2, 256], strides = [1, 1]} : vector<2x392xf32> to vector<2x256xf32>
    %241 = vector.broadcast %49 : vector<1x256xf32> to vector<2x256xf32>
    %242 = arith.mulf %240, %241 : vector<2x256xf32>
    %243 = vector.extract_strided_slice %108 {offsets = [0, 83], sizes = [2, 256], strides = [1, 1]} : vector<2x392xf32> to vector<2x256xf32>
    %244 = vector.broadcast %60 : vector<1x256xf32> to vector<2x256xf32>
    %245 = arith.mulf %243, %244 : vector<2x256xf32>
    %246 = vector.extract_strided_slice %108 {offsets = [0, 84], sizes = [2, 256], strides = [1, 1]} : vector<2x392xf32> to vector<2x256xf32>
    %247 = vector.extract_strided_slice %108 {offsets = [0, 85], sizes = [2, 256], strides = [1, 1]} : vector<2x392xf32> to vector<2x256xf32>
    %248 = vector.broadcast %71 : vector<1x256xf32> to vector<2x256xf32>
    %249 = arith.mulf %247, %248 : vector<2x256xf32>
    %250 = vector.extract_strided_slice %108 {offsets = [0, 86], sizes = [2, 256], strides = [1, 1]} : vector<2x392xf32> to vector<2x256xf32>
    %251 = vector.broadcast %82 : vector<1x256xf32> to vector<2x256xf32>
    %252 = arith.mulf %250, %251 : vector<2x256xf32>
    %253 = vector.extract_strided_slice %108 {offsets = [0, 87], sizes = [2, 256], strides = [1, 1]} : vector<2x392xf32> to vector<2x256xf32>
    %254 = vector.broadcast %93 : vector<1x256xf32> to vector<2x256xf32>
    %255 = arith.mulf %253, %254 : vector<2x256xf32>
    %256 = vector.extract_strided_slice %108 {offsets = [0, 88], sizes = [2, 256], strides = [1, 1]} : vector<2x392xf32> to vector<2x256xf32>
    %257 = vector.broadcast %104 : vector<1x256xf32> to vector<2x256xf32>
    %258 = arith.mulf %256, %257 : vector<2x256xf32>
    %259 = vector.extract_strided_slice %108 {offsets = [0, 96], sizes = [2, 256], strides = [1, 1]} : vector<2x392xf32> to vector<2x256xf32>
    %260 = vector.broadcast %27 : vector<1x256xf32> to vector<2x256xf32>
    %261 = arith.mulf %259, %260 : vector<2x256xf32>
    %262 = vector.extract_strided_slice %108 {offsets = [0, 97], sizes = [2, 256], strides = [1, 1]} : vector<2x392xf32> to vector<2x256xf32>
    %263 = vector.broadcast %38 : vector<1x256xf32> to vector<2x256xf32>
    %264 = arith.mulf %262, %263 : vector<2x256xf32>
    %265 = vector.extract_strided_slice %108 {offsets = [0, 98], sizes = [2, 256], strides = [1, 1]} : vector<2x392xf32> to vector<2x256xf32>
    %266 = vector.broadcast %49 : vector<1x256xf32> to vector<2x256xf32>
    %267 = arith.mulf %265, %266 : vector<2x256xf32>
    %268 = vector.extract_strided_slice %108 {offsets = [0, 99], sizes = [2, 256], strides = [1, 1]} : vector<2x392xf32> to vector<2x256xf32>
    %269 = vector.broadcast %60 : vector<1x256xf32> to vector<2x256xf32>
    %270 = arith.mulf %268, %269 : vector<2x256xf32>
    %271 = vector.extract_strided_slice %108 {offsets = [0, 100], sizes = [2, 256], strides = [1, 1]} : vector<2x392xf32> to vector<2x256xf32>
    %272 = vector.extract_strided_slice %108 {offsets = [0, 101], sizes = [2, 256], strides = [1, 1]} : vector<2x392xf32> to vector<2x256xf32>
    %273 = vector.broadcast %71 : vector<1x256xf32> to vector<2x256xf32>
    %274 = arith.mulf %272, %273 : vector<2x256xf32>
    %275 = vector.extract_strided_slice %108 {offsets = [0, 102], sizes = [2, 256], strides = [1, 1]} : vector<2x392xf32> to vector<2x256xf32>
    %276 = vector.broadcast %82 : vector<1x256xf32> to vector<2x256xf32>
    %277 = arith.mulf %275, %276 : vector<2x256xf32>
    %278 = vector.extract_strided_slice %108 {offsets = [0, 103], sizes = [2, 256], strides = [1, 1]} : vector<2x392xf32> to vector<2x256xf32>
    %279 = vector.broadcast %93 : vector<1x256xf32> to vector<2x256xf32>
    %280 = arith.mulf %278, %279 : vector<2x256xf32>
    %281 = vector.extract_strided_slice %108 {offsets = [0, 104], sizes = [2, 256], strides = [1, 1]} : vector<2x392xf32> to vector<2x256xf32>
    %282 = vector.broadcast %104 : vector<1x256xf32> to vector<2x256xf32>
    %283 = arith.mulf %281, %282 : vector<2x256xf32>
    %284 = vector.extract_strided_slice %108 {offsets = [0, 112], sizes = [2, 256], strides = [1, 1]} : vector<2x392xf32> to vector<2x256xf32>
    %285 = vector.broadcast %27 : vector<1x256xf32> to vector<2x256xf32>
    %286 = arith.mulf %284, %285 : vector<2x256xf32>
    %287 = vector.extract_strided_slice %108 {offsets = [0, 113], sizes = [2, 256], strides = [1, 1]} : vector<2x392xf32> to vector<2x256xf32>
    %288 = vector.broadcast %38 : vector<1x256xf32> to vector<2x256xf32>
    %289 = arith.mulf %287, %288 : vector<2x256xf32>
    %290 = vector.extract_strided_slice %108 {offsets = [0, 114], sizes = [2, 256], strides = [1, 1]} : vector<2x392xf32> to vector<2x256xf32>
    %291 = vector.broadcast %49 : vector<1x256xf32> to vector<2x256xf32>
    %292 = arith.mulf %290, %291 : vector<2x256xf32>
    %293 = vector.extract_strided_slice %108 {offsets = [0, 115], sizes = [2, 256], strides = [1, 1]} : vector<2x392xf32> to vector<2x256xf32>
    %294 = vector.broadcast %60 : vector<1x256xf32> to vector<2x256xf32>
    %295 = arith.mulf %293, %294 : vector<2x256xf32>
    %296 = vector.extract_strided_slice %108 {offsets = [0, 116], sizes = [2, 256], strides = [1, 1]} : vector<2x392xf32> to vector<2x256xf32>
    %297 = vector.extract_strided_slice %108 {offsets = [0, 117], sizes = [2, 256], strides = [1, 1]} : vector<2x392xf32> to vector<2x256xf32>
    %298 = vector.broadcast %71 : vector<1x256xf32> to vector<2x256xf32>
    %299 = arith.mulf %297, %298 : vector<2x256xf32>
    %300 = vector.extract_strided_slice %108 {offsets = [0, 118], sizes = [2, 256], strides = [1, 1]} : vector<2x392xf32> to vector<2x256xf32>
    %301 = vector.broadcast %82 : vector<1x256xf32> to vector<2x256xf32>
    %302 = arith.mulf %300, %301 : vector<2x256xf32>
    %303 = vector.extract_strided_slice %108 {offsets = [0, 119], sizes = [2, 256], strides = [1, 1]} : vector<2x392xf32> to vector<2x256xf32>
    %304 = vector.broadcast %93 : vector<1x256xf32> to vector<2x256xf32>
    %305 = arith.mulf %303, %304 : vector<2x256xf32>
    %306 = vector.extract_strided_slice %108 {offsets = [0, 120], sizes = [2, 256], strides = [1, 1]} : vector<2x392xf32> to vector<2x256xf32>
    %307 = vector.broadcast %104 : vector<1x256xf32> to vector<2x256xf32>
    %308 = arith.mulf %306, %307 : vector<2x256xf32>
    %309 = vector.extract_strided_slice %108 {offsets = [0, 128], sizes = [2, 256], strides = [1, 1]} : vector<2x392xf32> to vector<2x256xf32>
    %310 = vector.broadcast %27 : vector<1x256xf32> to vector<2x256xf32>
    %311 = arith.mulf %309, %310 : vector<2x256xf32>
    %312 = vector.extract_strided_slice %108 {offsets = [0, 129], sizes = [2, 256], strides = [1, 1]} : vector<2x392xf32> to vector<2x256xf32>
    %313 = vector.broadcast %38 : vector<1x256xf32> to vector<2x256xf32>
    %314 = arith.mulf %312, %313 : vector<2x256xf32>
    %315 = vector.extract_strided_slice %108 {offsets = [0, 130], sizes = [2, 256], strides = [1, 1]} : vector<2x392xf32> to vector<2x256xf32>
    %316 = vector.broadcast %49 : vector<1x256xf32> to vector<2x256xf32>
    %317 = arith.mulf %315, %316 : vector<2x256xf32>
    %318 = vector.extract_strided_slice %108 {offsets = [0, 131], sizes = [2, 256], strides = [1, 1]} : vector<2x392xf32> to vector<2x256xf32>
    %319 = vector.broadcast %60 : vector<1x256xf32> to vector<2x256xf32>
    %320 = arith.mulf %318, %319 : vector<2x256xf32>
    %321 = vector.extract_strided_slice %108 {offsets = [0, 132], sizes = [2, 256], strides = [1, 1]} : vector<2x392xf32> to vector<2x256xf32>
    %322 = vector.extract_strided_slice %108 {offsets = [0, 133], sizes = [2, 256], strides = [1, 1]} : vector<2x392xf32> to vector<2x256xf32>
    %323 = vector.broadcast %71 : vector<1x256xf32> to vector<2x256xf32>
    %324 = arith.mulf %322, %323 : vector<2x256xf32>
    %325 = vector.extract_strided_slice %108 {offsets = [0, 134], sizes = [2, 256], strides = [1, 1]} : vector<2x392xf32> to vector<2x256xf32>
    %326 = vector.broadcast %82 : vector<1x256xf32> to vector<2x256xf32>
    %327 = arith.mulf %325, %326 : vector<2x256xf32>
    %328 = vector.extract_strided_slice %108 {offsets = [0, 135], sizes = [2, 256], strides = [1, 1]} : vector<2x392xf32> to vector<2x256xf32>
    %329 = vector.broadcast %93 : vector<1x256xf32> to vector<2x256xf32>
    %330 = arith.mulf %328, %329 : vector<2x256xf32>
    %331 = vector.extract_strided_slice %108 {offsets = [0, 136], sizes = [2, 256], strides = [1, 1]} : vector<2x392xf32> to vector<2x256xf32>
    %332 = vector.broadcast %104 : vector<1x256xf32> to vector<2x256xf32>
    %333 = arith.mulf %331, %332 : vector<2x256xf32>
    %cst_30 = arith.constant 1.000000e+00 : f32
    %334 = vector.broadcast %cst_30 : f32 to vector<1x256xf32>
    %335 = tpu.concatenate %111, %114, %117, %120, %121, %124, %127, %130, %133, %136, %139, %142, %145, %146, %149, %152 in 0 : vector<2x256xf32>, vector<2x256xf32>, vector<2x256xf32>, vector<2x256xf32>, vector<2x256xf32>, vector<2x256xf32>, vector<2x256xf32>, vector<2x256xf32>, vector<2x256xf32>, vector<2x256xf32>, vector<2x256xf32>, vector<2x256xf32>, vector<2x256xf32>, vector<2x256xf32>, vector<2x256xf32>, vector<2x256xf32> -> vector<32x256xf32>
    %336 = tpu.concatenate %155, %158, %161, %164, %167, %170, %171, %174, %177, %180, %183, %186, %189, %192, %195, %196 in 0 : vector<2x256xf32>, vector<2x256xf32>, vector<2x256xf32>, vector<2x256xf32>, vector<2x256xf32>, vector<2x256xf32>, vector<2x256xf32>, vector<2x256xf32>, vector<2x256xf32>, vector<2x256xf32>, vector<2x256xf32>, vector<2x256xf32>, vector<2x256xf32>, vector<2x256xf32>, vector<2x256xf32>, vector<2x256xf32> -> vector<32x256xf32>
    %337 = tpu.concatenate %199, %202, %205, %208, %211, %214, %217, %220, %221, %224, %227, %230, %233, %236, %239, %242 in 0 : vector<2x256xf32>, vector<2x256xf32>, vector<2x256xf32>, vector<2x256xf32>, vector<2x256xf32>, vector<2x256xf32>, vector<2x256xf32>, vector<2x256xf32>, vector<2x256xf32>, vector<2x256xf32>, vector<2x256xf32>, vector<2x256xf32>, vector<2x256xf32>, vector<2x256xf32>, vector<2x256xf32>, vector<2x256xf32> -> vector<32x256xf32>
    %338 = tpu.concatenate %245, %246, %249, %252, %255, %258, %261, %264, %267, %270, %271, %274, %277, %280, %283, %286 in 0 : vector<2x256xf32>, vector<2x256xf32>, vector<2x256xf32>, vector<2x256xf32>, vector<2x256xf32>, vector<2x256xf32>, vector<2x256xf32>, vector<2x256xf32>, vector<2x256xf32>, vector<2x256xf32>, vector<2x256xf32>, vector<2x256xf32>, vector<2x256xf32>, vector<2x256xf32>, vector<2x256xf32>, vector<2x256xf32> -> vector<32x256xf32>
    %339 = tpu.concatenate %289, %292, %295, %296, %299, %302, %305, %308, %311, %314, %317, %320, %321, %324, %327, %330 in 0 : vector<2x256xf32>, vector<2x256xf32>, vector<2x256xf32>, vector<2x256xf32>, vector<2x256xf32>, vector<2x256xf32>, vector<2x256xf32>, vector<2x256xf32>, vector<2x256xf32>, vector<2x256xf32>, vector<2x256xf32>, vector<2x256xf32>, vector<2x256xf32>, vector<2x256xf32>, vector<2x256xf32>, vector<2x256xf32> -> vector<32x256xf32>
    %340 = tpu.concatenate %333, %334 in 0 : vector<2x256xf32>, vector<1x256xf32> -> vector<3x256xf32>
    %341 = tpu.concatenate %335, %336, %337, %338, %339, %340 in 0 : vector<32x256xf32>, vector<32x256xf32>, vector<32x256xf32>, vector<32x256xf32>, vector<32x256xf32>, vector<3x256xf32> -> vector<163x256xf32>
    %c0_31 = arith.constant 0 : index
    %c0_32 = arith.constant 0 : index
    %342 = vector.load %arg2[%c0_31, %c0_32] : memref<16x163xf32, #tpu.memory_space<vmem>>, vector<16x163xf32>
    %cst_33 = arith.constant dense<0.000000e+00> : vector<16x256xf32>
    %343 = tpu.matmul %342, %341, %cst_33 {dimension_numbers = #tpu.dot_dimension_numbers<[1], [0], [0], [1], [0, 0, 1, 1], [], []>} : vector<16x163xf32>, vector<163x256xf32>, vector<16x256xf32> -> vector<16x256xf32>
    %cst_34 = arith.constant 0.000000e+00 : f32
    %344 = vector.broadcast %cst_34 : f32 to vector<16x34xf32>
    %345 = tpu.concatenate %344, %343, %344 in 1 : vector<16x34xf32>, vector<16x256xf32>, vector<16x34xf32> -> vector<16x324xf32>
    %346 = vector.extract_strided_slice %345 {offsets = [0, 0], sizes = [16, 256], strides = [1, 1]} : vector<16x324xf32> to vector<16x256xf32>
    %347 = vector.broadcast %49 : vector<1x256xf32> to vector<16x256xf32>
    %348 = arith.mulf %346, %347 : vector<16x256xf32>
    %349 = vector.extract_strided_slice %345 {offsets = [0, 1], sizes = [16, 256], strides = [1, 1]} : vector<16x324xf32> to vector<16x256xf32>
    %350 = vector.broadcast %60 : vector<1x256xf32> to vector<16x256xf32>
    %351 = arith.mulf %349, %350 : vector<16x256xf32>
    %352 = vector.extract_strided_slice %345 {offsets = [0, 2], sizes = [16, 256], strides = [1, 1]} : vector<16x324xf32> to vector<16x256xf32>
    %353 = vector.extract_strided_slice %345 {offsets = [0, 3], sizes = [16, 256], strides = [1, 1]} : vector<16x324xf32> to vector<16x256xf32>
    %354 = vector.broadcast %71 : vector<1x256xf32> to vector<16x256xf32>
    %355 = arith.mulf %353, %354 : vector<16x256xf32>
    %356 = vector.extract_strided_slice %345 {offsets = [0, 4], sizes = [16, 256], strides = [1, 1]} : vector<16x324xf32> to vector<16x256xf32>
    %357 = vector.broadcast %82 : vector<1x256xf32> to vector<16x256xf32>
    %358 = arith.mulf %356, %357 : vector<16x256xf32>
    %359 = vector.extract_strided_slice %345 {offsets = [0, 16], sizes = [16, 256], strides = [1, 1]} : vector<16x324xf32> to vector<16x256xf32>
    %360 = vector.broadcast %49 : vector<1x256xf32> to vector<16x256xf32>
    %361 = arith.mulf %359, %360 : vector<16x256xf32>
    %362 = vector.extract_strided_slice %345 {offsets = [0, 17], sizes = [16, 256], strides = [1, 1]} : vector<16x324xf32> to vector<16x256xf32>
    %363 = vector.broadcast %60 : vector<1x256xf32> to vector<16x256xf32>
    %364 = arith.mulf %362, %363 : vector<16x256xf32>
    %365 = vector.extract_strided_slice %345 {offsets = [0, 18], sizes = [16, 256], strides = [1, 1]} : vector<16x324xf32> to vector<16x256xf32>
    %366 = vector.extract_strided_slice %345 {offsets = [0, 19], sizes = [16, 256], strides = [1, 1]} : vector<16x324xf32> to vector<16x256xf32>
    %367 = vector.broadcast %71 : vector<1x256xf32> to vector<16x256xf32>
    %368 = arith.mulf %366, %367 : vector<16x256xf32>
    %369 = vector.extract_strided_slice %345 {offsets = [0, 20], sizes = [16, 256], strides = [1, 1]} : vector<16x324xf32> to vector<16x256xf32>
    %370 = vector.broadcast %82 : vector<1x256xf32> to vector<16x256xf32>
    %371 = arith.mulf %369, %370 : vector<16x256xf32>
    %372 = vector.extract_strided_slice %345 {offsets = [0, 32], sizes = [16, 256], strides = [1, 1]} : vector<16x324xf32> to vector<16x256xf32>
    %373 = vector.broadcast %49 : vector<1x256xf32> to vector<16x256xf32>
    %374 = arith.mulf %372, %373 : vector<16x256xf32>
    %375 = vector.extract_strided_slice %345 {offsets = [0, 33], sizes = [16, 256], strides = [1, 1]} : vector<16x324xf32> to vector<16x256xf32>
    %376 = vector.broadcast %60 : vector<1x256xf32> to vector<16x256xf32>
    %377 = arith.mulf %375, %376 : vector<16x256xf32>
    %378 = vector.extract_strided_slice %345 {offsets = [0, 34], sizes = [16, 256], strides = [1, 1]} : vector<16x324xf32> to vector<16x256xf32>
    %379 = vector.extract_strided_slice %345 {offsets = [0, 35], sizes = [16, 256], strides = [1, 1]} : vector<16x324xf32> to vector<16x256xf32>
    %380 = vector.broadcast %71 : vector<1x256xf32> to vector<16x256xf32>
    %381 = arith.mulf %379, %380 : vector<16x256xf32>
    %382 = vector.extract_strided_slice %345 {offsets = [0, 36], sizes = [16, 256], strides = [1, 1]} : vector<16x324xf32> to vector<16x256xf32>
    %383 = vector.broadcast %82 : vector<1x256xf32> to vector<16x256xf32>
    %384 = arith.mulf %382, %383 : vector<16x256xf32>
    %385 = vector.extract_strided_slice %345 {offsets = [0, 48], sizes = [16, 256], strides = [1, 1]} : vector<16x324xf32> to vector<16x256xf32>
    %386 = vector.broadcast %49 : vector<1x256xf32> to vector<16x256xf32>
    %387 = arith.mulf %385, %386 : vector<16x256xf32>
    %388 = vector.extract_strided_slice %345 {offsets = [0, 49], sizes = [16, 256], strides = [1, 1]} : vector<16x324xf32> to vector<16x256xf32>
    %389 = vector.broadcast %60 : vector<1x256xf32> to vector<16x256xf32>
    %390 = arith.mulf %388, %389 : vector<16x256xf32>
    %391 = vector.extract_strided_slice %345 {offsets = [0, 50], sizes = [16, 256], strides = [1, 1]} : vector<16x324xf32> to vector<16x256xf32>
    %392 = vector.extract_strided_slice %345 {offsets = [0, 51], sizes = [16, 256], strides = [1, 1]} : vector<16x324xf32> to vector<16x256xf32>
    %393 = vector.broadcast %71 : vector<1x256xf32> to vector<16x256xf32>
    %394 = arith.mulf %392, %393 : vector<16x256xf32>
    %395 = vector.extract_strided_slice %345 {offsets = [0, 52], sizes = [16, 256], strides = [1, 1]} : vector<16x324xf32> to vector<16x256xf32>
    %396 = vector.broadcast %82 : vector<1x256xf32> to vector<16x256xf32>
    %397 = arith.mulf %395, %396 : vector<16x256xf32>
    %398 = vector.extract_strided_slice %345 {offsets = [0, 64], sizes = [16, 256], strides = [1, 1]} : vector<16x324xf32> to vector<16x256xf32>
    %399 = vector.broadcast %49 : vector<1x256xf32> to vector<16x256xf32>
    %400 = arith.mulf %398, %399 : vector<16x256xf32>
    %401 = vector.extract_strided_slice %345 {offsets = [0, 65], sizes = [16, 256], strides = [1, 1]} : vector<16x324xf32> to vector<16x256xf32>
    %402 = vector.broadcast %60 : vector<1x256xf32> to vector<16x256xf32>
    %403 = arith.mulf %401, %402 : vector<16x256xf32>
    %404 = vector.extract_strided_slice %345 {offsets = [0, 66], sizes = [16, 256], strides = [1, 1]} : vector<16x324xf32> to vector<16x256xf32>
    %405 = vector.extract_strided_slice %345 {offsets = [0, 67], sizes = [16, 256], strides = [1, 1]} : vector<16x324xf32> to vector<16x256xf32>
    %406 = vector.broadcast %71 : vector<1x256xf32> to vector<16x256xf32>
    %407 = arith.mulf %405, %406 : vector<16x256xf32>
    %408 = vector.extract_strided_slice %345 {offsets = [0, 68], sizes = [16, 256], strides = [1, 1]} : vector<16x324xf32> to vector<16x256xf32>
    %409 = vector.broadcast %82 : vector<1x256xf32> to vector<16x256xf32>
    %410 = arith.mulf %408, %409 : vector<16x256xf32>
    %cst_35 = arith.constant 1.000000e+00 : f32
    %411 = vector.broadcast %cst_35 : f32 to vector<1x256xf32>
    %412 = tpu.concatenate %348, %351, %352, %355, %358, %361, %364, %365, %368, %371, %374, %377, %378, %381, %384, %387 in 0 : vector<16x256xf32>, vector<16x256xf32>, vector<16x256xf32>, vector<16x256xf32>, vector<16x256xf32>, vector<16x256xf32>, vector<16x256xf32>, vector<16x256xf32>, vector<16x256xf32>, vector<16x256xf32>, vector<16x256xf32>, vector<16x256xf32>, vector<16x256xf32>, vector<16x256xf32>, vector<16x256xf32>, vector<16x256xf32> -> vector<256x256xf32>
    %413 = tpu.concatenate %390, %391, %394, %397, %400, %403, %404, %407, %410, %411 in 0 : vector<16x256xf32>, vector<16x256xf32>, vector<16x256xf32>, vector<16x256xf32>, vector<16x256xf32>, vector<16x256xf32>, vector<16x256xf32>, vector<16x256xf32>, vector<16x256xf32>, vector<1x256xf32> -> vector<145x256xf32>
    %414 = tpu.concatenate %412, %413 in 0 : vector<256x256xf32>, vector<145x256xf32> -> vector<401x256xf32>
    %c0_36 = arith.constant 0 : index
    %c0_37 = arith.constant 0 : index
    %415 = vector.load %arg3[%c0_36, %c0_37] : memref<32x401xf32, #tpu.memory_space<vmem>>, vector<32x401xf32>
    %cst_38 = arith.constant dense<0.000000e+00> : vector<32x256xf32>
    %416 = tpu.matmul %415, %414, %cst_38 {dimension_numbers = #tpu.dot_dimension_numbers<[1], [0], [0], [1], [0, 0, 1, 1], [], []>} : vector<32x401xf32>, vector<401x256xf32>, vector<32x256xf32> -> vector<32x256xf32>
    %cst_39 = arith.constant 0.000000e+00 : f32
    %417 = vector.broadcast %cst_39 : f32 to vector<32x34xf32>
    %418 = tpu.concatenate %417, %416, %417 in 1 : vector<32x34xf32>, vector<32x256xf32>, vector<32x34xf32> -> vector<32x324xf32>
    %419 = vector.extract_strided_slice %418 {offsets = [0, 0], sizes = [32, 256], strides = [1, 1]} : vector<32x324xf32> to vector<32x256xf32>
    %420 = vector.broadcast %49 : vector<1x256xf32> to vector<32x256xf32>
    %421 = arith.mulf %419, %420 : vector<32x256xf32>
    %422 = vector.extract_strided_slice %418 {offsets = [0, 1], sizes = [32, 256], strides = [1, 1]} : vector<32x324xf32> to vector<32x256xf32>
    %423 = vector.broadcast %60 : vector<1x256xf32> to vector<32x256xf32>
    %424 = arith.mulf %422, %423 : vector<32x256xf32>
    %425 = vector.extract_strided_slice %418 {offsets = [0, 2], sizes = [32, 256], strides = [1, 1]} : vector<32x324xf32> to vector<32x256xf32>
    %426 = vector.extract_strided_slice %418 {offsets = [0, 3], sizes = [32, 256], strides = [1, 1]} : vector<32x324xf32> to vector<32x256xf32>
    %427 = vector.broadcast %71 : vector<1x256xf32> to vector<32x256xf32>
    %428 = arith.mulf %426, %427 : vector<32x256xf32>
    %429 = vector.extract_strided_slice %418 {offsets = [0, 4], sizes = [32, 256], strides = [1, 1]} : vector<32x324xf32> to vector<32x256xf32>
    %430 = vector.broadcast %82 : vector<1x256xf32> to vector<32x256xf32>
    %431 = arith.mulf %429, %430 : vector<32x256xf32>
    %432 = vector.extract_strided_slice %418 {offsets = [0, 16], sizes = [32, 256], strides = [1, 1]} : vector<32x324xf32> to vector<32x256xf32>
    %433 = vector.broadcast %49 : vector<1x256xf32> to vector<32x256xf32>
    %434 = arith.mulf %432, %433 : vector<32x256xf32>
    %435 = vector.extract_strided_slice %418 {offsets = [0, 17], sizes = [32, 256], strides = [1, 1]} : vector<32x324xf32> to vector<32x256xf32>
    %436 = vector.broadcast %60 : vector<1x256xf32> to vector<32x256xf32>
    %437 = arith.mulf %435, %436 : vector<32x256xf32>
    %438 = vector.extract_strided_slice %418 {offsets = [0, 18], sizes = [32, 256], strides = [1, 1]} : vector<32x324xf32> to vector<32x256xf32>
    %439 = vector.extract_strided_slice %418 {offsets = [0, 19], sizes = [32, 256], strides = [1, 1]} : vector<32x324xf32> to vector<32x256xf32>
    %440 = vector.broadcast %71 : vector<1x256xf32> to vector<32x256xf32>
    %441 = arith.mulf %439, %440 : vector<32x256xf32>
    %442 = vector.extract_strided_slice %418 {offsets = [0, 20], sizes = [32, 256], strides = [1, 1]} : vector<32x324xf32> to vector<32x256xf32>
    %443 = vector.broadcast %82 : vector<1x256xf32> to vector<32x256xf32>
    %444 = arith.mulf %442, %443 : vector<32x256xf32>
    %445 = vector.extract_strided_slice %418 {offsets = [0, 32], sizes = [32, 256], strides = [1, 1]} : vector<32x324xf32> to vector<32x256xf32>
    %446 = vector.broadcast %49 : vector<1x256xf32> to vector<32x256xf32>
    %447 = arith.mulf %445, %446 : vector<32x256xf32>
    %448 = vector.extract_strided_slice %418 {offsets = [0, 33], sizes = [32, 256], strides = [1, 1]} : vector<32x324xf32> to vector<32x256xf32>
    %449 = vector.broadcast %60 : vector<1x256xf32> to vector<32x256xf32>
    %450 = arith.mulf %448, %449 : vector<32x256xf32>
    %451 = vector.extract_strided_slice %418 {offsets = [0, 34], sizes = [32, 256], strides = [1, 1]} : vector<32x324xf32> to vector<32x256xf32>
    %452 = vector.extract_strided_slice %418 {offsets = [0, 35], sizes = [32, 256], strides = [1, 1]} : vector<32x324xf32> to vector<32x256xf32>
    %453 = vector.broadcast %71 : vector<1x256xf32> to vector<32x256xf32>
    %454 = arith.mulf %452, %453 : vector<32x256xf32>
    %455 = vector.extract_strided_slice %418 {offsets = [0, 36], sizes = [32, 256], strides = [1, 1]} : vector<32x324xf32> to vector<32x256xf32>
    %456 = vector.broadcast %82 : vector<1x256xf32> to vector<32x256xf32>
    %457 = arith.mulf %455, %456 : vector<32x256xf32>
    %458 = vector.extract_strided_slice %418 {offsets = [0, 48], sizes = [32, 256], strides = [1, 1]} : vector<32x324xf32> to vector<32x256xf32>
    %459 = vector.broadcast %49 : vector<1x256xf32> to vector<32x256xf32>
    %460 = arith.mulf %458, %459 : vector<32x256xf32>
    %461 = vector.extract_strided_slice %418 {offsets = [0, 49], sizes = [32, 256], strides = [1, 1]} : vector<32x324xf32> to vector<32x256xf32>
    %462 = vector.broadcast %60 : vector<1x256xf32> to vector<32x256xf32>
    %463 = arith.mulf %461, %462 : vector<32x256xf32>
    %464 = vector.extract_strided_slice %418 {offsets = [0, 50], sizes = [32, 256], strides = [1, 1]} : vector<32x324xf32> to vector<32x256xf32>
    %465 = vector.extract_strided_slice %418 {offsets = [0, 51], sizes = [32, 256], strides = [1, 1]} : vector<32x324xf32> to vector<32x256xf32>
    %466 = vector.broadcast %71 : vector<1x256xf32> to vector<32x256xf32>
    %467 = arith.mulf %465, %466 : vector<32x256xf32>
    %468 = vector.extract_strided_slice %418 {offsets = [0, 52], sizes = [32, 256], strides = [1, 1]} : vector<32x324xf32> to vector<32x256xf32>
    %469 = vector.broadcast %82 : vector<1x256xf32> to vector<32x256xf32>
    %470 = arith.mulf %468, %469 : vector<32x256xf32>
    %471 = vector.extract_strided_slice %418 {offsets = [0, 64], sizes = [32, 256], strides = [1, 1]} : vector<32x324xf32> to vector<32x256xf32>
    %472 = vector.broadcast %49 : vector<1x256xf32> to vector<32x256xf32>
    %473 = arith.mulf %471, %472 : vector<32x256xf32>
    %474 = vector.extract_strided_slice %418 {offsets = [0, 65], sizes = [32, 256], strides = [1, 1]} : vector<32x324xf32> to vector<32x256xf32>
    %475 = vector.broadcast %60 : vector<1x256xf32> to vector<32x256xf32>
    %476 = arith.mulf %474, %475 : vector<32x256xf32>
    %477 = vector.extract_strided_slice %418 {offsets = [0, 66], sizes = [32, 256], strides = [1, 1]} : vector<32x324xf32> to vector<32x256xf32>
    %478 = vector.extract_strided_slice %418 {offsets = [0, 67], sizes = [32, 256], strides = [1, 1]} : vector<32x324xf32> to vector<32x256xf32>
    %479 = vector.broadcast %71 : vector<1x256xf32> to vector<32x256xf32>
    %480 = arith.mulf %478, %479 : vector<32x256xf32>
    %481 = vector.extract_strided_slice %418 {offsets = [0, 68], sizes = [32, 256], strides = [1, 1]} : vector<32x324xf32> to vector<32x256xf32>
    %482 = vector.broadcast %82 : vector<1x256xf32> to vector<32x256xf32>
    %483 = arith.mulf %481, %482 : vector<32x256xf32>
    %cst_40 = arith.constant 1.000000e+00 : f32
    %484 = vector.broadcast %cst_40 : f32 to vector<1x256xf32>
    %485 = tpu.concatenate %421, %424, %425, %428, %431, %434, %437, %438, %441, %444, %447, %450, %451, %454, %457, %460 in 0 : vector<32x256xf32>, vector<32x256xf32>, vector<32x256xf32>, vector<32x256xf32>, vector<32x256xf32>, vector<32x256xf32>, vector<32x256xf32>, vector<32x256xf32>, vector<32x256xf32>, vector<32x256xf32>, vector<32x256xf32>, vector<32x256xf32>, vector<32x256xf32>, vector<32x256xf32>, vector<32x256xf32>, vector<32x256xf32> -> vector<512x256xf32>
    %486 = tpu.concatenate %463, %464, %467, %470, %473, %476, %477, %480, %483, %484 in 0 : vector<32x256xf32>, vector<32x256xf32>, vector<32x256xf32>, vector<32x256xf32>, vector<32x256xf32>, vector<32x256xf32>, vector<32x256xf32>, vector<32x256xf32>, vector<32x256xf32>, vector<1x256xf32> -> vector<289x256xf32>
    %487 = tpu.concatenate %485, %486 in 0 : vector<512x256xf32>, vector<289x256xf32> -> vector<801x256xf32>
    %c0_41 = arith.constant 0 : index
    %c0_42 = arith.constant 0 : index
    %488 = vector.load %arg4[%c0_41, %c0_42] : memref<1x801xf32, #tpu.memory_space<vmem>>, vector<1x801xf32>
    %cst_43 = arith.constant dense<0.000000e+00> : vector<1x256xf32>
    %489 = tpu.matmul %488, %487, %cst_43 {dimension_numbers = #tpu.dot_dimension_numbers<[1], [0], [0], [1], [0, 0, 1, 1], [], []>} : vector<1x801xf32>, vector<801x256xf32>, vector<1x256xf32> -> vector<1x256xf32>
    %c0_44 = arith.constant 0 : index
    %c0_45 = arith.constant 0 : index
    %c0_46 = arith.constant 0 : index
    %490 = vector.load %arg5[%c0_44, %c0_45, %c0_46] : memref<1x1x256xf32, #tpu.memory_space<vmem>>, vector<1x1x256xf32>
    %491 = vector.shape_cast %490 : vector<1x1x256xf32> to vector<1x256xf32>
    %492 = vector.shape_cast %489 : vector<1x256xf32> to vector<1x1x256xf32>
    tpu.vector_store %arg5[%c0_44, %c0_45, %c0_46], %492 {strides = array<i32>} : memref<1x1x256xf32, #tpu.memory_space<vmem>>, vector<1x1x256xf32>,
    return
  }
  func.func @transform_0(%arg0: i32) -> (i32, i32, i32) {
    %c0_i32 = arith.constant 0 : i32
    %c0_i32_0 = arith.constant 0 : i32
    %c0_i32_1 = arith.constant 0 : i32
    return %arg0, %c0_i32, %c0_i32_0 : i32, i32, i32
  }
  func.func @transform_1(%arg0: i32) -> (i32, i32) {
    %c0_i32 = arith.constant 0 : i32
    %c0_i32_0 = arith.constant 0 : i32
    %c0_i32_1 = arith.constant 0 : i32
    return %c0_i32, %c0_i32_0 : i32, i32
  }
  func.func @transform_2(%arg0: i32) -> (i32, i32) {
    %c0_i32 = arith.constant 0 : i32
    %c0_i32_0 = arith.constant 0 : i32
    %c0_i32_1 = arith.constant 0 : i32
    return %c0_i32, %c0_i32_0 : i32, i32
  }
  func.func @transform_3(%arg0: i32) -> (i32, i32) {
    %c0_i32 = arith.constant 0 : i32
    %c0_i32_0 = arith.constant 0 : i32
    %c0_i32_1 = arith.constant 0 : i32
    return %c0_i32, %c0_i32_0 : i32, i32
  }
  func.func @transform_4(%arg0: i32) -> (i32, i32, i32) {
    %c0_i32 = arith.constant 0 : i32
    %c0_i32_0 = arith.constant 0 : i32
    %c0_i32_1 = arith.constant 0 : i32
    return %arg0, %c0_i32, %c0_i32_0 : i32, i32, i32
  }
}

</mosaic_0001>

<bundles_post_ra>
// kernel: refining_network_pallas.1
= control target key start
LH: loop header
LB: loop body
LE: loop exit
PB: predicated region body
PF: predicated region fallthrough
CT: control target
= control target key end

     0   :  { %s9311_s15 = smov 0   ;;  %s15350_s0 = inlined_call_operand.vmem [shape: f32[2,2,256], index: 0, kind: input, shape index: {}]   ;;  %s15351_s1 = inlined_call_operand.vmem [shape: f32[16,163], index: 1, kind: input, shape index: {}]   ;;  %s15352_s2 = inlined_call_operand.vmem [shape: f32[32,401], index: 2, kind: input, shape index: {}]   ;;  %s15353_s3 = inlined_call_operand.vmem [shape: f32[1,801], index: 3, kind: input, shape index: {}]   ;;  %s15354_s4 = inlined_call_operand.vmem [shape: f32[2,1,256], index: 4, kind: output, shape index: {}]  }
   0x1 LB: > { %s6194_s16 = sadd.s32 4294967295, %s9189_s15   ;;  %p6198_p0 = scmp.ge.s32.totalorder %s9189_s15, 1  ;;  %s9189_s15 = sphi %s9311_s15, %s14_s15  }
   0x2   : > { %p162_p1 = scmp.lt.s32.totalorder %s9189_s15, 3 }
   0x4   : > { %p163_p2 = pnand %p6198_p0, %p162_p1 }
   0x6   : > { %166 = sbr.rel (%p163_p2) target bundleno = 2612 (0xa34), region = 36 }
   0xd   : > { %p187_p3 = scmp.lt.s32.totalorder %s6194_s16, 1  ;;  %v15371_v0 = vlaneseq  ;;  %s15361_s21 = smov 68   ;;  %v15373_v14 = vmov 0.0  }
   0xe   : > { %s15400_s22 = smov 1   ;;  %s15394_s23 = smov 3  }
   0xf   : > { %s17122_s16 = smov (!%p187_p3, %s6194_s16), 1  ;;  %v197_v1 = vand.u32 127, %v15371_v0  ;;  %s9195_s24 = smov 2  }
  0x10   : > { %s6234_s17 = sshll.u32 %s17122_s16, 2  ;;  %s9196_s25 = smov 6  }
  0x11   : > { %v198_v2 = vadd.s32 128, %v197_v1  ;;  %v9323_v3 = vand.u32 15, %v197_v1  ;;  %s191_s20 = scalar_lea.vmem %s15350_s0, %s6234_s17  ;;  %s9197_s26 = smov 5  }
  0x12   : > { %v6218_v4 = vld.sshfl [vmem:[%s191_s20] sm:$0x33 pattern:$0x76325410]  ;;  %s9198_s27 = smov 8   ;;  %s9199_s28 = smov 7  }
  0x13   : > { %v210_v5 = vand.u32 15, %v198_v2  ;;  %v235_v6 = vadd.s32 4294967293, %v9323_v3  ;;  %329 = vrot.lane.b32.xlu0 %v6218_v4, %s15361_s21  ;;  %v328_v7 = vcombine.high %v6218_v4, %v6218_v4  ;;  %v247_v8 = vadd.s32 4294967294, %v9323_v3  ;;  %s15384_s29 = smov 17   ;;  %s15392_s30 = smov 16  }
  0x14   : > { %v259_v9 = vadd.s32 4294967295, %v9323_v3  ;;  %v283_v10 = vadd.s32 2, %v9323_v3  ;;  %v271_v26 = vadd.s32 1, %v9323_v3  ;;  %v307_v29 = vadd.s32 4, %v9323_v3  ;;  %s15378_s5 = smov 19   ;;  %s9203_s6 = smov 18  }
  0x15   : > { %v236_v11 = vadd.s32 4294967293, %v210_v5  ;;  %vm237_vm0 = vcmp.ge.s32.totalorder %v235_v6, 0  ;;  %v248_v12 = vadd.s32 4294967294, %v210_v5  ;;  %v260_v13 = vadd.s32 4294967295, %v210_v5  ;;  %s9204_s7 = smov 22   ;;  %s9205_s8 = smov 21  }
  0x16   : > { %v6204_v15 = vsel %vm237_vm0, 1.0, %v15373_v14  ;;  %vm249_vm1 = vcmp.ge.s32.totalorder %v247_v8, 0  ;;  %vm261_vm2 = vcmp.ge.s32.totalorder %v259_v9, 0  ;;  %v284_v16 = vadd.s32 2, %v210_v5  ;;  %s9206_s9 = smov 24   ;;  %s9207_s10 = smov 23  }
  0x17   : > { %vm238_vm3 = vcmp.ge.s32.totalorder %v236_v11, 0  ;;  %vm250_vm4 = vcmp.ge.s32.totalorder %v248_v12, 0  ;;  %v9335_v17 = vsel %vm249_vm1, 1.0, %v15373_v14  ;;  %vm262_vm5 = vcmp.ge.s32.totalorder %v260_v13, 0  ;;  %331 = vrot.lane.b32.xlu0 %v328_v7, %s15361_s21  ;;  %s15369_s11 = smov 33   ;;  %s15370_s12 = smov 32  }
  0x18   : > { %15925 = vst [vmem:[#allocation2_spill] sm:$0xff] %v9335_v17  ;;  %v6205_v18 = vsel %vm238_vm3, 1.0, %v15373_v14  ;;  %v9340_v19 = vsel %vm250_vm4, 1.0, %v15373_v14  ;;  %v6208_v20 = vsel %vm261_vm2, 1.0, %v15373_v14  ;;  %v6209_v21 = vsel %vm262_vm5, 1.0, %v15373_v14  ;;  %s15368_s13 = smov 35  }
  0x19   : > { %15926 = vst [vmem:[#allocation3_spill] sm:$0xff] %v9340_v19  ;;  %v9344_v22 = vpack.i.bf16 %v6205_v18, %v6204_v15  ;;  %v9346_v23 = vpack.i.bf16 %v6209_v21, %v6208_v20  ;;  %v9350_v24 = vpack.i.bf16 %v9340_v19, %v9335_v17  ;;  %vm287_vm6 = vcmp.lt.s32.totalorder %v283_v10, 16  ;;  %s15359_s14 = smov 34   ;;  %s9212_s17 = smov 38  }
  0x1a   : > { %vm288_vm7 = vcmp.lt.s32.totalorder %v284_v16, 16  ;;  %v6212_v25 = vsel %vm287_vm6, 1.0, %v15373_v14  ;;  %v272_v27 = vadd.s32 1, %v210_v5  ;;  %v308_v30 = vadd.s32 4, %v210_v5  ;;  %s9213_s18 = smov 37   ;;  %s9214_s19 = smov 40  }
  0x1b   : > { %15927 = vst [vmem:[#allocation4_spill] sm:$0xff] %v9346_v23  ;;  %15928 = vst [vmem:[#allocation5_spill] sm:$0xff] %v9350_v24  ;;  %6693 = vrot.lane.b32.xlu1 %v9344_v22, %s15400_s22  ;;  %v6213_v28 = vsel %vm288_vm7, 1.0, %v15373_v14  ;;  %v295_v31 = vadd.s32 3, %v9323_v3  ;;  %6703 = vrot.lane.b32.xlu0 %v9346_v23, %s15394_s23  ;;  %vm275_vm8 = vcmp.lt.s32.totalorder %v271_v26, 16  ;;  %v296_v33 = vadd.s32 3, %v210_v5 }
  0x1c   : > { %v9361_v32 = vpack.i.bf16 %v6213_v28, %v6212_v25  ;;  %vm276_vm9 = vcmp.lt.s32.totalorder %v272_v27, 16  ;;  %v6210_v34 = vsel %vm275_vm8, 1.0, %v15373_v14  ;;  %vm311_vm10 = vcmp.lt.s32.totalorder %v307_v29, 16  ;;  %s9215_s20 = smov 39   ;;  %s15437_s21 = smov 117  }
  0x1d   : > { %v6211_v35 = vsel %vm276_vm9, 1.0, %v15373_v14  ;;  %vm312_vm11 = vcmp.lt.s32.totalorder %v308_v30, 16  ;;  %v6216_v36 = vsel %vm311_vm10, 1.0, %v15373_v14  ;;  %vm299_vm12 = vcmp.lt.s32.totalorder %v295_v31, 16  ;;  %s9266_s23 = smov 108   ;;  %s15417_s22 = smov 107  }
  0x1e   : > { %15929 = vst [vmem:[#allocation6_spill] sm:$0xff] %v9361_v32  ;;  %v6217_v37 = vsel %vm312_vm11, 1.0, %v15373_v14  ;;  %v9368_v38 = vpack.i.bf16 %v6211_v35, %v6210_v34  ;;  %vm300_vm13 = vcmp.lt.s32.totalorder %v296_v33, 16  ;;  %v6214_v40 = vsel %vm299_vm12, 1.0, %v15373_v14 }
  0x1f   : > { %6698 = vrot.lane.b32.xlu1 %v9350_v24, %s9195_s24  ;;  %v9370_v39 = vpack.i.bf16 %v6217_v37, %v6216_v36  ;;  %6713 = vrot.lane.b32.xlu0 %v9361_v32, %s9196_s25  ;;  %v6215_v41 = vsel %vm300_vm13, 1.0, %v15373_v14  ;;  %v223_v42 = vadd.s32 4294967292, %v9323_v3  ;;  %v224_v43 = vadd.s32 4294967292, %v210_v5  ;;  %s15366_s24 = smov 49   ;;  %s15367_s25 = smov 48  }
  0x20   : > { %15930 = vst [vmem:[#allocation7_spill] sm:$0xff] %v9368_v38  ;;  %v9377_v44 = vpack.i.bf16 %v6215_v41, %v6214_v40  ;;  %vm15490_vm0 = vcmask 556032   ;;  %vm15526_vm1 = vcmask 7168   ;;  %vm362_vm2 = vcmask 15360  }
  0x21   : > { %vm225_vm14 = vcmp.ge.s32.totalorder %v223_v42, 0  ;;  %vm226_vm15 = vcmp.ge.s32.totalorder %v224_v43, 0  ;;  %vm15525_vm3 = vcmask 23552   ;;  %vm390_vm4 = vcmask 39936  }
  0x22   : > { %v9381_v45 = vsel %vm225_vm14, 1.0, %v15373_v14  ;;  %v9384_v46 = vsel %vm226_vm15, 1.0, %v15373_v14  ;;  %vm404_vm5 = vcmask 48128   ;;  %vm418_vm6 = vcmask 56320  }
  0x23   : > { %6708 = vrot.lane.b32.xlu1 %v9368_v38, %s9197_s26  ;;  %6723 = vrot.lane.b32.xlu0 %v9370_v39, %s9198_s27  ;;  %15931 = vst [vmem:[#allocation8_spill] sm:$0xff] %v9381_v45  ;;  %15932 = vst [vmem:[#allocation9_spill] sm:$0xff] %v9384_v46  ;;  %v9389_v47 = vpack.i.bf16 %v9384_v46, %v9381_v45  ;;  %s15365_s26 = smov 51   ;;  %s9219_s27 = smov 50   ;;  %vm432_vm7 = vcmask 64512   ;;  %vm15520_vm8 = vcmask 130048  }
  0x24   : > { %vm15519_vm9 = vcmask 138240   ;;  %vm470_vm10 = vcmask 146432   ;;  %vm15516_vm11 = vcmask 154624   ;;  %vm494_vm12 = vcmask 171008  }
  0x25   : > { %vm506_vm13 = vcmask 179200   ;;  %vm530_vm14 = vcmask 195584   ;;  %vm626_vm15 = vcmask 326656  }
  0x27   : > { %6718 = vrot.lane.b32.xlu1 %v9377_v44, %s9199_s28  ;;  %6733 = vrot.lane.b32.xlu0 %v9344_v22, %s15384_s29  ;;  %s9220_s28 = smov 54   ;;  %s9264_s29 = smov 110  }
  0x2b   : > { %6728 = vrot.lane.b32.xlu1 %v9389_v47, %s15392_s30  ;;  %6743 = vrot.lane.b32.xlu0 %v9346_v23, %s15378_s5  ;;  %s9263_s5 = smov 111   ;;  %s9265_s30 = smov 109  }
  0x2f   : > { %6738 = vrot.lane.b32.xlu1 %v9350_v24, %s9203_s6  ;;  %6753 = vrot.lane.b32.xlu0 %v9361_v32, %s9204_s7  ;;  %s9221_s6 = smov 53   ;;  %s9222_s7 = smov 56  }
  0x33   : > { %6748 = vrot.lane.b32.xlu1 %v9368_v38, %s9205_s8  ;;  %6763 = vrot.lane.b32.xlu0 %v9370_v39, %s9206_s9  ;;  %s9223_s8 = smov 55   ;;  %s15363_s9 = smov 65  }
  0x37   : > { %6758 = vrot.lane.b32.xlu1 %v9377_v44, %s9207_s10  ;;  %6773 = vrot.lane.b32.xlu0 %v9344_v22, %s15369_s11  ;;  %s15364_s10 = smov 64   ;;  %s9261_s11 = smov 122  }
  0x3b   : > { %6768 = vrot.lane.b32.xlu1 %v9389_v47, %s15370_s12  ;;  %6783 = vrot.lane.b32.xlu0 %v9346_v23, %s15368_s13  ;;  %s15474_s13 = smov 123   ;;  %s9262_s12 = smov 121  }
  0x3f   : > { %6778 = vrot.lane.b32.xlu1 %v9350_v24, %s15359_s14  ;;  %6793 = vrot.lane.b32.xlu0 %v9361_v32, %s9212_s17  ;;  %s15362_s17 = smov 67   ;;  %s9252_s14 = smov 118  }
  0x43   : > { %6788 = vrot.lane.b32.xlu1 %v9368_v38, %s9213_s18  ;;  %6803 = vrot.lane.b32.xlu0 %v9370_v39, %s9214_s19  ;;  %s9227_s18 = smov 66   ;;  %s9228_s19 = smov 70  }
  0x47   : > { %6798 = vrot.lane.b32.xlu1 %v9377_v44, %s9215_s20  ;;  %6813 = vrot.lane.b32.xlu0 %v9344_v22, %s15366_s24  ;;  %s9229_s20 = smov 69   ;;  %s9258_s24 = smov 125  }
  0x4b   : > { %6808 = vrot.lane.b32.xlu1 %v9389_v47, %s15367_s25  ;;  %6823 = vrot.lane.b32.xlu0 %v9346_v23, %s15365_s26  ;;  %s9257_s26 = smov 126   ;;  %s9259_s25 = smov 124  }
  0x4f   : > { %6818 = vrot.lane.b32.xlu1 %v9350_v24, %s9219_s27  ;;  %6833 = vrot.lane.b32.xlu0 %v9361_v32, %s9220_s28  ;;  %s9230_s27 = smov 72   ;;  %s9231_s28 = smov 71  }
  0x53   : > { %6828 = vrot.lane.b32.xlu1 %v9368_v38, %s9221_s6  ;;  %6843 = vrot.lane.b32.xlu0 %v9370_v39, %s9222_s7  ;;  %s9232_s6 = smov 81   ;;  %s15355_s7 = smov 80  }
  0x57   : > { %6838 = vrot.lane.b32.xlu1 %v9377_v44, %s9223_s8  ;;  %6853 = vrot.lane.b32.xlu0 %v9344_v22, %s15363_s9  ;;  %s9234_s8 = smov 83   ;;  %s9255_s9 = smov 119  }
  0x5b   : > { %6848 = vrot.lane.b32.xlu1 %v9389_v47, %s15364_s10  ;;  %6863 = vrot.lane.b32.xlu0 %v9346_v23, %s15362_s17  ;;  %s15491_s17 = smov 120   ;;  %s9256_s10 = smov 127  }
  0x5f   : > { %6858 = vrot.lane.b32.xlu1 %v9350_v24, %s9227_s18  ;;  %6873 = vrot.lane.b32.xlu0 %v9361_v32, %s9228_s19  ;;  %s9235_s18 = smov 82   ;;  %s9236_s19 = smov 86  }
  0x63   : > { %6868 = vrot.lane.b32.xlu1 %v9368_v38, %s9229_s20  ;;  %6883 = vrot.lane.b32.xlu0 %v9370_v39, %s9230_s27  ;;  %s9237_s20 = smov 85   ;;  %s9238_s27 = smov 88  }
  0x67   : > { %6878 = vrot.lane.b32.xlu1 %v9377_v44, %s9231_s28  ;;  %6893 = vrot.lane.b32.xlu0 %v9344_v22, %s9232_s6  ;;  %s9239_s28 = smov 87   ;;  %s9240_s6 = smov 97  }
  0x6b   : > { %6888 = vrot.lane.b32.xlu1 %v9389_v47, %s15355_s7  ;;  %6903 = vrot.lane.b32.xlu0 %v9346_v23, %s9234_s8  ;;  %s15357_s7 = smov 96   ;;  %s9242_s8 = smov 99  }
  0x6f   : > { %6898 = vrot.lane.b32.xlu1 %v9350_v24, %s9235_s18  ;;  %6913 = vrot.lane.b32.xlu0 %v9361_v32, %s9236_s19  ;;  %s9243_s18 = smov 98   ;;  %s9244_s19 = smov 102  }
  0x73   : > { %6908 = vrot.lane.b32.xlu1 %v9368_v38, %s9237_s20  ;;  %6923 = vrot.lane.b32.xlu0 %v9370_v39, %s9238_s27  ;;  %s9245_s20 = smov 101   ;;  %s9246_s27 = smov 104  }
  0x77   : > { %6918 = vrot.lane.b32.xlu1 %v9377_v44, %s9239_s28  ;;  %6933 = vrot.lane.b32.xlu0 %v9344_v22, %s9240_s6  ;;  %s9247_s28 = smov 103   ;;  %s15719_s6 = smov 113  }
  0x7b   : > { %6928 = vrot.lane.b32.xlu1 %v9389_v47, %s15357_s7  ;;  %6943 = vrot.lane.b32.xlu0 %v9346_v23, %s9242_s8  ;;  %s9250_s7 = smov 115  }
  0x7f   : > { %6938 = vrot.lane.b32.xlu1 %v9350_v24, %s9243_s18  ;;  %6953 = vrot.lane.b32.xlu0 %v9361_v32, %s9244_s19  ;;  %s9249_s18 = smov 112  }
  0x83   : > { %6948 = vrot.lane.b32.xlu1 %v9368_v38, %s9245_s20  ;;  %6963 = vrot.lane.b32.xlu0 %v9370_v39, %s9246_s27  ;;  %s9251_s27 = smov 114  }
  0x85   : > { %v330_v48 = vpop.permute.xlu0 %329 }
  0x86   : > { %v9467_v50 = vsel %vm15490_vm0, 0.0, %v330_v48 }
  0x87   : > { %6958 = vrot.lane.b32.xlu1 %v9377_v44, %s9247_s28  ;;  %6973 = vrot.lane.b32.xlu0 %v9344_v22, %s15719_s6 }
  0x89   : > { %v9460_v49 = vpop.permute.xlu0 %331 }
  0x8a   : > { %v9477_v55 = vsel %vm15490_vm0, %v330_v48, %v9460_v49 }
  0x8b   : > { %6968 = vrot.lane.b32.xlu1 %v9389_v47, %s9249_s18  ;;  %6983 = vrot.lane.b32.xlu0 %v9346_v23, %s9250_s7  ;;  %15934 = vst [vmem:[#allocation11_spill] sm:$0xff] %v9477_v55  ;;  %v9562_v47 = vsel %vm15490_vm0, %v9460_v49, 0.0  ;;  %vm590_vm0 = vcmask 302080  }
  0x8c   : > { %15943 = vst [vmem:[#allocation20_spill] sm:$0xff] %v9562_v47 }
  0x8d   : > { %v6694_v51 = vpop.permute.xlu1 %6693  ;;  %v6704_v54 = vpop.permute.xlu0 %6703 }
  0x8e   : > { %v9469_v52 = vunpack.i.h.bf16 %v6694_v51  ;;  %v9471_v53 = vunpack.i.l.bf16 %v6694_v51  ;;  %v9494_v63 = vunpack.i.h.bf16 %v6704_v54  ;;  %v9498_v1 = vunpack.i.l.bf16 %v6704_v54 }
  0x8f   : > { %6978 = vrot.lane.b32.xlu1 %v9350_v24, %s9251_s27  ;;  %6993 = vrot.lane.b32.xlu0 %v9361_v32, %s9252_s14  ;;  %v7037_v51 = vpack.i.bf16 %v9477_v55, %v9467_v50  ;;  %v15401_v24 = vrot.slane %v9467_v50, 6 }
  0x90   : > { %15933 = vst [vmem:[#allocation10_spill] sm:$0xff] %v9469_v52  ;;  %v9484_v56 = vsel %vm15526_vm1, %v9471_v53, %v9469_v52  ;;  %v353_v57 = vmul.f32 %v9471_v53, %v9467_v50  ;;  %15936 = vst [vmem:[#allocation13_spill] sm:$0xff] %v9494_v63  ;;  %v9519_v12 = vsel %vm15525_vm3, %v9498_v1, %v9494_v63  ;;  %vm1149_vm3 = vcmask 1039360  }
  0x91   : > { %v6699_v58 = vpop.permute.xlu1 %6698  ;;  %v354_v59 = vmul.f32 %v9484_v56, %v9477_v55  ;;  %v6714_v62 = vpop.permute.xlu0 %6713  ;;  %15938 = vst [vmem:[#allocation15_spill] sm:$0xff] %v9519_v12  ;;  %v381_v18 = vmul.f32 %v9498_v1, %v9467_v50  ;;  %v382_v20 = vmul.f32 %v9519_v12, %v9477_v55  ;;  %vm15545_vm1 = vcmask 1014784  }
  0x92   : > { %v9490_v60 = vunpack.i.h.bf16 %v6699_v58  ;;  %v9492_v61 = vunpack.i.l.bf16 %v6699_v58  ;;  %v1140_v2 = vrot.slane %v353_v57, 6  ;;  %v9534_v29 = vunpack.i.h.bf16 %v6714_v62 }
  0x93   : > { %6988 = vrot.lane.b32.xlu1 %v9368_v38, %s15437_s21  ;;  %7003 = vrot.lane.b32.xlu0 %v9370_v39, %s15491_s17  ;;  %v1141_v3 = vrot.slane %v354_v59, 6  ;;  %v1174_v26 = vrot.slane %v381_v18, 2  ;;  %v1175_v27 = vrot.slane %v382_v20, 2  ;;  %v9536_v30 = vunpack.i.l.bf16 %v6714_v62 }
  0x94   : > { %15935 = vst [vmem:[#allocation12_spill] sm:$0xff] %v9490_v60  ;;  %v9504_v4 = vsel %vm362_vm2, %v9492_v61, %v9490_v60  ;;  %v367_v6 = vmul.f32 %v9492_v61, %v9467_v50  ;;  %15940 = vst [vmem:[#allocation17_spill] sm:$0xff] %v9534_v29  ;;  %v355_v62 = vmul.f32 %v9469_v52, %v9562_v47  ;;  %vm722_vm2 = vcmask 457728  }
  0x95   : > { %v6709_v5 = vpop.permute.xlu1 %6708  ;;  %v368_v7 = vmul.f32 %v9504_v4, %v9477_v55  ;;  %v6724_v8 = vpop.permute.xlu0 %6723  ;;  %v7017_v11 = vpack.i.bf16 %v1141_v3, %v1140_v2  ;;  %v7027_v36 = vpack.i.bf16 %v1175_v27, %v1174_v26  ;;  %v9555_v41 = vsel %vm404_vm5, %v9536_v30, %v9534_v29 }
  0x96   : > { %v9512_v9 = vunpack.i.h.bf16 %v6709_v5  ;;  %v9514_v10 = vunpack.i.l.bf16 %v6709_v5  ;;  %v1157_v15 = vrot.slane %v367_v6, 4  ;;  %15942 = vst [vmem:[#allocation19_spill] sm:$0xff] %v9555_v41  ;;  %v410_v54 = vmul.f32 %v9555_v41, %v9477_v55 }
  0x97   : > { %6998 = vrot.lane.b32.xlu1 %v9377_v44, %s9255_s9  ;;  %v1158_v16 = vrot.slane %v368_v7, 4  ;;  %v409_v44 = vmul.f32 %v9536_v30, %v9467_v50  ;;  %v1142_v26 = vrot.slane %v355_v62, 6  ;;  %vm15502_vm5 = vcmask 547840  }
  0x98   : > { %15937 = vst [vmem:[#allocation14_spill] sm:$0xff] %v9512_v9  ;;  %v9532_v28 = vsel %vm390_vm4, %v9514_v10, %v9512_v9  ;;  %v395_v33 = vmul.f32 %v9514_v10, %v9467_v50  ;;  %v1222_v6 = vrot.slane %v410_v54, 4  ;;  %vm15503_vm4 = vcmask 531456  }
  0x99   : > { %v6719_v13 = vpop.permute.xlu1 %6718  ;;  %v9525_v21 = vpop.permute.xlu0 %6733  ;;  %v7022_v25 = vpack.i.bf16 %v1158_v16, %v1157_v15  ;;  %15939 = vst [vmem:[#allocation16_spill] sm:$0xff] %v9532_v28  ;;  %v396_v34 = vmul.f32 %v9532_v28, %v9477_v55  ;;  %v1221_v2 = vrot.slane %v409_v44, 4  ;;  %v9591_v15 = vunpack.i.l.bf16 %v6724_v8 }
  0x9a   : > { %v9547_v37 = vunpack.i.h.bf16 %v6719_v13  ;;  %v9549_v39 = vunpack.i.l.bf16 %v6719_v13  ;;  %v1204_v42 = vrot.slane %v395_v33, 6  ;;  %v9589_v13 = vunpack.i.h.bf16 %v6724_v8 }
  0x9b   : > { %7018 = vrot.lane.b32.xlu1 %v7017_v11, %s9256_s10  ;;  %v1205_v43 = vrot.slane %v396_v34, 6  ;;  %15947 = vst [vmem:[#allocation24_spill] sm:$0xff] %v9591_v15  ;;  %v15375_v27 = vunpack.i.h.bf16 %v9525_v21  ;;  %v7057_v34 = vpack.i.bf16 %v1222_v6, %v1221_v2 }
  0x9c   : > { %15941 = vst [vmem:[#allocation18_spill] sm:$0xff] %v9547_v37  ;;  %v9574_v58 = vsel %vm418_vm6, %v9549_v39, %v9547_v37  ;;  %v423_v7 = vmul.f32 %v9549_v39, %v9467_v50  ;;  %15946 = vst [vmem:[#allocation23_spill] sm:$0xff] %v9589_v13  ;;  %vm782_vm6 = vcmask 564224  }
  0x9d   : > { %v9528_v22 = vpop.permute.xlu1 %6728  ;;  %v9538_v31 = vpop.permute.xlu0 %6743  ;;  %15944 = vst [vmem:[#allocation21_spill] sm:$0xff] %v9574_v58  ;;  %v7047_v49 = vpack.i.bf16 %v1205_v43, %v1204_v42  ;;  %v424_v11 = vmul.f32 %v9574_v58, %v9477_v55  ;;  %v6735_v42 = vunpack.i.l.bf16 %v9525_v21 }
  0x9e   : > { %v15376_v16 = vunpack.i.h.bf16 %v9528_v22  ;;  %v6730_v18 = vunpack.i.l.bf16 %v9528_v22  ;;  %v1238_v8 = vrot.slane %v423_v7, 2 }
  0x9f   : > { %7023 = vrot.lane.b32.xlu1 %v7022_v25, %s9257_s26 }
  0xa0   : > { %v447_v54 = vsel %vm15520_vm8, %v6730_v18, %v15376_v16  ;;  %vm1094_vm8 = vcmask 973824  }
  0xa1   : > { %v9545_v35 = vpop.permute.xlu1 %6738  ;;  %v9551_v40 = vpop.permute.xlu0 %6753  ;;  %v452_v7 = vmul.f32 %v447_v54, %v9477_v55 }
  0xa2   : > { %v15379_v54 = vunpack.i.h.bf16 %v9545_v35  ;;  %v6740_v0 = vunpack.i.l.bf16 %v9545_v35 }
  0xa3   : > { %7028 = vrot.lane.b32.xlu1 %v7027_v36, %s9258_s24  ;;  %v1239_v36 = vrot.slane %v424_v11, 2 }
  0xa5   : > { %v9564_v48 = vpop.permute.xlu1 %6748  ;;  %v9570_v57 = vpop.permute.xlu0 %6763  ;;  %v7067_v2 = vpack.i.bf16 %v1239_v36, %v1238_v8  ;;  %v1269_v36 = vrot.slane %v452_v7, 6 }
  0xa6   : > { %v15377_v59 = vunpack.i.l.bf16 %v9570_v57 }
  0xa7   : > { %7038 = vrot.lane.b32.xlu1 %v7037_v51, %s9259_s25  ;;  %v9606_v51 = vsel %vm432_vm7, %v9591_v15, %v9589_v13  ;;  %vm794_vm7 = vcmask 572416  }
  0xa8   : > { %v535_v3 = vmul.f32 %v15377_v59, %v9467_v50  ;;  %15948 = vst [vmem:[#allocation25_spill] sm:$0xff] %v9606_v51  ;;  %v438_v6 = vmul.f32 %v9606_v51, %v9477_v55 }
  0xa9   : > { %v9583_v5 = vpop.permute.xlu1 %6758  ;;  %v9595_v20 = vpop.permute.xlu0 %6773 }
  0xaa   : > { %15945 = vst [vmem:[#allocation22_spill] sm:$0xff] %v9583_v5  ;;  %v1407_v25 = vrot.slane %v535_v3, 6  ;;  %v437_v3 = vmul.f32 %v9591_v15, %v9467_v50 }
  0xab   : > { %7048 = vrot.lane.b32.xlu1 %v7047_v49, %s15474_s13  ;;  %v451_v49 = vmul.f32 %v6730_v18, %v9467_v50  ;;  %v463_v18 = vmul.f32 %v6735_v42, %v9467_v50 }
  0xac   : > { %v7007_v44 = vpack.i.bf16 %v1407_v25, %v1142_v26  ;;  %v459_v25 = vsel %vm15519_vm9, %v6735_v42, %v15375_v27  ;;  %vm1070_vm9 = vcmask 957440  }
  0xad   : > { %v9599_v33 = vpop.permute.xlu1 %6768  ;;  %v9602_v43 = vpop.permute.xlu0 %6783  ;;  %v1268_v8 = vrot.slane %v451_v49, 6  ;;  %v1284_v42 = vrot.slane %v463_v18, 4  ;;  %v471_v49 = vsel %vm470_vm10, %v6740_v0, %v15379_v54  ;;  %vm806_vm10 = vcmask 580608  }
  0xae   : > { %7008 = vrot.lane.b32.xlu0 %v7007_v44, %s9256_s10  ;;  %v464_v44 = vmul.f32 %v459_v25, %v9477_v55  ;;  %v476_v25 = vmul.f32 %v471_v49, %v9477_v55 }
  0xaf   : > { %7058 = vrot.lane.b32.xlu1 %v7057_v34, %s9261_s11  ;;  %v7077_v34 = vpack.i.bf16 %v438_v6, %v437_v3  ;;  %v475_v3 = vmul.f32 %v6740_v0, %v9467_v50  ;;  %v15393_v0 = vunpack.i.h.bf16 %v9564_v48 }
  0xb0   : > { %v1285_v16 = vrot.slane %v464_v44, 4 }
  0xb1   : > { %v9614_v62 = vpop.permute.xlu1 %6778  ;;  %v9621_v11 = vpop.permute.xlu0 %6793  ;;  %v1301_v44 = vrot.slane %v475_v3, 2 }
  0xb2   : > { %15949 = vst [vmem:[#allocation26_spill] sm:$0xff] %v9614_v62  ;;  %15950 = vst [vmem:[#allocation27_spill] sm:$0xff] %v9621_v11  ;;  %v7092_v7 = vpack.i.bf16 %v1285_v16, %v1284_v42  ;;  %v6750_v16 = vunpack.i.l.bf16 %v9564_v48 }
  0xb3   : > { %7068 = vrot.lane.b32.xlu1 %v7067_v2, %s9262_s12  ;;  %v7082_v2 = vpack.i.bf16 %v1269_v36, %v1268_v8  ;;  %v6745_v8 = vunpack.i.l.bf16 %v9538_v31 }
  0xb5   : > { %v9628_v26 = vpop.permute.xlu1 %6788  ;;  %v9633_v14 = vpop.permute.xlu0 %6803  ;;  %v487_v54 = vmul.f32 %v6745_v8, %v9467_v50 }
  0xb6   : > { %15951 = vst [vmem:[#allocation28_spill] sm:$0xff] %v9628_v26 }
  0xb7   : > { %7078 = vrot.lane.b32.xlu1 %v7077_v34, %s15491_s17  ;;  %v15387_v34 = vunpack.i.h.bf16 %v9538_v31 }
  0xb9   : > { %v9636_v27 = vpop.permute.xlu1 %6798  ;;  %v9638_v59 = vpop.permute.xlu0 %6813  ;;  %v483_v49 = vsel %vm15516_vm11, %v6745_v8, %v15387_v34  ;;  %v499_v34 = vmul.f32 %v6750_v16, %v9467_v50  ;;  %v15399_v8 = vrot.slane %v9477_v55, 6  ;;  %vm1082_vm11 = vcmask 965632  }
  0xba   : > { %v488_v19 = vmul.f32 %v483_v49, %v9477_v55 }
  0xbb   : > { %7083 = vrot.lane.b32.xlu1 %v7082_v2, %s9249_s18  ;;  %v1302_v2 = vrot.slane %v476_v25, 2  ;;  %v495_v25 = vsel %vm494_vm12, %v6750_v16, %v15393_v0  ;;  %vm15489_vm12 = vcmask 654336  }
  0xbc   : > { %v7112_v32 = vpack.i.bf16 %v488_v19, %v487_v54  ;;  %v1346_v19 = vrot.slane %v499_v34, 4  ;;  %v369_v34 = vmul.f32 %v9490_v60, %v9562_v47  ;;  %v383_v60 = vmul.f32 %v9494_v63, %v9562_v47 }
  0xbd   : > { %v9644_v6 = vpop.permute.xlu1 %6808  ;;  %v9649_v18 = vpop.permute.xlu0 %6823  ;;  %v7102_v17 = vpack.i.bf16 %v1302_v2, %v1301_v44  ;;  %v500_v44 = vmul.f32 %v495_v25, %v9477_v55  ;;  %v6755_v25 = vunpack.i.l.bf16 %v9551_v40 }
  0xbf   : > { %7093 = vrot.lane.b32.xlu1 %v7092_v7, %s9263_s5  ;;  %v1347_v54 = vrot.slane %v500_v44, 4  ;;  %v15416_v44 = vunpack.i.h.bf16 %v9551_v40 }
  0xc1   : > { %v9652_v36 = vpop.permute.xlu1 %6818  ;;  %v9656_v42 = vpop.permute.xlu0 %6833  ;;  %v7132_v23 = vpack.i.bf16 %v1347_v54, %v1346_v19  ;;  %v6766_v54 = vunpack.i.h.bf16 %v9570_v57  ;;  %v507_v58 = vsel %vm506_vm13, %v6755_v25, %v15416_v44  ;;  %v15420_v44 = vunpack.i.h.bf16 %v9599_v33 }
  0xc2   : > { %15952 = vst [vmem:[#allocation29_spill] sm:$0xff] %v9656_v42  ;;  %v512_v5 = vmul.f32 %v507_v58, %v9477_v55  ;;  %v15958_v58 = vunpack.i.l.bf16 %v9570_v57  ;;  %v15421_v57 = vunpack.i.h.bf16 %v9595_v20  ;;  %vm854_vm13 = vcmask 670720  }
  0xc3   : > { %7103 = vrot.lane.b32.xlu1 %v7102_v17, %s9264_s29  ;;  %v7122_v17 = vpack.i.bf16 %v15399_v8, %v15401_v24  ;;  %v537_v46 = vmul.f32 %v6766_v54, %v9562_v47 }
  0xc5   : > { %v9662_v7 = vpop.permute.xlu1 %6828  ;;  %v9665_v3 = vpop.permute.xlu0 %6843 }
  0xc6   : > { %15953 = vst [vmem:[#allocation30_spill] sm:$0xff] %v9662_v7  ;;  %v15413_v8 = vunpack.i.l.bf16 %v9665_v3 }
  0xc7   : > { %7113 = vrot.lane.b32.xlu1 %v7112_v32, %s9265_s30 }
  0xc8   : > { %v727_v7 = vmul.f32 %v15413_v8, %v9467_v50  ;;  %v1364_v8 = vrot.slane %v512_v5, 2  ;;  %v1409_v5 = vrot.slane %v537_v46, 6  ;;  %v561_v46 = vmul.f32 %v15421_v57, %v9562_v47 }
  0xc9   : > { %v9672_v38 = vpop.permute.xlu1 %6838  ;;  %v9676_v2 = vpop.permute.xlu0 %6853 }
  0xca   : > { %15954 = vst [vmem:[#allocation31_spill] sm:$0xff] %v9672_v38  ;;  %v15402_v49 = vunpack.i.l.bf16 %v9672_v38 }
  0xcb   : > { %7123 = vrot.lane.b32.xlu1 %v7122_v17, %s9266_s23  ;;  %v511_v17 = vmul.f32 %v6755_v25, %v9467_v50  ;;  %v1176_v25 = vrot.slane %v383_v60, 2 }
  0xcc   : > { %v715_v32 = vmul.f32 %v15402_v49, %v9467_v50 }
  0xcd   : > { %v9684_v16 = vpop.permute.xlu1 %6848  ;;  %v9686_v0 = vpop.permute.xlu0 %6863  ;;  %v1363_v45 = vrot.slane %v511_v17, 2  ;;  %v531_v17 = vsel %vm530_vm14, %v15958_v58, %v6766_v54  ;;  %v549_v54 = vmul.f32 %v15420_v44, %v9562_v47  ;;  %vm878_vm14 = vcmask 695296  }
  0xce   : > { %15955 = vst [vmem:[#allocation32_spill] sm:$0xff] %v9684_v16  ;;  %v1702_v24 = vrot.slane %v715_v32, 4 }
  0xcf   : > { %7133 = vrot.lane.b32.xlu1 %v7132_v23, %s15417_s22  ;;  %v1159_v23 = vrot.slane %v369_v34, 4  ;;  %v1719_v34 = vrot.slane %v727_v7, 2  ;;  %v7142_v38 = vpack.i.bf16 %v1364_v8, %v1363_v45  ;;  %s9268_s22 = smov 106   ;;  %v1426_v58 = vrot.slane %v549_v54, 4 }
  0xd1   : > { %v9693_v51 = vpop.permute.xlu1 %6858  ;;  %v9695_v15 = vpop.permute.xlu0 %6873  ;;  %v7012_v12 = vpack.i.bf16 %v1702_v24, %v1159_v23  ;;  %v7032_v63 = vpack.i.bf16 %v1719_v34, %v1176_v25  ;;  %v15427_v25 = vunpack.i.l.bf16 %v9684_v16 }
  0xd2   : > { %15956 = vst [vmem:[#allocation33_spill] sm:$0xff] %v9693_v51  ;;  %v15436_v54 = vunpack.i.l.bf16 %v9693_v51 }
  0xd3   : > { %7013 = vrot.lane.b32.xlu0 %v7012_v12, %s9257_s26  ;;  %7143 = vrot.lane.b32.xlu1 %v7142_v38, %s9268_s22  ;;  %v536_v12 = vmul.f32 %v531_v17, %v9477_v55  ;;  %v15429_v17 = vunpack.i.h.bf16 %v9602_v43  ;;  %v739_v57 = vmul.f32 %v15427_v25, %v9467_v50 }
  0xd4   : > { %v763_v25 = vmul.f32 %v15436_v54, %v9467_v50 }
  0xd5   : > { %v9703_v49 = vpop.permute.xlu1 %6868  ;;  %v9705_v19 = vpop.permute.xlu0 %6883  ;;  %v1408_v45 = vrot.slane %v536_v12, 6  ;;  %v585_v12 = vmul.f32 %v15429_v17, %v9562_v47 }
  0xd7   : > { %7033 = vrot.lane.b32.xlu0 %v7032_v63, %s9258_s24  ;;  %v7152_v8 = vpack.i.bf16 %v1409_v5, %v1408_v45  ;;  %v15423_v63 = vunpack.i.l.bf16 %v9676_v2  ;;  %v1474_v28 = vrot.slane %v585_v12, 6 }
  0xd9   : > { %v9714_v32 = vpop.permute.xlu1 %6878  ;;  %v9718_v52 = vpop.permute.xlu0 %6893  ;;  %7153 = vrot.lane.b32.xlu1 %v7152_v8, %s9256_s10  ;;  %v1443_v8 = vrot.slane %v561_v46, 2  ;;  %v751_v44 = vmul.f32 %v15423_v63, %v9467_v50  ;;  %v15439_v63 = vunpack.i.l.bf16 %v9686_v0 }
  0xda   : > { %15957 = vst [vmem:[#allocation34_spill] sm:$0xff] %v9718_v52 }
  0xdb   : > { %v1750_v16 = vrot.slane %v751_v44, 6  ;;  %v1767_v44 = vrot.slane %v763_v25, 4  ;;  %v15450_v25 = vrot.slane %v9562_v47, 4 }
  0xdd   : > { %v9722_v24 = vpop.permute.xlu1 %6888  ;;  %v9726_v23 = vpop.permute.xlu0 %6903  ;;  %1431 = vrot.lane.b32.xlu1 %v1426_v58, %s9255_s9  ;;  %v15963_v58 = vunpack.i.h.bf16 %v9614_v62  ;;  %v15441_v62 = vunpack.i.h.bf16 %v9628_v26  ;;  %v7182_v54 = vpack.i.bf16 %v1750_v16, %v1474_v28 }
  0xde   : > { %15959 = vst [vmem:[#allocation35_spill] sm:$0xff] %v9726_v23 }
  0xdf   : > { %v573_v23 = vmul.f32 %v15963_v58, %v9562_v47  ;;  %v775_v58 = vmul.f32 %v15439_v63, %v9467_v50  ;;  %v597_v12 = vmul.f32 %v15441_v62, %v9562_v47  ;;  %v7192_v62 = vpack.i.bf16 %v1767_v44, %v15450_v25 }
  0xe1   : > { %v9732_v60 = vpop.permute.xlu1 %6898  ;;  %v9734_v7 = vpop.permute.xlu0 %6913  ;;  %1448 = vrot.lane.b32.xlu1 %v1443_v8, %s9252_s14  ;;  %v7172_v41 = vpack.i.bf16 %v739_v57, %v573_v23  ;;  %v6806_v57 = vunpack.i.h.bf16 %v9633_v14  ;;  %v1506_v26 = vrot.slane %v597_v12, 2  ;;  %v397_v12 = vmul.f32 %v9512_v9, %v9562_v47 }
  0xe5   : > { %v9741_v38 = vpop.permute.xlu1 %6908  ;;  %v9743_v34 = vpop.permute.xlu0 %6923  ;;  %7173 = vrot.lane.b32.xlu1 %v7172_v41, %s15437_s21  ;;  %s9269_s21 = smov 116  }
  0xe6   : > { %15960 = vst [vmem:[#allocation36_spill] sm:$0xff] %v9743_v34  ;;  %v15448_v51 = vunpack.i.l.bf16 %v9743_v34 }
  0xe8   : > { %v919_v41 = vmul.f32 %v15448_v51, %v9467_v50  ;;  %v633_v51 = vmul.f32 %v6806_v57, %v9562_v47 }
  0xe9   : > { %v9753_v5 = vpop.permute.xlu1 %6918  ;;  %v9755_v45 = vpop.permute.xlu0 %6933  ;;  %7183 = vrot.lane.b32.xlu1 %v7182_v54, %s9269_s21  ;;  %v15969_v54 = vunpack.i.l.bf16 %v9633_v14 }
  0xea   : > { %15961 = vst [vmem:[#allocation37_spill] sm:$0xff] %v9753_v5  ;;  %15962 = vst [vmem:[#allocation38_spill] sm:$0xff] %v9755_v45  ;;  %v15440_v17 = vunpack.i.l.bf16 %v9753_v5  ;;  %v1554_v25 = vrot.slane %v633_v51, 4  ;;  %v15457_v51 = vunpack.i.l.bf16 %v9722_v24 }
  0xec   : > { %v907_v23 = vmul.f32 %v15440_v17, %v9467_v50  ;;  %v1784_v17 = vrot.slane %v775_v58, 2  ;;  %v15970_v58 = vunpack.i.h.bf16 %v9621_v11  ;;  %v15456_v11 = vunpack.i.h.bf16 %v9644_v6 }
  0xed   : > { %v9771_v46 = vpop.permute.xlu1 %6928  ;;  %v9774_v45 = vpop.permute.xlu0 %6943  ;;  %7193 = vrot.lane.b32.xlu1 %v7192_v62, %s9250_s7  ;;  %v1206_v62 = vrot.slane %v397_v12, 6 }
  0xee   : > { %15964 = vst [vmem:[#allocation39_spill] sm:$0xff] %v9771_v46  ;;  %15965 = vst [vmem:[#allocation40_spill] sm:$0xff] %v9774_v45  ;;  %v609_v34 = vmul.f32 %v15970_v58, %v9562_v47 }
  0xf0   : > { %v7212_v58 = vpack.i.bf16 %v9467_v50, %v609_v34 }
  0xf1   : > { %v9782_v8 = vpop.permute.xlu1 %6938  ;;  %v9787_v45 = vpop.permute.xlu0 %6953 }
  0xf2   : > { %15966 = vst [vmem:[#allocation41_spill] sm:$0xff] %v9782_v8  ;;  %15967 = vst [vmem:[#allocation42_spill] sm:$0xff] %v9787_v45  ;;  %v7042_v45 = vpack.i.bf16 %v907_v23, %v9562_v47  ;;  %v627_v8 = vsel %vm626_vm15, %v15969_v54, %v6806_v57  ;;  %v7202_v23 = vpack.i.bf16 %v1784_v17, %v1506_v26  ;;  %v2023_v54 = vrot.slane %v919_v41, 6 }
  0xf3   : > { %v632_v44 = vmul.f32 %v627_v8, %v9477_v55  ;;  %v645_v17 = vmul.f32 %v15456_v11, %v9562_v47  ;;  %v15458_v41 = vunpack.i.h.bf16 %v9652_v36  ;;  %v15469_v11 = vunpack.i.l.bf16 %v9732_v60 }
  0xf4   : > { %7043 = vrot.lane.b32.xlu0 %v7042_v45, %s9259_s25  ;;  %7203 = vrot.lane.b32.xlu1 %v7202_v23, %s9251_s27  ;;  %v7052_v57 = vpack.i.bf16 %v2023_v54, %v1206_v62  ;;  %v15460_v23 = vunpack.i.h.bf16 %v9638_v59  ;;  %v15463_v54 = vunpack.i.l.bf16 %v9718_v52  ;;  %v835_v62 = vmul.f32 %v15457_v51, %v9467_v50 }
  0xf5   : > { %v9800_v63 = vpop.permute.xlu1 %6948  ;;  %v9803_v16 = vpop.permute.xlu0 %6963  ;;  %v1553_v5 = vrot.slane %v632_v44, 4  ;;  %v1571_v12 = vrot.slane %v645_v17, 2  ;;  %v6846_v52 = vunpack.i.h.bf16 %v9665_v3  ;;  %vm15513_vm15 = vcmask 269312  }
  0xf6   : > { %15968 = vst [vmem:[#allocation43_spill] sm:$0xff] %v9803_v16  ;;  %v847_v17 = vmul.f32 %v15463_v54, %v9467_v50 }
  0xf7   : > { %v7222_v8 = vpack.i.bf16 %v1554_v25, %v1553_v5  ;;  %v669_v5 = vmul.f32 %v15458_v41, %v9562_v47 }
  0xf8   : > { %7213 = vrot.lane.b32.xlu1 %v7212_v58, %s15719_s6  ;;  %7053 = vrot.lane.b32.xlu0 %v7052_v57, %s15474_s13  ;;  %v15466_v58 = vunpack.i.h.bf16 %v9649_v18  ;;  %v657_v57 = vmul.f32 %v15460_v23, %v9562_v47  ;;  %v15471_v23 = vunpack.i.h.bf16 %v9656_v42  ;;  %v1894_v54 = vrot.slane %v847_v17, 4  ;;  %s9270_s13 = smov 100  }
  0xf9   : > { %v9815_v28 = vpop.permute.xlu1 %6958  ;;  %v9821_v46 = vpop.permute.xlu0 %6973  ;;  %v15978_v17 = vunpack.i.l.bf16 %v9665_v3  ;;  %v6866_v3 = vunpack.i.h.bf16 %v9686_v0 }
  0xfa   : > { %15971 = vst [vmem:[#allocation44_spill] sm:$0xff] %v9821_v46  ;;  %v681_v41 = vmul.f32 %v15466_v58, %v9562_v47 }
  0xfc   : > { %7223 = vrot.lane.b32.xlu1 %v7222_v8, %s9263_s5  ;;  %v1877_v8 = vrot.slane %v835_v62, 6  ;;  %v859_v62 = vmul.f32 %v15469_v11, %v9467_v50  ;;  %v6856_v11 = vunpack.i.h.bf16 %v9676_v2 }
  0xfd   : > { %v9827_v45 = vpop.permute.xlu1 %6968  ;;  %v9831_v46 = vpop.permute.xlu0 %6983 }
  0xfe   : > { %15972 = vst [vmem:[#allocation45_spill] sm:$0xff] %v9831_v46  ;;  %v723_v46 = vsel %vm722_vm2, %v15978_v17, %v6846_v52  ;;  %v729_v17 = vmul.f32 %v6846_v52, %v9562_v47  ;;  %vm890_vm2 = vcmask 703488  }
 0x100   : > { %1576 = vrot.lane.b32.xlu1 %v1571_v12, %s9247_s28  ;;  %v1602_v12 = vrot.slane %v669_v5, 6  ;;  %v1619_v5 = vrot.slane %v681_v41, 4 }
 0x101   : > { %v9835_v26 = vpop.permute.xlu1 %6978  ;;  %v9845_v44 = vpop.permute.xlu0 %6993 }
 0x102   : > { %15974 = vst [vmem:[#allocation47_spill] sm:$0xff] %v9845_v44 }
 0x104   : > { %1590 = vrot.lane.b32.xlu1 %v657_v57, %s9244_s19 }
 0x105   : > { %v9843_v34 = vpop.permute.xlu1 %6988  ;;  %v9866_v51 = vpop.permute.xlu0 %7003 }
 0x106   : > { %15973 = vst [vmem:[#allocation46_spill] sm:$0xff] %v9843_v34  ;;  %15975 = vst [vmem:[#allocation48_spill] sm:$0xff] %v9866_v51  ;;  %v7242_v34 = vpack.i.bf16 %v1877_v8, %v1602_v12  ;;  %v15477_v44 = vunpack.i.l.bf16 %v9866_v51  ;;  %v1911_v12 = vrot.slane %v859_v62, 2  ;;  %v15980_v51 = vunpack.i.l.bf16 %v9676_v2 }
 0x108   : > { %7243 = vrot.lane.b32.xlu1 %v7242_v34, %s9245_s20  ;;  %v1111_v41 = vmul.f32 %v15477_v44, %v9467_v50  ;;  %v7252_v34 = vpack.i.bf16 %v1894_v54, %v1619_v5  ;;  %v425_v44 = vmul.f32 %v9547_v37, %v9562_v47  ;;  %v728_v5 = vmul.f32 %v723_v46, %v9477_v55 }
 0x109   : > { %v9857_v25 = vpop.permute.xlu1 %6998  ;;  %v1721_v37 = vrot.slane %v729_v17, 2  ;;  %v753_v46 = vmul.f32 %v6856_v11, %v9562_v47  ;;  %v15983_v17 = vrot.slane %v9467_v50, 6 }
 0x10a   : > { %v15476_v58 = vunpack.i.l.bf16 %v9857_v25 }
 0x10c   : > { %v1099_v8 = vmul.f32 %v15476_v58, %v9467_v50  ;;  %7253 = vrot.lane.b32.xlu1 %v7252_v34, %s9270_s13  ;;  %v2327_v34 = vrot.slane %v1111_v41, 2 }
 0x10d   : > { %v9872_v9 = vpop.permute.xlu1 %7018 }
 0x10e   : > { %15976 = vst [vmem:[#allocation49_spill] sm:$0xff] %v9872_v9  ;;  %v705_v9 = vmul.f32 %v15471_v23, %v9562_v47  ;;  %v15483_v23 = vrot.slane %v9562_v47, 2  ;;  %v2310_v42 = vrot.slane %v1099_v8, 4  ;;  %v747_v8 = vsel %vm15503_vm4, %v15980_v51, %v6856_v11 }
 0x10f   : > { %v752_v51 = vmul.f32 %v747_v8, %v9477_v55  ;;  %v15985_v11 = vunpack.i.l.bf16 %v9633_v14  ;;  %vm15511_vm4 = vcmask 400384  }
 0x110   : > { %v1687_v54 = vrot.slane %v705_v9, 6  ;;  %v7262_v52 = vpack.i.bf16 %v1911_v12, %v15483_v23  ;;  %v1240_v9 = vrot.slane %v425_v44, 2  ;;  %v15982_v12 = vunpack.i.l.bf16 %v9686_v0 }
 0x111   : > { %v9882_v57 = vpop.permute.xlu1 %7023  ;;  %v15984_v44 = vunpack.i.h.bf16 %v9528_v22  ;;  %v631_v8 = vmul.f32 %v15985_v11, %v9467_v50  ;;  %v15485_v0 = vunpack.i.h.bf16 %v9695_v15 }
 0x112   : > { %15977 = vst [vmem:[#allocation50_spill] sm:$0xff] %v9882_v57  ;;  %v411_v57 = vmul.f32 %v9534_v29, %v9562_v47  ;;  %7263 = vrot.lane.b32.xlu1 %v7262_v52, %s9242_s8  ;;  %v771_v41 = vsel %vm15502_vm5, %v15982_v12, %v6866_v3  ;;  %v7272_v52 = vpack.i.bf16 %v15983_v17, %v1687_v54  ;;  %v6875_v12 = vunpack.i.l.bf16 %v9695_v15 }
 0x113   : > { %v453_v23 = vmul.f32 %v15984_v44, %v9562_v47  ;;  %v776_v22 = vmul.f32 %v771_v41, %v9477_v55  ;;  %v1751_v17 = vrot.slane %v752_v51, 6  ;;  %v439_v44 = vmul.f32 %v9589_v13, %v9562_v47 }
 0x114   : > { %v1223_v58 = vrot.slane %v411_v57, 4  ;;  %v15981_v57 = vunpack.i.l.bf16 %v9636_v27  ;;  %v795_v41 = vsel %vm794_vm7, %v6875_v12, %v15485_v0  ;;  %v1552_v0 = vrot.slane %v631_v8, 4 }
 0x115   : > { %v9902_v62 = vpop.permute.xlu1 %7028  ;;  %v15486_v8 = vunpack.i.l.bf16 %v9705_v19  ;;  %vm15529_vm7 = vcmask 285696   ;;  %vm15535_vm5 = vcmask 834560  }
 0x116   : > { %15979 = vst [vmem:[#allocation51_spill] sm:$0xff] %v9902_v62  ;;  %v7062_v29 = vpack.i.bf16 %v2310_v42, %v1223_v58  ;;  %v619_v62 = vmul.f32 %v15981_v57, %v9467_v50  ;;  %v6870_v58 = vunpack.i.l.bf16 %v9703_v49  ;;  %v1720_v57 = vrot.slane %v728_v5, 2  ;;  %7273 = vrot.lane.b32.xlu1 %v7272_v52, %s9256_s10 }
 0x117   : > { %v777_v42 = vmul.f32 %v6866_v3, %v9562_v47  ;;  %v1752_v5 = vrot.slane %v753_v46, 6  ;;  %v15987_v52 = vunpack.i.h.bf16 %v9525_v21 }
 0x118   : > { %7063 = vrot.lane.b32.xlu0 %v7062_v29, %s9261_s11  ;;  %v7072_v29 = vpack.i.bf16 %v2327_v34, %v1240_v9  ;;  %v15986_v34 = vunpack.i.h.bf16 %v9703_v49  ;;  %v6880_v9 = vunpack.i.l.bf16 %v9714_v32  ;;  %v7282_v3 = vpack.i.bf16 %v1721_v37, %v1720_v57 }
 0x119   : > { %v9918_v2 = vpop.permute.xlu1 %7038  ;;  %v1535_v11 = vrot.slane %v619_v62, 6  ;;  %v465_v46 = vmul.f32 %v15987_v52, %v9562_v47  ;;  %v1270_v37 = vrot.slane %v453_v23, 6  ;;  %v787_v62 = vmul.f32 %v6870_v58, %v9467_v50 }
 0x11a   : > { %v783_v14 = vsel %vm782_vm6, %v6870_v58, %v15986_v34  ;;  %7283 = vrot.lane.b32.xlu1 %v7282_v3, %s9258_s24  ;;  %v6881_v34 = vunpack.i.h.bf16 %v9714_v32  ;;  %v811_v21 = vmul.f32 %v6880_v9, %v9467_v50  ;;  %v1785_v52 = vrot.slane %v776_v22, 2 }
 0x11b   : > { %v788_v57 = vmul.f32 %v783_v14, %v9477_v55  ;;  %v7087_v13 = vpack.i.bf16 %v1535_v11, %v1270_v37  ;;  %v9965_v3 = vmul.f32 %v9471_v53, %v9477_v55  ;;  %v9969_v23 = vmul.f32 %v9498_v1, %v9477_v55 }
 0x11c   : > { %7073 = vrot.lane.b32.xlu0 %v7072_v29, %s9262_s12  ;;  %v1786_v29 = vrot.slane %v777_v42, 2  ;;  %v7292_v42 = vpack.i.bf16 %v1752_v5, %v1751_v17  ;;  %v15988_v58 = vunpack.i.h.bf16 %v9545_v35  ;;  %v800_v5 = vmul.f32 %v795_v41, %v9477_v55 }
 0x11d   : > { %v9940_v54 = vpop.permute.xlu1 %7048  ;;  %v1286_v53 = vrot.slane %v465_v46, 4  ;;  %v1812_v1 = vrot.slane %v787_v62, 6  ;;  %v807_v17 = vsel %vm806_vm10, %v6880_v9, %v6881_v34  ;;  %v6891_v35 = vunpack.i.h.bf16 %v9722_v24 }
 0x11e   : > { %v477_v14 = vmul.f32 %v15988_v58, %v9562_v47  ;;  %7293 = vrot.lane.b32.xlu1 %v7292_v42, %s9269_s21  ;;  %v15487_v11 = vunpack.i.l.bf16 %v9815_v28  ;;  %v1813_v37 = vrot.slane %v788_v57, 6  ;;  %v1846_v58 = vrot.slane %v811_v21, 2 }
 0x11f   : > { %v7097_v41 = vpack.i.bf16 %v1552_v0, %v1286_v53  ;;  %v9993_v9 = vmul.f32 %v9484_v56, %v9562_v47  ;;  %v813_v0 = vmul.f32 %v6881_v34, %v9562_v47  ;;  %v15990_v56 = vunpack.i.l.bf16 %v9722_v24 }
 0x120   : > { %1259 = vrot.lane.b32.xlu0 %v439_v44, %s15491_s17  ;;  %v799_v44 = vmul.f32 %v6875_v12, %v9467_v50  ;;  %v7302_v12 = vpack.i.bf16 %v1786_v29, %v1785_v52  ;;  %v823_v29 = vmul.f32 %v15486_v8, %v9467_v50  ;;  %v1303_v62 = vrot.slane %v477_v14, 2  ;;  %s16001_s17 = smov 107  }
 0x121   : > { %v9957_v51 = vpop.permute.xlu1 %7058  ;;  %v831_v21 = vsel %vm15489_vm12, %v15990_v56, %v6891_v35  ;;  %v6901_v52 = vunpack.i.h.bf16 %v9732_v60  ;;  %v1003_v34 = vmul.f32 %v15487_v11, %v9467_v50  ;;  %v7312_v53 = vpack.i.bf16 %v1813_v37, %v1812_v1 }
 0x122   : > { %v1829_v46 = vrot.slane %v799_v44, 4  ;;  %7303 = vrot.lane.b32.xlu1 %v7302_v12, %s9251_s27  ;;  %v15488_v44 = vunpack.i.l.bf16 %v9803_v16  ;;  %v1830_v12 = vrot.slane %v800_v5, 4  ;;  %v7107_v14 = vpack.i.bf16 %v1846_v58, %v1303_v62 }
 0x123   : > { %v10020_v56 = vmul.f32 %v9504_v4, %v9562_v47  ;;  %v15991_v8 = vunpack.i.h.bf16 %v9538_v31  ;;  %v1848_v11 = vrot.slane %v813_v0, 2  ;;  %v836_v5 = vmul.f32 %v831_v21, %v9477_v55 }
 0x124   : > { %7088 = vrot.lane.b32.xlu0 %v7087_v13, %s9249_s18  ;;  %v9989_v13 = vmul.f32 %v9492_v61, %v9477_v55  ;;  %v812_v61 = vmul.f32 %v807_v17, %v9477_v55  ;;  %v10015_v17 = vmul.f32 %v9536_v30, %v9477_v55  ;;  %v837_v1 = vmul.f32 %v6891_v35, %v9562_v47 }
 0x125   : > { %v9980_v22 = vpop.permute.xlu1 %7068  ;;  %v489_v32 = vmul.f32 %v15991_v8, %v9562_v47  ;;  %v15993_v37 = vunpack.i.l.bf16 %v9732_v60  ;;  %v6910_v31 = vunpack.i.l.bf16 %v9741_v38  ;;  %v1015_v8 = vmul.f32 %v15488_v44, %v9467_v50 }
 0x126   : > { %7313 = vrot.lane.b32.xlu1 %v7312_v53, %s9249_s18  ;;  %v7322_v0 = vpack.i.bf16 %v1830_v12, %v1829_v46  ;;  %v1847_v35 = vrot.slane %v812_v61, 2  ;;  %v2147_v21 = vrot.slane %v1003_v34, 6  ;;  %v15995_v24 = vunpack.i.h.bf16 %v9564_v48 }
 0x127   : > { %v855_v4 = vsel %vm854_vm13, %v15993_v37, %v6901_v52  ;;  %v7117_v62 = vpack.i.bf16 %v823_v29, %v489_v32  ;;  %v6775_v37 = vunpack.i.l.bf16 %v9595_v20  ;;  %v1879_v58 = vrot.slane %v837_v1, 6 }
 0x128   : > { %7098 = vrot.lane.b32.xlu0 %v7097_v41, %s9263_s5  ;;  %v6770_v41 = vunpack.i.l.bf16 %v9599_v33  ;;  %v501_v42 = vmul.f32 %v15995_v24, %v9562_v47  ;;  %v860_v46 = vmul.f32 %v855_v4, %v9477_v55  ;;  %vm15504_vm6 = vcmask 261120  }
 0x129   : > { %v10001_v57 = vpop.permute.xlu1 %7078  ;;  %v15493_v32 = vunpack.i.h.bf16 %v9734_v7  ;;  %v6915_v29 = vunpack.i.l.bf16 %v9734_v7  ;;  %v15996_v61 = vunpack.i.h.bf16 %v9741_v38  ;;  %vm902_vm10 = vcmask 711680  }
 0x12a   : > { %15989 = vst [vmem:[#allocation52_spill] sm:$0xff] %v10001_v57  ;;  %7323 = vrot.lane.b32.xlu1 %v7322_v0, %s9263_s5  ;;  %vm15501_vm13 = vcmask 785408   ;;  %v7332_v34 = vpack.i.bf16 %v1848_v11, %v1847_v35  ;;  %v1878_v12 = vrot.slane %v836_v5, 6  ;;  %v15997_v24 = vrot.slane %v9562_v47, 6 }
 0x12b   : > { %v879_v48 = vsel %vm878_vm14, %v6910_v31, %v15996_v61  ;;  %v2164_v0 = vrot.slane %v1015_v8, 4  ;;  %v16000_v44 = vunpack.i.h.bf16 %v9599_v33  ;;  %v547_v5 = vmul.f32 %v6770_v41, %v9467_v50 }
 0x12c   : > { %7108 = vrot.lane.b32.xlu0 %v7107_v14, %s9264_s29  ;;  %v15994_v14 = vunpack.i.h.bf16 %v9551_v40  ;;  %v861_v40 = vmul.f32 %v6901_v52, %v9562_v47  ;;  %v7127_v1 = vpack.i.bf16 %v2147_v21, %v15997_v24  ;;  %v10063_v52 = vmul.f32 %v9514_v10, %v9477_v55 }
 0x12d   : > { %v10029_v30 = vpop.permute.xlu1 %7083  ;;  %v543_v11 = vsel %vm15504_vm6, %v6770_v41, %v16000_v44  ;;  %vm15527_vm14 = vcmask 277504   ;;  %v883_v35 = vmul.f32 %v6910_v31, %v9467_v50  ;;  %v1348_v10 = vrot.slane %v501_v42, 4 }
 0x12e   : > { %15992 = vst [vmem:[#allocation53_spill] sm:$0xff] %v10029_v30  ;;  %v513_v60 = vmul.f32 %v15994_v14, %v9562_v47  ;;  %v15999_v14 = vunpack.i.h.bf16 %v9595_v20  ;;  %7333 = vrot.lane.b32.xlu1 %v7332_v34, %s9264_s29  ;;  %v1131_v8 = vmul.f32 %v9549_v39, %v9477_v55  ;;  %v1913_v20 = vrot.slane %v861_v40, 2 }
 0x12f   : > { %v891_v33 = vsel %vm890_vm2, %v6915_v29, %v15493_v32  ;;  %v884_v44 = vmul.f32 %v879_v48, %v9477_v55  ;;  %v1912_v21 = vrot.slane %v860_v46, 2  ;;  %vm938_vm12 = vcmask 793600  }
 0x130   : > { %7118 = vrot.lane.b32.xlu0 %v7117_v62, %s9265_s30  ;;  %v555_v61 = vsel %vm15513_vm15, %v6775_v37, %v15999_v14  ;;  %v7342_v41 = vpack.i.bf16 %v1879_v58, %v1878_v12  ;;  %v7137_v24 = vpack.i.bf16 %v2164_v0, %v1348_v10  ;;  %v1365_v31 = vrot.slane %v513_v60, 2  ;;  %v16004_v0 = vld [vmem:[#allocation39_spill] sm:$0xff] }
 0x131   : > { %v10059_v4 = vpop.permute.xlu1 %7093  ;;  %v548_v34 = vmul.f32 %v543_v11, %v9477_v55  ;;  %v560_v42 = vmul.f32 %v555_v61, %v9477_v55  ;;  %v6785_v39 = vunpack.i.l.bf16 %v9602_v43  ;;  %v895_v14 = vmul.f32 %v6915_v29, %v9467_v50 }
 0x132   : > { %15998 = vst [vmem:[#allocation54_spill] sm:$0xff] %v10059_v4  ;;  %v896_v48 = vmul.f32 %v891_v33, %v9477_v55  ;;  %v1975_v46 = vrot.slane %v883_v35, 4  ;;  %7343 = vrot.lane.b32.xlu1 %v7342_v41, %s9245_s20  ;;  %v2451_v60 = vrot.slane %v1131_v8, 2  ;;  %v6930_v11 = vunpack.i.l.bf16 %v16004_v0  ;;  %v16005_v33 = vld [vmem:[#allocation16_spill] sm:$0xff] }
 0x133   : > { %v7352_v10 = vpack.i.bf16 %v1913_v20, %v1912_v21  ;;  %v1976_v32 = vrot.slane %v884_v44, 4  ;;  %v1424_v29 = vrot.slane %v547_v5, 4  ;;  %v1425_v62 = vrot.slane %v548_v34, 4  ;;  %v16009_v44 = vld [vmem:[#allocation19_spill] sm:$0xff]  ;;  %v16011_v34 = vld [vmem:[#allocation38_spill] sm:$0xff] }
 0x134   : > { %7128 = vrot.lane.b32.xlu0 %v7127_v1, %s9266_s23  ;;  %v559_v1 = vmul.f32 %v6775_v37, %v9467_v50  ;;  %v16003_v37 = vld [vmem:[#allocation37_spill] sm:$0xff]  ;;  %v7147_v53 = vpack.i.bf16 %v2451_v60, %v1365_v31  ;;  %v2417_v35 = vrot.slane %v10063_v52, 6  ;;  %v1126_v41 = vmul.f32 %v16005_v33, %v9562_v47  ;;  %v16014_v60 = vld [vmem:[#allocation28_spill] sm:$0xff] }
 0x135   : > { %v10091_v58 = vpop.permute.xlu1 %7103  ;;  %v6921_v12 = vunpack.i.h.bf16 %v16003_v37  ;;  %v16007_v8 = vunpack.i.h.bf16 %v9800_v63  ;;  %v16008_v61 = vunpack.i.h.bf16 %v9602_v43  ;;  %v1129_v5 = vmul.f32 %v16009_v44, %v9562_v47 }
 0x136   : > { %16002 = vst [vmem:[#allocation55_spill] sm:$0xff] %v10091_v58  ;;  %v1441_v4 = vrot.slane %v559_v1, 2  ;;  %v1992_v21 = vrot.slane %v895_v14, 2  ;;  %7353 = vrot.lane.b32.xlu1 %v7352_v10, %s9242_s8  ;;  %v16010_v52 = vunpack.i.l.bf16 %v16003_v37  ;;  %v6935_v1 = vunpack.i.l.bf16 %v16011_v34 }
 0x137   : > { %v981_v58 = vmul.f32 %v16007_v8, %v9562_v47  ;;  %v579_v20 = vsel %vm15529_vm7, %v6785_v39, %v16008_v61  ;;  %v16012_v43 = vunpack.i.h.bf16 %v16004_v0  ;;  %vm15534_vm2 = vcmask 809984  }
 0x138   : > { %7138 = vrot.lane.b32.xlu0 %v7137_v24, %s16001_s17  ;;  %v16006_v24 = vld [vmem:[#allocation26_spill] sm:$0xff]  ;;  %v903_v31 = vsel %vm902_vm10, %v16010_v52, %v6921_v12  ;;  %v7362_v33 = vpack.i.bf16 %v1976_v32, %v1975_v46  ;;  %v1993_v8 = vrot.slane %v896_v48, 2  ;;  %v7157_v10 = vpack.i.bf16 %v1425_v62, %v1424_v29 }
 0x139   : > { %v6780_v40 = vunpack.i.l.bf16 %v16006_v24  ;;  %v927_v61 = vsel %vm15501_vm13, %v6930_v11, %v16012_v43  ;;  %v10118_v14 = vpop.permute.xlu1 %7113  ;;  %v1442_v44 = vrot.slane %v560_v42, 2  ;;  %v16013_v37 = vunpack.i.h.bf16 %v16006_v24 }
 0x13a   : > { %v6790_v30 = vunpack.i.l.bf16 %v16014_v60  ;;  %v2118_v57 = vrot.slane %v981_v58, 2  ;;  %v2418_v16 = vrot.slane %v1126_v41, 6  ;;  %v584_v0 = vmul.f32 %v579_v20, %v9477_v55  ;;  %7363 = vrot.lane.b32.xlu1 %v7362_v33, %s9257_s26 }
 0x13b   : > { %v567_v52 = vsel %vm15527_vm14, %v6780_v40, %v16013_v37  ;;  %v908_v43 = vmul.f32 %v903_v31, %v9477_v55  ;;  %v909_v32 = vmul.f32 %v6921_v12, %v9562_v47  ;;  %vm602_vm10 = vcmask 310272  }
 0x13c   : > { %7148 = vrot.lane.b32.xlu0 %v7147_v53, %s9268_s22  ;;  %v583_v53 = vmul.f32 %v6785_v39, %v9467_v50  ;;  %vm614_vm13 = vcmask 318464   ;;  %v16015_v62 = vunpack.i.h.bf16 %v16011_v34  ;;  %v931_v39 = vmul.f32 %v6930_v11, %v9467_v50 }
 0x13d   : > { %v932_v48 = vmul.f32 %v927_v61, %v9477_v55  ;;  %v15518_v46 = vrot.slane %v9477_v55, 2  ;;  %v571_v58 = vmul.f32 %v6780_v40, %v9467_v50  ;;  %v572_v12 = vmul.f32 %v567_v52, %v9477_v55 }
 0x13e   : > { %v939_v42 = vsel %vm938_vm12, %v6935_v1, %v16015_v62  ;;  %v7372_v29 = vpack.i.bf16 %v1993_v8, %v1992_v21  ;;  %v7162_v41 = vpack.i.bf16 %v1442_v44, %v1441_v4  ;;  %v1472_v24 = vrot.slane %v583_v53, 6  ;;  %v16018_v62 = vld [vmem:[#allocation40_spill] sm:$0xff]  ;;  %v10150_v4 = vpop.permute.xlu1 %7123 }
 0x13f   : > { %v2435_v20 = vrot.slane %v1129_v5, 4  ;;  %v16016_v31 = vunpack.i.h.bf16 %v16014_v60  ;;  %v943_v11 = vmul.f32 %v6935_v1, %v9467_v50  ;;  %v944_v61 = vmul.f32 %v939_v42, %v9477_v55 }
 0x140   : > { %7158 = vrot.lane.b32.xlu0 %v7157_v10, %s9255_s9  ;;  %v16017_v10 = vrot.slane %v9969_v23, 2  ;;  %v6946_v40 = vunpack.i.h.bf16 %v16018_v62  ;;  %v15510_v52 = vunpack.i.l.bf16 %v16018_v62  ;;  %7373 = vrot.lane.b32.xlu1 %v7372_v29, %s9258_s24  ;;  %v2040_v5 = vrot.slane %v931_v39, 4  ;;  %s16251_s9 = smov 48  }
 0x141   : > { %v591_v33 = vsel %vm590_vm0, %v6790_v30, %v16016_v31  ;;  %v7382_v21 = vpack.i.bf16 %v909_v32, %v908_v43  ;;  %v2041_v60 = vrot.slane %v932_v48, 4  ;;  %v16019_v23 = vrot.slane %v9562_v47, 2  ;;  %v16026_v32 = vld [vmem:[#allocation41_spill] sm:$0xff] }
 0x142   : > { %v10143_v37 = vpack.i.bf16 %v16017_v10, %v2118_v57  ;;  %v7167_v1 = vpack.i.bf16 %v572_v12, %v571_v58  ;;  %v1473_v8 = vrot.slane %v584_v0, 6  ;;  %v16020_v44 = vrot.slane %v9965_v3, 6  ;;  %v16030_v3 = vld [vmem:[#allocation27_spill] sm:$0xff] }
 0x143   : > { %v10157_v57 = vpack.i.bf16 %v16019_v23, %v15518_v46  ;;  %v16021_v53 = vrot.slane %v9993_v9, 6  ;;  %v16023_v29 = vrot.slane %v9989_v13, 4  ;;  %v16024_v39 = vrot.slane %v10020_v56, 4 }
 0x144   : > { %7163 = vrot.lane.b32.xlu0 %v7162_v41, %s9252_s14  ;;  %v15506_v48 = vunpack.i.h.bf16 %v16026_v32  ;;  %v6940_v41 = vunpack.i.l.bf16 %v16026_v32  ;;  %v10173_v31 = vpack.i.bf16 %v2418_v16, %v2417_v35  ;;  %v16028_v0 = vrot.slane %v10015_v17, 4  ;;  %7383 = vrot.lane.b32.xlu1 %v7382_v21, %s9259_s25  ;;  %s16031_s14 = smov 117   ;;  %v10188_v35 = vpop.permute.xlu1 %7133 }
 0x145   : > { %v10163_v42 = vpack.i.bf16 %v16021_v53, %v16020_v44  ;;  %v10169_v43 = vpack.i.bf16 %v16024_v39, %v16023_v29  ;;  %v6795_v9 = vunpack.i.l.bf16 %v16030_v3  ;;  %v595_v12 = vmul.f32 %v6790_v30, %v9467_v50 }
 0x146   : > { %16027 = vst [vmem:[#allocation26_spill] sm:$0xff] %v10173_v31  ;;  %v10177_v58 = vpack.i.bf16 %v2435_v20, %v16028_v0  ;;  %v6801_v13 = vunpack.i.h.bf16 %v9636_v27  ;;  %vm950_vm0 = vcmask 801792   ;;  %v596_v56 = vmul.f32 %v591_v33, %v9477_v55 }
 0x147   : > { %16022 = vst [vmem:[#allocation37_spill] sm:$0xff] %v10163_v42  ;;  %16025 = vst [vmem:[#allocation16_spill] sm:$0xff] %v10169_v43  ;;  %v2057_v10 = vrot.slane %v943_v11, 2  ;;  %v963_v16 = vsel %vm15534_vm2, %v15510_v52, %v6946_v40  ;;  %v7392_v17 = vpack.i.bf16 %v2041_v60, %v2040_v5  ;;  %v2058_v20 = vrot.slane %v944_v61, 2 }
 0x148   : > { %16029 = vst [vmem:[#allocation19_spill] sm:$0xff] %v10177_v58  ;;  %7168 = vrot.lane.b32.xlu0 %v7167_v1, %s16031_s14  ;;  %v7177_v23 = vpack.i.bf16 %v1473_v8, %v1472_v24  ;;  %v15509_v30 = vrot.slane %v9467_v50, 4  ;;  %v15505_v44 = vrot.slane %v9477_v55, 4  ;;  %vm15508_vm12 = vcmask 392192   ;;  %v16071_v58 = vld [vmem:[#allocation51_spill] sm:$0xff] }
 0x149   : > { %v951_v21 = vsel %vm950_vm0, %v6940_v41, %v15506_v48  ;;  %v6950_v33 = vunpack.i.l.bf16 %v9800_v63  ;;  %v16032_v11 = vunpack.i.h.bf16 %v16030_v3  ;;  %v1504_v5 = vrot.slane %v595_v12, 2  ;;  %7393 = vrot.lane.b32.xlu1 %v7392_v17, %s9250_s7 }
 0x14a   : > { %v16033_v60 = vunpack.i.l.bf16 %v9636_v27  ;;  %vm15537_vm6 = vcmask 826368   ;;  %v6810_v61 = vunpack.i.l.bf16 %v9644_v6  ;;  %v969_v8 = vmul.f32 %v6946_v40, %v9562_v47 }
 0x14b   : > { %v603_v1 = vsel %vm602_vm10, %v6795_v9, %v16032_v11  ;;  %v968_v53 = vmul.f32 %v963_v16, %v9477_v55  ;;  %v955_v29 = vmul.f32 %v6940_v41, %v9467_v50  ;;  %v956_v39 = vmul.f32 %v951_v21, %v9477_v55 }
 0x14c   : > { %v615_v24 = vsel %vm614_vm13, %v16033_v60, %v6801_v13  ;;  %7178 = vrot.lane.b32.xlu0 %v7177_v23, %s9269_s21  ;;  %v7397_v0 = vpack.i.bf16 %v2058_v20, %v2057_v10  ;;  %v7187_v27 = vpack.i.bf16 %v15505_v44, %v15509_v30  ;;  %v1505_v3 = vrot.slane %v596_v56, 2  ;;  %v16035_v10 = vld [vmem:[#allocation42_spill] sm:$0xff]  ;;  %v10222_v56 = vpop.permute.xlu1 %7143  ;;  %s16054_s21 = smov 123  }
 0x14d   : > { %v607_v12 = vmul.f32 %v6795_v9, %v9467_v50  ;;  %v621_v17 = vmul.f32 %v6801_v13, %v9562_v47  ;;  %v16034_v23 = vunpack.i.h.bf16 %v9800_v63  ;;  %vm15530_vm13 = vcmask 842752  }
 0x14e   : > { %v608_v41 = vmul.f32 %v603_v1, %v9477_v55  ;;  %v620_v16 = vmul.f32 %v615_v24, %v9477_v55  ;;  %v15507_v20 = vunpack.i.h.bf16 %v16035_v10  ;;  %v6955_v21 = vunpack.i.l.bf16 %v16035_v10  ;;  %7398 = vrot.lane.b32.xlu1 %v7397_v0, %s9251_s27 }
 0x14f   : > { %v975_v40 = vsel %vm15537_vm6, %v6950_v33, %v16034_v23  ;;  %v16036_v9 = vunpack.i.h.bf16 %v9644_v6  ;;  %v2090_v13 = vrot.slane %v969_v8, 6  ;;  %v979_v11 = vmul.f32 %v6950_v33, %v9467_v50 }
 0x150   : > { %7188 = vrot.lane.b32.xlu0 %v7187_v27, %s9250_s7  ;;  %v6961_v1 = vunpack.i.h.bf16 %v9815_v28  ;;  %v980_v60 = vmul.f32 %v975_v40, %v9477_v55  ;;  %v7402_v24 = vpack.i.bf16 %v956_v39, %v955_v29  ;;  %v2089_v23 = vrot.slane %v968_v53, 6 }
 0x151   : > { %v639_v63 = vsel %vm15508_vm12, %v6810_v61, %v16036_v9  ;;  %v7197_v44 = vpack.i.bf16 %v1505_v3, %v1504_v5  ;;  %v1537_v48 = vrot.slane %v621_v17, 6  ;;  %v6815_v0 = vunpack.i.l.bf16 %v9638_v59  ;;  %v10245_v3 = vpop.permute.xlu1 %7153 }
 0x152   : > { %vm662_vm10 = vcmask 408576   ;;  %vm1022_vm0 = vcmask 916480   ;;  %v643_v27 = vmul.f32 %v6810_v61, %v9467_v50  ;;  %v644_v6 = vmul.f32 %v639_v63, %v9477_v55  ;;  %7403 = vrot.lane.b32.xlu1 %v7402_v24, %s15719_s6 }
 0x153   : > { %v6820_v8 = vunpack.i.l.bf16 %v9652_v36  ;;  %v987_v33 = vsel %vm15535_vm5, %v6955_v21, %v15507_v20  ;;  %v2116_v5 = vrot.slane %v979_v11, 2  ;;  %v16037_v53 = vunpack.i.l.bf16 %v9815_v28 }
 0x154   : > { %7198 = vrot.lane.b32.xlu0 %v7197_v44, %s9251_s27  ;;  %v15515_v39 = vunpack.i.h.bf16 %v9827_v45  ;;  %v6970_v61 = vunpack.i.l.bf16 %v9827_v45  ;;  %v7412_v17 = vpack.i.bf16 %v2090_v13, %v2089_v23  ;;  %v2117_v40 = vrot.slane %v980_v60, 2 }
 0x155   : > { %v999_v29 = vsel %vm15530_vm13, %v16037_v53, %v6961_v1  ;;  %v7207_v9 = vpack.i.bf16 %v608_v41, %v607_v12  ;;  %v1536_v63 = vrot.slane %v620_v16, 6  ;;  %v16038_v20 = vunpack.i.h.bf16 %v9638_v59 }
 0x156   : > { %vm15512_vm12 = vcmask 416768   ;;  %v6825_v44 = vunpack.i.l.bf16 %v9649_v18  ;;  %v1569_v28 = vrot.slane %v643_v27, 2  ;;  %v16039_v11 = vunpack.i.h.bf16 %v9652_v36  ;;  %7413 = vrot.lane.b32.xlu1 %v7412_v17, %s9249_s18 }
 0x157   : > { %v651_v24 = vsel %vm15511_vm4, %v6815_v0, %v16038_v20  ;;  %v991_v30 = vmul.f32 %v6955_v21, %v9467_v50  ;;  %v1005_v52 = vmul.f32 %v6961_v1, %v9562_v47  ;;  %v992_v59 = vmul.f32 %v987_v33, %v9477_v55  ;;  %v10265_v20 = vpop.permute.xlu1 %1431 }
 0x158   : > { %v663_v53 = vsel %vm662_vm10, %v6820_v8, %v16039_v11  ;;  %7208 = vrot.lane.b32.xlu0 %v7207_v9, %s15719_s6  ;;  %v1004_v12 = vmul.f32 %v999_v29, %v9477_v55  ;;  %v1023_v41 = vsel %vm1022_vm0, %v6970_v61, %v15515_v39  ;;  %v15514_v36 = vunpack.i.h.bf16 %v9835_v26 }
 0x159   : > { %v6980_v16 = vunpack.i.l.bf16 %v9835_v26  ;;  %v7422_v21 = vpack.i.bf16 %v2117_v40, %v2116_v5  ;;  %v7217_v13 = vpack.i.bf16 %v1537_v48, %v1536_v63  ;;  %v1570_v1 = vrot.slane %v644_v6, 2  ;;  %v16041_v6 = vld [vmem:[#allocation45_spill] sm:$0xff] }
 0x15a   : > { %v655_v60 = vmul.f32 %v6815_v0, %v9467_v50  ;;  %v656_v23 = vmul.f32 %v651_v24, %v9477_v55  ;;  %vm1058_vm10 = vcmask 941056   ;;  %vm15550_vm4 = vcmask 932864  }
 0x15b   : > { %v16040_v27 = vunpack.i.h.bf16 %v9649_v18  ;;  %v667_v29 = vmul.f32 %v6820_v8, %v9467_v50  ;;  %v668_v17 = vmul.f32 %v663_v53, %v9477_v55  ;;  %v2149_v9 = vrot.slane %v1005_v52, 6  ;;  %7423 = vrot.lane.b32.xlu1 %v7422_v21, %s9264_s29  ;;  %v10283_v8 = vpop.permute.xlu1 %1448  ;;  %v16042_v53 = vld [vmem:[#allocation29_spill] sm:$0xff] }
 0x15c   : > { %7218 = vrot.lane.b32.xlu0 %v7217_v13, %s9249_s18  ;;  %v1027_v48 = vmul.f32 %v6970_v61, %v9467_v50  ;;  %v1028_v0 = vmul.f32 %v1023_v41, %v9477_v55  ;;  %v6986_v5 = vunpack.i.h.bf16 %v16041_v6  ;;  %v15517_v40 = vunpack.i.l.bf16 %v16041_v6 }
 0x15d   : > { %v675_v33 = vsel %vm15512_vm12, %v6825_v44, %v16040_v27  ;;  %v1047_v18 = vsel %vm15550_vm4, %v6980_v16, %v15514_v36  ;;  %v7432_v63 = vpack.i.bf16 %v992_v59, %v991_v30  ;;  %v2148_v52 = vrot.slane %v1004_v12, 6 }
 0x15e   : > { %v7227_v24 = vpack.i.bf16 %v1570_v1, %v1569_v28  ;;  %v679_v11 = vmul.f32 %v6825_v44, %v9467_v50  ;;  %v6835_v21 = vunpack.i.l.bf16 %v16042_v53  ;;  %v680_v61 = vmul.f32 %v675_v33, %v9477_v55 }
 0x15f   : > { %v1600_v41 = vrot.slane %v667_v29, 6  ;;  %vm698_vm12 = vcmask 441344   ;;  %vm710_vm15 = vcmask 449536   ;;  %7433 = vrot.lane.b32.xlu1 %v7432_v63, %s9265_s30  ;;  %v2181_v13 = vrot.slane %v1027_v48, 2  ;;  %v16044_v63 = vld [vmem:[#allocation31_spill] sm:$0xff]  ;;  %v10298_v48 = vpop.permute.xlu1 %7173 }
 0x160   : > { %7228 = vrot.lane.b32.xlu0 %v7227_v24, %s9247_s28  ;;  %v1059_v30 = vsel %vm1058_vm10, %v15517_v40, %v6986_v5  ;;  %v1051_v28 = vmul.f32 %v6980_v16, %v9467_v50  ;;  %v1052_v44 = vmul.f32 %v1047_v18, %v9477_v55  ;;  %v7442_v59 = vpack.i.bf16 %v2149_v9, %v2148_v52  ;;  %v16045_v16 = vld [vmem:[#allocation47_spill] sm:$0xff]  ;;  %s16244_s28 = smov 16  }
 0x161   : > { %v2182_v12 = vrot.slane %v1028_v0, 2  ;;  %v7232_v1 = vpack.i.bf16 %v656_v23, %v655_v60  ;;  %v1601_v27 = vrot.slane %v668_v17, 6  ;;  %v1617_v33 = vrot.slane %v679_v11, 4  ;;  %v16046_v23 = vld [vmem:[#allocation46_spill] sm:$0xff] }
 0x162   : > { %v16043_v29 = vunpack.i.h.bf16 %v16042_v53  ;;  %v6841_v39 = vunpack.i.h.bf16 %v16044_v63  ;;  %v1065_v24 = vmul.f32 %v6986_v5, %v9562_v47  ;;  %v1064_v40 = vmul.f32 %v1059_v30, %v9477_v55 }
 0x163   : > { %v15522_v46 = vunpack.i.h.bf16 %v16045_v16  ;;  %v6995_v9 = vunpack.i.l.bf16 %v16045_v16  ;;  %7443 = vrot.lane.b32.xlu1 %v7442_v59, %s9266_s23  ;;  %v2234_v60 = vrot.slane %v1051_v28, 6  ;;  %v15521_v17 = vunpack.i.h.bf16 %v16046_v23 }
 0x164   : > { %v699_v36 = vsel %vm698_vm12, %v6835_v21, %v16043_v29  ;;  %7233 = vrot.lane.b32.xlu0 %v7232_v1, %s9244_s19  ;;  %v6990_v0 = vunpack.i.l.bf16 %v16046_v23  ;;  %v7452_v18 = vpack.i.bf16 %v2182_v12, %v2181_v13  ;;  %v2235_v52 = vrot.slane %v1052_v44, 6  ;;  %s16241_s19 = smov 3  }
 0x165   : > { %v7237_v11 = vpack.i.bf16 %v1601_v27, %v1600_v41  ;;  %v1618_v5 = vrot.slane %v680_v61, 4  ;;  %v703_v53 = vmul.f32 %v6835_v21, %v9467_v50  ;;  %v704_v30 = vmul.f32 %v699_v36, %v9477_v55  ;;  %v10322_v36 = vpop.permute.xlu1 %7183 }
 0x166   : > { %v16047_v29 = vunpack.i.l.bf16 %v16044_v63  ;;  %v2253_v28 = vrot.slane %v1065_v24, 4  ;;  %v1083_v13 = vsel %vm1082_vm11, %v6995_v9, %v15522_v46  ;;  %v1071_v61 = vsel %vm1070_vm9, %v6990_v0, %v15521_v17 }
 0x167   : > { %7453 = vrot.lane.b32.xlu1 %v7452_v18, %s9242_s8  ;;  %v7001_v21 = vunpack.i.h.bf16 %v9857_v25  ;;  %v7457_v41 = vpack.i.bf16 %v2235_v52, %v2234_v60  ;;  %v2252_v44 = vrot.slane %v1064_v40, 4  ;;  %v7247_v12 = vpack.i.bf16 %v1618_v5, %v1617_v33  ;;  %v16048_v18 = vld [vmem:[#allocation32_spill] sm:$0xff] }
 0x168   : > { %v711_v59 = vsel %vm710_vm15, %v16047_v29, %v6841_v39  ;;  %7238 = vrot.lane.b32.xlu0 %v7237_v11, %s9245_s20  ;;  %v15523_v1 = vrot.slane %v9467_v50, 2  ;;  %v1685_v27 = vrot.slane %v703_v53, 6  ;;  %vm15524_vm15 = vcmask 523264   ;;  %v16049_v29 = vld [vmem:[#allocation33_spill] sm:$0xff]  ;;  %s9275_s20 = smov 4  }
 0x169   : > { %vm758_vm12 = vcmask 539648   ;;  %v716_v63 = vmul.f32 %v711_v59, %v9477_v55  ;;  %v717_v24 = vmul.f32 %v6841_v39, %v9562_v47  ;;  %v6851_v11 = vunpack.i.h.bf16 %v16048_v18 }
 0x16a   : > { %v6861_v17 = vunpack.i.h.bf16 %v16049_v29  ;;  %v1087_v40 = vmul.f32 %v6995_v9, %v9467_v50  ;;  %v1088_v33 = vmul.f32 %v1083_v13, %v9477_v55  ;;  %v1075_v60 = vmul.f32 %v6990_v0, %v9467_v50 }
 0x16b   : > { %7458 = vrot.lane.b32.xlu1 %v7457_v41, %s9256_s10  ;;  %v1076_v52 = vmul.f32 %v1071_v61, %v9477_v55  ;;  %v16050_v5 = vunpack.i.l.bf16 %v9857_v25  ;;  %v7462_v53 = vpack.i.bf16 %v2253_v28, %v2252_v44  ;;  %v16051_v59 = vrot.slane %v9477_v55, 2 }
 0x16c   : > { %7248 = vrot.lane.b32.xlu0 %v7247_v12, %s9270_s13  ;;  %v1686_v46 = vrot.slane %v704_v30, 6  ;;  %v10342_v12 = vpop.permute.xlu1 %7193  ;;  %v1704_v9 = vrot.slane %v717_v24, 4  ;;  %v16052_v13 = vunpack.i.l.bf16 %v16048_v18  ;;  %v16053_v25 = vunpack.i.l.bf16 %v16049_v29 }
 0x16d   : > { %v1095_v39 = vsel %vm1094_vm8, %v16050_v5, %v7001_v21  ;;  %v7257_v41 = vpack.i.bf16 %v16051_v59, %v15523_v1  ;;  %v2293_v61 = vrot.slane %v1087_v40, 6  ;;  %v1101_v30 = vmul.f32 %v7001_v21, %v9562_v47  ;;  %v10354_v5 = vpop.permute.xlu0 %7008 }
 0x16e   : > { %v735_v0 = vsel %vm15524_vm15, %v16052_v13, %v6851_v11  ;;  %v759_v28 = vsel %vm758_vm12, %v16053_v25, %v6861_v17  ;;  %v1100_v44 = vmul.f32 %v1095_v39, %v9477_v55  ;;  %v7472_v24 = vpack.i.bf16 %v1076_v52, %v1075_v60 }
 0x16f   : > { %7463 = vrot.lane.b32.xlu1 %v7462_v53, %s9257_s26  ;;  %v2294_v59 = vrot.slane %v1088_v33, 6  ;;  %v7267_v18 = vpack.i.bf16 %v1686_v46, %v1685_v27  ;;  %v1703_v1 = vrot.slane %v716_v63, 4  ;;  %v740_v53 = vmul.f32 %v735_v0, %v9477_v55 }
 0x170   : > { %7258 = vrot.lane.b32.xlu0 %v7257_v41, %s9242_s8  ;;  %v741_v29 = vmul.f32 %v6851_v11, %v9562_v47  ;;  %v764_v40 = vmul.f32 %v759_v28, %v9477_v55  ;;  %v765_v39 = vmul.f32 %v6861_v17, %v9562_v47  ;;  %v10362_v41 = vpop.permute.xlu1 %7203  ;;  %v2312_v21 = vrot.slane %v1101_v30, 4 }
 0x171   : > { %v10364_v13 = vpop.permute.xlu0 %7013  ;;  %v7477_v33 = vpack.i.bf16 %v2294_v59, %v2293_v61  ;;  %v2311_v46 = vrot.slane %v1100_v44, 4  ;;  %v7277_v27 = vpack.i.bf16 %v1704_v9, %v1703_v1  ;;  %v16055_v11 = vunpack.i.h.bf16 %v9695_v15  ;;  %v16057_v1 = vld [vmem:[#allocation34_spill] sm:$0xff] }
 0x172   : > { %v1769_v63 = vrot.slane %v765_v39, 4  ;;  %v6886_v17 = vunpack.i.h.bf16 %v9705_v19  ;;  %v16056_v52 = vunpack.i.h.bf16 %v9703_v49  ;;  %v7287_v28 = vpack.i.bf16 %v741_v29, %v740_v53  ;;  %v16061_v53 = vld [vmem:[#allocation9_spill] sm:$0xff]  ;;  %v16062_v29 = vld [vmem:[#allocation10_spill] sm:$0xff] }
 0x173   : > { %7473 = vrot.lane.b32.xlu1 %v7472_v24, %s9259_s25  ;;  %v10371_v60 = vmul.f32 %v16055_v11, %v9562_v47  ;;  %v7482_v25 = vpack.i.bf16 %v2312_v21, %v2311_v46  ;;  %v1768_v61 = vrot.slane %v764_v40, 4  ;;  %v6896_v9 = vunpack.i.h.bf16 %v16057_v1 }
 0x174   : > { %7268 = vrot.lane.b32.xlu0 %v7267_v18, %s9256_s10  ;;  %v789_v0 = vmul.f32 %v16056_v52, %v9562_v47  ;;  %v16058_v44 = vunpack.i.l.bf16 %v16018_v62  ;;  %v10381_v24 = vpop.permute.xlu1 %7213  ;;  %vm818_vm12 = vcmask 588800   ;;  %vm842_vm15 = vcmask 662528   ;;  %v16065_v52 = vld [vmem:[#allocation49_spill] sm:$0xff] }
 0x175   : > { %16059 = vst [vmem:[#allocation38_spill] sm:$0xff] %v10381_v24  ;;  %v10383_v15 = vpop.permute.xlu0 %7033  ;;  %v1831_v49 = vrot.slane %v10371_v60, 4  ;;  %v10389_v59 = vmul.f32 %v6886_v17, %v9562_v47  ;;  %v1115_v62 = vmul.f32 %v16061_v53, %v9562_v47  ;;  %v1118_v40 = vmul.f32 0.0, %v16062_v29 }
 0x176   : > { %v967_v30 = vmul.f32 %v16058_v44, %v9467_v50  ;;  %16060 = vst [vmem:[#allocation28_spill] sm:$0xff] %v10383_v15  ;;  %v1814_v18 = vrot.slane %v789_v0, 6  ;;  %v7297_v39 = vpack.i.bf16 %v1769_v63, %v1768_v61  ;;  %v16063_v21 = vunpack.i.l.bf16 %v9705_v19  ;;  %v16068_v44 = vld [vmem:[#allocation12_spill] sm:$0xff] }
 0x177   : > { %7478 = vrot.lane.b32.xlu1 %v7477_v33, %s16054_s21  ;;  %v10397_v46 = vmul.f32 %v6896_v9, %v9562_v47  ;;  %v7020_v0 = vunpack.i.l.bf16 %v16065_v52  ;;  %v7040_v63 = vunpack.i.l.bf16 %v9918_v2  ;;  %v7050_v61 = vunpack.i.l.bf16 %v9940_v54 }
 0x178   : > { %7278 = vrot.lane.b32.xlu0 %v7277_v27, %s9257_s26  ;;  %v819_v33 = vsel %vm818_vm12, %v16063_v21, %v6886_v17  ;;  %v16064_v27 = vunpack.i.l.bf16 %v16057_v1  ;;  %v2088_v60 = vrot.slane %v967_v30, 6  ;;  %v7051_v17 = vunpack.i.h.bf16 %v9940_v54  ;;  %v10411_v1 = vpop.permute.xlu1 %7223 }
 0x179   : > { %16067 = vst [vmem:[#allocation41_spill] sm:$0xff] %v10411_v1  ;;  %v1121_v30 = vmul.f32 0.0, %v16068_v44  ;;  %v7307_v29 = vpack.i.bf16 %v9562_v47, %v9477_v55  ;;  %v16069_v54 = vunpack.i.l.bf16 %v16041_v6  ;;  %v7010_v31 = vunpack.i.l.bf16 %v10354_v5 }
 0x17a   : > { %v843_v11 = vsel %vm842_vm15, %v16064_v27, %v6896_v9  ;;  %vm15544_vm15 = vcmask 1006592   ;;  %v2356_v9 = vrot.slane %v1118_v40, 6  ;;  %vm1377_vm12 = vcmask 1041408  }
 0x17b   : > { %7483 = vrot.lane.b32.xlu1 %v7482_v25, %s9261_s11  ;;  %v7021_v25 = vunpack.i.h.bf16 %v16065_v52  ;;  %v10421_v21 = vmul.f32 %v843_v11, %v9477_v55  ;;  %v10426_v27 = vmul.f32 %v16069_v54, %v9467_v50  ;;  %v16070_v52 = vld [vmem:[#allocation50_spill] sm:$0xff]  ;;  %v7030_v11 = vunpack.i.l.bf16 %v16071_v58  ;;  %s9271_s11 = smov 105  }
 0x17c   : > { %7288 = vrot.lane.b32.xlu0 %v7287_v28, %s16031_s14  ;;  %v10403_v28 = vpop.permute.xlu0 %7043  ;;  %v7026_v44 = vunpack.i.h.bf16 %v16070_v52  ;;  %v7025_v19 = vunpack.i.l.bf16 %v16070_v52  ;;  %v1214_v54 = vsel %vm15544_vm15, %v7050_v61, %v7051_v17  ;;  %v7060_v52 = vunpack.i.l.bf16 %v9957_v51  ;;  %v10448_v24 = vpop.permute.xlu1 %1576  ;;  %s16247_s14 = smov 19  }
 0x17d   : > { %16066 = vst [vmem:[#allocation40_spill] sm:$0xff] %v10403_v28  ;;  %v10429_v40 = vsel %vm1149_vm3, %v7020_v0, %v7021_v25  ;;  %v7061_v0 = vunpack.i.h.bf16 %v9957_v51  ;;  %v2373_v42 = vrot.slane %v1121_v30, 4  ;;  %vm1380_vm14 = vcmask 1043456   ;;  %16074 = vst [vmem:[#allocation42_spill] sm:$0xff] %v10448_v24  ;;  %v16076_v51 = vld [vmem:[#allocation14_spill] sm:$0xff]  ;;  %v16078_v30 = vld [vmem:[#allocation17_spill] sm:$0xff] }
 0x17e   : > { %vm1383_vm7 = vcmask 1045504   ;;  %vm15547_vm13 = vcmask 1022976   ;;  %v1130_v1 = vmul.f32 0.0, %v16078_v30  ;;  %v341_v24 = vmul.f32 %v16061_v53, %v9477_v55 }
 0x17f   : > { %2345 = vrot.lane.b32.xlu1 %v1115_v62, %s15719_s6  ;;  %v10417_v62 = vmul.f32 %v819_v33, %v9477_v55  ;;  %v7031_v33 = vunpack.i.h.bf16 %v16071_v58  ;;  %v7070_v58 = vunpack.i.l.bf16 %v9980_v22  ;;  %vm15546_vm2 = vcmask 1031168  }
 0x180   : > { %7298 = vrot.lane.b32.xlu0 %v7297_v39, %s9250_s7  ;;  %v16072_v39 = vunpack.i.h.bf16 %v9918_v2  ;;  %v10444_v43 = vpop.permute.xlu0 %7053  ;;  %vm15543_vm5 = vcmask 998400   ;;  %vm15542_vm6 = vcmask 990208   ;;  %v10475_v30 = vpop.permute.xlu1 %1590  ;;  %vm15566_vm4 = vcmask 867328  }
 0x181   : > { %16073 = vst [vmem:[#allocation27_spill] sm:$0xff] %v10444_v43  ;;  %v7337_v53 = vpack.i.bf16 %v10389_v59, %v10417_v62  ;;  %16081 = vst [vmem:[#allocation29_spill] sm:$0xff] %v10475_v30  ;;  %v1184_v62 = vsel %vm15547_vm13, %v7030_v11, %v7031_v33 }
 0x182   : > { %v1197_v6 = vsel %vm15545_vm1, %v7040_v63, %v16072_v39  ;;  %v16075_v63 = vmov 0.0   ;;  %v1127_v39 = vmul.f32 0.0, %v16076_v51  ;;  %v7045_v51 = vunpack.i.l.bf16 %v10403_v28 }
 0x183   : > { %2361 = vrot.lane.b32.xlu1 %v2356_v9, %s9249_s18  ;;  %v7317_v9 = vpack.i.bf16 %v2088_v60, %v1814_v18  ;;  %v7507_v61 = vpack.i.bf16 %v16075_v63, %v9562_v47  ;;  %v7055_v18 = vunpack.i.l.bf16 %v10444_v43  ;;  %v16077_v60 = vrot.slane %v9467_v50, 4 }
 0x184   : > { %7308 = vrot.lane.b32.xlu0 %v7307_v29, %s15719_s6  ;;  %v7071_v29 = vunpack.i.h.bf16 %v9980_v22  ;;  %v1151_v63 = vsel %vm1149_vm3, %v7021_v25, %v7010_v31  ;;  %v16080_v31 = vld [vmem:[#allocation8_spill] sm:$0xff] }
 0x185   : > { %v7327_v22 = vpack.i.bf16 %v16077_v60, %v1831_v49  ;;  %v2419_v49 = vrot.slane %v1127_v39, 6  ;;  %v1895_v60 = vrot.slane %v10421_v21, 4  ;;  %v340_v25 = vmul.f32 %v16080_v31, %v9467_v50 }
 0x186   : > { %v1215_v28 = vsel %vm15544_vm15, %v7051_v17, %v7055_v18  ;;  %v1248_v21 = vsel %vm15542_vm6, %v7070_v58, %v7071_v29  ;;  %vm1293_vm15 = vcmask 908288  }
 0x187   : > { %2378 = vrot.lane.b32.xlu1 %v2373_v42, %s9263_s5  ;;  %v7015_v42 = vunpack.i.l.bf16 %v10364_v13 }
 0x188   : > { %7318 = vrot.lane.b32.xlu0 %v7317_v9, %s9249_s18  ;;  %v7035_v9 = vunpack.i.l.bf16 %v10383_v15  ;;  %v1167_v15 = vsel %vm15546_vm2, %v7025_v19, %v7026_v44 }
 0x18a   : > { %v10462_v23 = vpop.permute.xlu0 %7063  ;;  %v1185_v17 = vsel %vm15547_vm13, %v7031_v33, %v7035_v9  ;;  %vm1310_vm13 = vcmask 900096  }
 0x18b   : > { %16079 = vst [vmem:[#allocation45_spill] sm:$0xff] %v10462_v23  ;;  %v7065_v43 = vunpack.i.l.bf16 %v10462_v23  ;;  %7508 = vrot.lane.b32.xlu1 %v7507_v61, %s9265_s30  ;;  %v1379_v23 = vsel %vm1377_vm12, %v341_v24, %v1151_v63  ;;  %v1231_v61 = vsel %vm15543_vm5, %v7060_v52, %v7061_v0  ;;  %v16083_v24 = vunpack.i.h.bf16 %v9918_v2 }
 0x18c   : > { %7328 = vrot.lane.b32.xlu0 %v7327_v22, %s9263_s5  ;;  %v1168_v22 = vsel %vm15546_vm2, %v7026_v44, %v7015_v42  ;;  %v1386_v52 = vsel %vm1377_vm12, %v1197_v6, %v1214_v54  ;;  %v2436_v63 = vrot.slane %v1130_v1, 4  ;;  %v1378_v44 = vsel %vm1377_vm12, %v340_v25, %v10429_v40  ;;  %v16085_v42 = vld [vmem:[#allocation36_spill] sm:$0xff] }
 0x18d   : > { %v1232_v59 = vsel %vm15543_vm5, %v7061_v0, %v7065_v43  ;;  %v1198_v19 = vsel %vm15545_vm1, %v16083_v24, %v7045_v51  ;;  %v1388_v11 = vsel %vm1380_vm14, %v1386_v52, %v1231_v61  ;;  %v1382_v2 = vsel %vm1380_vm14, %v1379_v23, %v1168_v22 }
 0x18e   : > { %v10481_v39 = vpop.permute.xlu0 %7073  ;;  %v1387_v43 = vsel %vm1377_vm12, %v1198_v19, %v1215_v28  ;;  %v1390_v6 = vsel %vm1383_vm7, %v1388_v11, %v1248_v21  ;;  %v16084_v1 = vrot.slane %v10397_v46, 4  ;;  %v1385_v28 = vsel %vm1383_vm7, %v1382_v2, %v1185_v17 }
 0x18f   : > { %16082 = vst [vmem:[#allocation31_spill] sm:$0xff] %v10481_v39  ;;  %v7075_v30 = vunpack.i.l.bf16 %v10481_v39  ;;  %2424 = vrot.lane.b32.xlu1 %v2419_v49, %s9266_s23  ;;  %v1389_v0 = vsel %vm1380_vm14, %v1387_v43, %v1232_v59  ;;  %v1381_v40 = vsel %vm1380_vm14, %v1378_v44, %v1167_v15  ;;  %v6926_v9 = vunpack.i.h.bf16 %v16085_v42 }
 0x190   : > { %7338 = vrot.lane.b32.xlu0 %v7337_v53, %s9265_s30  ;;  %v7347_v58 = vpack.i.bf16 %v16084_v1, %v1895_v60  ;;  %v1384_v51 = vsel %vm1383_vm7, %v1381_v40, %v1184_v62  ;;  %v16086_v49 = vunpack.i.h.bf16 %v9741_v38  ;;  %v16087_v15 = vunpack.i.h.bf16 %v9734_v7 }
 0x191   : > { %v1249_v33 = vsel %vm15542_vm6, %v7071_v29, %v7075_v30  ;;  %v10511_v29 = vpop.permute.xlu1 %7243  ;;  %vm914_vm6 = vcmask 719872   ;;  %v6237_v46 = vpack.c.bf16 %v1390_v6, %v1384_v51  ;;  %v2251_v25 = vrot.slane %v10426_v27, 4 }
 0x192   : > { %v10503_v54 = vpop.permute.xlu0 %1259  ;;  %v1391_v18 = vsel %vm1383_vm7, %v1389_v0, %v1249_v33  ;;  %v885_v53 = vmul.f32 %v16086_v49, %v9562_v47  ;;  %v897_v60 = vmul.f32 %v16087_v15, %v9562_v47  ;;  %v16089_v61 = vrot.slane %v9477_v55, 6 }
 0x193   : > { %v6235_v23 = vpack.c.bf16 %v1391_v18, %v1385_v28  ;;  %2441 = vrot.lane.b32.xlu1 %v2436_v63, %s16001_s17  ;;  %v16090_v38 = vrot.slane %v9562_v47, 6  ;;  %v16091_v59 = vunpack.i.l.bf16 %v16085_v42  ;;  %v921_v24 = vmul.f32 %v6926_v9, %v9562_v47  ;;  %v16093_v63 = vld [vmem:[#allocation22_spill] sm:$0xff]  ;;  %v16097_v28 = vld [vmem:[#allocation39_spill] sm:$0xff] }
 0x194   : > { %7348 = vrot.lane.b32.xlu0 %v7347_v58, %s9270_s13  ;;  %v1977_v21 = vrot.slane %v885_v53, 4  ;;  %v1994_v7 = vrot.slane %v897_v60, 2  ;;  %v15548_v43 = vunpack.i.h.bf16 %v16093_v63  ;;  %v15551_v44 = vunpack.i.l.bf16 %v16093_v63  ;;  %s9274_s13 = smov 15  }
 0x195   : > { %6236 = vmatprep.subr.bf16.mxu0 %v6235_v23  ;;  %v7357_v22 = vpack.i.bf16 %v16090_v38, %v16089_v61  ;;  %v915_v62 = vsel %vm914_vm6, %v16091_v59, %v6926_v9  ;;  %v10532_v17 = vpop.permute.xlu1 %7253  ;;  %v2025_v11 = vrot.slane %v921_v24, 6  ;;  %v16094_v33 = vunpack.i.h.bf16 %v16011_v34  ;;  %v16099_v9 = vld [vmem:[#allocation43_spill] sm:$0xff] }
 0x196   : > { %v10523_v30 = vpop.permute.xlu0 %7088  ;;  %6238 = vmatpush1.bf16.msra.mxu0 %v6237_v46  ;;  %v920_v27 = vmul.f32 %v915_v62, %v9477_v55  ;;  %v7367_v52 = vpack.i.bf16 %v2251_v25, %v1977_v21  ;;  %v16096_v6 = vrot.slane %v9467_v50, 2  ;;  %vm518_vm6 = vcmask 187392   ;;  %v16102_v25 = vld [vmem:[#allocation52_spill] sm:$0xff]  ;;  %v16104_v21 = vld [vmem:[#allocation54_spill] sm:$0xff] }
 0x197   : > { %16088 = vst [vmem:[#allocation47_spill] sm:$0xff] %v10523_v30  ;;  %v945_v2 = vmul.f32 %v16094_v33, %v9562_v47  ;;  %v16098_v18 = vunpack.i.h.bf16 %v16097_v28  ;;  %v15549_v23 = vunpack.i.h.bf16 %v16099_v9  ;;  %v10559_v34 = vsel %vm518_vm6, %v15551_v44, %v15548_v43 }
 0x198   : > { %7358 = vrot.lane.b32.xlu0 %v7357_v22, %s9256_s10  ;;  %v7377_v1 = vpack.i.bf16 %v16096_v6, %v1994_v7  ;;  %v2024_v58 = vrot.slane %v920_v27, 6  ;;  %vm1010_vm5 = vcmask 850944   ;;  %v16101_v15 = vunpack.i.h.bf16 %v16026_v32  ;;  %v16103_v22 = vld [vmem:[#allocation53_spill] sm:$0xff] }
 0x199   : > { %v933_v40 = vmul.f32 %v16098_v18, %v9562_v47  ;;  %v10551_v42 = vpop.permute.xlu1 %7263  ;;  %v2059_v51 = vrot.slane %v945_v2, 2  ;;  %v7081_v61 = vunpack.i.h.bf16 %v16102_v25  ;;  %v7080_v38 = vunpack.i.l.bf16 %v16102_v25 }
 0x19a   : > { %v10536_v19 = vpop.permute.xlu0 %7098  ;;  %v7387_v53 = vpack.i.bf16 %v2025_v11, %v2024_v58  ;;  %v957_v60 = vmul.f32 %v16101_v15, %v9562_v47  ;;  %v7086_v59 = vunpack.i.h.bf16 %v16103_v22  ;;  %v7085_v62 = vunpack.i.l.bf16 %v16103_v22  ;;  %v16107_v15 = vld [vmem:[#allocation55_spill] sm:$0xff] }
 0x19b   : > { %16092 = vst [vmem:[#allocation32_spill] sm:$0xff] %v10536_v19  ;;  %v2042_v46 = vrot.slane %v933_v40, 4  ;;  %v7096_v7 = vunpack.i.h.bf16 %v16104_v21  ;;  %v7095_v24 = vunpack.i.l.bf16 %v16104_v21  ;;  %v16105_v27 = vunpack.i.l.bf16 %v16099_v9 }
 0x19c   : > { %7368 = vrot.lane.b32.xlu0 %v7367_v52, %s9257_s26  ;;  %vm15562_vm6 = vcmask 982016   ;;  %vm1324_vm1 = vcmask 891904   ;;  %v7126_v11 = vunpack.i.h.bf16 %v10150_v4  ;;  %v7125_v33 = vunpack.i.l.bf16 %v10150_v4 }
 0x19d   : > { %v10577_v32 = vsel %vm1010_vm5, %v16105_v27, %v15549_v23  ;;  %v10579_v52 = vpop.permute.xlu1 %7273  ;;  %v7136_v2 = vunpack.i.h.bf16 %v10188_v35  ;;  %v7135_v6 = vunpack.i.l.bf16 %v10188_v35  ;;  %v1261_v28 = vsel %vm15562_vm6, %v7080_v38, %v7081_v61 }
 0x19e   : > { %v10544_v0 = vpop.permute.xlu0 %7108  ;;  %vm15580_vm5 = vcmask 883712   ;;  %vm15567_vm2 = vcmask 875520   ;;  %v1277_v18 = vsel %vm1022_vm0, %v7085_v62, %v7086_v59  ;;  %v1294_v40 = vsel %vm1293_vm15, %v7095_v24, %v7096_v7 }
 0x19f   : > { %16095 = vst [vmem:[#allocation33_spill] sm:$0xff] %v10544_v0  ;;  %v7115_v4 = vunpack.i.l.bf16 %v10118_v14  ;;  %v7106_v35 = vunpack.i.h.bf16 %v16107_v15  ;;  %v7105_v25 = vunpack.i.l.bf16 %v16107_v15  ;;  %v1339_v38 = vsel %vm15580_vm5, %v7125_v33, %v7126_v11 }
 0x1a0   : > { %7378 = vrot.lane.b32.xlu0 %v7377_v1, %s9258_s24  ;;  %v1356_v21 = vsel %vm15567_vm2, %v7135_v6, %v7136_v2  ;;  %v7146_v62 = vunpack.i.h.bf16 %v10222_v56  ;;  %v7090_v24 = vunpack.i.l.bf16 %v10523_v30  ;;  %v7100_v43 = vunpack.i.l.bf16 %v10536_v19 }
 0x1a1   : > { %v7110_v6 = vunpack.i.l.bf16 %v10544_v0  ;;  %v1114_v23 = vmul.f32 %v16080_v31, %v9477_v55  ;;  %v16109_v44 = vrot.slane %v9477_v55, 4  ;;  %v16110_v39 = vrot.slane %v9562_v47, 4 }
 0x1a2   : > { %v10561_v49 = vpop.permute.xlu0 %7118 }
 0x1a3   : > { %16100 = vst [vmem:[#allocation34_spill] sm:$0xff] %v10561_v49  ;;  %v7120_v15 = vunpack.i.l.bf16 %v10561_v49  ;;  %v1311_v49 = vsel %vm1310_vm13, %v7105_v25, %v7106_v35  ;;  %v7407_v19 = vpack.i.bf16 %v1114_v23, %v957_v60  ;;  %v7155_v60 = vunpack.i.l.bf16 %v10245_v3 }
 0x1a4   : > { %7388 = vrot.lane.b32.xlu0 %v7387_v53, %s16054_s21  ;;  %v7116_v53 = vunpack.i.h.bf16 %v10118_v14  ;;  %v7145_v14 = vunpack.i.l.bf16 %v10222_v56 }
 0x1a6   : > { %v10585_v1 = vpop.permute.xlu0 %7128  ;;  %v1325_v33 = vsel %vm1324_vm1, %v7115_v4, %v7116_v53  ;;  %v1278_v4 = vsel %vm1022_vm0, %v7086_v59, %v7090_v24  ;;  %v1262_v59 = vsel %vm15562_vm6, %v7081_v61, %v10503_v54 }
 0x1a7   : > { %16106 = vst [vmem:[#allocation9_spill] sm:$0xff] %v10585_v1  ;;  %v7130_v22 = vunpack.i.l.bf16 %v10585_v1  ;;  %v7417_v1 = vpack.i.bf16 %v16110_v39, %v16109_v44  ;;  %v1373_v39 = vsel %vm15566_vm4, %v7145_v14, %v7146_v62  ;;  %v7156_v44 = vunpack.i.h.bf16 %v10245_v3 }
 0x1a8   : > { %2047 = vrot.lane.b32.xlu0 %v2042_v46, %s9250_s7  ;;  %v10604_v46 = vpop.permute.xlu1 %7283  ;;  %s16238_s7 = smov 120  }
 0x1a9   : > { %v1340_v56 = vsel %vm15580_vm5, %v7126_v11, %v7130_v22  ;;  %v1295_v11 = vsel %vm1293_vm15, %v7096_v7, %v7100_v43  ;;  %v1326_v22 = vsel %vm1324_vm1, %v7116_v53, %v7120_v15 }
 0x1aa   : > { %v10601_v27 = vpop.permute.xlu0 %7138  ;;  %v1399_v23 = vsel %vm1377_vm12, %v1326_v22, %v1340_v56 }
 0x1ab   : > { %16108 = vst [vmem:[#allocation10_spill] sm:$0xff] %v10601_v27  ;;  %v7140_v58 = vunpack.i.l.bf16 %v10601_v27  ;;  %v1398_v27 = vsel %vm1377_vm12, %v1325_v33, %v1339_v38  ;;  %v16114_v33 = vunpack.i.h.bf16 %v10354_v5 }
 0x1ac   : > { %2064 = vrot.lane.b32.xlu0 %v2059_v51, %s9251_s27  ;;  %v1400_v31 = vsel %vm1380_vm14, %v1398_v27, %v1356_v21  ;;  %v10637_v43 = vpop.permute.xlu1 %7293  ;;  %s16246_s27 = smov 17  }
 0x1ad   : > { %v1357_v0 = vsel %vm15567_vm2, %v7136_v2, %v7140_v58  ;;  %v1312_v2 = vsel %vm1310_vm13, %v7106_v35, %v7110_v6  ;;  %v1393_v58 = vsel %vm1377_vm12, %v1262_v59, %v1278_v4  ;;  %v1402_v61 = vsel %vm1383_vm7, %v1400_v31, %v1373_v39 }
 0x1ae   : > { %v10623_v51 = vpop.permute.xlu0 %7148  ;;  %v1401_v53 = vsel %vm1380_vm14, %v1399_v23, %v1357_v0  ;;  %v1395_v38 = vsel %vm1380_vm14, %v1393_v58, %v1295_v11  ;;  %v16113_v0 = vunpack.i.h.bf16 %v16099_v9  ;;  %v1417_v6 = vsel %vm1149_vm3, %v7155_v60, %v7156_v44 }
 0x1af   : > { %16111 = vst [vmem:[#allocation49_spill] sm:$0xff] %v10623_v51  ;;  %v7150_v30 = vunpack.i.l.bf16 %v10623_v51  ;;  %v1397_v24 = vsel %vm1383_vm7, %v1395_v38, %v1312_v2  ;;  %v16115_v9 = vunpack.i.h.bf16 %v16035_v10  ;;  %v16142_v51 = vld [vmem:[#allocation47_spill] sm:$0xff] }
 0x1b0   : > { %7408 = vrot.lane.b32.xlu0 %v7407_v19, %s15719_s6  ;;  %v1392_v19 = vsel %vm1377_vm12, %v1261_v28, %v1277_v18  ;;  %v1017_v14 = vmul.f32 %v16113_v0, %v9562_v47  ;;  %v524_v18 = vmul.f32 %v10559_v34, %v9477_v55  ;;  %v10672_v31 = vpop.permute.xlu1 %7303 }
 0x1b1   : > { %v1374_v7 = vsel %vm15566_vm4, %v7146_v62, %v7150_v30  ;;  %v1394_v27 = vsel %vm1380_vm14, %v1392_v19, %v1294_v40  ;;  %v16112_v30 = vunpack.i.l.bf16 %v16093_v63  ;;  %v1416_v40 = vsel %vm1149_vm3, %v16114_v33, %v7155_v60 }
 0x1b2   : > { %v7159_v25 = vpop.permute.xlu0 %7158  ;;  %v1403_v54 = vsel %vm1383_vm7, %v1401_v53, %v1374_v7  ;;  %v1396_v28 = vsel %vm1383_vm7, %v1394_v27, %v1311_v49  ;;  %v993_v4 = vmul.f32 %v16115_v9, %v9562_v47  ;;  %v2166_v39 = vrot.slane %v1017_v14, 4  ;;  %v16118_v9 = vld [vmem:[#allocation48_spill] sm:$0xff] }
 0x1b3   : > { %v7161_v35 = vunpack.i.h.bf16 %v7159_v25  ;;  %v7160_v21 = vunpack.i.l.bf16 %v7159_v25  ;;  %v523_v62 = vmul.f32 %v16112_v30, %v9467_v50  ;;  %v6239_v15 = vpack.c.bf16 %v1403_v54, %v1397_v24 }
 0x1b4   : > { %7418 = vrot.lane.b32.xlu0 %v7417_v1, %s9263_s5  ;;  %v6241_v56 = vpack.c.bf16 %v1402_v61, %v1396_v28  ;;  %v1016_v1 = vmul.f32 %v10577_v32, %v9477_v55  ;;  %v1647_v10 = vsel %vm1377_vm12, %v524_v18, %v1417_v6  ;;  %v7437_v58 = vpack.i.bf16 %v9477_v55, %v993_v4  ;;  %v10689_v54 = vpop.permute.xlu1 %7313 }
 0x1b5   : > { %v1433_v49 = vsel %vm1094_vm8, %v7160_v21, %v7161_v35  ;;  %v1434_v34 = vsel %vm1094_vm8, %v7161_v35, %v10265_v20  ;;  %6240 = vmatprep.subr.bf16.mxu0 %v6239_v15  ;;  %v1646_v59 = vsel %vm1377_vm12, %v523_v62, %v1416_v40  ;;  %v16116_v19 = vunpack.i.h.bf16 %v9827_v45 }
 0x1b6   : > { %v7164_v5 = vpop.permute.xlu0 %7163  ;;  %6242 = vmatpush1.bf16.msra.mxu0 %v6241_v56  ;;  %v1649_v32 = vsel %vm1380_vm14, %v1646_v59, %v1433_v49  ;;  %v1650_v2 = vsel %vm1380_vm14, %v1647_v10, %v1434_v34  ;;  %v2165_v38 = vrot.slane %v1016_v1, 4  ;;  %v16117_v30 = vunpack.i.h.bf16 %v9835_v26 }
 0x1b7   : > { %v7166_v11 = vunpack.i.h.bf16 %v7164_v5  ;;  %v7165_v22 = vunpack.i.l.bf16 %v7164_v5  ;;  %v1029_v61 = vmul.f32 %v16116_v19, %v9562_v47  ;;  %v7185_v45 = vunpack.i.l.bf16 %v10322_v36 }
 0x1b8   : > { %7428 = vrot.lane.b32.xlu0 %v10143_v37, %s9264_s29  ;;  %v7447_v21 = vpack.i.bf16 %v2166_v39, %v2165_v38  ;;  %v1053_v62 = vmul.f32 %v16117_v30, %v9562_v47  ;;  %v10705_v14 = vpop.permute.xlu1 %7323  ;;  %v7195_v18 = vunpack.i.l.bf16 %v10342_v12  ;;  %vm1481_vm8 = vcmask 949248  }
 0x1b9   : > { %v1450_v23 = vsel %vm1082_vm11, %v7165_v22, %v7166_v11  ;;  %v1451_v60 = vsel %vm1082_vm11, %v7166_v11, %v10283_v8  ;;  %v2183_v27 = vrot.slane %v1029_v61, 2  ;;  %v7175_v33 = vunpack.i.l.bf16 %v10298_v48 }
 0x1ba   : > { %v10683_v7 = vpop.permute.xlu0 %7168  ;;  %v1652_v53 = vsel %vm1383_vm7, %v1649_v32, %v1450_v23  ;;  %v1653_v25 = vsel %vm1383_vm7, %v1650_v2, %v1451_v60  ;;  %v2236_v40 = vrot.slane %v1053_v62, 6  ;;  %v7006_v4 = vunpack.i.h.bf16 %v16118_v9 }
 0x1bb   : > { %v7527_v37 = vpack.i.bf16 %v1653_v25, %v1652_v53  ;;  %v15563_v15 = vunpack.i.h.bf16 %v10683_v7  ;;  %v7205_v1 = vunpack.i.l.bf16 %v10362_v41  ;;  %v1657_v11 = vsel %vm1377_vm12, %v7175_v33, %v7185_v45 }
 0x1bc   : > { %7438 = vrot.lane.b32.xlu0 %v7437_v58, %s9265_s30  ;;  %v10729_v22 = vpop.permute.xlu1 %7333  ;;  %vm16119_vm11 = vcmask 932864   ;;  %v1660_v10 = vsel %vm1380_vm14, %v1657_v11, %v7195_v18  ;;  %v16120_v23 = vunpack.i.l.bf16 %v16118_v9  ;;  %v16121_v25 = vunpack.i.h.bf16 %v16045_v16  ;;  %v16128_v9 = vld [vmem:[#allocation30_spill] sm:$0xff] }
 0x1bd   : > { %7528 = vrot.lane.b32.xlu1 %v7527_v37, %s9271_s11  ;;  %v1465_v49 = vsel %vm1070_vm9, %v15563_v15, %v7175_v33  ;;  %v1663_v58 = vsel %vm1383_vm7, %v1660_v10, %v7205_v1  ;;  %v16122_v37 = vld [vmem:[#allocation46_spill] sm:$0xff]  ;;  %vm16138_vm4 = vcmask 826368  }
 0x1be   : > { %v10695_v35 = vpop.permute.xlu0 %7178  ;;  %v1107_v60 = vsel %vm15562_vm6, %v16120_v23, %v7006_v4  ;;  %v1089_v38 = vmul.f32 %v16121_v25, %v9562_v47  ;;  %v16123_v19 = vunpack.i.h.bf16 %v16122_v37  ;;  %v16126_v33 = vld [vmem:[#allocation18_spill] sm:$0xff]  ;;  %v16129_v23 = vunpack.i.h.bf16 %v16093_v63 }
 0x1bf   : > { %v15565_v24 = vunpack.i.h.bf16 %v10695_v35  ;;  %vm16136_vm6 = vcmask 1022976  }
 0x1c0   : > { %7448 = vrot.lane.b32.xlu0 %v7447_v21, %s16001_s17  ;;  %v1077_v61 = vmul.f32 %v16123_v19, %v9562_v47  ;;  %v1113_v21 = vmul.f32 %v7006_v4, %v9562_v47  ;;  %v10756_v62 = vpop.permute.xlu1 %7343  ;;  %v6831_v4 = vunpack.i.h.bf16 %v16128_v9  ;;  %vm16139_vm2 = vmmov %vm16136_vm6 }
 0x1c1   : > { %v1483_v26 = vsel %vm1481_vm8, %v15565_v24, %v7185_v45  ;;  %v7180_v24 = vunpack.i.l.bf16 %v10695_v35 }
 0x1c2   : > { %v10702_v0 = vpop.permute.xlu0 %7188  ;;  %v1656_v5 = vsel %vm1377_vm12, %v1465_v49, %v1483_v26  ;;  %v1133_v26 = vmul.f32 0.0, %v16126_v33  ;;  %v2295_v49 = vrot.slane %v1089_v38, 6  ;;  %v10787_v63 = vmul.f32 %v6831_v4, %v9562_v47 }
 0x1c3   : > { %v15564_v28 = vunpack.i.h.bf16 %v10702_v0 }
 0x1c4   : > { %2188 = vrot.lane.b32.xlu0 %v2183_v27, %s9242_s8  ;;  %v1112_v27 = vmul.f32 %v1107_v60, %v9477_v55  ;;  %v525_v60 = vmul.f32 %v16129_v23, %v9562_v47  ;;  %v10773_v25 = vpop.permute.xlu1 %7353  ;;  %s16239_s8 = smov 1  }
 0x1c5   : > { %v1497_v6 = vsel %vm1058_vm10, %v15564_v28, %v7195_v18  ;;  %v16125_v18 = vld [vmem:[#allocation15_spill] sm:$0xff] }
 0x1c6   : > { %v10718_v56 = vpop.permute.xlu0 %7198  ;;  %v1659_v39 = vsel %vm1380_vm14, %v1656_v5, %v1497_v6  ;;  %v1123_v16 = vmul.f32 %v16125_v18, %v9562_v47  ;;  %v2329_v5 = vrot.slane %v1113_v21, 2  ;;  %v1648_v19 = vsel %vm1377_vm12, %v525_v60, %v7156_v44  ;;  %v16131_v44 = vld [vmem:[#allocation41_spill] sm:$0xff] }
 0x1c7   : > { %v15561_v34 = vunpack.i.h.bf16 %v10718_v56  ;;  %v1651_v3 = vsel %vm1380_vm14, %v1648_v19, %v10265_v20  ;;  %v7226_v33 = vunpack.i.h.bf16 %v16131_v44 }
 0x1c8   : > { %2241 = vrot.lane.b32.xlu0 %v2236_v40, %s9256_s10  ;;  %v16127_v40 = vld [vmem:[#allocation21_spill] sm:$0xff]  ;;  %v2389_v10 = vrot.slane %v1123_v16, 2 }
 0x1c9   : > { %v1514_v59 = vsel %vm16119_vm11, %v15561_v34, %v7205_v1  ;;  %v1132_v6 = vmul.f32 %v16127_v40, %v9562_v47  ;;  %v6830_v1 = vunpack.i.l.bf16 %v16128_v9  ;;  %vm686_vm11 = vcmask 433152   ;;  %v16135_v34 = vld [vmem:[#allocation16_spill] sm:$0xff] }
 0x1ca   : > { %v10736_v32 = vpop.permute.xlu0 %7208  ;;  %v1662_v2 = vsel %vm1383_vm7, %v1659_v39, %v1514_v59  ;;  %v2328_v39 = vrot.slane %v1112_v27, 2  ;;  %v15560_v40 = vunpack.i.l.bf16 %v10511_v29  ;;  %v10803_v9 = vsel %vm1383_vm7, %v1651_v3, %v10283_v8 }
 0x1cb   : > { %v7537_v53 = vpack.i.bf16 %v1663_v58, %v1662_v2  ;;  %v2453_v2 = vrot.slane %v1133_v26, 2  ;;  %v2452_v58 = vrot.slane %v1132_v6, 2  ;;  %v15559_v26 = vunpack.i.l.bf16 %v16131_v44 }
 0x1cc   : > { %7468 = vrot.lane.b32.xlu0 %v10157_v57, %s9258_s24  ;;  %v16124_v57 = vld [vmem:[#allocation13_spill] sm:$0xff]  ;;  %v7487_v38 = vpack.i.bf16 %v2329_v5, %v2328_v39  ;;  %v16132_v39 = vld [vmem:[#allocation38_spill] sm:$0xff]  ;;  %v7285_v8 = vunpack.i.l.bf16 %v10604_v46  ;;  %v7295_v27 = vunpack.i.l.bf16 %v10637_v43  ;;  %v7091_v47 = vunpack.i.h.bf16 %v16142_v51 }
 0x1cd   : > { %7538 = vrot.lane.b32.xlu1 %v7537_v53, %s9271_s11  ;;  %v1124_v45 = vmul.f32 0.0, %v16124_v57  ;;  %v687_v53 = vsel %vm686_vm11, %v6830_v1, %v6831_v4  ;;  %v16130_v57 = vld [vmem:[#allocation28_spill] sm:$0xff]  ;;  %v10792_v16 = vpack.i.bf16 %v2453_v2, %v2452_v58  ;;  %vm1626_vm11 = vcmask 818176   ;;  %v16133_v2 = vld [vmem:[#allocation37_spill] sm:$0xff] }
 0x1ce   : > { %v10754_v30 = vpop.permute.xlu0 %7218  ;;  %v10784_v21 = vmul.f32 %v687_v53, %v9477_v55  ;;  %v15569_v58 = vunpack.i.l.bf16 %v16132_v39  ;;  %v10823_v53 = vsel %vm1293_vm15, %v15559_v26, %v7226_v33  ;;  %v16143_v55 = vunpack.i.h.bf16 %v10695_v35 }
 0x1cf   : > { %v2390_v59 = vrot.slane %v1124_v45, 2  ;;  %v7036_v45 = vunpack.i.h.bf16 %v16130_v57  ;;  %v7221_v23 = vunpack.i.h.bf16 %v10754_v30  ;;  %v15571_v57 = vunpack.i.h.bf16 %v10604_v46 }
 0x1d0   : > { %2283 = vrot.lane.b32.xlu0 %v1077_v61, %s9259_s25  ;;  %v10781_v61 = vmul.f32 %v6830_v1, %v9467_v50  ;;  %v7186_v1 = vunpack.i.h.bf16 %v10322_v36  ;;  %v16145_v51 = vunpack.i.h.bf16 %v10637_v43  ;;  %v7220_v35 = vunpack.i.l.bf16 %v10754_v30 }
 0x1d1   : > { %v7502_v18 = vpack.i.bf16 %v2390_v59, %v2389_v10  ;;  %v15568_v10 = vunpack.i.l.bf16 %v10532_v17  ;;  %v10847_v15 = vsel %vm16136_vm6, %v7036_v45, %v7285_v8  ;;  %v7190_v45 = vunpack.i.l.bf16 %v10702_v0 }
 0x1d2   : > { %v10767_v11 = vpop.permute.xlu0 %7228  ;;  %vm1034_vm6 = vcmask 924672   ;;  %v7210_v30 = vunpack.i.l.bf16 %v10736_v32 }
 0x1d4   : > { %2300 = vrot.lane.b32.xlu0 %v2295_v49, %s16054_s21  ;;  %v10807_v49 = vpop.permute.xlu1 %7363  ;;  %s9276_s21 = smov 20  }
 0x1d6   : > { %v10775_v37 = vpop.permute.xlu0 %7233 }
 0x1d7   : > { %v7235_v59 = vunpack.i.l.bf16 %v10775_v37 }
 0x1d8   : > { %7488 = vrot.lane.b32.xlu0 %v7487_v38, %s9262_s12  ;;  %v16134_v38 = vld [vmem:[#allocation29_spill] sm:$0xff]  ;;  %v10849_v28 = vpop.permute.xlu1 %7373  ;;  %s9273_s12 = smov 45  }
 0x1d9   : > { %v1675_v19 = vsel %vm1377_vm12, %v16134_v38, %v15560_v40  ;;  %16137 = vst [vmem:[#allocation12_spill] sm:$0xff] %v10849_v28  ;;  %v1482_v28 = vsel %vm1481_vm8, %v7180_v24, %v16143_v55 }
 0x1da   : > { %v10799_v6 = vpop.permute.xlu0 %7238  ;;  %v10839_v4 = vsel %vm1380_vm14, %v1675_v19, %v15568_v10  ;;  %v1666_v19 = vsel %vm1377_vm12, %v15569_v58, %v7221_v23  ;;  %v10861_v10 = vsel %vm16139_vm2, %v7285_v8, %v15571_v57  ;;  %v7170_v58 = vunpack.i.l.bf16 %v10683_v7 }
 0x1db   : > { %v15570_v36 = vunpack.i.h.bf16 %v10799_v6  ;;  %v7240_v60 = vunpack.i.l.bf16 %v10799_v6  ;;  %vm16144_vm2 = vcmask 809984  }
 0x1dc   : > { %7493 = vrot.lane.b32.xlu0 %v16133_v2, %s9249_s18 }
 0x1dd   : > { %v1609_v26 = vsel %vm16138_vm4, %v7240_v60, %v15570_v36  ;;  %v16140_v60 = vunpack.i.h.bf16 %v10775_v37  ;;  %vm16141_vm4 = vcmask 834560  }
 0x1de   : > { %v10830_v3 = vpop.permute.xlu0 %7248 }
 0x1df   : > { %v15575_v5 = vunpack.i.h.bf16 %v10830_v3  ;;  %v7250_v20 = vunpack.i.l.bf16 %v10830_v3  ;;  %v1592_v36 = vsel %vm16141_vm4, %v7235_v59, %v16140_v60  ;;  %v7200_v59 = vunpack.i.l.bf16 %v10718_v56 }
 0x1e0   : > { %7498 = vrot.lane.b32.xlu0 %v16135_v34, %s9263_s5  ;;  %v10877_v34 = vsel %vm1481_vm8, %v7186_v1, %v7295_v27  ;;  %vm16157_vm4 = vcmask 1031168  }
 0x1e1   : > { %v1627_v40 = vsel %vm1626_vm11, %v7250_v20, %v15575_v5  ;;  %v1669_v20 = vsel %vm1380_vm14, %v1666_v19, %v7226_v33  ;;  %v1673_v5 = vsel %vm1377_vm12, %v1592_v36, %v1609_v26  ;;  %v10894_v33 = vsel %vm1481_vm8, %v7295_v27, %v16145_v51  ;;  %v10901_v36 = vpop.permute.xlu1 %7383  ;;  %v16149_v51 = vld [vmem:[#allocation26_spill] sm:$0xff] }
 0x1e2   : > { %v10868_v2 = vpop.permute.xlu0 %7258  ;;  %v1676_v60 = vsel %vm1380_vm14, %v1673_v5, %v1627_v40  ;;  %v16146_v26 = vunpack.i.h.bf16 %v10702_v0  ;;  %v16147_v40 = vunpack.i.h.bf16 %v10683_v7  ;;  %v7305_v7 = vunpack.i.l.bf16 %v10672_v31 }
 0x1e3   : > { %v15579_v8 = vunpack.i.h.bf16 %v10868_v2  ;;  %v7260_v57 = vunpack.i.l.bf16 %v10868_v2  ;;  %vm16151_vm8 = vcmask 932864  }
 0x1e4   : > { %7503 = vrot.lane.b32.xlu0 %v7502_v18, %s9264_s29  ;;  %v1496_v18 = vsel %vm1058_vm10, %v7190_v45, %v16146_v26  ;;  %v1464_v5 = vsel %vm1070_vm9, %v7170_v58, %v16147_v40  ;;  %v7211_v45 = vunpack.i.h.bf16 %v10736_v32  ;;  %v16150_v26 = vunpack.i.h.bf16 %v10718_v56 }
 0x1e5   : > { %v1641_v1 = vsel %vm16144_vm2, %v7260_v57, %v15579_v8  ;;  %v16148_v8 = vld [vmem:[#allocation42_spill] sm:$0xff]  ;;  %v1655_v0 = vsel %vm1377_vm12, %v1464_v5, %v1482_v28  ;;  %v1544_v28 = vsel %vm1022_vm0, %v7091_v47, %v7220_v35  ;;  %v16152_v40 = vunpack.i.l.bf16 %v10579_v52  ;;  %vm16158_vm2 = vmmov %vm16157_vm4 }
 0x1e6   : > { %v7269_v55 = vpop.permute.xlu0 %7268  ;;  %v1679_v24 = vsel %vm1383_vm7, %v1676_v60, %v1641_v1  ;;  %v1672_v27 = vsel %vm1383_vm7, %v1669_v20, %v16148_v8  ;;  %v7306_v1 = vunpack.i.h.bf16 %v10672_v31  ;;  %v1658_v58 = vsel %vm1380_vm14, %v1655_v0, %v1496_v18  ;;  %v16155_v0 = vld [vmem:[#allocation19_spill] sm:$0xff] }
 0x1e7   : > { %v7271_v57 = vunpack.i.h.bf16 %v7269_v55  ;;  %v7270_v19 = vunpack.i.l.bf16 %v7269_v55  ;;  %v7547_v60 = vpack.i.bf16 %v1679_v24, %v1672_v27  ;;  %v1513_v20 = vsel %vm16151_vm8, %v7200_v59, %v16150_v26  ;;  %v16153_v27 = vld [vmem:[#allocation32_spill] sm:$0xff] }
 0x1e8   : > { %7513 = vrot.lane.b32.xlu0 %v16149_v51, %s9266_s23  ;;  %v1545_v55 = vsel %vm1022_vm0, %v7220_v35, %v7221_v23  ;;  %v7231_v18 = vunpack.i.h.bf16 %v10767_v11  ;;  %v7230_v56 = vunpack.i.l.bf16 %v10767_v11  ;;  %v7101_v23 = vunpack.i.h.bf16 %v16153_v27 }
 0x1e9   : > { %v1694_v32 = vsel %vm1149_vm3, %v7270_v19, %v7271_v57  ;;  %v1695_v24 = vsel %vm1149_vm3, %v7271_v57, %v16152_v40  ;;  %7548 = vrot.lane.b32.xlu1 %v7547_v60, %s9271_s11  ;;  %v1527_v35 = vsel %vm1034_vm6, %v7210_v30, %v7211_v45  ;;  %v16154_v19 = vunpack.i.l.bf16 %v16132_v39  ;;  %v10940_v60 = vpop.permute.xlu1 %7393 }
 0x1ea   : > { %v10926_v5 = vpop.permute.xlu0 %7278  ;;  %v1661_v51 = vsel %vm1383_vm7, %v1658_v58, %v1513_v20  ;;  %v1925_v11 = vsel %vm1377_vm12, %v10781_v61, %v1694_v32  ;;  %v1926_v26 = vsel %vm1377_vm12, %v10784_v21, %v1695_v24  ;;  %v16156_v40 = vunpack.i.h.bf16 %v10364_v13 }
 0x1eb   : > { %v7281_v59 = vunpack.i.h.bf16 %v10926_v5  ;;  %v7280_v47 = vunpack.i.l.bf16 %v10926_v5  ;;  %v1528_v57 = vsel %vm1034_vm6, %v7211_v45, %v16154_v19  ;;  %v1664_v27 = vsel %vm1377_vm12, %v1527_v35, %v1544_v28 }
 0x1ec   : > { %7518 = vrot.lane.b32.xlu0 %v16155_v0, %s16001_s17  ;;  %v1665_v58 = vsel %vm1377_vm12, %v1528_v57, %v1545_v55  ;;  %vm16159_vm8 = vcmask 842752   ;;  %v16162_v55 = vunpack.i.l.bf16 %v16131_v44  ;;  %v16164_v35 = vunpack.i.h.bf16 %v10799_v6  ;;  %s16252_s17 = smov 49  }
 0x1ed   : > { %v1711_v30 = vsel %vm16157_vm4, %v16156_v40, %v7280_v47  ;;  %v1712_v45 = vsel %vm16158_vm2, %v7280_v47, %v7281_v59  ;;  %v1578_v32 = vsel %vm16159_vm8, %v7230_v56, %v7231_v18  ;;  %vm16160_vm5 = vmmov %vm16159_vm8  ;;  %vm16161_vm4 = vcmask 932864   ;;  %v10989_v40 = vpop.permute.xlu1 %7398 }
 0x1ee   : > { %v1928_v20 = vsel %vm1380_vm14, %v1925_v11, %v1711_v30  ;;  %v1929_v19 = vsel %vm1380_vm14, %v1926_v26, %v1712_v45  ;;  %v7289_v61 = vpop.permute.xlu0 %7288  ;;  %v1579_v13 = vsel %vm16160_vm5, %v7231_v18, %v16148_v8  ;;  %v1794_v28 = vsel %vm16161_vm4, %v7305_v7, %v7306_v1 }
 0x1ef   : > { %v7291_v21 = vunpack.i.h.bf16 %v7289_v61  ;;  %v7290_v24 = vunpack.i.l.bf16 %v7289_v61  ;;  %v1561_v47 = vsel %vm1293_vm15, %v7101_v23, %v16162_v55  ;;  %v1931_v56 = vsel %vm1383_vm7, %v1928_v20, %v10847_v15 }
 0x1f0   : > { %7523 = vrot.lane.b32.xlu0 %v10792_v16, %s9268_s22  ;;  %v1932_v8 = vsel %vm1383_vm7, %v1929_v19, %v10861_v10  ;;  %v16163_v18 = vunpack.i.l.bf16 %v10511_v29  ;;  %vm16165_vm5 = vcmask 826368   ;;  %v7532_v0 = vpack.i.bf16 %v1661_v51, %v10803_v9  ;;  %s9272_s22 = smov 75  }
 0x1f1   : > { %v1667_v44 = vsel %vm1380_vm14, %v1664_v27, %v1561_v47  ;;  %v1668_v23 = vsel %vm1380_vm14, %v1665_v58, %v10823_v53  ;;  %v16166_v16 = vunpack.i.h.bf16 %v10775_v37  ;;  %vm16167_vm2 = vcmask 834560  }
 0x1f2   : > { %v1610_v57 = vsel %vm16165_vm5, %v16164_v35, %v16163_v18  ;;  %v1743_v10 = vsel %vm1070_vm9, %v7290_v24, %v7291_v21  ;;  %v7299_v11 = vpop.permute.xlu0 %7298  ;;  %v1670_v26 = vsel %vm1383_vm7, %v1667_v44, %v1578_v32  ;;  %v1671_v6 = vsel %vm1383_vm7, %v1668_v23, %v1579_v13 }
 0x1f3   : > { %v1593_v15 = vsel %vm16167_vm2, %v16166_v16, %v16134_v38  ;;  %v16168_v9 = vunpack.i.l.bf16 %v10532_v17  ;;  %v16169_v51 = vunpack.i.h.bf16 %v10830_v3  ;;  %v7301_v30 = vunpack.i.h.bf16 %v7299_v11 }
 0x1f4   : > { %v7300_v45 = vunpack.i.l.bf16 %v7299_v11  ;;  %v7557_v37 = vpack.i.bf16 %v1932_v8, %v1931_v56  ;;  %v1674_v38 = vsel %vm1377_vm12, %v1593_v15, %v1610_v57  ;;  %v16170_v27 = vunpack.i.l.bf16 %v10551_v42  ;;  %7533 = vrot.lane.b32.xlu0 %v7532_v0, %s9271_s11  ;;  %v11041_v15 = vpop.permute.xlu1 %7403 }
 0x1f5   : > { %v1628_v53 = vsel %vm1626_vm11, %v16169_v51, %v16168_v9  ;;  %v16171_v58 = vunpack.i.h.bf16 %v10868_v2  ;;  %vm16172_vm8 = vcmask 809984   ;;  %v16173_v19 = vunpack.i.h.bf16 %v10298_v48 }
 0x1f6   : > { %v16174_v32 = vunpack.i.h.bf16 %v10637_v43  ;;  %v1935_v13 = vsel %vm1377_vm12, %v1743_v10, %v10894_v33  ;;  %v16175_v55 = vunpack.i.h.bf16 %v10342_v12  ;;  %v1777_v2 = vsel %vm1058_vm10, %v7300_v45, %v7301_v30  ;;  %7558 = vrot.lane.b32.xlu1 %v7557_v37, %s9272_s22  ;;  %vm16187_vm2 = vmmov %vm16172_vm8 }
 0x1f7   : > { %v1642_v20 = vsel %vm16172_vm8, %v16171_v58, %v16170_v27  ;;  %v1742_v61 = vsel %vm1070_vm9, %v16173_v19, %v7290_v24  ;;  %v1677_v48 = vsel %vm1380_vm14, %v1674_v38, %v1628_v53  ;;  %v1938_v43 = vsel %vm1380_vm14, %v1935_v13, %v1777_v2  ;;  %vm16179_vm9 = vmmov %vm16161_vm4 }
 0x1f8   : > { %v1936_v3 = vsel %vm1377_vm12, %v7291_v21, %v16174_v32  ;;  %v1776_v47 = vsel %vm1058_vm10, %v16175_v55, %v7300_v45  ;;  %v11019_v21 = vpop.permute.xlu0 %7308  ;;  %v7542_v24 = vpack.i.bf16 %v1671_v6, %v1670_v26  ;;  %v1934_v33 = vsel %vm1377_vm12, %v1742_v61, %v10877_v34  ;;  %v11075_v19 = vpop.permute.xlu1 %7413  ;;  %vm16185_vm4 = vmmov %vm16165_vm5 }
 0x1f9   : > { %v1939_v56 = vsel %vm1380_vm14, %v1936_v3, %v7301_v30  ;;  %v7310_v8 = vunpack.i.l.bf16 %v11019_v21  ;;  %v1941_v18 = vsel %vm1383_vm7, %v1938_v43, %v1794_v28  ;;  %v1680_v35 = vsel %vm1383_vm7, %v1677_v48, %v1642_v20  ;;  %vm16186_vm5 = vmmov %vm16185_vm4 }
 0x1fa   : > { %v1942_v12 = vsel %vm1383_vm7, %v1939_v56, %v7306_v1  ;;  %v7316_v57 = vunpack.i.h.bf16 %v10689_v54  ;;  %v7315_v0 = vunpack.i.l.bf16 %v10689_v54  ;;  %v1937_v44 = vsel %vm1380_vm14, %v1934_v33, %v1776_v47  ;;  %7543 = vrot.lane.b32.xlu0 %v7542_v24, %s9271_s11  ;;  %vm16188_vm8 = vmmov %vm16187_vm2 }
 0x1fb   : > { %v7567_v23 = vpack.i.bf16 %v1942_v12, %v1941_v18  ;;  %v16176_v1 = vmov %v16170_v27  ;;  %v16177_v16 = vunpack.i.l.bf16 %v10579_v52  ;;  %v16178_v54 = vunpack.i.h.bf16 %v10362_v41  ;;  %v16184_v18 = vld [vmem:[#allocation35_spill] sm:$0xff] }
 0x1fc   : > { %v1681_v34 = vsel %vm1383_vm7, %v10839_v4, %v16176_v1  ;;  %v16180_v26 = vunpack.i.h.bf16 %v16132_v39  ;;  %v11054_v6 = vpop.permute.xlu0 %7318  ;;  %v7326_v9 = vunpack.i.h.bf16 %v10705_v14  ;;  %v7325_v31 = vunpack.i.l.bf16 %v10705_v14  ;;  %v16181_v39 = vld [vmem:[#allocation33_spill] sm:$0xff] }
 0x1fd   : > { %v1927_v28 = vsel %vm1377_vm12, %v10787_v63, %v16177_v16  ;;  %v1793_v10 = vsel %vm16179_vm9, %v16178_v54, %v7305_v7  ;;  %7568 = vrot.lane.b32.xlu1 %v7567_v23, %s9272_s22  ;;  %v7552_v63 = vpack.i.bf16 %v1681_v34, %v1680_v35  ;;  %v7320_v41 = vunpack.i.l.bf16 %v11054_v6  ;;  %v11097_v34 = vpop.permute.xlu1 %7423 }
 0x1fe   : > { %v1930_v11 = vsel %vm1380_vm14, %v1927_v28, %v7281_v59  ;;  %v1804_v4 = vsel %vm1034_vm6, %v16180_v26, %v7310_v8  ;;  %v1940_v7 = vsel %vm1383_vm7, %v1937_v44, %v1793_v10  ;;  %v1821_v5 = vsel %vm1022_vm0, %v7315_v0, %v7316_v57 }
 0x1ff   : > { %v7311_v59 = vunpack.i.h.bf16 %v11019_v21  ;;  %7553 = vrot.lane.b32.xlu0 %v7552_v63, %s9271_s11  ;;  %v7111_v51 = vunpack.i.h.bf16 %v16181_v39  ;;  %v7335_v53 = vunpack.i.l.bf16 %v10729_v22  ;;  %v1943_v30 = vsel %vm1377_vm12, %v1804_v4, %v1821_v5  ;;  %s16248_s11 = smov 32  }
 0x200   : > { %v16182_v45 = vunpack.i.h.bf16 %v10604_v46  ;;  %v7336_v37 = vunpack.i.h.bf16 %v10729_v22  ;;  %v1822_v38 = vsel %vm1022_vm0, %v7316_v57, %v7320_v41  ;;  %v11072_v27 = vpop.permute.xlu0 %7328  ;;  %v1838_v20 = vsel %vm1293_vm15, %v7325_v31, %v7326_v9  ;;  %v16183_v22 = vld [vmem:[#allocation34_spill] sm:$0xff] }
 0x201   : > { %v7330_v61 = vunpack.i.l.bf16 %v11072_v27  ;;  %v1805_v32 = vsel %vm1034_vm6, %v7310_v8, %v7311_v59  ;;  %v1946_v46 = vsel %vm1380_vm14, %v1943_v30, %v1838_v20  ;;  %v1855_v3 = vsel %vm1310_vm13, %v7111_v51, %v7335_v53 }
 0x202   : > { %v1933_v14 = vsel %vm1383_vm7, %v1930_v11, %v16182_v45  ;;  %v7121_v13 = vunpack.i.h.bf16 %v16183_v22  ;;  %v1944_v55 = vsel %vm1377_vm12, %v1805_v32, %v1822_v38  ;;  %v1856_v2 = vsel %vm1310_vm13, %v7335_v53, %v7336_v37  ;;  %v11119_v45 = vpop.permute.xlu1 %7433 }
 0x203   : > { %v7562_v58 = vpack.i.bf16 %v1940_v7, %v1933_v14  ;;  %v1839_v47 = vsel %vm1293_vm15, %v7326_v9, %v7330_v61  ;;  %v7346_v56 = vunpack.i.h.bf16 %v10756_v62  ;;  %v7345_v48 = vunpack.i.l.bf16 %v10756_v62 }
 0x204   : > { %v1947_v43 = vsel %vm1380_vm14, %v1944_v55, %v1839_v47  ;;  %v7339_v21 = vpop.permute.xlu0 %7338  ;;  %v1949_v33 = vsel %vm1383_vm7, %v1946_v46, %v1855_v3  ;;  %v6906_v35 = vunpack.i.h.bf16 %v16184_v18  ;;  %v7246_v57 = vunpack.i.h.bf16 %v10511_v29 }
 0x205   : > { %7563 = vrot.lane.b32.xlu0 %v7562_v58, %s9272_s22  ;;  %v7341_v24 = vunpack.i.h.bf16 %v7339_v21  ;;  %v7340_v12 = vunpack.i.l.bf16 %v7339_v21  ;;  %v1950_v8 = vsel %vm1383_vm7, %v1947_v43, %v1856_v2  ;;  %v7355_v0 = vunpack.i.l.bf16 %v10773_v25 }
 0x206   : > { %v7572_v44 = vpack.i.bf16 %v1950_v8, %v1949_v33  ;;  %v6905_v23 = vunpack.i.l.bf16 %v16184_v18  ;;  %v7256_v62 = vunpack.i.h.bf16 %v10532_v17  ;;  %v7266_v1 = vunpack.i.h.bf16 %v10551_v42 }
 0x207   : > { %v1869_v16 = vsel %vm1324_vm1, %v7121_v13, %v7340_v12  ;;  %v7276_v28 = vunpack.i.h.bf16 %v10579_v52  ;;  %v1886_v54 = vsel %vm16185_vm4, %v7246_v57, %v7345_v48  ;;  %v7356_v10 = vunpack.i.h.bf16 %v10773_v25 }
 0x208   : > { %v1870_v29 = vsel %vm1324_vm1, %v7340_v12, %v7341_v24  ;;  %v7349_v11 = vpop.permute.xlu0 %7348  ;;  %v1887_v26 = vsel %vm16186_vm5, %v7345_v48, %v7346_v56  ;;  %v1945_v17 = vsel %vm1377_vm12, %v7311_v59, %v7320_v41  ;;  %v1920_v63 = vsel %vm16187_vm2, %v7266_v1, %v7355_v0  ;;  %v16190_v12 = vld [vmem:[#allocation11_spill] sm:$0xff] }
 0x209   : > { %7573 = vrot.lane.b32.xlu0 %v7572_v44, %s9272_s22  ;;  %v7351_v42 = vunpack.i.h.bf16 %v7349_v11  ;;  %v7350_v4 = vunpack.i.l.bf16 %v7349_v11  ;;  %v1948_v9 = vsel %vm1380_vm14, %v1945_v17, %v7330_v61  ;;  %v1952_v52 = vsel %vm1377_vm12, %v1869_v16, %v1886_v54  ;;  %v16193_v44 = vld [vmem:[#allocation40_spill] sm:$0xff]  ;;  %v16194_v16 = vld [vmem:[#allocation27_spill] sm:$0xff] }
 0x20a   : > { %v1954_v31 = vsel %vm1377_vm12, %v7341_v24, %v7346_v56  ;;  %v1953_v25 = vsel %vm1377_vm12, %v1870_v29, %v1887_v26  ;;  %v1921_v41 = vsel %vm16188_vm8, %v7355_v0, %v7356_v10  ;;  %v1951_v58 = vsel %vm1383_vm7, %v1948_v9, %v7336_v37  ;;  %v16189_v56 = vld [vmem:[#allocation12_spill] sm:$0xff]  ;;  %v11138_v24 = vpop.permute.xlu1 %7443 }
 0x20b   : > { %v1903_v7 = vsel %vm1626_vm11, %v7256_v62, %v7350_v4  ;;  %v1904_v5 = vsel %vm1626_vm11, %v7350_v4, %v7351_v42  ;;  %v1957_v39 = vsel %vm1380_vm14, %v1954_v31, %v7351_v42  ;;  %vm866_vm11 = vcmask 678912  }
 0x20c   : > { %v1955_v59 = vsel %vm1380_vm14, %v1952_v52, %v1903_v7  ;;  %v1956_v51 = vsel %vm1380_vm14, %v1953_v25, %v1904_v5  ;;  %v7359_v53 = vpop.permute.xlu0 %7358  ;;  %v1960_v30 = vsel %vm1383_vm7, %v1957_v39, %v7356_v10  ;;  %v871_v22 = vmul.f32 %v6905_v23, %v9467_v50 }
 0x20d   : > { %v7360_v14 = vunpack.i.l.bf16 %v7359_v53  ;;  %v1959_v38 = vsel %vm1383_vm7, %v1956_v51, %v1921_v41  ;;  %v1958_v20 = vsel %vm1383_vm7, %v1955_v59, %v1920_v63  ;;  %v7361_v46 = vunpack.i.h.bf16 %v7359_v53  ;;  %v16197_v41 = vld [vmem:[#allocation20_spill] sm:$0xff] }
 0x20e   : > { %v7582_v61 = vpack.i.bf16 %v1960_v30, %v1959_v38  ;;  %v7577_v32 = vpack.i.bf16 %v1958_v20, %v1951_v58  ;;  %v7366_v13 = vunpack.i.h.bf16 %v10807_v49  ;;  %v7365_v55 = vunpack.i.l.bf16 %v10807_v49  ;;  %v11162_v7 = vpop.permute.xlu1 %7453 }
 0x20f   : > { %v1967_v3 = vsel %vm1149_vm3, %v7276_v28, %v7360_v14  ;;  %v867_v37 = vsel %vm866_vm11, %v6905_v23, %v6906_v35  ;;  %v7376_v48 = vunpack.i.h.bf16 %v16189_v56  ;;  %v7375_v43 = vunpack.i.l.bf16 %v16189_v56 }
 0x210   : > { %v11128_v47 = vpop.permute.xlu0 %7368  ;;  %7583 = vrot.lane.b32.xlu0 %v7582_v61, %s9272_s22  ;;  %7578 = vrot.lane.b32.xlu1 %v7577_v32, %s9272_s22  ;;  %v2195_v21 = vsel %vm1377_vm12, %v871_v22, %v1967_v3  ;;  %v1968_v49 = vsel %vm1149_vm3, %v7360_v14, %v7361_v46  ;;  %v872_v33 = vmul.f32 %v867_v37, %v16190_v12  ;;  %vm16191_vm9 = vcmask 1031168   ;;  %s16249_s22 = smov 33  }
 0x211   : > { %v7370_v2 = vunpack.i.l.bf16 %v11128_v47  ;;  %v1984_v8 = vsel %vm16191_vm9, %v7365_v55, %v7366_v13  ;;  %vm16192_vm4 = vmmov %vm16191_vm9  ;;  %v7046_v23 = vunpack.i.h.bf16 %v16193_v44  ;;  %v7056_v28 = vunpack.i.h.bf16 %v16194_v16 }
 0x212   : > { %v2198_v1 = vsel %vm1380_vm14, %v2195_v21, %v1984_v8  ;;  %vm16195_vm5 = vcmask 1022976   ;;  %v7386_v10 = vunpack.i.h.bf16 %v10901_v36  ;;  %v2196_v29 = vsel %vm1377_vm12, %v872_v33, %v1968_v49 }
 0x213   : > { %v1985_v57 = vsel %vm16192_vm4, %v7366_v13, %v7370_v2  ;;  %v2001_v54 = vsel %vm16195_vm5, %v7375_v43, %v7376_v48  ;;  %v7385_v11 = vunpack.i.l.bf16 %v10901_v36  ;;  %v7396_v26 = vunpack.i.h.bf16 %v10940_v60  ;;  %vm16196_vm2 = vmmov %vm16195_vm5 }
 0x214   : > { %v11144_v0 = vpop.permute.xlu0 %7378  ;;  %v2199_v17 = vsel %vm1380_vm14, %v2196_v29, %v1985_v57  ;;  %v7395_v4 = vunpack.i.l.bf16 %v10940_v60  ;;  %v7401_v63 = vunpack.i.h.bf16 %v10989_v40  ;;  %v2201_v52 = vsel %vm1383_vm7, %v2198_v1, %v2001_v54 }
 0x215   : > { %v7380_v62 = vunpack.i.l.bf16 %v11144_v0  ;;  %v7400_v25 = vunpack.i.l.bf16 %v10989_v40  ;;  %v873_v59 = vmul.f32 %v6906_v35, %v16197_v41  ;;  %vm16198_vm8 = vcmask 1014784  }
 0x216   : > { %v2015_v60 = vsel %vm16198_vm8, %v7046_v23, %v7385_v11  ;;  %vm16199_vm11 = vcmask 1006592   ;;  %vm16201_vm4 = vmmov %vm16198_vm8  ;;  %v2049_v30 = vsel %vm1058_vm10, %v7395_v4, %v7396_v26  ;;  %vm16202_vm5 = vcmask 932864  }
 0x217   : > { %v2002_v42 = vsel %vm16196_vm2, %v7376_v48, %v7380_v62  ;;  %vm16200_vm9 = vmmov %vm16199_vm11  ;;  %v2016_v40 = vsel %vm16201_vm4, %v7385_v11, %v7386_v10  ;;  %v2197_v14 = vsel %vm1377_vm12, %v873_v59, %v7361_v46  ;;  %v2066_v18 = vsel %vm16202_vm5, %v7400_v25, %v7401_v63  ;;  %v11183_v46 = vpop.permute.xlu1 %7458  ;;  %v16204_v59 = vld [vmem:[#allocation9_spill] sm:$0xff] }
 0x218   : > { %v7389_v9 = vpop.permute.xlu0 %7388  ;;  %v2202_v31 = vsel %vm1383_vm7, %v2199_v17, %v2002_v42  ;;  %v2200_v35 = vsel %vm1380_vm14, %v2197_v14, %v7370_v2  ;;  %vm16203_vm2 = vmmov %vm16202_vm5  ;;  %v7321_v57 = vunpack.i.h.bf16 %v11054_v6  ;;  %v7406_v44 = vunpack.i.h.bf16 %v11041_v15 }
 0x219   : > { %v7391_v36 = vunpack.i.h.bf16 %v7389_v9  ;;  %v7390_v5 = vunpack.i.l.bf16 %v7389_v9  ;;  %v7587_v39 = vpack.i.bf16 %v2202_v31, %v2201_v52  ;;  %v2203_v32 = vsel %vm1383_vm7, %v2200_v35, %v7380_v62 }
 0x21a   : > { %v7405_v23 = vunpack.i.l.bf16 %v11041_v15  ;;  %v7415_v62 = vunpack.i.l.bf16 %v11075_v19  ;;  %v7416_v16 = vunpack.i.h.bf16 %v11075_v19  ;;  %v7425_v17 = vunpack.i.l.bf16 %v11097_v34 }
 0x21b   : > { %v2032_v51 = vsel %vm16199_vm11, %v7056_v28, %v7390_v5  ;;  %v2033_v53 = vsel %vm16200_vm9, %v7390_v5, %v7391_v36  ;;  %7588 = vrot.lane.b32.xlu1 %v7587_v39, %s9273_s12  ;;  %v2206_v20 = vsel %vm1377_vm12, %v7386_v10, %v7391_v36  ;;  %v11193_v8 = vpop.permute.xlu1 %7463  ;;  %v7331_v10 = vunpack.i.h.bf16 %v11072_v27 }
 0x21c   : > { %v2204_v38 = vsel %vm1377_vm12, %v2015_v60, %v2032_v51  ;;  %v2048_v58 = vpop.permute.xlu0 %2047  ;;  %v2205_v22 = vsel %vm1377_vm12, %v2016_v40, %v2033_v53  ;;  %v2097_v54 = vsel %vm1022_vm0, %v7321_v57, %v7415_v62  ;;  %v2080_v6 = vsel %vm1034_vm6, %v7405_v23, %v7406_v44 }
 0x21d   : > { %v2207_v61 = vsel %vm1380_vm14, %v2204_v38, %v2049_v30  ;;  %v2050_v3 = vsel %vm1058_vm10, %v7396_v26, %v2048_v58  ;;  %v2209_v37 = vsel %vm1380_vm14, %v2206_v20, %v2048_v58  ;;  %v7426_v26 = vunpack.i.h.bf16 %v11097_v34  ;;  %v16205_v20 = vld [vmem:[#allocation44_spill] sm:$0xff] }
 0x21e   : > { %v2210_v13 = vsel %vm1383_vm7, %v2207_v61, %v2066_v18  ;;  %v2208_v2 = vsel %vm1380_vm14, %v2205_v22, %v2050_v3  ;;  %v2213_v19 = vsel %vm1377_vm12, %v2080_v6, %v2097_v54  ;;  %v2098_v27 = vsel %vm1022_vm0, %v7415_v62, %v7416_v16 }
 0x21f   : > { %v7592_v55 = vpack.i.bf16 %v2210_v13, %v2203_v32  ;;  %v11207_v15 = vpop.permute.xlu1 %7473  ;;  %v2125_v25 = vsel %vm1310_vm13, %v7425_v17, %v7426_v26  ;;  %v7445_v36 = vunpack.i.l.bf16 %v11138_v24  ;;  %v7131_v60 = vunpack.i.h.bf16 %v16204_v59 }
 0x220   : > { %v2065_v56 = vpop.permute.xlu0 %2064  ;;  %v7436_v30 = vunpack.i.h.bf16 %v11119_v45  ;;  %v7435_v14 = vunpack.i.l.bf16 %v11119_v45  ;;  %v7446_v35 = vunpack.i.h.bf16 %v11138_v24  ;;  %v6976_v61 = vunpack.i.h.bf16 %v16205_v20 }
 0x221   : > { %v2067_v48 = vsel %vm16203_vm2, %v7401_v63, %v2065_v56  ;;  %v2212_v43 = vsel %vm1383_vm7, %v2209_v37, %v2065_v56  ;;  %7593 = vrot.lane.b32.xlu0 %v7592_v55, %s9273_s12  ;;  %vm16206_vm10 = vcmask 883712   ;;  %v6975_v3 = vunpack.i.l.bf16 %v16205_v20  ;;  %v16207_v37 = vld [vmem:[#allocation10_spill] sm:$0xff] }
 0x222   : > { %v2211_v21 = vsel %vm1383_vm7, %v2208_v2, %v2067_v48  ;;  %v2156_v32 = vsel %vm16206_vm10, %v7131_v60, %v7445_v36  ;;  %v7456_v22 = vunpack.i.h.bf16 %v11162_v7  ;;  %v7455_v13 = vunpack.i.l.bf16 %v11162_v7  ;;  %vm16208_vm8 = vmmov %vm16206_vm10 }
 0x223   : > { %v7597_v49 = vpack.i.bf16 %v2212_v43, %v2211_v21  ;;  %v11230_v38 = vpop.permute.xlu1 %7478  ;;  %v7141_v56 = vunpack.i.h.bf16 %v16207_v37  ;;  %v2139_v2 = vsel %vm1324_vm1, %v7435_v14, %v7436_v30  ;;  %v2157_v43 = vsel %vm16208_vm8, %v7445_v36, %v7446_v35 }
 0x224   : > { %v11191_v33 = vpop.permute.xlu0 %7408  ;;  %v2222_v21 = vsel %vm1377_vm12, %v2139_v2, %v2156_v32  ;;  %vm16209_vm11 = vcmask 875520   ;;  %vm16211_vm4 = vcmask 809984   ;;  %v7465_v59 = vunpack.i.l.bf16 %v11193_v8 }
 0x225   : > { %7598 = vrot.lane.b32.xlu1 %v7597_v49, %s9273_s12  ;;  %v7410_v1 = vunpack.i.l.bf16 %v11191_v33  ;;  %vm16210_vm9 = vmmov %vm16209_vm11  ;;  %v2190_v54 = vsel %vm16211_vm4, %v7455_v13, %v7456_v22  ;;  %v1039_v60 = vmul.f32 %v6975_v3, %v9467_v50  ;;  %vm16213_vm2 = vcmask 1031168  }
 0x226   : > { %vm16212_vm5 = vmmov %vm16211_vm4  ;;  %vm16215_vm8 = vcmask 1022976   ;;  %v7481_v37 = vunpack.i.h.bf16 %v11230_v38 }
 0x227   : > { %v2081_v42 = vsel %vm1034_vm6, %v7406_v44, %v7410_v1  ;;  %v2215_v49 = vsel %vm1377_vm12, %v7410_v1, %v7416_v16  ;;  %v11247_v44 = vpop.permute.xlu1 %7483  ;;  %vm16214_vm10 = vmmov %vm16213_vm2 }
 0x228   : > { %v7419_v28 = vpop.permute.xlu0 %7418  ;;  %v2214_v34 = vsel %vm1377_vm12, %v2081_v42, %v2098_v27  ;;  %v7460_v27 = vunpack.i.l.bf16 %v11183_v46  ;;  %v7485_v2 = vunpack.i.l.bf16 %v11247_v44 }
 0x229   : > { %v7421_v29 = vunpack.i.h.bf16 %v7419_v28  ;;  %v7420_v11 = vunpack.i.l.bf16 %v7419_v28 }
 0x22b   : > { %v2108_v4 = vsel %vm1293_vm15, %v7331_v10, %v7420_v11  ;;  %v2109_v63 = vsel %vm1293_vm15, %v7420_v11, %v7421_v29  ;;  %v2218_v10 = vsel %vm1380_vm14, %v2215_v49, %v7421_v29  ;;  %v1035_v29 = vsel %vm1034_vm6, %v6975_v3, %v6976_v61  ;;  %v16217_v49 = vld [vmem:[#allocation45_spill] sm:$0xff] }
 0x22c   : > { %v11213_v9 = vpop.permute.xlu0 %7428  ;;  %v2216_v52 = vsel %vm1380_vm14, %v2213_v19, %v2108_v4  ;;  %v2217_v5 = vsel %vm1380_vm14, %v2214_v34, %v2109_v63  ;;  %v7461_v63 = vunpack.i.h.bf16 %v11183_v46 }
 0x22d   : > { %v7430_v31 = vunpack.i.l.bf16 %v11213_v9  ;;  %v2219_v53 = vsel %vm1383_vm7, %v2216_v52, %v2125_v25  ;;  %v11269_v25 = vpop.permute.xlu1 %2345 }
 0x22e   : > { %v2243_v46 = vsel %vm1149_vm3, %v7460_v27, %v7461_v63 }
 0x22f   : > { %v2126_v39 = vsel %vm1310_vm13, %v7426_v26, %v7430_v31  ;;  %v2221_v16 = vsel %vm1383_vm7, %v2218_v10, %v7430_v31  ;;  %v7371_v31 = vunpack.i.h.bf16 %v11128_v47 }
 0x230   : > { %v11224_v51 = vpop.permute.xlu0 %7438  ;;  %v2220_v40 = vsel %vm1383_vm7, %v2217_v5, %v2126_v39  ;;  %v1040_v5 = vmul.f32 %v1035_v29, %v16190_v12  ;;  %v7466_v39 = vunpack.i.h.bf16 %v11193_v8 }
 0x231   : > { %v7440_v58 = vunpack.i.l.bf16 %v11224_v51  ;;  %v7602_v18 = vpack.i.bf16 %v2220_v40, %v2219_v53  ;;  %v2260_v47 = vsel %vm16213_vm2, %v7371_v31, %v7465_v59  ;;  %v11283_v32 = vpop.permute.xlu1 %2361  ;;  %vm16221_vm2 = vcmask 1014784  }
 0x233   : > { %7603 = vrot.lane.b32.xlu0 %v7602_v18, %s9273_s12  ;;  %v2140_v45 = vsel %vm1324_vm1, %v7436_v30, %v7440_v58  ;;  %v2224_v57 = vsel %vm1377_vm12, %v7440_v58, %v7446_v35  ;;  %v7381_v30 = vunpack.i.h.bf16 %v11144_v0  ;;  %v2465_v18 = vsel %vm1377_vm12, %v1039_v60, %v2243_v46 }
 0x234   : > { %v7449_v55 = vpop.permute.xlu0 %7448  ;;  %v2223_v62 = vsel %vm1377_vm12, %v2140_v45, %v2157_v43  ;;  %v2261_v35 = vsel %vm16214_vm10, %v7465_v59, %v7466_v39  ;;  %v2468_v8 = vsel %vm1380_vm14, %v2465_v18, %v2260_v47  ;;  %vm16222_vm10 = vmmov %vm16221_vm2 }
 0x235   : > { %v7451_v24 = vunpack.i.h.bf16 %v7449_v55  ;;  %v7450_v48 = vunpack.i.l.bf16 %v7449_v55 }
 0x237   : > { %v2173_v7 = vsel %vm16209_vm11, %v7141_v56, %v7450_v48  ;;  %v2174_v23 = vsel %vm16210_vm9, %v7450_v48, %v7451_v24  ;;  %v2227_v28 = vsel %vm1380_vm14, %v2224_v57, %v7451_v24  ;;  %vm16216_vm11 = vmmov %vm16215_vm8  ;;  %v7480_v56 = vunpack.i.l.bf16 %v11230_v38 }
 0x238   : > { %v2225_v11 = vsel %vm1380_vm14, %v2222_v21, %v2173_v7  ;;  %v2189_v6 = vpop.permute.xlu0 %2188  ;;  %v2226_v1 = vsel %vm1380_vm14, %v2223_v62, %v2174_v23  ;;  %v7476_v24 = vunpack.i.h.bf16 %v11207_v15  ;;  %v7475_v48 = vunpack.i.l.bf16 %v11207_v15  ;;  %v11301_v7 = vpop.permute.xlu1 %2378 }
 0x239   : > { %v2191_v26 = vsel %vm16212_vm5, %v7456_v22, %v2189_v6  ;;  %v2230_v17 = vsel %vm1383_vm7, %v2227_v28, %v2189_v6  ;;  %v2228_v42 = vsel %vm1383_vm7, %v2225_v11, %v2190_v54  ;;  %v1041_v21 = vmul.f32 %v6976_v61, %v16197_v41  ;;  %v16223_v6 = vld [vmem:[#allocation31_spill] sm:$0xff] }
 0x23a   : > { %v2229_v4 = vsel %vm1383_vm7, %v2226_v1, %v2191_v26  ;;  %v7607_v19 = vpack.i.bf16 %v2228_v42, %v2221_v16  ;;  %v7066_v57 = vunpack.i.h.bf16 %v16217_v49  ;;  %vm16218_vm9 = vcmask 1006592  }
 0x23b   : > { %v7612_v52 = vpack.i.bf16 %v2230_v17, %v2229_v4  ;;  %vm16219_vm4 = vmmov %vm16218_vm9  ;;  %v7486_v62 = vunpack.i.h.bf16 %v11247_v44  ;;  %vm16220_vm5 = vcmask 998400   ;;  %v2285_v20 = vsel %vm16222_vm10, %v7475_v48, %v7476_v24 }
 0x23c   : > { %v2242_v34 = vpop.permute.xlu0 %2241  ;;  %7608 = vrot.lane.b32.xlu1 %v7607_v19, %s9273_s12  ;;  %v2302_v23 = vsel %vm16219_vm4, %v7480_v56, %v7481_v37  ;;  %v2319_v28 = vsel %vm16220_vm5, %v7066_v57, %v7485_v2  ;;  %v7076_v1 = vunpack.i.h.bf16 %v16223_v6  ;;  %v7509_v29 = vpop.permute.xlu1 %7508  ;;  %vm2540_vm4 = vcmask 859136  }
 0x23d   : > { %v2244_v36 = vsel %vm1149_vm3, %v7461_v63, %v2242_v34  ;;  %7613 = vrot.lane.b32.xlu0 %v7612_v52, %s9273_s12  ;;  %v2467_v54 = vsel %vm1377_vm12, %v1041_v21, %v2242_v34  ;;  %v2474_v16 = vsel %vm1377_vm12, %v2285_v20, %v2302_v23  ;;  %v7511_v48 = vunpack.i.h.bf16 %v7509_v29  ;;  %v16228_v20 = vld [vmem:[#allocation24_spill] sm:$0xff]  ;;  %s16250_s12 = smov 35  }
 0x23e   : > { %v2466_v53 = vsel %vm1377_vm12, %v1040_v5, %v2244_v36  ;;  %v2477_v42 = vsel %vm1380_vm14, %v2474_v16, %v2319_v28  ;;  %v2470_v4 = vsel %vm1380_vm14, %v2467_v54, %v7466_v39  ;;  %v16227_v28 = vld [vmem:[#allocation49_spill] sm:$0xff]  ;;  %vm16231_vm10 = vcmask 875520  }
 0x23f   : > { %v2469_v22 = vsel %vm1380_vm14, %v2466_v53, %v2261_v35  ;;  %v7151_v54 = vunpack.i.h.bf16 %v16227_v28 }
 0x240   : > { %v7469_v40 = vpop.permute.xlu0 %7468 }
 0x241   : > { %v7471_v14 = vunpack.i.h.bf16 %v7469_v40  ;;  %v7470_v58 = vunpack.i.l.bf16 %v7469_v40  ;;  %v2425_v40 = vpop.permute.xlu1 %2424 }
 0x243   : > { %v2271_v50 = vsel %vm16215_vm8, %v7381_v30, %v7470_v58  ;;  %v2272_v3 = vsel %vm16216_vm11, %v7470_v58, %v7471_v14  ;;  %vm16224_vm8 = vmmov %vm16220_vm5  ;;  %vm16225_vm11 = vcmask 990208   ;;  %v2473_v34 = vsel %vm1383_vm7, %v2470_v4, %v7471_v14 }
 0x244   : > { %v2284_v13 = vpop.permute.xlu0 %2283  ;;  %v2471_v45 = vsel %vm1383_vm7, %v2468_v8, %v2271_v50  ;;  %v2472_v0 = vsel %vm1383_vm7, %v2469_v22, %v2272_v3  ;;  %v2320_v44 = vsel %vm16224_vm8, %v7485_v2, %v7486_v62  ;;  %v7411_v30 = vunpack.i.h.bf16 %v11191_v33  ;;  %vm16232_vm8 = vmmov %vm16231_vm10 }
 0x245   : > { %v7617_v55 = vpack.i.bf16 %v2472_v0, %v2471_v45  ;;  %v2286_v15 = vsel %vm16221_vm2, %v7476_v24, %v2284_v13  ;;  %v7431_v3 = vunpack.i.h.bf16 %v11213_v9  ;;  %v2442_v33 = vpop.permute.xlu1 %2441  ;;  %v7441_v9 = vunpack.i.h.bf16 %v11224_v51 }
 0x246   : > { %v2347_v50 = vsel %vm1034_vm6, %v7411_v30, %v11269_v25  ;;  %vm16229_vm5 = vcmask 883712  }
 0x247   : > { %7618 = vrot.lane.b32.xlu1 %v7617_v55, %s9274_s13  ;;  %vm16230_vm2 = vmmov %vm16229_vm5 }
 0x248   : > { %v2301_v43 = vpop.permute.xlu0 %2300 }
 0x249   : > { %v2303_v38 = vsel %vm16218_vm9, %v7481_v37, %v2301_v43  ;;  %v2476_v10 = vsel %vm1377_vm12, %v2284_v13, %v2301_v43  ;;  %vm16226_vm9 = vmmov %vm16225_vm11  ;;  %v7510_v43 = vunpack.i.l.bf16 %v7509_v29 }
 0x24a   : > { %v2475_v61 = vsel %vm1377_vm12, %v2286_v15, %v2303_v38  ;;  %v2479_v19 = vsel %vm1380_vm14, %v2476_v10, %v7486_v62  ;;  %v7529_v38 = vpop.permute.xlu1 %7528 }
 0x24b   : > { %v2478_v63 = vsel %vm1380_vm14, %v2475_v61, %v2320_v44  ;;  %v1134_v61 = vmul.f32 %v16228_v20, %v16190_v12  ;;  %v2410_v51 = vsel %vm1324_vm1, %v7510_v43, %v7511_v48  ;;  %v7531_v16 = vunpack.i.h.bf16 %v7529_v38 }
 0x24c   : > { %v7489_v11 = vpop.permute.xlu0 %7488 }
 0x24d   : > { %v7491_v26 = vunpack.i.h.bf16 %v7489_v11  ;;  %v7490_v17 = vunpack.i.l.bf16 %v7489_v11 }
 0x24f   : > { %v2336_v27 = vsel %vm16225_vm11, %v7076_v1, %v7490_v17  ;;  %v2337_v52 = vsel %vm16226_vm9, %v7490_v17, %v7491_v26  ;;  %v2482_v31 = vsel %vm1383_vm7, %v2479_v19, %v7491_v26  ;;  %vm16233_vm11 = vcmask 867328  }
 0x250   : > { %v7494_v36 = vpop.permute.xlu0 %7493  ;;  %v2480_v5 = vsel %vm1383_vm7, %v2477_v42, %v2336_v27  ;;  %v2481_v59 = vsel %vm1383_vm7, %v2478_v63, %v2337_v52  ;;  %v7530_v52 = vunpack.i.l.bf16 %v7529_v38  ;;  %vm16234_vm9 = vmmov %vm16233_vm11 }
 0x251   : > { %v7622_v46 = vpack.i.bf16 %v2480_v5, %v2473_v34  ;;  %v7627_v39 = vpack.i.bf16 %v2482_v31, %v2481_v59  ;;  %v7496_v60 = vunpack.i.h.bf16 %v7494_v36  ;;  %v7495_v47 = vunpack.i.l.bf16 %v7494_v36 }
 0x253   : > { %7623 = vrot.lane.b32.xlu0 %v7622_v46, %s9274_s13  ;;  %7628 = vrot.lane.b32.xlu1 %v7627_v39, %s9274_s13  ;;  %v2363_v14 = vsel %vm1022_vm0, %v7495_v47, %v7496_v60  ;;  %v2483_v35 = vsel %vm1377_vm12, %v7411_v30, %v7495_v47  ;;  %v2364_v23 = vsel %vm1022_vm0, %v7496_v60, %v11283_v32 }
 0x254   : > { %v7499_v53 = vpop.permute.xlu0 %7498  ;;  %v2484_v0 = vsel %vm1377_vm12, %v2347_v50, %v2363_v14  ;;  %v2409_v32 = vsel %vm1324_vm1, %v7441_v9, %v7510_v43  ;;  %v2485_v26 = vsel %vm1377_vm12, %v11269_v25, %v2364_v23 }
 0x255   : > { %v7501_v58 = vunpack.i.h.bf16 %v7499_v53  ;;  %v7500_v18 = vunpack.i.l.bf16 %v7499_v53 }
 0x257   : > { %v2380_v8 = vsel %vm1293_vm15, %v7500_v18, %v7501_v58  ;;  %v2486_v13 = vsel %vm1380_vm14, %v2483_v35, %v7500_v18  ;;  %v2381_v15 = vsel %vm1293_vm15, %v7501_v58, %v11301_v7  ;;  %v7539_v7 = vpop.permute.xlu1 %7538  ;;  %v2728_v35 = vld [vmem:[%s15351_s1 + $0x8] sm:$0xff] }
 0x258   : > { %v7504_v22 = vpop.permute.xlu0 %7503  ;;  %v2487_v55 = vsel %vm1380_vm14, %v2484_v0, %v2380_v8  ;;  %v2489_v2 = vsel %vm1383_vm7, %v2486_v13, %v7431_v3  ;;  %v2488_v44 = vsel %vm1380_vm14, %v2485_v26, %v2381_v15  ;;  %v7541_v5 = vunpack.i.h.bf16 %v7539_v7  ;;  %v16236_v13 = vld [vmem:[#allocation25_spill] sm:$0xff]  ;;  %v16237_v0 = vld [vmem:[#allocation23_spill] sm:$0xff] }
 0x259   : > { %v7505_v45 = vunpack.i.l.bf16 %v7504_v22  ;;  %v7506_v21 = vunpack.i.h.bf16 %v7504_v22  ;;  %v7540_v59 = vunpack.i.l.bf16 %v7539_v7  ;;  %v16242_v26 = vld [vmem:[#allocation7_spill] sm:$0xff] }
 0x25b   : > { %v2397_v37 = vsel %vm1310_vm13, %v7431_v3, %v7505_v45  ;;  %v2398_v11 = vsel %vm1310_vm13, %v7505_v45, %v7506_v21  ;;  %v7549_v60 = vpop.permute.xlu1 %7548  ;;  %v2501_v3 = vsel %vm1377_vm12, %v1134_v61, 1.0  ;;  %v1135_v45 = vmul.f32 %v16236_v13, %v16197_v41 }
 0x25c   : > { %v7514_v56 = vpop.permute.xlu0 %7513  ;;  %v2490_v24 = vsel %vm1383_vm7, %v2487_v55, %v2397_v37  ;;  %v2491_v27 = vsel %vm1383_vm7, %v2488_v44, %v2398_v11  ;;  %v2541_v55 = vsel %vm2540_vm4, %v7530_v52, %v7531_v16  ;;  %v7550_v23 = vunpack.i.l.bf16 %v7549_v60 }
 0x25d   : > { %v7632_v49 = vpack.i.bf16 %v2490_v24, %v2489_v2  ;;  %v7515_v57 = vunpack.i.l.bf16 %v7514_v56  ;;  %v7516_v62 = vunpack.i.h.bf16 %v7514_v56  ;;  %v2544_v2 = vsel %vm2540_vm4, %v7540_v59, %v7541_v5 }
 0x25e   : > { %v2502_v41 = vsel %vm1377_vm12, %v1135_v45, 1.0  ;;  %v7551_v28 = vunpack.i.h.bf16 %v7549_v60 }
 0x25f   : > { %7633 = vrot.lane.b32.xlu0 %v7632_v49, %s9274_s13  ;;  %v2492_v17 = vsel %vm1377_vm12, %v7441_v9, %v7515_v57  ;;  %v2426_v12 = vsel %vm16229_vm5, %v7515_v57, %v7516_v62  ;;  %v2427_v42 = vsel %vm16230_vm2, %v7516_v62, %v2425_v40  ;;  %vm16235_vm5 = vcmask 285696  }
 0x260   : > { %v7519_v10 = vpop.permute.xlu0 %7518  ;;  %v2493_v46 = vsel %vm1377_vm12, %v2409_v32, %v2426_v12  ;;  %v2494_v39 = vsel %vm1377_vm12, %v2410_v51, %v2427_v42  ;;  %6221 = vmatprep.mubr.msk.f32.mxu0 %vm16235_vm5, %v2728_v35  ;;  %vm16258_vm2 = vcmask 982016  }
 0x261   : > { %v7521_v6 = vunpack.i.h.bf16 %v7519_v10  ;;  %v7520_v1 = vunpack.i.l.bf16 %v7519_v10 }
 0x263   : > { %v2495_v4 = vsel %vm1380_vm14, %v2492_v17, %v7520_v1  ;;  %v2443_v19 = vsel %vm16231_vm10, %v7520_v1, %v7521_v6  ;;  %v2444_v29 = vsel %vm16232_vm8, %v7521_v6, %v2442_v33  ;;  %v1136_v33 = vmul.f32 0.0, %v16237_v0  ;;  %vm16259_vm10 = vmmov %vm16258_vm2 }
 0x264   : > { %v7524_v63 = vpop.permute.xlu0 %7523  ;;  %v2498_v25 = vsel %vm1383_vm7, %v2495_v4, %v7151_v54  ;;  %v2496_v47 = vsel %vm1380_vm14, %v2493_v46, %v2443_v19  ;;  %v2497_v53 = vsel %vm1380_vm14, %v2494_v39, %v2444_v29  ;;  %vm2646_vm14 = vcmask 367616   ;;  %vm16260_vm8 = vmmov %vm16235_vm5 }
 0x265   : > { %v7526_v31 = vunpack.i.h.bf16 %v7524_v63  ;;  %v7525_v34 = vunpack.i.l.bf16 %v7524_v63  ;;  %v7637_v36 = vpack.i.bf16 %v2498_v25, %v2491_v27  ;;  %v2503_v9 = vsel %vm1377_vm12, %v1136_v33, 1.0  ;;  %v16243_v27 = vld [vmem:[#allocation6_spill] sm:$0xff] }
 0x266   : > { %vm2699_vm12 = vcmask 121856   ;;  %vm16268_vm5 = vcmask 7168  }
 0x267   : > { %v2460_v40 = vsel %vm16233_vm11, %v7151_v54, %v7525_v34  ;;  %v2461_v30 = vsel %vm16234_vm9, %v7525_v34, %v7526_v31  ;;  %7638 = vrot.lane.b32.xlu1 %v7637_v36, %s9274_s13  ;;  %v16245_v31 = vld [vmem:[#allocation5_spill] sm:$0xff]  ;;  %vm16266_vm11 = vcmask 277504  }
 0x268   : > { %v7534_v58 = vpop.permute.xlu0 %7533  ;;  %v2499_v18 = vsel %vm1383_vm7, %v2496_v47, %v2460_v40  ;;  %v2500_v14 = vsel %vm1383_vm7, %v2497_v53, %v2461_v30  ;;  %v7559_v37 = vpop.permute.xlu1 %7558  ;;  %vm2593_vm7 = vcmask 613376   ;;  %vm16267_vm9 = vmmov %vm16266_vm11 }
 0x269   : > { %v7536_v8 = vunpack.i.h.bf16 %v7534_v58  ;;  %v7535_v22 = vunpack.i.l.bf16 %v7534_v58  ;;  %v7642_v50 = vpack.i.bf16 %v2500_v14, %v2499_v18  ;;  %v7561_v54 = vunpack.i.h.bf16 %v7559_v37 }
 0x26a   : > { %v7560_v20 = vunpack.i.l.bf16 %v7559_v37 }
 0x26b   : > { %7643 = vrot.lane.b32.xlu0 %v7642_v50, %s9274_s13  ;;  %2719 = vrot.lane.b32.xlu1 %v2501_v3, %s16238_s7  ;;  %v2542_v56 = vsel %vm2540_vm4, %v7531_v16, %v7535_v22  ;;  %v2543_v24 = vsel %vm2540_vm4, %v7536_v8, %v7540_v59  ;;  %v16240_v16 = vld [vmem:[#allocation4_spill] sm:$0xff]  ;;  %s9277_s13 = smov 36  }
 0x26c   : > { %v7544_v48 = vpop.permute.xlu0 %7543  ;;  %v6243_v43 = vpack.c.bf16 %v2544_v2, %v2542_v56  ;;  %v6245_v21 = vpack.c.bf16 %v2543_v24, %v2541_v55  ;;  %v2594_v4 = vsel %vm2593_vm7, %v7560_v20, %v7561_v54 }
 0x26d   : > { %v7546_v49 = vunpack.i.h.bf16 %v7544_v48  ;;  %v7545_v57 = vunpack.i.l.bf16 %v7544_v48 }
 0x26e   : > { %6244 = vmatprep.subr.bf16.mxu0 %v6243_v43 }
 0x26f   : > { %v7569_v38 = vpop.permute.xlu1 %7568  ;;  %2721 = vrot.lane.b32.xlu0 %v2502_v41, %s16238_s7  ;;  %2723 = vrot.lane.b32.xlu1 %v2503_v9, %s16238_s7  ;;  %v2546_v51 = vsel %vm2540_vm4, %v7546_v49, %v7550_v23  ;;  %v2545_v1 = vsel %vm2540_vm4, %v7545_v57, %v7546_v49  ;;  %s16253_s7 = smov 51  }
 0x270   : > { %6246 = vmatpush1.bf16.msra.mxu0 %v6245_v21  ;;  %v7571_v61 = vunpack.i.h.bf16 %v7569_v38  ;;  %v7570_v11 = vunpack.i.l.bf16 %v7569_v38 }
 0x271   : > { %v7554_v62 = vpop.permute.xlu0 %7553 }
 0x272   : > { %v7556_v15 = vunpack.i.h.bf16 %v7554_v62  ;;  %v7555_v10 = vunpack.i.l.bf16 %v7554_v62  ;;  %v2597_v29 = vsel %vm2593_vm7, %v7570_v11, %v7571_v61 }
 0x273   : > { %7648 = vrot.lane.b32.xlu0 %v16240_v16, %s16239_s8  ;;  %7653 = vrot.lane.b32.xlu1 %v16242_v26, %s16241_s19  ;;  %s9278_s8 = smov 52   ;;  %s16254_s19 = smov 64  }
 0x274   : > { %v2548_v6 = vsel %vm2540_vm4, %v7555_v10, %v7556_v15  ;;  %v2547_v32 = vsel %vm2540_vm4, %v7551_v28, %v7555_v10  ;;  %vm2737_vm4 = vcmask 1042432  }
 0x275   : > { %v6247_v7 = vpack.c.bf16 %v2548_v6, %v2546_v51  ;;  %v6249_v44 = vpack.c.bf16 %v2547_v32, %v2545_v1 }
 0x277   : > { %v7564_v17 = vpop.permute.xlu0 %7563  ;;  %6248 = vmatprep.subr.bf16.mxu0 %v6247_v7  ;;  %7658 = vrot.lane.b32.xlu0 %v16243_v27, %s9275_s20  ;;  %s16255_s20 = smov 65  }
 0x278   : > { %v7566_v12 = vunpack.i.h.bf16 %v7564_v17  ;;  %v7565_v42 = vunpack.i.l.bf16 %v7564_v17  ;;  %6250 = vmatpush1.bf16.msra.mxu0 %v6249_v44  ;;  %7663 = vrot.lane.b32.xlu1 %v16245_v31, %s16244_s28  ;;  %s16256_s28 = smov 67  }
 0x27a   : > { %v2595_v19 = vsel %vm2593_vm7, %v7561_v54, %v7565_v42  ;;  %v2596_v63 = vsel %vm2593_vm7, %v7566_v12, %v7570_v11 }
 0x27b   : > { %v6251_v25 = vpack.c.bf16 %v2597_v29, %v2595_v19  ;;  %v6253_v52 = vpack.c.bf16 %v2596_v63, %v2594_v4  ;;  %7668 = vrot.lane.b32.xlu0 %v16240_v16, %s16246_s27  ;;  %v7574_v34 = vpop.permute.xlu0 %7573  ;;  %s16257_s27 = smov 68  }
 0x27c   : > { %7673 = vrot.lane.b32.xlu1 %v16242_v26, %s16247_s14  ;;  %v7576_v36 = vunpack.i.h.bf16 %v7574_v34  ;;  %v7575_v5 = vunpack.i.l.bf16 %v7574_v34 }
 0x27d   : > { %6252 = vmatprep.subr.bf16.mxu0 %v6251_v25 }
 0x27e   : > { %6254 = vmatpush1.bf16.msra.mxu0 %v6253_v52  ;;  %v2598_v58 = vsel %vm2593_vm7, %v7575_v5, %v7576_v36 }
 0x27f   : > { %7678 = vrot.lane.b32.xlu0 %v16243_v27, %s9276_s21  ;;  %s15717_s21 = smov 79  }
 0x280   : > { %7683 = vrot.lane.b32.xlu1 %v16245_v31, %s16248_s11 }
 0x282   : > { %v7584_v59 = vpop.permute.xlu0 %7583  ;;  %v7579_v46 = vpop.permute.xlu1 %7578 }
 0x283   : > { %v7586_v39 = vunpack.i.h.bf16 %v7584_v59  ;;  %v7585_v60 = vunpack.i.l.bf16 %v7584_v59  ;;  %v7581_v47 = vunpack.i.h.bf16 %v7579_v46  ;;  %v7580_v53 = vunpack.i.l.bf16 %v7579_v46  ;;  %7688 = vrot.lane.b32.xlu0 %v16240_v16, %s16249_s22 }
 0x284   : > { %7693 = vrot.lane.b32.xlu1 %v16242_v26, %s16250_s12 }
 0x285   : > { %v2599_v40 = vsel %vm2593_vm7, %v7576_v36, %v7580_v53  ;;  %v2601_v30 = vsel %vm2593_vm7, %v7585_v60, %v7586_v39  ;;  %v2600_v18 = vsel %vm2593_vm7, %v7581_v47, %v7585_v60  ;;  %vm16274_vm7 = vmmov %vm16267_vm9 }
 0x286   : > { %v6255_v14 = vpack.c.bf16 %v2601_v30, %v2599_v40  ;;  %v6257_v35 = vpack.c.bf16 %v2600_v18, %v2598_v58 }
 0x287   : > { %7698 = vrot.lane.b32.xlu0 %v16243_v27, %s9277_s13 }
 0x288   : > { %6256 = vmatprep.subr.bf16.mxu0 %v6255_v14  ;;  %7703 = vrot.lane.b32.xlu1 %v16245_v31, %s16251_s9  ;;  %s16261_s9 = smov 34  }
 0x289   : > { %6258 = vmatpush1.bf16.msra.mxu0 %v6257_v35 }
 0x28b   : > { %7708 = vrot.lane.b32.xlu0 %v16240_v16, %s16252_s17  ;;  %s9279_s17 = smov 94  }
 0x28c   : > { %7713 = vrot.lane.b32.xlu1 %v16242_v26, %s16253_s7  ;;  %s9280_s7 = smov 95  }
 0x28d   : > { %v7589_v8 = vpop.permute.xlu1 %7588 }
 0x28e   : > { %v7591_v50 = vunpack.i.h.bf16 %v7589_v8  ;;  %v7590_v3 = vunpack.i.l.bf16 %v7589_v8  ;;  %v2727_v8 = vld [vmem:[%s15351_s1] sm:$0xff] }
 0x28f   : > { %7718 = vrot.lane.b32.xlu0 %v16243_v27, %s9278_s8  ;;  %s16321_s8 = smov 96  }
 0x290   : > { %7723 = vrot.lane.b32.xlu1 %v16245_v31, %s16254_s19  ;;  %v2647_v2 = vsel %vm2646_vm14, %v7590_v3, %v7591_v50  ;;  %v2729_v3 = vld [vmem:[%s15351_s1 + $0x10] sm:$0xff]  ;;  %s9281_s19 = smov 93  }
 0x293   : > { %v7594_v22 = vpop.permute.xlu0 %7593  ;;  %7728 = vrot.lane.b32.xlu0 %v16240_v16, %s16255_s20  ;;  %s9282_s20 = smov 92  }
 0x294   : > { %7733 = vrot.lane.b32.xlu1 %v16242_v26, %s16256_s28  ;;  %v7595_v13 = vunpack.i.l.bf16 %v7594_v22  ;;  %v7596_v0 = vunpack.i.h.bf16 %v7594_v22  ;;  %s16325_s28 = smov 80  }
 0x296   : > { %v2648_v37 = vsel %vm2646_vm14, %v7591_v50, %v7595_v13  ;;  %v2730_v50 = vld [vmem:[%s15351_s1 + $0x18] sm:$0xff] }
 0x297   : > { %v7599_v45 = vpop.permute.xlu1 %7598  ;;  %7738 = vrot.lane.b32.xlu0 %v16243_v27, %s16257_s27 }
 0x298   : > { %v7601_v33 = vunpack.i.h.bf16 %v7599_v45  ;;  %v7600_v55 = vunpack.i.l.bf16 %v7599_v45 }
 0x29a   : > { %v2650_v56 = vsel %vm2646_vm14, %v7600_v55, %v7601_v33  ;;  %v2649_v24 = vsel %vm2646_vm14, %v7596_v0, %v7600_v55 }
 0x29b   : > { %v6259_v48 = vpack.c.bf16 %v2650_v56, %v2648_v37  ;;  %v6261_v43 = vpack.c.bf16 %v2649_v24, %v2647_v2 }
 0x29d   : > { %6260 = vmatprep.subr.bf16.mxu0 %v6259_v48 }
 0x29e   : > { %6262 = vmatpush1.bf16.msra.mxu0 %v6261_v43 }
 0x2a5   : > { %v7604_v21 = vpop.permute.xlu0 %7603 }
 0x2a6   : > { %v7606_v49 = vunpack.i.h.bf16 %v7604_v21  ;;  %v7605_v41 = vunpack.i.l.bf16 %v7604_v21 }
 0x2a8   : > { %v2651_v10 = vsel %vm2646_vm14, %v7605_v41, %v7606_v49 }
 0x2ae   : > { %v7609_v9 = vpop.permute.xlu1 %7608 }
 0x2af   : > { %v7611_v57 = vunpack.i.h.bf16 %v7609_v9  ;;  %v7610_v38 = vunpack.i.l.bf16 %v7609_v9  ;;  %v7614_v23 = vpop.permute.xlu0 %7613 }
 0x2b0   : > { %v7616_v62 = vunpack.i.h.bf16 %v7614_v23  ;;  %v7615_v28 = vunpack.i.l.bf16 %v7614_v23 }
 0x2b1   : > { %v2652_v54 = vsel %vm2646_vm14, %v7606_v49, %v7610_v38 }
 0x2b2   : > { %v2654_v15 = vsel %vm2646_vm14, %v7615_v28, %v7616_v62  ;;  %v2653_v20 = vsel %vm2646_vm14, %v7611_v57, %v7615_v28  ;;  %vm16275_vm14 = vcmask 23552  }
 0x2b3   : > { %v6263_v61 = vpack.c.bf16 %v2654_v15, %v2652_v54  ;;  %v6265_v51 = vpack.c.bf16 %v2653_v20, %v2651_v10 }
 0x2b5   : > { %6264 = vmatprep.subr.bf16.mxu0 %v6263_v61 }
 0x2b6   : > { %6266 = vmatpush1.bf16.msra.mxu0 %v6265_v51 }
 0x2b9   : > { %v7619_v11 = vpop.permute.xlu1 %7618 }
 0x2ba   : > { %v7621_v6 = vunpack.i.h.bf16 %v7619_v11  ;;  %v7620_v1 = vunpack.i.l.bf16 %v7619_v11 }
 0x2bc   : > { %v2700_v4 = vsel %vm2699_vm12, %v7620_v1, %v7621_v6 }
 0x2c5   : > { %v7624_v32 = vpop.permute.xlu0 %7623  ;;  %v7629_v16 = vpop.permute.xlu1 %7628 }
 0x2c6   : > { %v7626_v26 = vunpack.i.h.bf16 %v7624_v32  ;;  %v7625_v17 = vunpack.i.l.bf16 %v7624_v32  ;;  %v7631_v7 = vunpack.i.h.bf16 %v7629_v16  ;;  %v7630_v44 = vunpack.i.l.bf16 %v7629_v16 }
 0x2c8   : > { %v2701_v12 = vsel %vm2699_vm12, %v7621_v6, %v7625_v17  ;;  %v2703_v42 = vsel %vm2699_vm12, %v7630_v44, %v7631_v7  ;;  %v2702_v19 = vsel %vm2699_vm12, %v7626_v26, %v7630_v44 }
 0x2c9   : > { %v6267_v29 = vpack.c.bf16 %v2703_v42, %v2701_v12  ;;  %v6269_v63 = vpack.c.bf16 %v2702_v19, %v2700_v4 }
 0x2cb   : > { %6268 = vmatprep.subr.bf16.mxu0 %v6267_v29 }
 0x2cc   : > { %6270 = vmatpush1.bf16.msra.mxu0 %v6269_v63 }
 0x2d1   : > { %v7634_v27 = vpop.permute.xlu0 %7633 }
 0x2d2   : > { %v7636_v52 = vunpack.i.h.bf16 %v7634_v27  ;;  %v7635_v31 = vunpack.i.l.bf16 %v7634_v27 }
 0x2d4   : > { %v2704_v53 = vsel %vm2699_vm12, %v7635_v31, %v7636_v52  ;;  %v16278_v31 = vld [vmem:[#allocation3_spill] sm:$0xff] }
 0x2d9   : > { %v7639_v25 = vpop.permute.xlu1 %7638 }
 0x2da   : > { %v7640_v34 = vunpack.i.l.bf16 %v7639_v25  ;;  %v7641_v59 = vunpack.i.h.bf16 %v7639_v25 }
 0x2dc   : > { %v2705_v60 = vsel %vm2699_vm12, %v7636_v52, %v7640_v34 }
 0x2dd   : > { %v7644_v36 = vpop.permute.xlu0 %7643  ;;  %v2720_v5 = vpop.permute.xlu1 %2719 }
 0x2de   : > { %v7646_v46 = vunpack.i.h.bf16 %v7644_v36  ;;  %v7645_v39 = vunpack.i.l.bf16 %v7644_v36  ;;  %v16279_v36 = vld [vmem:[#allocation2_spill] sm:$0xff] }
 0x2e0   : > { %v2707_v47 = vsel %vm2699_vm12, %v7645_v39, %v7646_v46  ;;  %v2706_v40 = vsel %vm2699_vm12, %v7641_v59, %v7645_v39  ;;  %vm2879_vm12 = vcmask 31744  }
 0x2e1   : > { %v2722_v30 = vpop.permute.xlu0 %2721  ;;  %v2724_v58 = vpop.permute.xlu1 %2723  ;;  %v6271_v18 = vpack.c.bf16 %v2707_v47, %v2705_v60  ;;  %v6273_v14 = vpack.c.bf16 %v2706_v40, %v2704_v53 }
 0x2e2   : > { %v2726_v35 = vsel %vm16258_vm2, %v2722_v30, %v2724_v58  ;;  %v2725_v22 = vsel %vm16259_vm10, %v2720_v5, %v2722_v30  ;;  %vm16285_vm2 = vcmask 130048   ;;  %vm2936_vm10 = vcmask 162816  }
 0x2e3   : > { %6272 = vmatprep.subr.bf16.mxu0 %v6271_v18 }
 0x2e4   : > { %6274 = vmatpush1.bf16.msra.mxu0 %v6273_v14 }
 0x2e5   : > { %6219 = vmatprep.subr.msk.mxu0 %vm2737_vm4, %v2726_v35  ;;  %v7649_v55 = vpop.permute.xlu0 %7648  ;;  %v7654_v56 = vpop.permute.xlu1 %7653 }
 0x2e6   : > { %v11494_v20 = vunpack.i.h.bf16 %v7649_v55  ;;  %v11496_v61 = vunpack.i.l.bf16 %v7649_v55  ;;  %v11498_v11 = vunpack.i.h.bf16 %v7654_v56  ;;  %v11500_v6 = vunpack.i.l.bf16 %v7654_v56 }
 0x2e8   : > { %6220 = vmatpush1.msk.msra.mxu0 %vm2737_vm4, %v2725_v22  ;;  %16262 = vst [vmem:[#allocation50_spill] sm:$0xff] %v11494_v20  ;;  %16263 = vst [vmem:[#allocation51_spill] sm:$0xff] %v11496_v61  ;;  %v11514_v26 = vsel %vm16268_vm5, %v11496_v61, %v11494_v20  ;;  %v11544_v25 = vsel %vm16275_vm14, %v11500_v6, %v11498_v11  ;;  %vm16306_vm5 = vcmask 261120   ;;  %vm2993_vm14 = vcmask 293888  }
 0x2e9   : > { %2807 = vmatmul.mubr.f32.vlgmr.msra.gmra.mrb[0].mxu0 %v2727_v8  ;;  %v7659_v37 = vpop.permute.xlu0 %7658  ;;  %16264 = vst [vmem:[#allocation14_spill] sm:$0xff] %v11498_v11  ;;  %16265 = vst [vmem:[#allocation17_spill] sm:$0xff] %v11500_v6 }
 0x2ea   : > { %6222 = vmatprep.mubr.msk.f32.mxu0 %vm16260_vm8, %v2730_v50  ;;  %v7664_v24 = vpop.permute.xlu1 %7663  ;;  %v11524_v12 = vunpack.i.h.bf16 %v7659_v37  ;;  %v11526_v42 = vunpack.i.l.bf16 %v7659_v37  ;;  %16276 = vst [vmem:[#allocation52_spill] sm:$0xff] %v11544_v25  ;;  %vm16277_vm4 = vmmov %vm16274_vm7  ;;  %vm16290_vm8 = vcmask 138240  }
 0x2eb   : > { %v11528_v4 = vunpack.i.h.bf16 %v7664_v24  ;;  %v11530_v29 = vunpack.i.l.bf16 %v7664_v24 }
 0x2ec   : > { %16270 = vst [vmem:[#allocation36_spill] sm:$0xff] %v11524_v12  ;;  %16271 = vst [vmem:[#allocation22_spill] sm:$0xff] %v11526_v42  ;;  %v11576_v14 = vsel %vm2879_vm12, %v11526_v42, %v11524_v12  ;;  %vm16315_vm12 = vcmask 392192  }
 0x2ed   : > { %2813 = vmatmul.mubr.f32.gmra.mrb[2].mxu0 %v2729_v3  ;;  %v7669_v2 = vpop.permute.xlu0 %7668  ;;  %16272 = vst [vmem:[#allocation39_spill] sm:$0xff] %v11528_v4  ;;  %16273 = vst [vmem:[#allocation43_spill] sm:$0xff] %v11530_v29  ;;  %v11581_v35 = vsel %vm16285_vm2, %v11530_v29, %v11528_v4  ;;  %vm16323_vm2 = vcmask 416768  }
 0x2ee   : > { %v11468_v43 = vpop.permute.xlu1 %7673  ;;  %v11560_v47 = vunpack.i.h.bf16 %v7669_v2  ;;  %v11562_v53 = vunpack.i.l.bf16 %v7669_v2  ;;  %16284 = vst [vmem:[#allocation46_spill] sm:$0xff] %v11576_v14  ;;  %16286 = vst [vmem:[#allocation13_spill] sm:$0xff] %v11581_v35 }
 0x2f0   : > { %16280 = vst [vmem:[#allocation53_spill] sm:$0xff] %v11560_v47  ;;  %16281 = vst [vmem:[#allocation54_spill] sm:$0xff] %v11562_v53  ;;  %v11606_v37 = vsel %vm16290_vm8, %v11562_v53, %v11560_v47  ;;  %vm16328_vm8 = vcmask 523264  }
 0x2f1   : > { %v7679_v48 = vpop.permute.xlu0 %7678  ;;  %16291 = vst [vmem:[#allocation30_spill] sm:$0xff] %v11606_v37 }
 0x2f2   : > { %v11472_v49 = vpop.permute.xlu1 %7683  ;;  %v11564_v40 = vunpack.i.h.bf16 %v7679_v48  ;;  %v11568_v58 = vunpack.i.l.bf16 %v7679_v48 }
 0x2f4   : > { %16282 = vst [vmem:[#allocation55_spill] sm:$0xff] %v11564_v40  ;;  %16283 = vst [vmem:[#allocation48_spill] sm:$0xff] %v11568_v58  ;;  %v11618_v48 = vsel %vm2936_vm10, %v11568_v58, %v11564_v40  ;;  %vm16326_vm10 = vcmask 531456  }
 0x2f5   : > { %v11470_v21 = vpop.permute.xlu0 %7688  ;;  %16293 = vst [vmem:[#allocation41_spill] sm:$0xff] %v11618_v48 }
 0x2f6   : > { %v11476_v9 = vpop.permute.xlu1 %7693  ;;  %v11598_v55 = vunpack.i.h.bf16 %v11470_v21  ;;  %v11609_v56 = vunpack.i.l.bf16 %v11470_v21 }
 0x2f8   : > { %16289 = vst [vmem:[#allocation21_spill] sm:$0xff] %v11598_v55  ;;  %16292 = vst [vmem:[#allocation28_spill] sm:$0xff] %v11609_v56 }
 0x2f9   : > { %v11474_v41 = vpop.permute.xlu0 %7698 }
 0x2fa   : > { %v11480_v38 = vpop.permute.xlu1 %7703 }
 0x2fd   : > { %v11478_v57 = vpop.permute.xlu0 %7708 }
 0x2fe   : > { %v11484_v62 = vpop.permute.xlu1 %7713 }
 0x301   : > { %v11482_v23 = vpop.permute.xlu0 %7718 }
 0x302   : > { %v11488_v54 = vpop.permute.xlu1 %7723 }
 0x305   : > { %v11486_v28 = vpop.permute.xlu0 %7728 }
 0x306   : > { %v11492_v10 = vpop.permute.xlu1 %7733 }
 0x309   : > { %v11490_v15 = vpop.permute.xlu0 %7738 }
 0x3bc   : > { %v2808_v13 = vpop.f32.mrb[0].mxu0 }
 0x3bd   : > { %2823 = vrot.lane.b32.xlu0 %v2808_v13, %s16261_s9  ;;  %v2810_v45 = vpop.f32.mrb[1].mxu0 }
 0x3be   : > { %2825 = vrot.lane.b32.xlu1 %v2810_v45, %s16261_s9 }
 0x3c0   : > { %v2814_v0 = vpop.f32.mrb[2].mxu0 }
 0x3c1   : > { %2827 = vrot.lane.b32.xlu0 %v2814_v0, %s16261_s9  ;;  %v2816_v33 = vpop.f32.mrb[3].mxu0  ;;  %v11592_v0 = vunpack.i.h.bf16 %v11468_v43 }
 0x3c2   : > { %2829 = vrot.lane.b32.xlu1 %v2816_v33, %s16261_s9  ;;  %v11595_v33 = vunpack.i.l.bf16 %v11468_v43 }
 0x3c3   : > { %16287 = vst [vmem:[#allocation15_spill] sm:$0xff] %v11592_v0 }
 0x3c4   : > { %16288 = vst [vmem:[#allocation18_spill] sm:$0xff] %v11595_v33 }
 0x42f   : > { %v2824_v51 = vpop.permute.xlu0 %2823 }
 0x430   : > { %v11503_v1 = vsel %vm16266_vm11, 0.0, %v2824_v51  ;;  %v11505_v32 = vpop.permute.xlu1 %2825  ;;  %vm16298_vm11 = vcmask 154624  }
 0x431   : > { %v11509_v16 = vsel %vm16267_vm9, %v2824_v51, %v11505_v32  ;;  %v2855_v7 = vmul.f32 %v11496_v61, %v11503_v1  ;;  %v2869_v39 = vmul.f32 %v11500_v6, %v11503_v1  ;;  %v2843_v30 = vmul.f32 %v16279_v36, %v11503_v1 }
 0x432   : > { %v11518_v17 = vpack.i.bf16 %v11509_v16, %v11503_v1  ;;  %v2856_v44 = vmul.f32 %v11514_v26, %v11509_v16  ;;  %v2844_v34 = vmul.f32 %v16278_v31, %v11509_v16  ;;  %v2870_v60 = vmul.f32 %v11544_v25, %v11509_v16 }
 0x433   : > { %v2828_v19 = vpop.permute.xlu0 %2827  ;;  %v2884_v22 = vmul.f32 %v11526_v42, %v11503_v1  ;;  %v2885_v3 = vmul.f32 %v11576_v14, %v11509_v16  ;;  %v2898_v13 = vmul.f32 %v11530_v29, %v11503_v1  ;;  %v2899_v45 = vmul.f32 %v11581_v35, %v11509_v16 }
 0x434   : > { %16269 = vst [vmem:[#allocation8_spill] sm:$0xff] %v11518_v17  ;;  %v11533_v63 = vsel %vm16274_vm7, 0.0, %v2828_v19  ;;  %7743 = vrot.lane.b32.xlu0 %v11518_v17, %s9257_s26  ;;  %7748 = vrot.lane.b32.xlu1 %v11518_v17, %s9264_s29  ;;  %v11539_v27 = vpop.permute.xlu1 %2829  ;;  %v7762_v59 = vpack.i.bf16 %v2856_v44, %v2855_v7  ;;  %v7767_v50 = vpack.i.bf16 %v2870_v60, %v2869_v39  ;;  %v11625_v44 = vunpack.i.h.bf16 %v11472_v49 }
 0x435   : > { %v11548_v52 = vsel %vm16277_vm4, %v2828_v19, %v11539_v27  ;;  %v2845_v5 = vmul.f32 %v16279_v36, %v11533_v63  ;;  %v2912_v2 = vmul.f32 %v11562_v53, %v11503_v1  ;;  %v2913_v24 = vmul.f32 %v11606_v37, %v11509_v16 }
 0x436   : > { %v2846_v46 = vmul.f32 %v16278_v31, %v11548_v52  ;;  %v7772_v43 = vpack.i.bf16 %v2885_v3, %v2884_v22  ;;  %v7777_v51 = vpack.i.bf16 %v2899_v45, %v2898_v13  ;;  %v2941_v7 = vmul.f32 %v11568_v58, %v11503_v1  ;;  %16294 = vst [vmem:[#allocation38_spill] sm:$0xff] %v11625_v44 }
 0x437   : > { %v6277_v8 = vpack.c.bf16 %v2845_v5, %v2843_v30  ;;  %v2942_v21 = vmul.f32 %v11618_v48, %v11509_v16  ;;  %v11628_v19 = vunpack.i.l.bf16 %v11472_v49  ;;  %v11634_v5 = vunpack.i.l.bf16 %v11476_v9 }
 0x438   : > { %7753 = vrot.lane.b32.xlu0 %v11518_v17, %s9279_s17  ;;  %7763 = vrot.lane.b32.xlu1 %v7762_v59, %s9256_s10  ;;  %v6275_v18 = vpack.c.bf16 %v2846_v46, %v2844_v34  ;;  %v11631_v34 = vunpack.i.h.bf16 %v11476_v9  ;;  %v7782_v59 = vpack.i.bf16 %v2913_v24, %v2912_v2  ;;  %v11641_v46 = vsel %vm16298_vm11, %v11595_v33, %v11592_v0 }
 0x439   : > { %16295 = vst [vmem:[#allocation37_spill] sm:$0xff] %v11628_v19  ;;  %16297 = vst [vmem:[#allocation16_spill] sm:$0xff] %v11634_v5  ;;  %v2926_v49 = vmul.f32 %v11595_v33, %v11503_v1  ;;  %vm16300_vm9 = vcmask 269312   ;;  %v7792_v9 = vpack.i.bf16 %v2942_v21, %v2941_v7  ;;  %v2927_v60 = vmul.f32 %v11641_v46, %v11509_v16 }
 0x43a   : > { %6276 = vmatprep.subr.bf16.mxu1 %v6275_v18  ;;  %16296 = vst [vmem:[#allocation29_spill] sm:$0xff] %v11631_v34  ;;  %16299 = vst [vmem:[#allocation47_spill] sm:$0xff] %v11641_v46  ;;  %v11648_v39 = vsel %vm16300_vm9, %v11609_v56, %v11598_v55  ;;  %v2969_v30 = vmul.f32 %v11609_v56, %v11503_v1  ;;  %v11660_v22 = vunpack.i.l.bf16 %v11474_v41  ;;  %v11666_v3 = vunpack.i.l.bf16 %v11480_v38 }
 0x43b   : > { %6278 = vmatpush1.bf16.msra.mxu1 %v6277_v8  ;;  %16301 = vst [vmem:[#allocation42_spill] sm:$0xff] %v11648_v39  ;;  %v2970_v18 = vmul.f32 %v11648_v39, %v11509_v16  ;;  %v11657_v8 = vunpack.i.h.bf16 %v11474_v41  ;;  %v11673_v13 = vsel %vm16306_vm5, %v11628_v19, %v11625_v44  ;;  %v2955_v45 = vmul.f32 %v11628_v19, %v11503_v1 }
 0x43c   : > { %7758 = vrot.lane.b32.xlu0 %v11518_v17, %s9256_s10  ;;  %7768 = vrot.lane.b32.xlu1 %v7767_v50, %s9258_s24  ;;  %16303 = vst [vmem:[#allocation32_spill] sm:$0xff] %v11660_v22  ;;  %v11663_v50 = vunpack.i.h.bf16 %v11480_v38  ;;  %16305 = vst [vmem:[#allocation33_spill] sm:$0xff] %v11666_v3  ;;  %v2956_v41 = vmul.f32 %v11673_v13, %v11509_v16  ;;  %vm16308_vm7 = vcmask 285696   ;;  %v7787_v2 = vpack.i.bf16 %v2927_v60, %v2926_v49 }
 0x43d   : > { %16302 = vst [vmem:[#allocation26_spill] sm:$0xff] %v11657_v8  ;;  %16307 = vst [vmem:[#allocation34_spill] sm:$0xff] %v11673_v13  ;;  %v11682_v38 = vsel %vm16308_vm7, %v11634_v5, %v11631_v34  ;;  %v7802_v24 = vpack.i.bf16 %v2970_v18, %v2969_v30  ;;  %v11689_v7 = vunpack.i.h.bf16 %v11484_v62  ;;  %v11692_v21 = vunpack.i.h.bf16 %v11482_v23 }
 0x43e   : > { %16304 = vst [vmem:[#allocation19_spill] sm:$0xff] %v11663_v50  ;;  %16309 = vst [vmem:[#allocation35_spill] sm:$0xff] %v11682_v38  ;;  %v11704_v49 = vsel %vm2993_vm14, %v11660_v22, %v11657_v8  ;;  %v2998_v60 = vmul.f32 %v11660_v22, %v11503_v1  ;;  %vm3050_vm4 = vcmask 424960   ;;  %v11720_v31 = vunpack.i.h.bf16 %v11486_v28 }
 0x43f   : > { %16310 = vst [vmem:[#allocation12_spill] sm:$0xff] %v11689_v7  ;;  %16311 = vst [vmem:[#allocation11_spill] sm:$0xff] %v11692_v21  ;;  %v2999_v30 = vmul.f32 %v11704_v49, %v11509_v16  ;;  %v11723_v36 = vunpack.i.l.bf16 %v11486_v28  ;;  %v11726_v17 = vunpack.i.h.bf16 %v11488_v54  ;;  %vm16330_vm11 = vcmask 277504  }
 0x440   : > { %7773 = vrot.lane.b32.xlu0 %v7772_v43, %s9259_s25  ;;  %7778 = vrot.lane.b32.xlu1 %v7777_v51, %s9249_s18  ;;  %v2983_v43 = vmul.f32 %v11634_v5, %v11503_v1  ;;  %v2984_v51 = vmul.f32 %v11682_v38, %v11509_v16  ;;  %16314 = vst [vmem:[#allocation20_spill] sm:$0xff] %v11704_v49  ;;  %16317 = vst [vmem:[#allocation44_spill] sm:$0xff] %v11720_v31  ;;  %v11729_v49 = vunpack.i.l.bf16 %v11488_v54  ;;  %vm16344_vm5 = vcmask 547840  }
 0x441   : > { %16318 = vst [vmem:[#allocation10_spill] sm:$0xff] %v11723_v36  ;;  %16319 = vst [vmem:[#allocation45_spill] sm:$0xff] %v11726_v17  ;;  %v11774_v13 = vsel %vm16330_vm11, %v11539_v27, 0.0  ;;  %v11777_v48 = vunpack.i.h.bf16 %v11478_v57  ;;  %v11793_v27 = vunpack.i.l.bf16 %v11492_v10  ;;  %vm16351_vm7 = vcmask 556032  }
 0x442   : > { %v7807_v18 = vpack.i.bf16 %v2984_v51, %v2983_v43  ;;  %16320 = vst [vmem:[#allocation31_spill] sm:$0xff] %v11729_v49  ;;  %vm16334_vm9 = vmmov %vm16330_vm11  ;;  %vm16353_vm14 = vcmask 400384  }
 0x443   : > { %16331 = vst [vmem:[#allocation4_spill] sm:$0xff] %v11777_v48  ;;  %16336 = vst [vmem:[#allocation56_spill] sm:$0xff] %v11793_v27 }
 0x444   : > { %7783 = vrot.lane.b32.xlu0 %v7782_v59, %s9263_s5  ;;  %7793 = vrot.lane.b32.xlu1 %v7792_v9, %s9266_s23  ;;  %v11695_v59 = vunpack.i.l.bf16 %v11482_v23  ;;  %v11698_v9 = vunpack.i.l.bf16 %v11484_v62  ;;  %v11713_v23 = vsel %vm16315_vm12, %v11666_v3, %v11663_v50  ;;  %v7797_v62 = vpack.i.bf16 %v2956_v41, %v2955_v45 }
 0x445   : > { %16316 = vst [vmem:[#allocation9_spill] sm:$0xff] %v11713_v23  ;;  %v7812_v45 = vpack.i.bf16 %v2999_v30, %v2998_v60  ;;  %v11755_v30 = vsel %vm16326_vm10, %v11723_v36, %v11720_v31  ;;  %vm16395_vm12 = vcmask 1022976  }
 0x446   : > { %16312 = vst [vmem:[#allocation40_spill] sm:$0xff] %v11695_v59  ;;  %16313 = vst [vmem:[#allocation27_spill] sm:$0xff] %v11698_v9  ;;  %v11735_v41 = vsel %vm3050_vm4, %v11695_v59, %v11692_v21  ;;  %v3055_v28 = vmul.f32 %v11695_v59, %v11503_v1  ;;  %v11742_v43 = vsel %vm16323_vm2, %v11698_v9, %v11689_v7  ;;  %vm16398_vm2 = vcmask 1031168  }
 0x447   : > { %16322 = vst [vmem:[#allocation49_spill] sm:$0xff] %v11735_v41  ;;  %16324 = vst [vmem:[#allocation24_spill] sm:$0xff] %v11742_v43  ;;  %v3056_v51 = vmul.f32 %v11735_v41, %v11509_v16  ;;  %v3041_v60 = vmul.f32 %v11742_v43, %v11509_v16 }
 0x448   : > { %7788 = vrot.lane.b32.xlu0 %v7787_v2, %s9265_s30  ;;  %7803 = vrot.lane.b32.xlu1 %v7802_v24, %s9280_s7  ;;  %v3012_v2 = vmul.f32 %v11666_v3, %v11503_v1  ;;  %v3013_v24 = vmul.f32 %v11713_v23, %v11509_v16  ;;  %16327 = vst [vmem:[#allocation25_spill] sm:$0xff] %v11755_v30  ;;  %vm16396_vm4 = vmmov %vm16395_vm12 }
 0x449   : > { %v7827_v23 = vpack.i.bf16 %v3056_v51, %v3055_v28  ;;  %v11780_v28 = vunpack.i.l.bf16 %v11478_v57  ;;  %v11783_v51 = vunpack.i.h.bf16 %v11492_v10  ;;  %v11811_v10 = vmul.f32 %v11692_v21, %v11774_v13  ;;  %vm16399_vm10 = vmmov %vm16398_vm2 }
 0x44a   : > { %v7817_v54 = vpack.i.bf16 %v3013_v24, %v3012_v2  ;;  %v3084_v2 = vmul.f32 %v11755_v30, %v11509_v16  ;;  %v11764_v24 = vsel %vm16328_vm8, %v11729_v49, %v11726_v17  ;;  %vm16400_vm8 = vmmov %vm16398_vm2 }
 0x44b   : > { %16329 = vst [vmem:[#allocation23_spill] sm:$0xff] %v11764_v24  ;;  %v3070_v38 = vmul.f32 %v11764_v24, %v11509_v16  ;;  %16332 = vst [vmem:[#allocation7_spill] sm:$0xff] %v11780_v28 }
 0x44c   : > { %7798 = vrot.lane.b32.xlu0 %v7797_v62, %s16321_s8  ;;  %7808 = vrot.lane.b32.xlu1 %v7807_v18, %s9281_s19  ;;  %v3040_v62 = vmul.f32 %v11698_v9, %v11503_v1  ;;  %v3083_v18 = vmul.f32 %v11723_v36, %v11503_v1  ;;  %16333 = vst [vmem:[#allocation6_spill] sm:$0xff] %v11783_v51  ;;  %vm16401_vm11 = vmmov %vm16398_vm2 }
 0x44e   : > { %v7837_v39 = vpack.i.bf16 %v3084_v2, %v3083_v18  ;;  %v11825_v18 = vmul.f32 %v11755_v30, %v11548_v52  ;;  %v11828_v2 = vunpack.i.l.bf16 %v11490_v15  ;;  %v11879_v30 = vmul.f32 %v11793_v27, %v11533_v63 }
 0x450   : > { %7813 = vrot.lane.b32.xlu0 %v7812_v45, %s9282_s20  ;;  %7818 = vrot.lane.b32.xlu1 %v7817_v54, %s16325_s28  ;;  %v7822_v45 = vpack.i.bf16 %v3041_v60, %v3040_v62  ;;  %v3069_v54 = vmul.f32 %v11729_v49, %v11503_v1  ;;  %v11790_v62 = vunpack.i.h.bf16 %v11490_v15  ;;  %16340 = vst [vmem:[#allocation60_spill] sm:$0xff] %v11825_v18  ;;  %16341 = vst [vmem:[#allocation61_spill] sm:$0xff] %v11828_v2 }
 0x451   : > { %v11842_v60 = vmul.f32 %v11764_v24, %v11548_v52  ;;  %v11846_v15 = vmul.f32 %v11726_v17, %v11774_v13  ;;  %16348 = vst [vmem:[#allocation67_spill] sm:$0xff] %v11879_v30 }
 0x452   : > { %v7832_v46 = vpack.i.bf16 %v3070_v38, %v3069_v54  ;;  %16335 = vst [vmem:[#allocation5_spill] sm:$0xff] %v11790_v62  ;;  %v11803_v38 = vpack.i.bf16 %v11774_v13, %v11548_v52  ;;  %v11838_v54 = vmul.f32 %v11720_v31, %v11774_v13 }
 0x453   : > { %16342 = vst [vmem:[#allocation62_spill] sm:$0xff] %v11842_v60  ;;  %16343 = vst [vmem:[#allocation63_spill] sm:$0xff] %v11846_v15  ;;  %v11902_v60 = vsel %vm16351_vm7, %v11828_v2, %v11790_v62  ;;  %v11906_v15 = vmul.f32 %v11828_v2, %v11503_v1 }
 0x454   : > { %7828 = vrot.lane.b32.xlu0 %v7827_v23, %s9258_s24  ;;  %7823 = vrot.lane.b32.xlu1 %v7822_v45, %s9257_s26  ;;  %v11787_v23 = vsel %vm16334_vm9, %v11505_v32, 0.0  ;;  %v11807_v32 = vmul.f32 %v11735_v41, %v11548_v52  ;;  %v11855_v45 = vmul.f32 %v11793_v27, %v11503_v1  ;;  %16352 = vst [vmem:[#allocation70_spill] sm:$0xff] %v11902_v60  ;;  %vm16403_vm9 = vmmov %vm16396_vm4 }
 0x455   : > { %v11799_v57 = vpack.i.bf16 %v11533_v63, %v11787_v23  ;;  %v11883_v18 = vmul.f32 %v11790_v62, %v11787_v23  ;;  %v11929_v30 = vmul.f32 %v11902_v60, %v11548_v52  ;;  %vm16404_vm7 = vmmov %vm16396_vm4 }
 0x456   : > { %16337 = vst [vmem:[#allocation57_spill] sm:$0xff] %v11807_v32  ;;  %v11875_v32 = vmul.f32 %v11783_v51, %v11787_v23 }
 0x457   : > { %16349 = vst [vmem:[#allocation68_spill] sm:$0xff] %v11883_v18  ;;  %v11957_v18 = vmul.f32 %v11777_v48, %v11787_v23 }
 0x458   : > { %7838 = vrot.lane.b32.xlu0 %v7837_v39, %s9249_s18  ;;  %7833 = vrot.lane.b32.xlu1 %v7832_v46, %s15719_s6  ;;  %v11815_v39 = vmul.f32 %v11742_v43, %v11548_v52  ;;  %v11819_v46 = vmul.f32 %v11689_v7, %v11774_v13  ;;  %v11851_v43 = vsel %vm16344_vm5, %v11793_v27, %v11783_v51  ;;  %vm3408_vm5 = vcmask 769024  }
 0x459   : > { %16345 = vst [vmem:[#allocation64_spill] sm:$0xff] %v11851_v43  ;;  %v11861_v24 = vmul.f32 %v11851_v43, %v11509_v16  ;;  %v11865_v41 = vmul.f32 %v11851_v43, %v11548_v52  ;;  %16347 = vst [vmem:[#allocation66_spill] sm:$0xff] %v11875_v32  ;;  %v11895_v27 = vmul.f32 %v11828_v2, %v11533_v63 }
 0x45a   : > { %16338 = vst [vmem:[#allocation58_spill] sm:$0xff] %v11815_v39  ;;  %16339 = vst [vmem:[#allocation59_spill] sm:$0xff] %v11819_v46  ;;  %v11869_v39 = vmul.f32 %v11783_v51, %v11774_v13  ;;  %v11911_v51 = vsel %vm16353_vm14, %v11780_v28, %v11777_v48  ;;  %v11917_v43 = vmul.f32 %v11902_v60, %v11509_v16 }
 0x45b   : > { %16346 = vst [vmem:[#allocation65_spill] sm:$0xff] %v11865_v41  ;;  %16350 = vst [vmem:[#allocation69_spill] sm:$0xff] %v11895_v27  ;;  %v11921_v32 = vmul.f32 %v11780_v28, %v11503_v1  ;;  %v11925_v2 = vmul.f32 %v11911_v51, %v11509_v16  ;;  %v11933_v41 = vmul.f32 %v11790_v62, %v11774_v13 }
 0x45c   : > { %7848 = vrot.lane.b32.xlu0 %v11799_v57, %s9264_s29  ;;  %7843 = vrot.lane.b32.xlu1 %v11799_v57, %s9257_s26  ;;  %16354 = vst [vmem:[#allocation71_spill] sm:$0xff] %v11911_v51  ;;  %v11937_v46 = vmul.f32 %v11911_v51, %v11548_v52  ;;  %v11941_v1 = vmul.f32 %v11777_v48, %v11774_v13  ;;  %16357 = vst [vmem:[#allocation74_spill] sm:$0xff] %v11957_v18 }
 0x45d   : > { %v11961_v27 = vmul.f32 %v11780_v28, %v11533_v63  ;;  %v2887_v16 = vmul.f32 %v11526_v42, %v11533_v63  ;;  %v2858_v62 = vmul.f32 %v11496_v61, %v11533_v63  ;;  %v2886_v60 = vmul.f32 %v11524_v12, %v11787_v23  ;;  %vm16405_vm14 = vmmov %vm16396_vm4 }
 0x45e   : > { %16355 = vst [vmem:[#allocation72_spill] sm:$0xff] %v11937_v46  ;;  %16356 = vst [vmem:[#allocation73_spill] sm:$0xff] %v11941_v1  ;;  %v2857_v28 = vmul.f32 %v11494_v20, %v11787_v23  ;;  %v2915_v61 = vmul.f32 %v11562_v53, %v11533_v63  ;;  %v2872_v51 = vmul.f32 %v11500_v6, %v11533_v63 }
 0x45f   : > { %16358 = vst [vmem:[#allocation75_spill] sm:$0xff] %v11961_v27  ;;  %v7892_v48 = vpack.i.bf16 %v2887_v16, %v2886_v60  ;;  %v2914_v18 = vmul.f32 %v11560_v47, %v11787_v23  ;;  %v2871_v27 = vmul.f32 %v11498_v11, %v11787_v23 }
 0x460   : > { %7853 = vrot.lane.b32.xlu1 %v11799_v57, %s9279_s17  ;;  %7863 = vrot.lane.b32.xlu0 %v11803_v38, %s9257_s26  ;;  %v7882_v42 = vpack.i.bf16 %v2858_v62, %v2857_v28  ;;  %v2929_v28 = vmul.f32 %v11595_v33, %v11533_v63  ;;  %v2901_v62 = vmul.f32 %v11530_v29, %v11533_v63 }
 0x461   : > { %v7902_v46 = vpack.i.bf16 %v2915_v61, %v2914_v18  ;;  %v7887_v1 = vpack.i.bf16 %v2872_v51, %v2871_v27  ;;  %v2958_v61 = vmul.f32 %v11628_v19, %v11533_v63  ;;  %v2944_v51 = vmul.f32 %v11568_v58, %v11533_v63 }
 0x462   : > { %v2957_v27 = vmul.f32 %v11625_v44, %v11787_v23 }
 0x464   : > { %7858 = vrot.lane.b32.xlu1 %v11799_v57, %s9256_s10  ;;  %7873 = vrot.lane.b32.xlu0 %v11803_v38, %s9279_s17  ;;  %v7917_v18 = vpack.i.bf16 %v2958_v61, %v2957_v27  ;;  %v3058_v61 = vmul.f32 %v11695_v59, %v11533_v63  ;;  %v3057_v27 = vmul.f32 %v11692_v21, %v11787_v23 }
 0x468   : > { %7868 = vrot.lane.b32.xlu1 %v11803_v38, %s9264_s29  ;;  %7878 = vrot.lane.b32.xlu0 %v11803_v38, %s9256_s10 }
 0x46c   : > { %7893 = vrot.lane.b32.xlu1 %v7892_v48, %s9259_s25  ;;  %7883 = vrot.lane.b32.xlu0 %v7882_v42, %s9256_s10  ;;  %v2928_v42 = vmul.f32 %v11592_v0, %v11787_v23  ;;  %v2900_v48 = vmul.f32 %v11528_v4, %v11787_v23 }
 0x46e   : > { %v7907_v60 = vpack.i.bf16 %v2929_v28, %v2928_v42  ;;  %v7897_v16 = vpack.i.bf16 %v2901_v62, %v2900_v48  ;;  %v3001_v28 = vmul.f32 %v11660_v22, %v11533_v63  ;;  %v2972_v62 = vmul.f32 %v11609_v56, %v11533_v63 }
 0x46f   : > { %v3000_v42 = vmul.f32 %v11657_v8, %v11787_v23  ;;  %v2971_v48 = vmul.f32 %v11598_v55, %v11787_v23  ;;  %v2988_v22 = vmul.f32 %v11631_v34, %v11774_v13 }
 0x470   : > { %7903 = vrot.lane.b32.xlu1 %v7902_v46, %s9263_s5  ;;  %7888 = vrot.lane.b32.xlu0 %v7887_v1, %s9258_s24  ;;  %v2943_v46 = vmul.f32 %v11564_v40, %v11787_v23 }
 0x472   : > { %v7912_v1 = vpack.i.bf16 %v2944_v51, %v2943_v46  ;;  %v2986_v51 = vmul.f32 %v11634_v5, %v11533_v63  ;;  %v2985_v46 = vmul.f32 %v11631_v34, %v11787_v23 }
 0x474   : > { %7908 = vrot.lane.b32.xlu1 %v7907_v60, %s9265_s30  ;;  %7898 = vrot.lane.b32.xlu0 %v7897_v16, %s9249_s18  ;;  %v7932_v60 = vpack.i.bf16 %v3001_v28, %v3000_v42  ;;  %v7922_v16 = vpack.i.bf16 %v2972_v62, %v2971_v48  ;;  %v3086_v28 = vmul.f32 %v11723_v36, %v11533_v63 }
 0x475   : > { %v3015_v62 = vmul.f32 %v11666_v3, %v11533_v63  ;;  %v3085_v42 = vmul.f32 %v11720_v31, %v11787_v23  ;;  %v3014_v48 = vmul.f32 %v11663_v50, %v11787_v23  ;;  %v3072_v3 = vmul.f32 %v11729_v49, %v11533_v63 }
 0x478   : > { %7918 = vrot.lane.b32.xlu1 %v7917_v18, %s16321_s8  ;;  %7913 = vrot.lane.b32.xlu0 %v7912_v1, %s9266_s23  ;;  %v7947_v18 = vpack.i.bf16 %v3058_v61, %v3057_v27  ;;  %v7927_v1 = vpack.i.bf16 %v2986_v51, %v2985_v46  ;;  %v7937_v61 = vpack.i.bf16 %v3015_v62, %v3014_v48 }
 0x479   : > { %v2859_v51 = vmul.f32 %v11514_v26, %v11548_v52  ;;  %v2860_v27 = vmul.f32 %v11494_v20, %v11774_v13  ;;  %v3042_v46 = vmul.f32 %v11689_v7, %v11787_v23  ;;  %v2874_v62 = vmul.f32 %v11498_v11, %v11774_v13 }
 0x47a   : > { %v2888_v48 = vmul.f32 %v11576_v14, %v11548_v52  ;;  %v2931_v7 = vmul.f32 %v11592_v0, %v11774_v13 }
 0x47c   : > { %7933 = vrot.lane.b32.xlu1 %v7932_v60, %s9282_s20  ;;  %7923 = vrot.lane.b32.xlu0 %v7922_v16, %s9280_s7  ;;  %v3043_v60 = vmul.f32 %v11698_v9, %v11533_v63  ;;  %v7957_v16 = vpack.i.bf16 %v3086_v28, %v3085_v42  ;;  %v2873_v28 = vmul.f32 %v11544_v25, %v11548_v52 }
 0x47d   : > { %v3071_v42 = vmul.f32 %v11726_v17, %v11787_v23  ;;  %v2916_v23 = vmul.f32 %v11606_v37, %v11548_v52 }
 0x47f   : > { %v7952_v63 = vpack.i.bf16 %v3072_v3, %v3071_v42  ;;  %v16359_v3 = vld [vmem:[#allocation41_spill] sm:$0xff]  ;;  %v16360_v42 = vld [vmem:[#allocation47_spill] sm:$0xff] }
 0x480   : > { %7948 = vrot.lane.b32.xlu1 %v7947_v18, %s9258_s24  ;;  %7928 = vrot.lane.b32.xlu0 %v7927_v1, %s9281_s19  ;;  %v7942_v18 = vpack.i.bf16 %v3043_v60, %v3042_v46  ;;  %v7962_v1 = vpack.i.bf16 %v2860_v27, %v2859_v51  ;;  %v2889_v60 = vmul.f32 %v11524_v12, %v11774_v13 }
 0x481   : > { %v2903_v51 = vmul.f32 %v11528_v4, %v11774_v13  ;;  %v2917_v27 = vmul.f32 %v11560_v47, %v11774_v13 }
 0x482   : > { %v7972_v46 = vpack.i.bf16 %v2889_v60, %v2888_v48  ;;  %v16361_v48 = vld [vmem:[#allocation42_spill] sm:$0xff] }
 0x483   : > { %v2973_v60 = vmul.f32 %v16361_v48, %v11548_v52  ;;  %v3003_v48 = vmul.f32 %v11657_v8, %v11774_v13 }
 0x484   : > { %7958 = vrot.lane.b32.xlu1 %v7957_v16, %s9249_s18  ;;  %7938 = vrot.lane.b32.xlu0 %v7937_v61, %s16325_s28  ;;  %v7967_v16 = vpack.i.bf16 %v2874_v62, %v2873_v28  ;;  %v2902_v61 = vmul.f32 %v11581_v35, %v11548_v52  ;;  %v2946_v28 = vmul.f32 %v11564_v40, %v11774_v13 }
 0x485   : > { %v7982_v62 = vpack.i.bf16 %v2917_v27, %v2916_v23  ;;  %v2960_v27 = vmul.f32 %v11625_v44, %v11774_v13 }
 0x488   : > { %7943 = vrot.lane.b32.xlu0 %v7942_v18, %s9257_s26  ;;  %7963 = vrot.lane.b32.xlu1 %v7962_v1, %s9256_s10  ;;  %v7977_v18 = vpack.i.bf16 %v2903_v51, %v2902_v61  ;;  %v2945_v1 = vmul.f32 %v16359_v3, %v11548_v52  ;;  %v2974_v61 = vmul.f32 %v11598_v55, %v11774_v13  ;;  %v16362_v51 = vld [vmem:[#allocation34_spill] sm:$0xff] }
 0x489   : > { %v2959_v23 = vmul.f32 %v16362_v51, %v11548_v52 }
 0x48c   : > { %7953 = vrot.lane.b32.xlu0 %v7952_v63, %s15719_s6  ;;  %7968 = vrot.lane.b32.xlu1 %v7967_v16, %s9258_s24  ;;  %v2930_v63 = vmul.f32 %v16360_v42, %v11548_v52  ;;  %v7992_v16 = vpack.i.bf16 %v2946_v28, %v2945_v1  ;;  %v16363_v1 = vld [vmem:[#allocation35_spill] sm:$0xff] }
 0x48d   : > { %v2987_v28 = vmul.f32 %v16363_v1, %v11548_v52 }
 0x48f   : > { %v8007_v5 = vpack.i.bf16 %v2988_v22, %v2987_v28  ;;  %v16366_v22 = vld [vmem:[#allocation57_spill] sm:$0xff] }
 0x490   : > { %7973 = vrot.lane.b32.xlu0 %v7972_v46, %s9259_s25  ;;  %7978 = vrot.lane.b32.xlu1 %v7977_v18, %s9249_s18  ;;  %v7987_v46 = vpack.i.bf16 %v2931_v7, %v2930_v63  ;;  %v8002_v18 = vpack.i.bf16 %v2974_v61, %v2973_v60  ;;  %v16365_v7 = vld [vmem:[#allocation9_spill] sm:$0xff]  ;;  %v3017_v60 = vmul.f32 %v11663_v50, %v11774_v13 }
 0x491   : > { %v3016_v63 = vmul.f32 %v16365_v7, %v11548_v52 }
 0x494   : > { %7983 = vrot.lane.b32.xlu0 %v7982_v62, %s9263_s5  ;;  %7993 = vrot.lane.b32.xlu1 %v7992_v16, %s9266_s23  ;;  %v7997_v62 = vpack.i.bf16 %v2960_v27, %v2959_v23  ;;  %v16364_v16 = vld [vmem:[#allocation20_spill] sm:$0xff]  ;;  %v16367_v23 = vpack.i.bf16 %v11811_v10, %v16366_v22  ;;  %v16369_v27 = vld [vmem:[#allocation58_spill] sm:$0xff] }
 0x495   : > { %v3002_v55 = vmul.f32 %v16364_v16, %v11548_v52  ;;  %v16368_v52 = vld [vmem:[#allocation59_spill] sm:$0xff]  ;;  %v16372_v10 = vld [vmem:[#allocation60_spill] sm:$0xff] }
 0x497   : > { %v8012_v61 = vpack.i.bf16 %v3003_v48, %v3002_v55  ;;  %v16371_v55 = vld [vmem:[#allocation8_spill] sm:$0xff] }
 0x498   : > { %7988 = vrot.lane.b32.xlu0 %v7987_v46, %s9265_s30  ;;  %8003 = vrot.lane.b32.xlu1 %v8002_v18, %s9280_s7  ;;  %v8017_v46 = vpack.i.bf16 %v3017_v60, %v3016_v63  ;;  %v16370_v18 = vpack.i.bf16 %v16368_v52, %v16369_v27  ;;  %v16374_v63 = vld [vmem:[#allocation63_spill] sm:$0xff]  ;;  %v16375_v60 = vld [vmem:[#allocation62_spill] sm:$0xff]  ;;  %v16378_v52 = vld [vmem:[#allocation65_spill] sm:$0xff] }
 0x499   : > { %v16379_v27 = vpack.i.bf16 %v11869_v39, %v16378_v52  ;;  %v16387_v52 = vpack.i.bf16 %v11925_v2, %v11921_v32 }
 0x49c   : > { %7998 = vrot.lane.b32.xlu0 %v7997_v62, %s16321_s8  ;;  %8008 = vrot.lane.b32.xlu1 %v8007_v5, %s9281_s19  ;;  %v16373_v62 = vpack.i.bf16 %v11838_v54, %v16372_v10 }
 0x4a0   : > { %8013 = vrot.lane.b32.xlu0 %v8012_v61, %s9282_s20  ;;  %8018 = vrot.lane.b32.xlu1 %v8017_v46, %s16325_s28  ;;  %v16376_v61 = vpack.i.bf16 %v16374_v63, %v16375_v60  ;;  %v16386_v60 = vpack.i.bf16 %v11917_v43, %v11906_v15  ;;  %v16388_v43 = vpack.i.bf16 %v11933_v41, %v11929_v30 }
 0x4a4   : > { %8033 = vrot.lane.b32.xlu0 %v16367_v23, %s9258_s24  ;;  %8023 = vrot.lane.b32.xlu1 %v16370_v18, %s9257_s26  ;;  %v16380_v18 = vld [vmem:[#allocation67_spill] sm:$0xff] }
 0x4a6   : > { %v12117_v13 = vpop.permute.xlu0 %7743  ;;  %v12119_v28 = vpop.permute.xlu1 %7748 }
 0x4a7   : > { %v7750_v11 = vunpack.i.l.bf16 %v12119_v28 }
 0x4a8   : > { %8038 = vrot.lane.b32.xlu0 %v11799_v57, %s9263_s5  ;;  %8028 = vrot.lane.b32.xlu1 %v16371_v55, %s9263_s5  ;;  %v16377_v57 = vpack.i.bf16 %v11861_v24, %v11855_v45  ;;  %v16381_v55 = vld [vmem:[#allocation66_spill] sm:$0xff]  ;;  %v16384_v45 = vld [vmem:[#allocation68_spill] sm:$0xff] }
 0x4a9   : > { %v16382_v10 = vpack.i.bf16 %v16380_v18, %v16381_v55  ;;  %v16389_v18 = vld [vmem:[#allocation73_spill] sm:$0xff]  ;;  %v16390_v55 = vld [vmem:[#allocation72_spill] sm:$0xff] }
 0x4aa   : > { %v12125_v5 = vpop.permute.xlu0 %7753  ;;  %v12127_v48 = vpop.permute.xlu1 %7763 }
 0x4ab   : > { %v7765_v21 = vunpack.i.l.bf16 %v12127_v48 }
 0x4ac   : > { %8053 = vrot.lane.b32.xlu0 %v16373_v62, %s9249_s18  ;;  %8043 = vrot.lane.b32.xlu1 %v16376_v61, %s15719_s6  ;;  %s16554_s6 = smov 113  }
 0x4ae   : > { %v7759_v46 = vpop.permute.xlu0 %7758  ;;  %v12137_v22 = vpop.permute.xlu1 %7768 }
 0x4b0   : > { %8058 = vrot.lane.b32.xlu0 %v16377_v57, %s9264_s29  ;;  %8048 = vrot.lane.b32.xlu1 %v11803_v38, %s9263_s5  ;;  %v16383_v38 = vld [vmem:[#allocation69_spill] sm:$0xff]  ;;  %v3852_v57 = vld [vmem:[%s15352_s2 + $0x8] sm:$0xff] }
 0x4b1   : > { %v16385_v63 = vpack.i.bf16 %v16383_v38, %v16384_v45  ;;  %3946 = vmatprep.mubr.f32.mxu1 %v3852_v57  ;;  %v16392_v38 = vld [vmem:[#allocation75_spill] sm:$0xff]  ;;  %v16393_v45 = vld [vmem:[#allocation74_spill] sm:$0xff] }
 0x4b2   : > { %v12145_v23 = vpop.permute.xlu0 %7773  ;;  %v12147_v54 = vpop.permute.xlu1 %7778 }
 0x4b4   : > { %8073 = vrot.lane.b32.xlu0 %v16379_v27, %s9264_s29  ;;  %8063 = vrot.lane.b32.xlu1 %v16382_v10, %s9264_s29  ;;  %v16391_v10 = vpack.i.bf16 %v16389_v18, %v16390_v55 }
 0x4b6   : > { %v12157_v62 = vpop.permute.xlu0 %7783  ;;  %v12159_v24 = vpop.permute.xlu1 %7793 }
 0x4b8   : > { %8078 = vrot.lane.b32.xlu0 %v16385_v63, %s9265_s30  ;;  %8068 = vrot.lane.b32.xlu1 %v16386_v60, %s9265_s30  ;;  %v16394_v63 = vpack.i.bf16 %v16392_v38, %v16393_v45  ;;  %v7760_v38 = vunpack.i.l.bf16 %v7759_v46 }
 0x4ba   : > { %v12169_v39 = vpop.permute.xlu0 %7788  ;;  %v12171_v61 = vpop.permute.xlu1 %7803 }
 0x4bc   : > { %8088 = vrot.lane.b32.xlu0 %v16387_v52, %s15717_s21  ;;  %8083 = vrot.lane.b32.xlu1 %v16388_v43, %s9265_s30 }
 0x4be   : > { %v12184_v15 = vpop.permute.xlu0 %7798  ;;  %v12186_v27 = vpop.permute.xlu1 %7808 }
 0x4c0   : > { %8098 = vrot.lane.b32.xlu0 %v16391_v10, %s15717_s21  ;;  %8093 = vrot.lane.b32.xlu1 %v16394_v63, %s15717_s21  ;;  %v7761_v10 = vunpack.i.h.bf16 %v7759_v46 }
 0x4c2   : > { %v12196_v32 = vpop.permute.xlu0 %7813  ;;  %v12198_v2 = vpop.permute.xlu1 %7818  ;;  %v3509_v8 = vsel %vm1149_vm3, %v7760_v38, %v7761_v10 }
 0x4c6   : > { %v7829_v41 = vpop.permute.xlu0 %7828  ;;  %v12200_v30 = vpop.permute.xlu1 %7823 }
 0x4ca   : > { %v7839_v60 = vpop.permute.xlu0 %7838  ;;  %v12202_v57 = vpop.permute.xlu1 %7833 }
 0x4cb   : > { %v7841_v3 = vunpack.i.h.bf16 %v7839_v60  ;;  %v7840_v58 = vunpack.i.l.bf16 %v7839_v60  ;;  %v7745_v60 = vunpack.i.l.bf16 %v12117_v13 }
 0x4ce   : > { %v12204_v52 = vpop.permute.xlu0 %7848  ;;  %v12206_v43 = vpop.permute.xlu1 %7843 }
 0x4cf   : > { %v7846_v14 = vunpack.i.h.bf16 %v12206_v43 }
 0x4d2   : > { %v12208_v18 = vpop.permute.xlu0 %7863  ;;  %v12210_v55 = vpop.permute.xlu1 %7853 }
 0x4d6   : > { %v12212_v45 = vpop.permute.xlu0 %7873  ;;  %v12214_v63 = vpop.permute.xlu1 %7858 }
 0x4d7   : > { %v15667_v50 = vunpack.i.l.bf16 %v12214_v63 }
 0x4d9   : > { %v3510_v7 = vsel %vm1149_vm3, %v7761_v10, %v15667_v50 }
 0x4da   : > { %v12221_v16 = vpop.permute.xlu0 %7878  ;;  %v12223_v34 = vpop.permute.xlu1 %7868  ;;  %v8102_v1 = vpack.i.bf16 %v3510_v7, %v3509_v8  ;;  %v7830_v7 = vunpack.i.l.bf16 %v7829_v41 }
 0x4db   : > { %v7881_v47 = vunpack.i.h.bf16 %v12221_v16 }
 0x4dc   : > { %8103 = vrot.lane.b32.xlu1 %v8102_v1, %s15717_s21  ;;  %v7831_v1 = vunpack.i.h.bf16 %v7829_v41  ;;  %v7746_v41 = vunpack.i.h.bf16 %v12117_v13  ;;  %v7845_v13 = vunpack.i.l.bf16 %v12206_v43 }
 0x4de   : > { %v7884_v46 = vpop.permute.xlu0 %7883  ;;  %v12226_v56 = vpop.permute.xlu1 %7893  ;;  %v3553_v9 = vsel %vm16395_vm12, %v7830_v7, %v7831_v1  ;;  %v7766_v7 = vunpack.i.h.bf16 %v12127_v48  ;;  %vm3387_vm12 = vcmask 777216  }
 0x4df   : > { %v7886_v35 = vunpack.i.h.bf16 %v7884_v46 }
 0x4e2   : > { %v12228_v44 = vpop.permute.xlu0 %7888  ;;  %v12230_v40 = vpop.permute.xlu1 %7903 }
 0x4e6   : > { %v12232_v51 = vpop.permute.xlu0 %7898  ;;  %v12234_v38 = vpop.permute.xlu1 %7908 }
 0x4ea   : > { %v12236_v36 = vpop.permute.xlu0 %7913  ;;  %v12238_v10 = vpop.permute.xlu1 %7918 }
 0x4ee   : > { %v12240_v50 = vpop.permute.xlu0 %7923  ;;  %v12242_v8 = vpop.permute.xlu1 %7933 }
 0x4f2   : > { %v12244_v19 = vpop.permute.xlu0 %7928  ;;  %v12246_v49 = vpop.permute.xlu1 %7948 }
 0x4f3   : > { %v15692_v59 = vunpack.i.l.bf16 %v12246_v49 }
 0x4f5   : > { %v3554_v0 = vsel %vm16396_vm4, %v7831_v1, %v15692_v59  ;;  %v3597_v1 = vsel %vm1022_vm0, %v7840_v58, %v7841_v3  ;;  %v7885_v59 = vunpack.i.l.bf16 %v7884_v46  ;;  %v16397_v58 = vunpack.i.l.bf16 %v12221_v16 }
 0x4f6   : > { %v12253_v42 = vpop.permute.xlu0 %7938  ;;  %v12255_v31 = vpop.permute.xlu1 %7958  ;;  %v8117_v33 = vpack.i.bf16 %v3554_v0, %v3553_v9  ;;  %v7866_v0 = vunpack.i.h.bf16 %v12208_v18  ;;  %v7865_v9 = vunpack.i.l.bf16 %v12208_v18 }
 0x4f7   : > { %v15707_v37 = vunpack.i.l.bf16 %v12255_v31  ;;  %v3136_v53 = vsel %vm1149_vm3, %v7766_v7, %v7885_v59 }
 0x4f8   : > { %8118 = vrot.lane.b32.xlu1 %v8117_v33, %s15717_s21  ;;  %v3512_v33 = vsel %vm1149_vm3, %v16397_v58, %v7881_v47  ;;  %v3162_v46 = vsel %vm16399_vm10, %v7865_v9, %v7866_v0  ;;  %v3161_v59 = vsel %vm16401_vm11, %v7846_v14, %v7865_v9  ;;  %v7770_v0 = vunpack.i.l.bf16 %v12137_v22 }
 0x4f9   : > { %v3598_v17 = vsel %vm1022_vm0, %v7841_v3, %v15707_v37  ;;  %v3135_v3 = vsel %vm1149_vm3, %v7765_v21, %v7766_v7  ;;  %v3159_v37 = vsel %vm16398_vm2, %v7745_v60, %v7746_v41  ;;  %v8137_v58 = vpack.i.bf16 %v7881_v47, %v3512_v33 }
 0x4fa   : > { %v12273_v4 = vpop.permute.xlu0 %7943  ;;  %v7964_v48 = vpop.permute.xlu1 %7963  ;;  %v8127_v12 = vpack.i.bf16 %v3598_v17, %v3597_v1  ;;  %v7890_v21 = vunpack.i.l.bf16 %v12228_v44  ;;  %v16402_v7 = vunpack.i.h.bf16 %v12119_v28  ;;  %v7776_v14 = vunpack.i.h.bf16 %v12145_v23 }
 0x4fb   : > { %v7966_v29 = vunpack.i.h.bf16 %v7964_v48  ;;  %v7965_v18 = vunpack.i.l.bf16 %v7964_v48  ;;  %v7775_v9 = vunpack.i.l.bf16 %v12145_v23  ;;  %vm16406_vm2 = vcmask 1014784  }
 0x4fc   : > { %8128 = vrot.lane.b32.xlu1 %v8127_v12, %s15717_s21  ;;  %v3160_v12 = vsel %vm16400_vm8, %v7746_v41, %v7845_v13  ;;  %v7771_v41 = vunpack.i.h.bf16 %v12137_v22  ;;  %vm16407_vm10 = vmmov %vm16406_vm2 }
 0x4fd   : > { %v3138_v17 = vsel %vm1149_vm3, %v7965_v18, %v7966_v29  ;;  %v3137_v1 = vsel %vm1149_vm3, %v7886_v35, %v7965_v18  ;;  %v15714_v29 = vunpack.i.h.bf16 %v12125_v5  ;;  %v7755_v35 = vunpack.i.l.bf16 %v12125_v5  ;;  %vm16408_vm8 = vmmov %vm16406_vm2 }
 0x4fe   : > { %v12287_v48 = vpop.permute.xlu0 %7953  ;;  %v7969_v20 = vpop.permute.xlu1 %7968  ;;  %v6279_v25 = vpack.c.bf16 %v3138_v17, %v3136_v53  ;;  %v6281_v43 = vpack.c.bf16 %v3137_v1, %v3135_v3  ;;  %v6283_v47 = vpack.c.bf16 %v3162_v46, %v3160_v12  ;;  %v12298_v53 = vsel %vm1310_vm13, %v7750_v11, %v16402_v7  ;;  %vm16409_vm11 = vmmov %vm16406_vm2 }
 0x4ff   : > { %v7971_v6 = vunpack.i.h.bf16 %v7969_v20  ;;  %v7970_v60 = vunpack.i.l.bf16 %v7969_v20  ;;  %v6285_v18 = vpack.c.bf16 %v3161_v59, %v3159_v37  ;;  %v7895_v11 = vunpack.i.l.bf16 %v12226_v56 }
 0x500   : > { %8138 = vrot.lane.b32.xlu1 %v8137_v58, %s15717_s21  ;;  %6280 = vmatprep.subr.bf16.mxu1 %v6279_v25  ;;  %v7891_v25 = vunpack.i.h.bf16 %v12228_v44  ;;  %v3186_v22 = vsel %vm16404_vm7, %v7771_v41, %v7890_v21  ;;  %v12312_v23 = vsel %vm3408_vm5, %v7755_v35, %v15714_v29  ;;  %v3185_v37 = vsel %vm16396_vm4, %v7770_v0, %v7771_v41 }
 0x501   : > { %6282 = vmatpush1.bf16.msra.mxu1 %v6281_v43  ;;  %v3188_v20 = vsel %vm16403_vm9, %v7970_v60, %v7971_v6  ;;  %v7781_v43 = vunpack.i.h.bf16 %v12147_v54  ;;  %v7780_v12 = vunpack.i.l.bf16 %v12147_v54  ;;  %v7896_v21 = vunpack.i.h.bf16 %v12226_v56 }
 0x502   : > { %v7974_v13 = vpop.permute.xlu0 %7973  ;;  %v7979_v33 = vpop.permute.xlu1 %7978  ;;  %6284 = vmatprep.subr.bf16.mxu1 %v6283_v47  ;;  %v6287_v1 = vpack.c.bf16 %v3188_v20, %v3186_v22  ;;  %v3187_v6 = vsel %vm16405_vm14, %v7891_v25, %v7970_v60  ;;  %v3211_v35 = vsel %vm16407_vm10, %v7775_v9, %v7776_v14  ;;  %v7786_v47 = vunpack.i.h.bf16 %v12157_v62 }
 0x503   : > { %v7976_v3 = vunpack.i.h.bf16 %v7974_v13  ;;  %v7975_v17 = vunpack.i.l.bf16 %v7974_v13  ;;  %v7981_v44 = vunpack.i.h.bf16 %v7979_v33  ;;  %v7980_v46 = vunpack.i.l.bf16 %v7979_v33 }
 0x504   : > { %v7900_v7 = vunpack.i.l.bf16 %v12232_v51  ;;  %v6289_v20 = vpack.c.bf16 %v3187_v6, %v3185_v37  ;;  %v3212_v41 = vsel %vm16408_vm8, %v7776_v14, %v7895_v11  ;;  %v7785_v0 = vunpack.i.l.bf16 %v12157_v62 }
 0x505   : > { %6286 = vmatpush1.bf16.msra.mxu1 %v6285_v18  ;;  %v3214_v58 = vsel %vm16406_vm2, %v7975_v17, %v7976_v3  ;;  %v15716_v25 = vunpack.i.h.bf16 %v12159_v24  ;;  %v3213_v56 = vsel %vm16409_vm11, %v7896_v21, %v7975_v17  ;;  %v7795_v13 = vunpack.i.l.bf16 %v12159_v24 }
 0x506   : > { %v7984_v60 = vpop.permute.xlu0 %7983  ;;  %v12319_v59 = vpop.permute.xlu1 %7993  ;;  %6288 = vmatprep.subr.bf16.mxu1 %v6287_v1  ;;  %v6291_v54 = vpack.c.bf16 %v3214_v58, %v3212_v41  ;;  %v3240_v9 = vsel %vm1022_vm0, %v7980_v46, %v7981_v44  ;;  %v7791_v3 = vunpack.i.h.bf16 %v12169_v39  ;;  %v7790_v22 = vunpack.i.l.bf16 %v12169_v39 }
 0x507   : > { %v7986_v33 = vunpack.i.h.bf16 %v7984_v60  ;;  %v7985_v18 = vunpack.i.l.bf16 %v7984_v60  ;;  %v15715_v14 = vunpack.i.h.bf16 %v12171_v61  ;;  %v7901_v62 = vunpack.i.h.bf16 %v12232_v51 }
 0x508   : > { %v7805_v17 = vunpack.i.l.bf16 %v12171_v61  ;;  %v7905_v6 = vunpack.i.l.bf16 %v12230_v40  ;;  %v6293_v37 = vpack.c.bf16 %v3213_v56, %v3211_v35  ;;  %v3238_v44 = vsel %vm1022_vm0, %v7781_v43, %v7900_v7 }
 0x509   : > { %6290 = vmatpush1.bf16.msra.mxu1 %v6289_v20  ;;  %v6295_v58 = vpack.c.bf16 %v3240_v9, %v3238_v44  ;;  %v3237_v21 = vsel %vm1022_vm0, %v7780_v12, %v7781_v43  ;;  %v3239_v60 = vsel %vm1022_vm0, %v7901_v62, %v7980_v46  ;;  %vm3435_vm9 = vcmask 760832  }
 0x50a   : > { %v12334_v11 = vpop.permute.xlu0 %7988  ;;  %v12336_v1 = vpop.permute.xlu1 %8003  ;;  %6292 = vmatprep.subr.bf16.mxu1 %v6291_v54  ;;  %v7871_v51 = vunpack.i.h.bf16 %v12223_v34  ;;  %v7870_v20 = vunpack.i.l.bf16 %v12223_v34  ;;  %v3266_v41 = vsel %vm1293_vm15, %v7985_v18, %v7986_v33  ;;  %vm3462_vm7 = vcmask 752640  }
 0x50b   : > { %v7906_v54 = vunpack.i.h.bf16 %v12230_v40  ;;  %v3263_v43 = vsel %vm1293_vm15, %v7785_v0, %v7786_v47  ;;  %v12355_v46 = vsel %vm1324_vm1, %v7790_v22, %v7791_v3  ;;  %vm16410_vm14 = vcmask 883712  }
 0x50c   : > { %v12360_v34 = vsel %vm16410_vm14, %v7795_v13, %v15716_v25  ;;  %v7850_v12 = vunpack.i.l.bf16 %v12204_v52  ;;  %v6297_v40 = vpack.c.bf16 %v3239_v60, %v3237_v21  ;;  %v3264_v7 = vsel %vm1293_vm15, %v7786_v47, %v7905_v6  ;;  %vm16415_vm10 = vmmov %vm16410_vm14 }
 0x50d   : > { %6294 = vmatpush1.bf16.msra.mxu1 %v6293_v37  ;;  %v12367_v56 = vsel %vm3387_vm12, %v7805_v17, %v15715_v14  ;;  %v7801_v0 = vunpack.i.h.bf16 %v12184_v15  ;;  %v7800_v33 = vunpack.i.l.bf16 %v12184_v15  ;;  %v6299_v9 = vpack.c.bf16 %v3266_v41, %v3264_v7  ;;  %vm16417_vm8 = vmmov %vm16415_vm10 }
 0x50e   : > { %v12347_v29 = vpop.permute.xlu0 %7998  ;;  %v12349_v35 = vpop.permute.xlu1 %8008  ;;  %6296 = vmatprep.subr.bf16.mxu1 %v6295_v58  ;;  %v3265_v22 = vsel %vm1293_vm15, %v7906_v54, %v7985_v18  ;;  %v7811_v13 = vunpack.i.h.bf16 %v12186_v27  ;;  %v7991_v62 = vunpack.i.h.bf16 %v12334_v11  ;;  %v7990_v37 = vunpack.i.l.bf16 %v12334_v11  ;;  %vm16418_vm11 = vmmov %vm16417_vm8 }
 0x50f   : > { %v3286_v47 = vsel %vm1310_vm13, %v7870_v20, %v7871_v51  ;;  %v7810_v6 = vunpack.i.l.bf16 %v12186_v27  ;;  %v7815_v44 = vunpack.i.l.bf16 %v12196_v32  ;;  %v7851_v58 = vunpack.i.h.bf16 %v12204_v52 }
 0x510   : > { %v7826_v60 = vunpack.i.h.bf16 %v12200_v30  ;;  %v7910_v11 = vunpack.i.l.bf16 %v12234_v38  ;;  %v6301_v41 = vpack.c.bf16 %v3265_v22, %v3263_v43  ;;  %v16411_v51 = vunpack.i.h.bf16 %v12119_v28 }
 0x511   : > { %6298 = vmatpush1.bf16.msra.mxu1 %v6297_v40  ;;  %v7825_v40 = vunpack.i.l.bf16 %v12200_v30  ;;  %v7836_v7 = vunpack.i.h.bf16 %v12202_v57  ;;  %v3285_v52 = vsel %vm1310_vm13, %v7851_v58, %v7870_v20  ;;  %v7835_v25 = vunpack.i.l.bf16 %v12202_v57 }
 0x512   : > { %v12380_v21 = vpop.permute.xlu0 %8013  ;;  %v12382_v18 = vpop.permute.xlu1 %8018  ;;  %6300 = vmatprep.subr.bf16.mxu1 %v6299_v9  ;;  %v3284_v54 = vsel %vm1310_vm13, %v16411_v51, %v7850_v12  ;;  %v7996_v9 = vunpack.i.h.bf16 %v12319_v59  ;;  %v7995_v17 = vunpack.i.l.bf16 %v12319_v59  ;;  %v3312_v43 = vsel %vm1324_vm1, %v7990_v37, %v7991_v62 }
 0x513   : > { %v6303_v14 = vpack.c.bf16 %v3286_v47, %v3284_v54  ;;  %v7911_v28 = vunpack.i.h.bf16 %v12234_v38  ;;  %v7915_v12 = vunpack.i.l.bf16 %v12236_v36  ;;  %vm16412_vm4 = vcmask 785408  }
 0x514   : > { %v12405_v20 = vsel %vm16412_vm4, %v7800_v33, %v7801_v0  ;;  %v12410_v59 = vsel %vm3435_vm9, %v7810_v6, %v7811_v13  ;;  %v6305_v47 = vpack.c.bf16 %v3285_v52, %v12298_v53  ;;  %vm16413_vm2 = vcmask 1031168   ;;  %vm16419_vm14 = vmmov %vm16412_vm4 }
 0x515   : > { %6302 = vmatpush1.bf16.msra.mxu1 %v6301_v41  ;;  %v12419_v58 = vsel %vm16413_vm2, %v7825_v40, %v7826_v60  ;;  %v3311_v41 = vsel %vm1324_vm1, %v7911_v28, %v7990_v37  ;;  %v16414_v51 = vunpack.i.h.bf16 %v12196_v32  ;;  %v12430_v54 = vsel %vm1034_vm6, %v7835_v25, %v7836_v7  ;;  %vm16420_vm4 = vmmov %vm16413_vm2 }
 0x516   : > { %v12398_v22 = vpop.permute.xlu0 %8033  ;;  %v12400_v30 = vpop.permute.xlu1 %8023  ;;  %6304 = vmatprep.subr.bf16.mxu1 %v6303_v14  ;;  %v3310_v14 = vsel %vm1324_vm1, %v7791_v3, %v7910_v11  ;;  %v8001_v39 = vunpack.i.h.bf16 %v12347_v29  ;;  %v8000_v53 = vunpack.i.l.bf16 %v12347_v29  ;;  %v3338_v3 = vsel %vm16415_vm10, %v7995_v17, %v7996_v9  ;;  %vm16421_vm2 = vmmov %vm16419_vm14 }
 0x517   : > { %v6307_v33 = vpack.c.bf16 %v3312_v43, %v3310_v14  ;;  %v12425_v6 = vsel %vm3462_vm7, %v7815_v44, %v16414_v51  ;;  %v7916_v11 = vunpack.i.h.bf16 %v12236_v36  ;;  %v7920_v37 = vunpack.i.l.bf16 %v12238_v10  ;;  %vm16422_vm10 = vmmov %vm16421_vm2 }
 0x518   : > { %v7945_v40 = vunpack.i.l.bf16 %v12273_v4  ;;  %v16416_v25 = vunpack.i.h.bf16 %v12159_v24  ;;  %v6309_v9 = vpack.c.bf16 %v3311_v41, %v12355_v46  ;;  %v7855_v36 = vunpack.i.l.bf16 %v12210_v55 }
 0x519   : > { %6306 = vmatpush1.bf16.msra.mxu1 %v6305_v47  ;;  %v8006_v14 = vunpack.i.h.bf16 %v12336_v1  ;;  %v3337_v38 = vsel %vm16418_vm11, %v7916_v11, %v7995_v17  ;;  %v8005_v62 = vunpack.i.l.bf16 %v12336_v1  ;;  %v7925_v46 = vunpack.i.l.bf16 %v12240_v50 }
 0x51a   : > { %v12438_v44 = vpop.permute.xlu0 %8038  ;;  %v8029_v52 = vpop.permute.xlu1 %8028  ;;  %6308 = vmatprep.subr.bf16.mxu1 %v6307_v33  ;;  %v3336_v43 = vsel %vm16417_vm8, %v16416_v25, %v7915_v12  ;;  %v3364_v12 = vsel %vm16419_vm14, %v8000_v53, %v8001_v39  ;;  %v7955_v41 = vunpack.i.l.bf16 %v12287_v48  ;;  %v7876_v1 = vunpack.i.h.bf16 %v12212_v45  ;;  %vm16426_vm8 = vmmov %vm16420_vm4 }
 0x51b   : > { %v8040_v28 = vunpack.i.l.bf16 %v12438_v44  ;;  %v8031_v29 = vunpack.i.h.bf16 %v8029_v52  ;;  %v8030_v47 = vunpack.i.l.bf16 %v8029_v52  ;;  %v6311_v51 = vpack.c.bf16 %v3338_v3, %v3336_v43 }
 0x51c   : > { %v7921_v52 = vunpack.i.h.bf16 %v12238_v10  ;;  %v3532_v11 = vsel %vm16420_vm4, %v7826_v60, %v7945_v40  ;;  %v6313_v39 = vpack.c.bf16 %v3337_v38, %v12360_v34  ;;  %v3362_v10 = vsel %vm16421_vm2, %v7801_v0, %v7920_v37 }
 0x51d   : > { %v3614_v33 = vsel %vm1293_vm15, %v8031_v29, %v8040_v28  ;;  %v3613_v24 = vsel %vm1293_vm15, %v8030_v47, %v8031_v29  ;;  %6310 = vmatpush1.bf16.msra.mxu1 %v6309_v9  ;;  %v7875_v43 = vunpack.i.l.bf16 %v12212_v45  ;;  %v7926_v29 = vunpack.i.h.bf16 %v12240_v50 }
 0x51e   : > { %v12455_v25 = vpop.permute.xlu0 %8053  ;;  %v12457_v3 = vpop.permute.xlu1 %8043  ;;  %6312 = vmatprep.subr.bf16.mxu1 %v6311_v51  ;;  %v8107_v17 = vpack.i.bf16 %v3614_v33, %v3613_v24  ;;  %v6315_v47 = vpack.c.bf16 %v3364_v12, %v3362_v10  ;;  %v3363_v9 = vsel %vm16422_vm10, %v7921_v52, %v8000_v53  ;;  %v7856_v51 = vunpack.i.h.bf16 %v12210_v55 }
 0x51f   : > { %v7861_v33 = vunpack.i.h.bf16 %v12214_v63  ;;  %v3391_v34 = vsel %vm3387_vm12, %v8005_v62, %v8006_v14  ;;  %v16423_v15 = vunpack.i.h.bf16 %v12125_v5  ;;  %v3576_v50 = vsel %vm1034_vm6, %v7836_v7, %v7955_v41 }
 0x520   : > { %8108 = vrot.lane.b32.xlu0 %v8107_v17, %s15717_s21  ;;  %v8112_v55 = vpack.i.bf16 %v3532_v11, %v12419_v58  ;;  %v16424_v38 = vunpack.i.h.bf16 %v12171_v61  ;;  %v3390_v5 = vsel %vm3387_vm12, %v7926_v29, %v8005_v62  ;;  %v8025_v37 = vunpack.i.l.bf16 %v12400_v30 }
 0x521   : > { %6314 = vmatpush1.bf16.msra.mxu1 %v6313_v39  ;;  %v3410_v0 = vsel %vm3408_vm5, %v16423_v15, %v7855_v36  ;;  %v8041_v36 = vunpack.i.h.bf16 %v12438_v44  ;;  %v6317_v7 = vpack.c.bf16 %v3363_v9, %v12405_v20  ;;  %v16425_v14 = vunpack.i.l.bf16 %v12221_v16 }
 0x522   : > { %v12482_v45 = vpop.permute.xlu0 %8058  ;;  %v12484_v60 = vpop.permute.xlu1 %8048  ;;  %6316 = vmatprep.subr.bf16.mxu1 %v6315_v47  ;;  %v3389_v53 = vsel %vm3387_vm12, %v16424_v38, %v7925_v46  ;;  %v3412_v61 = vsel %vm3408_vm5, %v7875_v43, %v7876_v1  ;;  %v3411_v12 = vsel %vm3408_vm5, %v7856_v51, %v7875_v43  ;;  %v7946_v62 = vunpack.i.h.bf16 %v12273_v4 }
 0x523   : > { %v8050_v57 = vunpack.i.l.bf16 %v12484_v60  ;;  %v3511_v24 = vsel %vm1149_vm3, %v7861_v33, %v16425_v14  ;;  %v6319_v58 = vpack.c.bf16 %v3391_v34, %v3389_v53  ;;  %v8011_v52 = vunpack.i.h.bf16 %v12349_v35 }
 0x524   : > { %8113 = vrot.lane.b32.xlu0 %v8112_v55, %s15717_s21  ;;  %v8010_v44 = vunpack.i.l.bf16 %v12349_v35  ;;  %v7930_v16 = vunpack.i.l.bf16 %v12244_v19  ;;  %v8122_v1 = vpack.i.bf16 %v3576_v50, %v12430_v54  ;;  %v6321_v39 = vpack.c.bf16 %v3390_v5, %v12367_v56 }
 0x525   : > { %v3615_v46 = vsel %vm1293_vm15, %v8041_v36, %v8050_v57  ;;  %6318 = vmatpush1.bf16.msra.mxu1 %v6317_v7  ;;  %v8036_v10 = vunpack.i.h.bf16 %v12398_v22  ;;  %v8035_v43 = vunpack.i.l.bf16 %v12398_v22  ;;  %v3533_v35 = vsel %vm16426_vm8, %v7946_v62, %v8025_v37 }
 0x526   : > { %v12506_v20 = vpop.permute.xlu0 %8073  ;;  %v12508_v17 = vpop.permute.xlu1 %8063  ;;  %6320 = vmatprep.subr.bf16.mxu1 %v6319_v58  ;;  %v8142_v11 = vpack.i.bf16 %v3615_v46, %v8040_v28  ;;  %v8051_v29 = vunpack.i.h.bf16 %v12484_v60  ;;  %v7936_v47 = vunpack.i.h.bf16 %v12242_v8  ;;  %v6323_v9 = vpack.c.bf16 %v3412_v61, %v3410_v0 }
 0x527   : > { %v16427_v28 = vunpack.i.l.bf16 %v12214_v63  ;;  %v6325_v56 = vpack.c.bf16 %v3411_v12, %v12312_v23  ;;  %v8016_v51 = vunpack.i.h.bf16 %v12380_v21  ;;  %v8015_v22 = vunpack.i.l.bf16 %v12380_v21 }
 0x528   : > { %8143 = vrot.lane.b32.xlu1 %v8142_v11, %s15717_s21  ;;  %8123 = vrot.lane.b32.xlu0 %v8122_v1, %s15717_s21  ;;  %v8026_v33 = vunpack.i.h.bf16 %v12400_v30  ;;  %v3439_v34 = vsel %vm3435_vm9, %v8010_v44, %v8011_v52  ;;  %v7935_v15 = vunpack.i.l.bf16 %v12242_v8  ;;  %v7931_v50 = vunpack.i.h.bf16 %v12244_v19 }
 0x529   : > { %v8132_v54 = vpack.i.bf16 %v3511_v24, %v16427_v28  ;;  %6322 = vmatpush1.bf16.msra.mxu1 %v6321_v39  ;;  %v8152_v63 = vpack.i.bf16 %v3533_v35, %v7945_v40  ;;  %v3437_v23 = vsel %vm3435_vm9, %v7811_v13, %v7930_v16  ;;  %v7940_v21 = vunpack.i.l.bf16 %v12253_v42 }
 0x52a   : > { %v12528_v60 = vpop.permute.xlu0 %8078  ;;  %v12530_v0 = vpop.permute.xlu1 %8068  ;;  %6324 = vmatprep.subr.bf16.mxu1 %v6323_v9  ;;  %vm16428_vm11 = vcmask 1022976   ;;  %v8045_v8 = vunpack.i.l.bf16 %v12457_v3  ;;  %v3616_v19 = vsel %vm1293_vm15, %v8050_v57, %v8051_v29  ;;  %v7956_v55 = vunpack.i.h.bf16 %v12287_v48 }
 0x52b   : > { %v3556_v30 = vsel %vm16428_vm11, %v8035_v43, %v8036_v10  ;;  %v8021_v38 = vunpack.i.h.bf16 %v12382_v18  ;;  %vm3778_vm14 = vcmask 646144   ;;  %v6327_v4 = vpack.c.bf16 %v3439_v34, %v3437_v23  ;;  %vm16435_vm8 = vmmov %vm16428_vm11 }
 0x52c   : > { %8153 = vrot.lane.b32.xlu1 %v8152_v63, %s15717_s21  ;;  %8133 = vrot.lane.b32.xlu0 %v8132_v54, %s15717_s21  ;;  %v3438_v27 = vsel %vm3435_vm9, %v7931_v50, %v8010_v44  ;;  %v8020_v13 = vunpack.i.l.bf16 %v12382_v18  ;;  %v3534_v40 = vsel %vm16420_vm4, %v8025_v37, %v8026_v33  ;;  %v3466_v53 = vsel %vm3462_vm7, %v8015_v22, %v8016_v51 }
 0x52d   : > { %6326 = vmatpush1.bf16.msra.mxu1 %v6325_v56  ;;  %v3465_v5 = vsel %vm3462_vm7, %v7936_v47, %v8015_v22  ;;  %v8167_v36 = vpack.i.bf16 %v8036_v10, %v3556_v30  ;;  %v8056_v57 = vunpack.i.h.bf16 %v12455_v25  ;;  %v8055_v7 = vunpack.i.l.bf16 %v12455_v25 }
 0x52e   : > { %v8147_v14 = vpack.i.bf16 %v8051_v29, %v3616_v19  ;;  %v12552_v24 = vpop.permute.xlu0 %8088  ;;  %v12554_v58 = vpop.permute.xlu1 %8083  ;;  %6328 = vmatprep.subr.bf16.mxu1 %v6327_v4  ;;  %v7951_v18 = vunpack.i.h.bf16 %v12246_v49  ;;  %v3577_v37 = vsel %vm1034_vm6, %v7956_v55, %v8045_v8  ;;  %v6329_v61 = vpack.c.bf16 %v3438_v27, %v12410_v59 }
 0x52f   : > { %v16429_v12 = vunpack.i.h.bf16 %v12196_v32  ;;  %v7941_v25 = vunpack.i.h.bf16 %v12253_v42  ;;  %v16430_v44 = vunpack.i.h.bf16 %v12198_v2  ;;  %vm16431_vm2 = vcmask 654336  }
 0x530   : > { %8168 = vrot.lane.b32.xlu1 %v8167_v36, %s15717_s21  ;;  %8148 = vrot.lane.b32.xlu0 %v8147_v14, %s15717_s21  ;;  %v16433_v11 = vunpack.i.l.bf16 %v12198_v2  ;;  %vm16434_vm10 = vmmov %vm16431_vm2  ;;  %v3555_v32 = vsel %vm16435_vm8, %v7951_v18, %v8035_v43  ;;  %v8157_v1 = vpack.i.bf16 %v8026_v33, %v3534_v40  ;;  %v6333_v42 = vpack.c.bf16 %v3465_v5, %v12425_v6  ;;  %v3856_v18 = vld [vmem:[%s15352_s2 + $0x28] sm:$0xff] }
 0x531   : > { %v3464_v62 = vsel %vm3462_vm7, %v16429_v12, %v7935_v15  ;;  %v3490_v46 = vsel %vm16431_vm2, %v16430_v44, %v7940_v21  ;;  %v16432_v16 = vmov %v16430_v44  ;;  %6330 = vmatpush1.bf16.msra.mxu1 %v6329_v61  ;;  %vm16436_vm11 = vmmov %vm16431_vm2  ;;  %v3600_v10 = vsel %vm1022_vm0, %v8055_v7, %v8056_v57 }
 0x532   : > { %v6331_v52 = vpack.c.bf16 %v3466_v53, %v3464_v62  ;;  %v3489_v59 = vsel %vm16434_vm10, %v16433_v11, %v16432_v16  ;;  %v3492_v39 = vsel %vm16436_vm11, %v8020_v13, %v8021_v38  ;;  %v8046_v35 = vunpack.i.h.bf16 %v12457_v3  ;;  %v8099_v47 = vpop.permute.xlu0 %8098  ;;  %v8094_v9 = vpop.permute.xlu1 %8093  ;;  %vm16437_vm4 = vmmov %vm16431_vm2  ;;  %v3851_v53 = vld [vmem:[%s15352_s2] sm:$0xff] }
 0x533   : > { %v8065_v29 = vunpack.i.l.bf16 %v12508_v17  ;;  %v8172_v2 = vpack.i.bf16 %v3577_v37, %v7955_v41  ;;  %v8091_v43 = vunpack.i.h.bf16 %v12552_v24  ;;  %v8101_v28 = vunpack.i.h.bf16 %v8099_v47 }
 0x534   : > { %6332 = vmatprep.subr.bf16.mxu1 %v6331_v52  ;;  %v8100_v54 = vunpack.i.l.bf16 %v8099_v47  ;;  %v8095_v56 = vunpack.i.l.bf16 %v8094_v9  ;;  %v7961_v6 = vunpack.i.h.bf16 %v12255_v31  ;;  %v8061_v51 = vunpack.i.h.bf16 %v12482_v45  ;;  %8158 = vrot.lane.b32.xlu0 %v8157_v1, %s15717_s21 }
 0x535   : > { %8173 = vrot.lane.b32.xlu1 %v8172_v2, %s15717_s21  ;;  %v6335_v22 = vpack.c.bf16 %v3492_v39, %v3490_v46  ;;  %v3491_v33 = vsel %vm16437_vm4, %v7941_v25, %v8020_v13  ;;  %v8060_v34 = vunpack.i.l.bf16 %v12482_v45  ;;  %v8096_v48 = vunpack.i.h.bf16 %v8094_v9  ;;  %6334 = vmatpush1.bf16.msra.mxu1 %v6333_v42 }
 0x536   : > { %v3780_v41 = vsel %vm3778_vm14, %v8091_v43, %v8095_v56  ;;  %v3782_v15 = vsel %vm3778_vm14, %v8100_v54, %v8101_v28  ;;  %v8187_v50 = vpack.i.bf16 %v8056_v57, %v3600_v10  ;;  %v8076_v63 = vunpack.i.h.bf16 %v12506_v20  ;;  %v3854_v10 = vld [vmem:[%s15352_s2 + $0x18] sm:$0xff] }
 0x537   : > { %v8075_v23 = vunpack.i.l.bf16 %v12506_v20  ;;  %6336 = vmatprep.subr.bf16.mxu1 %v6335_v22  ;;  %v16438_v21 = vunpack.i.l.bf16 %v12246_v49  ;;  %v3578_v19 = vsel %vm1034_vm6, %v8045_v8, %v8046_v35  ;;  %v3636_v45 = vsel %vm1310_vm13, %v8061_v51, %v8065_v29 }
 0x538   : > { %v8090_v55 = vunpack.i.l.bf16 %v12552_v24  ;;  %v6337_v38 = vpack.c.bf16 %v3491_v33, %v3489_v59  ;;  %v6339_v20 = vpack.c.bf16 %v3782_v15, %v3780_v41  ;;  %v3599_v4 = vsel %vm1022_vm0, %v7961_v6, %v8055_v7  ;;  %v3859_v59 = vld [vmem:[%s15352_s2 + $0x40] sm:$0xff] }
 0x539   : > { %v8162_v30 = vpack.i.bf16 %v3555_v32, %v16438_v21  ;;  %8188 = vrot.lane.b32.xlu1 %v8187_v50, %s15717_s21  ;;  %v3635_v49 = vsel %vm1310_vm13, %v8060_v34, %v8061_v51  ;;  %v3781_v3 = vsel %vm3778_vm14, %v8096_v48, %v8100_v54  ;;  %v8177_v8 = vpack.i.bf16 %v8046_v35, %v3578_v19  ;;  %v3864_v32 = vld [vmem:[%s15352_s2 + $0x68] sm:$0xff] }
 0x53a   : > { %6338 = vmatpush1.bf16.msra.mxu1 %v6337_v38  ;;  %v3638_v27 = vsel %vm1310_vm13, %v8075_v23, %v8076_v63  ;;  %v8080_v13 = vunpack.i.l.bf16 %v12528_v60  ;;  %v8192_v40 = vpack.i.bf16 %v3636_v45, %v3635_v49  ;;  %v8071_v5 = vunpack.i.h.bf16 %v12530_v0 }
 0x53b   : > { %8163 = vrot.lane.b32.xlu0 %v8162_v30, %s15717_s21  ;;  %6340 = vmatprep.subr.bf16.mxu1 %v6339_v20  ;;  %v8070_v36 = vunpack.i.l.bf16 %v12530_v0  ;;  %v3779_v57 = vsel %vm3778_vm14, %v8090_v55, %v8091_v43  ;;  %v8085_v7 = vunpack.i.l.bf16 %v12554_v58  ;;  %v8081_v24 = vunpack.i.h.bf16 %v12528_v60  ;;  %v3855_v60 = vld [vmem:[%s15352_s2 + $0x20] sm:$0xff] }
 0x53c   : > { %v6341_v14 = vpack.c.bf16 %v3781_v3, %v3779_v57  ;;  %v8207_v37 = vpack.i.bf16 %v8076_v63, %v3638_v27  ;;  %v16439_v0 = vunpack.i.l.bf16 %v12255_v31  ;;  %v8066_v12 = vunpack.i.h.bf16 %v12508_v17  ;;  %v3860_v31 = vld [vmem:[%s15352_s2 + $0x48] sm:$0xff] }
 0x53d   : > { %8193 = vrot.lane.b32.xlu1 %v8192_v40, %s15717_s21  ;;  %3947 = vmatmul.mubr.f32.vlgmr.msra.gmra.mrb[0].mxu1 %v3851_v53  ;;  %v3658_v62 = vsel %vm1324_vm1, %v8071_v5, %v8080_v13  ;;  %v3657_v25 = vsel %vm1324_vm1, %v8070_v36, %v8071_v5  ;;  %v3659_v52 = vsel %vm1324_vm1, %v8081_v24, %v8085_v7  ;;  %v8086_v11 = vunpack.i.h.bf16 %v12554_v58  ;;  %v3863_v58 = vld [vmem:[%s15352_s2 + $0x60] sm:$0xff] }
 0x53e   : > { %6342 = vmatpush1.bf16.msra.mxu1 %v6341_v14  ;;  %v8182_v61 = vpack.i.bf16 %v3599_v4, %v16439_v0  ;;  %3952 = vmatprep.mubr.f32.mxu1 %v3856_v18  ;;  %v8212_v44 = vpack.i.bf16 %v3659_v52, %v8080_v13  ;;  %v8197_v46 = vpack.i.bf16 %v3658_v62, %v3657_v25  ;;  %v9284_v39 = vmov 1.0  }
 0x53f   : > { %8178 = vrot.lane.b32.xlu0 %v8177_v8, %s15717_s21  ;;  %v3637_v16 = vsel %vm1310_vm13, %v8066_v12, %v8075_v23  ;;  %v3660_v42 = vsel %vm1324_vm1, %v8085_v7, %v8086_v11  ;;  %vm16440_vm2 = vcmask 138240   ;;  %vm15721_vm10 = vcmask 1040384  }
 0x540   : > { %v8202_v1 = vpack.i.bf16 %v3637_v16, %v8065_v29  ;;  %v8217_v35 = vpack.i.bf16 %v8086_v11, %v3660_v42  ;;  %vm16442_vm8 = vmmov %vm16440_vm2 }
 0x541   : > { %8208 = vrot.lane.b32.xlu1 %v8207_v37, %s15717_s21  ;;  %3953 = vmatmul.mubr.f32.gmra.mrb[2].mxu1 %v3855_v60  ;;  %vm16443_vm11 = vmmov %vm16440_vm2 }
 0x542   : > { %3958 = vmatprep.mubr.f32.mxu1 %v3860_v31  ;;  %vm16444_vm4 = vmmov %vm16440_vm2 }
 0x543   : > { %8183 = vrot.lane.b32.xlu0 %v8182_v61, %s15717_s21 }
 0x545   : > { %8213 = vrot.lane.b32.xlu1 %v8212_v44, %s15717_s21  ;;  %3959 = vmatmul.mubr.f32.gmra.mrb[4].mxu1 %v3859_v59 }
 0x546   : > { %3964 = vmatprep.mubr.f32.mxu1 %v3864_v32 }
 0x547   : > { %8198 = vrot.lane.b32.xlu0 %v8197_v46, %s15717_s21 }
 0x549   : > { %3776 = vrot.lane.b32.xlu1 %v9284_v39, %s15717_s21  ;;  %3965 = vmatmul.mubr.f32.gmra.mrb[6].mxu1 %v3863_v58 }
 0x54a   : > { %6225 = vmatprep.mubr.msk.f32.mxu1 %vm16440_vm2, %v3854_v10  ;;  %vm16445_vm2 = vcmask 277504  }
 0x54b   : > { %8203 = vrot.lane.b32.xlu0 %v8202_v1, %s15717_s21 }
 0x54e   : > { %v8104_v17 = vpop.permute.xlu1 %8103 }
 0x54f   : > { %8218 = vrot.lane.b32.xlu0 %v8217_v35, %s15717_s21  ;;  %v8106_v56 = vunpack.i.h.bf16 %v8104_v17  ;;  %v8105_v6 = vunpack.i.l.bf16 %v8104_v17 }
 0x551   : > { %v3783_v15 = vsel %vm3778_vm14, %v8105_v6, %v8106_v56 }
 0x56a   : > { %v8119_v29 = vpop.permute.xlu1 %8118 }
 0x56b   : > { %v8121_v13 = vunpack.i.h.bf16 %v8119_v29  ;;  %v8120_v40 = vunpack.i.l.bf16 %v8119_v29 }
 0x56d   : > { %v3791_v60 = vsel %vm3778_vm14, %v8120_v40, %v8121_v13 }
 0x56e   : > { %v12660_v47 = vpop.permute.xlu1 %8128 }
 0x56f   : > { %v8131_v16 = vunpack.i.h.bf16 %v12660_v47  ;;  %v8130_v42 = vunpack.i.l.bf16 %v12660_v47 }
 0x572   : > { %v8139_v2 = vpop.permute.xlu1 %8138 }
 0x573   : > { %v8141_v51 = vunpack.i.h.bf16 %v8139_v2  ;;  %v8140_v22 = vunpack.i.l.bf16 %v8139_v2 }
 0x575   : > { %v3786_v23 = vsel %vm3778_vm14, %v8140_v22, %v8141_v51 }
 0x592   : > { %v12662_v9 = vpop.permute.xlu0 %8108 }
 0x596   : > { %v8114_v43 = vpop.permute.xlu0 %8113 }
 0x597   : > { %v8116_v55 = vunpack.i.h.bf16 %v8114_v43  ;;  %v8115_v38 = vunpack.i.l.bf16 %v8114_v43 }
 0x599   : > { %v3787_v53 = vsel %vm3778_vm14, %v8115_v38, %v8116_v55 }
 0x59a   : > { %v12664_v28 = vpop.permute.xlu1 %8143  ;;  %v12666_v54 = vpop.permute.xlu0 %8123 }
 0x59b   : > { %v8126_v62 = vunpack.i.h.bf16 %v12666_v54  ;;  %v8125_v25 = vunpack.i.l.bf16 %v12666_v54  ;;  %v8145_v47 = vunpack.i.l.bf16 %v12664_v28 }
 0x59d   : > { %v3795_v35 = vsel %vm3778_vm14, %v8125_v25, %v8126_v62 }
 0x59e   : > { %v8154_v33 = vpop.permute.xlu1 %8153  ;;  %v8134_v34 = vpop.permute.xlu0 %8133 }
 0x59f   : > { %v8136_v48 = vunpack.i.h.bf16 %v8134_v34  ;;  %v8135_v41 = vunpack.i.l.bf16 %v8134_v34  ;;  %v8155_v20 = vunpack.i.l.bf16 %v8154_v33  ;;  %v8156_v3 = vunpack.i.h.bf16 %v8154_v33 }
 0x5a1   : > { %v3785_v50 = vsel %vm3778_vm14, %v8136_v48, %v8140_v22  ;;  %v3784_v63 = vsel %vm3778_vm14, %v8106_v56, %v8135_v41  ;;  %v3788_v5 = vsel %vm3778_vm14, %v8116_v55, %v8155_v20 }
 0x5a2   : > { %v8169_v21 = vpop.permute.xlu1 %8168  ;;  %v12672_v30 = vpop.permute.xlu0 %8148  ;;  %v6343_v19 = vpack.c.bf16 %v3786_v23, %v3784_v63  ;;  %v6345_v45 = vpack.c.bf16 %v3785_v50, %v3783_v15  ;;  %v3799_v15 = vsel %vm3778_vm14, %v8130_v42, %v8131_v16  ;;  %v8111_v50 = vunpack.i.h.bf16 %v12662_v9  ;;  %v3853_v42 = vld [vmem:[%s15352_s2 + $0x10] sm:$0xff] }
 0x5a3   : > { %v8171_v36 = vunpack.i.h.bf16 %v8169_v21  ;;  %v8170_v57 = vunpack.i.l.bf16 %v8169_v21  ;;  %v8151_v17 = vunpack.i.h.bf16 %v12672_v30  ;;  %v8150_v29 = vunpack.i.l.bf16 %v12672_v30 }
 0x5a4   : > { %6344 = vmatprep.subr.bf16.mxu1 %v6343_v19  ;;  %v8146_v23 = vunpack.i.h.bf16 %v12664_v28 }
 0x5a5   : > { %6346 = vmatpush1.bf16.msra.mxu1 %v6345_v45  ;;  %v3794_v46 = vsel %vm3778_vm14, %v8170_v57, %v8171_v36  ;;  %v3806_v63 = vsel %vm3778_vm14, %v8150_v29, %v8151_v17  ;;  %v8110_v45 = vunpack.i.l.bf16 %v12662_v9  ;;  %v3866_v17 = vld [vmem:[%s15352_s2 + $0x78] sm:$0xff] }
 0x5a6   : > { %v8159_v49 = vpop.permute.xlu0 %8158 }
 0x5a7   : > { %v8174_v4 = vpop.permute.xlu1 %8173  ;;  %v8161_v8 = vunpack.i.h.bf16 %v8159_v49  ;;  %v8160_v27 = vunpack.i.l.bf16 %v8159_v49  ;;  %v3805_v49 = vsel %vm3778_vm14, %v8146_v23, %v8150_v29  ;;  %v3865_v29 = vld [vmem:[%s15352_s2 + $0x70] sm:$0xff] }
 0x5a8   : > { %v8175_v52 = vunpack.i.l.bf16 %v8174_v4  ;;  %v8176_v58 = vunpack.i.h.bf16 %v8174_v4  ;;  %v3804_v4 = vsel %vm3778_vm14, %v8111_v50, %v8145_v47 }
 0x5a9   : > { %v3789_v7 = vsel %vm3778_vm14, %v8156_v3, %v8160_v27  ;;  %v3790_v14 = vsel %vm3778_vm14, %v8160_v27, %v8161_v8  ;;  %v6363_v3 = vpack.c.bf16 %v3806_v63, %v3804_v4 }
 0x5aa   : > { %v6347_v37 = vpack.c.bf16 %v3790_v14, %v3788_v5  ;;  %v6349_v0 = vpack.c.bf16 %v3789_v7, %v3787_v53  ;;  %v3796_v2 = vsel %vm3778_vm14, %v8126_v62, %v8175_v52  ;;  %v3803_v53 = vsel %vm3778_vm14, %v8110_v45, %v8111_v50  ;;  %v16450_v45 = vld [vmem:[#allocation2_spill] sm:$0xff] }
 0x5ab   : > { %v8189_v24 = vpop.permute.xlu1 %8188 }
 0x5ac   : > { %6348 = vmatprep.subr.bf16.mxu1 %v6347_v37  ;;  %v8191_v43 = vunpack.i.h.bf16 %v8189_v24  ;;  %v8190_v54 = vunpack.i.l.bf16 %v8189_v24 }
 0x5ad   : > { %v8164_v18 = vpop.permute.xlu0 %8163  ;;  %6350 = vmatpush1.bf16.msra.mxu1 %v6349_v0 }
 0x5ae   : > { %v8166_v61 = vunpack.i.h.bf16 %v8164_v18  ;;  %v8165_v12 = vunpack.i.l.bf16 %v8164_v18  ;;  %v3802_v19 = vsel %vm3778_vm14, %v8190_v54, %v8191_v43 }
 0x5af   : > { %v12685_v11 = vpop.permute.xlu1 %8193 }
 0x5b0   : > { %v3793_v31 = vsel %vm3778_vm14, %v8166_v61, %v8170_v57  ;;  %v3792_v44 = vsel %vm3778_vm14, %v8121_v13, %v8165_v12  ;;  %v8196_v8 = vunpack.i.h.bf16 %v12685_v11  ;;  %v8195_v28 = vunpack.i.l.bf16 %v12685_v11 }
 0x5b1   : > { %v8179_v59 = vpop.permute.xlu0 %8178  ;;  %v6351_v32 = vpack.c.bf16 %v3794_v46, %v3792_v44  ;;  %v6353_v1 = vpack.c.bf16 %v3793_v31, %v3791_v60  ;;  %v6365_v57 = vpack.c.bf16 %v3805_v49, %v3803_v53 }
 0x5b2   : > { %v8181_v39 = vunpack.i.h.bf16 %v8179_v59  ;;  %v8180_v10 = vunpack.i.l.bf16 %v8179_v59  ;;  %v3807_v7 = vsel %vm3778_vm14, %v8195_v28, %v8196_v8 }
 0x5b3   : > { %6352 = vmatprep.subr.bf16.mxu1 %v6351_v32  ;;  %v8209_v34 = vpop.permute.xlu1 %8208 }
 0x5b4   : > { %v3797_v56 = vsel %vm3778_vm14, %v8176_v58, %v8180_v10  ;;  %6354 = vmatpush1.bf16.msra.mxu1 %v6353_v1  ;;  %v3798_v6 = vsel %vm3778_vm14, %v8180_v10, %v8181_v39  ;;  %v8211_v27 = vunpack.i.h.bf16 %v8209_v34  ;;  %v8210_v13 = vunpack.i.l.bf16 %v8209_v34  ;;  %v3858_v58 = vld [vmem:[%s15352_s2 + $0x38] sm:$0xff]  ;;  %v3857_v39 = vld [vmem:[%s15352_s2 + $0x30] sm:$0xff] }
 0x5b5   : > { %v8184_v51 = vpop.permute.xlu0 %8183  ;;  %v6355_v22 = vpack.c.bf16 %v3798_v6, %v3796_v2  ;;  %v6357_v33 = vpack.c.bf16 %v3797_v56, %v3795_v35  ;;  %v3862_v10 = vld [vmem:[%s15352_s2 + $0x58] sm:$0xff]  ;;  %v3861_v35 = vld [vmem:[%s15352_s2 + $0x50] sm:$0xff] }
 0x5b6   : > { %v8186_v48 = vunpack.i.h.bf16 %v8184_v51  ;;  %v8185_v41 = vunpack.i.l.bf16 %v8184_v51  ;;  %v3810_v24 = vsel %vm3778_vm14, %v8210_v13, %v8211_v27 }
 0x5b7   : > { %6356 = vmatprep.subr.bf16.mxu1 %v6355_v22  ;;  %v8214_v40 = vpop.permute.xlu1 %8213 }
 0x5b8   : > { %v3801_v21 = vsel %vm3778_vm14, %v8186_v48, %v8190_v54  ;;  %6358 = vmatpush1.bf16.msra.mxu1 %v6357_v33  ;;  %v3800_v30 = vsel %vm3778_vm14, %v8131_v16, %v8185_v41  ;;  %v8215_v14 = vunpack.i.l.bf16 %v8214_v40  ;;  %v8216_v52 = vunpack.i.h.bf16 %v8214_v40 }
 0x5b9   : > { %v8199_v55 = vpop.permute.xlu0 %8198  ;;  %v6359_v38 = vpack.c.bf16 %v3802_v19, %v3800_v30  ;;  %v6361_v20 = vpack.c.bf16 %v3801_v21, %v3799_v15 }
 0x5ba   : > { %v8201_v18 = vunpack.i.h.bf16 %v8199_v55  ;;  %v8200_v37 = vunpack.i.l.bf16 %v8199_v55 }
 0x5bb   : > { %6360 = vmatprep.subr.bf16.mxu1 %v6359_v38  ;;  %v12716_v1 = vpop.permute.xlu1 %3776  ;;  %v16451_v38 = vld [vmem:[#allocation3_spill] sm:$0xff] }
 0x5bc   : > { %6362 = vmatpush1.bf16.msra.mxu1 %v6361_v20  ;;  %v3811_v44 = vsel %vm3778_vm14, %v8200_v37, %v8201_v18  ;;  %v3812_v16 = vsel %vm3778_vm14, %v8201_v18, %v8215_v14  ;;  %16441 = vst [vmem:[#allocation57_spill] sm:$0xff] %v12716_v1 }
 0x5bd   : > { %v8204_v9 = vpop.permute.xlu0 %8203  ;;  %6364 = vmatprep.subr.bf16.mxu1 %v6363_v3 }
 0x5be   : > { %v8206_v5 = vunpack.i.h.bf16 %v8204_v9  ;;  %v8205_v36 = vunpack.i.l.bf16 %v8204_v9 }
 0x5c0   : > { %v3809_v0 = vsel %vm3778_vm14, %v8206_v5, %v8210_v13  ;;  %6366 = vmatpush1.bf16.msra.mxu1 %v6365_v57  ;;  %v3808_v61 = vsel %vm3778_vm14, %v8196_v8, %v8205_v36 }
 0x5c1   : > { %v8219_v12 = vpop.permute.xlu0 %8218  ;;  %v6367_v62 = vpack.c.bf16 %v3810_v24, %v3808_v61  ;;  %v6369_v25 = vpack.c.bf16 %v3809_v0, %v3807_v7 }
 0x5c2   : > { %v8221_v60 = vunpack.i.h.bf16 %v8219_v12  ;;  %v8220_v31 = vunpack.i.l.bf16 %v8219_v12  ;;  %v16460_v12 = vld [vmem:[#allocation51_spill] sm:$0xff] }
 0x5c3   : > { %6368 = vmatprep.subr.bf16.mxu1 %v6367_v62 }
 0x5c4   : > { %v3813_v46 = vsel %vm3778_vm14, %v8216_v52, %v8220_v31  ;;  %6370 = vmatpush1.bf16.msra.mxu1 %v6369_v25  ;;  %v3814_v11 = vsel %vm3778_vm14, %v8220_v31, %v8221_v60 }
 0x5c5   : > { %v6371_v59 = vpack.c.bf16 %v3814_v11, %v3812_v16  ;;  %v6373_v32 = vpack.c.bf16 %v3813_v46, %v3811_v44  ;;  %v16462_v44 = vld [vmem:[#allocation17_spill] sm:$0xff]  ;;  %v16463_v16 = vld [vmem:[#allocation52_spill] sm:$0xff] }
 0x5c7   : > { %6372 = vmatprep.subr.bf16.mxu1 %v6371_v59  ;;  %v16464_v59 = vld [vmem:[#allocation50_spill] sm:$0xff] }
 0x5c8   : > { %6374 = vmatpush1.bf16.msra.mxu1 %v6373_v32 }
 0x5c9   : > { %6223 = vmatprep.subr.msk.mxu1 %vm15721_vm10, %v12716_v1 }
 0x5cc   : > { %6224 = vmatpush1.msk.msra.mxu1 %vm15721_vm10, %v12716_v1  ;;  %vm16449_vm10 = vmmov %vm16445_vm2 }
 0x5cd   : > { %4036 = vmatmul.mubr.f32.vlgmr.msra.gmra.mrb[0].mxu1 %v3853_v42 }
 0x5ce   : > { %6226 = vmatprep.mubr.msk.f32.mxu1 %vm16442_vm8, %v3858_v58  ;;  %vm16446_vm8 = vmmov %vm16445_vm2  ;;  %v16465_v58 = vld [vmem:[#allocation22_spill] sm:$0xff] }
 0x5d1   : > { %4042 = vmatmul.mubr.f32.gmra.mrb[2].mxu1 %v3857_v39 }
 0x5d2   : > { %6227 = vmatprep.mubr.msk.f32.mxu1 %vm16443_vm11, %v3862_v10  ;;  %vm16447_vm11 = vmmov %vm16445_vm2  ;;  %v16466_v10 = vld [vmem:[#allocation46_spill] sm:$0xff] }
 0x5d5   : > { %4048 = vmatmul.mubr.f32.gmra.mrb[4].mxu1 %v3861_v35 }
 0x5d6   : > { %6228 = vmatprep.mubr.msk.f32.mxu1 %vm16444_vm4, %v3866_v17  ;;  %vm16448_vm4 = vmmov %vm16445_vm2  ;;  %v16467_v17 = vld [vmem:[#allocation14_spill] sm:$0xff] }
 0x5d9   : > { %4054 = vmatmul.mubr.f32.gmra.mrb[6].mxu1 %v3865_v29 }
 0x6a0   : > { %v4037_v2 = vpop.f32.mrb[0].mxu1 }
 0x6a1   : > { %4068 = vrot.lane.b32.xlu0 %v4037_v2, %s16261_s9  ;;  %v4039_v43 = vpop.f32.mrb[1].mxu1 }
 0x6a2   : > { %4070 = vrot.lane.b32.xlu1 %v4039_v43, %s16261_s9 }
 0x6a4   : > { %v4043_v54 = vpop.f32.mrb[2].mxu1 }
 0x6a5   : > { %4072 = vrot.lane.b32.xlu0 %v4043_v54, %s16261_s9  ;;  %v4045_v56 = vpop.f32.mrb[3].mxu1  ;;  %v16468_v54 = vld [vmem:[#allocation43_spill] sm:$0xff] }
 0x6a6   : > { %4074 = vrot.lane.b32.xlu1 %v4045_v56, %s16261_s9 }
 0x6a8   : > { %v4049_v6 = vpop.f32.mrb[4].mxu1 }
 0x6a9   : > { %4076 = vrot.lane.b32.xlu0 %v4049_v6, %s16261_s9  ;;  %v4051_v47 = vpop.f32.mrb[5].mxu1  ;;  %v16469_v6 = vld [vmem:[#allocation13_spill] sm:$0xff] }
 0x6aa   : > { %4078 = vrot.lane.b32.xlu1 %v4051_v47, %s16261_s9 }
 0x6ac   : > { %v4055_v51 = vpop.f32.mrb[6].mxu1 }
 0x6ad   : > { %4080 = vrot.lane.b32.xlu0 %v4055_v51, %s16261_s9  ;;  %v4057_v22 = vpop.f32.mrb[7].mxu1 }
 0x6ae   : > { %4082 = vrot.lane.b32.xlu1 %v4057_v22, %s16261_s9  ;;  %s16566_s9 = smov 79  }
 0x713   : > { %v4069_v33 = vpop.permute.xlu0 %4068 }
 0x714   : > { %v12755_v34 = vsel %vm16445_vm2, 0.0, %v4069_v33  ;;  %v4071_v48 = vpop.permute.xlu1 %4070 }
 0x715   : > { %v12758_v41 = vsel %vm16446_vm8, %v4069_v33, %v4071_v48  ;;  %v12763_v63 = vsel %vm16447_vm11, %v4071_v48, 0.0  ;;  %v4108_v3 = vmul.f32 %v16450_v45, %v12755_v34  ;;  %vm16454_vm8 = vmmov %vm16445_vm2  ;;  %v4116_v62 = vmul.f32 %v16460_v12, %v12755_v34  ;;  %v16470_v48 = vld [vmem:[#allocation36_spill] sm:$0xff] }
 0x716   : > { %v8222_v15 = vpack.i.bf16 %v12758_v41, %v12755_v34  ;;  %v4109_v20 = vmul.f32 %v16451_v38, %v12758_v41  ;;  %vm16457_vm11 = vmmov %vm16445_vm2  ;;  %v8242_v61 = vpack.i.bf16 %v12763_v63, %v12758_v41  ;;  %v4117_v25 = vmul.f32 %v12758_v41, %v11514_v26 }
 0x717   : > { %v4073_v50 = vpop.permute.xlu0 %4072  ;;  %v4128_v46 = vmul.f32 %v16462_v44, %v12755_v34  ;;  %v4129_v11 = vmul.f32 %v12758_v41, %v16463_v16  ;;  %v4118_v32 = vmul.f32 %v16464_v59, %v12763_v63  ;;  %v4140_v39 = vmul.f32 %v16465_v58, %v12755_v34 }
 0x718   : > { %v12766_v23 = vsel %vm16448_vm4, 0.0, %v4073_v50  ;;  %v4075_v21 = vpop.permute.xlu1 %4074  ;;  %8223 = vrot.lane.b32.xlu0 %v8222_v15, %s9257_s26  ;;  %vm16459_vm4 = vmmov %vm16445_vm2  ;;  %v8247_v31 = vpack.i.bf16 %v4117_v25, %v4116_v62  ;;  %v4141_v35 = vmul.f32 %v12758_v41, %v16466_v10  ;;  %v4130_v29 = vmul.f32 %v16467_v17, %v12763_v63  ;;  %v16479_v25 = vld [vmem:[#allocation53_spill] sm:$0xff] }
 0x719   : > { %v12770_v30 = vsel %vm16449_vm10, %v4073_v50, %v4075_v21  ;;  %v8342_v19 = vpack.i.bf16 %v12766_v23, %v12763_v63  ;;  %v4110_v55 = vmul.f32 %v16450_v45, %v12766_v23  ;;  %vm16452_vm10 = vmmov %vm16445_vm2  ;;  %v12815_v0 = vsel %vm16459_vm4, %v4075_v21, 0.0  ;;  %v16471_v50 = vld [vmem:[#allocation39_spill] sm:$0xff] }
 0x71a   : > { %v4111_v4 = vmul.f32 %v16451_v38, %v12770_v30  ;;  %v12827_v52 = vpack.i.bf16 %v12815_v0, %v12770_v30  ;;  %v4119_v60 = vmul.f32 %v16460_v12, %v12766_v23  ;;  %v4131_v42 = vmul.f32 %v16462_v44, %v12766_v23 }
 0x71b   : > { %v4077_v49 = vpop.permute.xlu0 %4076  ;;  %8343 = vrot.lane.b32.xlu1 %v8342_v19, %s9257_s26  ;;  %v6377_v27 = vpack.c.bf16 %v4110_v55, %v4108_v3  ;;  %v4143_v43 = vmul.f32 %v16465_v58, %v12766_v23  ;;  %v4152_v56 = vmul.f32 %v16468_v54, %v12755_v34  ;;  %v4153_v47 = vmul.f32 %v12758_v41, %v16469_v6  ;;  %v16507_v58 = vld [vmem:[#allocation40_spill] sm:$0xff] }
 0x71c   : > { %v12783_v8 = vpop.permute.xlu1 %4078  ;;  %8228 = vrot.lane.b32.xlu0 %v8222_v15, %s9264_s29  ;;  %v6375_v28 = vpack.c.bf16 %v4111_v4, %v4109_v20  ;;  %v12792_v53 = vsel %vm16445_vm2, 0.0, %v4077_v49  ;;  %16461 = vst [vmem:[#allocation63_spill] sm:$0xff] %v12827_v52  ;;  %v8392_v2 = vpack.i.bf16 %v4119_v60, %v4118_v32  ;;  %v8252_v51 = vpack.i.bf16 %v4129_v11, %v4128_v46  ;;  %v16473_v20 = vld [vmem:[#allocation49_spill] sm:$0xff] }
 0x71d   : > { %v12788_v13 = vsel %vm16452_vm10, %v4077_v49, %v12783_v8  ;;  %16453 = vst [vmem:[#allocation59_spill] sm:$0xff] %v12792_v53  ;;  %v4112_v24 = vmul.f32 %v16450_v45, %v12792_v53  ;;  %v8397_v22 = vpack.i.bf16 %v4131_v42, %v4130_v29  ;;  %v8257_v33 = vpack.i.bf16 %v4141_v35, %v4140_v39  ;;  %v16480_v11 = vld [vmem:[#allocation25_spill] sm:$0xff]  ;;  %v16481_v39 = vld [vmem:[#allocation18_spill] sm:$0xff]  ;;  %v16493_v29 = vld [vmem:[#allocation71_spill] sm:$0xff] }
 0x71e   : > { %6376 = vmatprep.subr.bf16.mxu1 %v6375_v28  ;;  %v4113_v7 = vmul.f32 %v16451_v38, %v12788_v13  ;;  %v4154_v21 = vmul.f32 %v16471_v50, %v12763_v63  ;;  %v12872_v4 = vmul.f32 %v12758_v41, %v16473_v20  ;;  %v8262_v3 = vpack.i.bf16 %v4153_v47, %v4152_v56  ;;  %v16474_v28 = vld [vmem:[#allocation54_spill] sm:$0xff]  ;;  %v16483_v56 = vld [vmem:[#allocation47_spill] sm:$0xff]  ;;  %vm16548_vm10 = vmmov %vm16445_vm2 }
 0x71f   : > { %6378 = vmatpush1.bf16.msra.mxu1 %v6377_v27  ;;  %v4081_v40 = vpop.permute.xlu0 %4080  ;;  %8348 = vrot.lane.b32.xlu1 %v8342_v19, %s9264_s29  ;;  %v4164_v27 = vmul.f32 %v16474_v28, %v12755_v34  ;;  %v4166_v60 = vmul.f32 %v16479_v25, %v12763_v63  ;;  %v12901_v32 = vmul.f32 %v12758_v41, %v16480_v11  ;;  %vm16741_vm4 = vcmask 1022976  }
 0x720   : > { %v12795_v9 = vsel %vm16454_vm8, 0.0, %v4081_v40  ;;  %8233 = vrot.lane.b32.xlu0 %v8222_v15, %s9279_s17  ;;  %v12798_v5 = vpop.permute.xlu1 %4082  ;;  %v4176_v35 = vmul.f32 %v16481_v39, %v12755_v34  ;;  %v4177_v47 = vmul.f32 %v12758_v41, %v16483_v56  ;;  %v12980_v44 = vmul.f32 %v12770_v30, %v16493_v29 }
 0x721   : > { %16455 = vst [vmem:[#allocation58_spill] sm:$0xff] %v12795_v9  ;;  %16456 = vst [vmem:[#allocation8_spill] sm:$0xff] %v12798_v5  ;;  %v12802_v36 = vsel %vm16457_vm11, %v4081_v40, %v12798_v5  ;;  %v4114_v57 = vmul.f32 %v16450_v45, %v12795_v9  ;;  %v16472_v45 = vld [vmem:[#allocation61_spill] sm:$0xff]  ;;  %v16475_v40 = vld [vmem:[#allocation11_spill] sm:$0xff]  ;;  %vm16731_vm8 = vcmask 1031168  }
 0x722   : > { %16458 = vst [vmem:[#allocation60_spill] sm:$0xff] %v12802_v36  ;;  %v4115_v14 = vmul.f32 %v16451_v38, %v12802_v36  ;;  %v12864_v55 = vmul.f32 %v16472_v45, %v12755_v34  ;;  %v12868_v38 = vmul.f32 %v16472_v45, %v12766_v23  ;;  %v16489_v36 = vld [vmem:[#allocation5_spill] sm:$0xff]  ;;  %v12956_v45 = vmul.f32 %v12758_v41, %v16493_v29  ;;  %v16495_v9 = vld [vmem:[#allocation4_spill] sm:$0xff]  ;;  %vm16733_vm11 = vmmov %vm16731_vm8 }
 0x723   : > { %8353 = vrot.lane.b32.xlu1 %v8342_v19, %s9279_s17  ;;  %v6381_v37 = vpack.c.bf16 %v4114_v57, %v4112_v24  ;;  %v12878_v57 = vmul.f32 %v16475_v40, %v12763_v63  ;;  %v16487_v24 = vld [vmem:[#allocation70_spill] sm:$0xff]  ;;  %v12941_v5 = vmul.f32 %v16489_v36, %v12763_v63  ;;  %16499 = vst [vmem:[#allocation74_spill] sm:$0xff] %v12980_v44 }
 0x724   : > { %8238 = vrot.lane.b32.xlu0 %v8222_v15, %s9256_s10  ;;  %v6379_v18 = vpack.c.bf16 %v4115_v14, %v4113_v7  ;;  %v4142_v15 = vmul.f32 %v16470_v48, %v12763_v63  ;;  %v16476_v7 = vld [vmem:[#allocation30_spill] sm:$0xff]  ;;  %v12934_v1 = vmul.f32 %v12758_v41, %v16487_v24  ;;  %16494 = vst [vmem:[#allocation68_spill] sm:$0xff] %v12956_v45 }
 0x725   : > { %v4165_v14 = vmul.f32 %v12758_v41, %v16476_v7  ;;  %16490 = vst [vmem:[#allocation67_spill] sm:$0xff] %v12941_v5  ;;  %v8272_v53 = vpack.i.bf16 %v4177_v47, %v4176_v35  ;;  %v13010_v35 = vmul.f32 %v16507_v58, %v12755_v34  ;;  %v13014_v47 = vmul.f32 %v16507_v58, %v12766_v23 }
 0x726   : > { %6380 = vmatprep.subr.bf16.mxu1 %v6379_v18  ;;  %v8402_v49 = vpack.i.bf16 %v4143_v43, %v4142_v15  ;;  %v16477_v18 = vld [vmem:[#allocation23_spill] sm:$0xff]  ;;  %16488 = vst [vmem:[#allocation65_spill] sm:$0xff] %v12934_v1 }
 0x727   : > { %8358 = vrot.lane.b32.xlu1 %v8342_v19, %s9256_s10  ;;  %6382 = vmatpush1.bf16.msra.mxu1 %v6381_v37  ;;  %v4155_v19 = vmul.f32 %v16468_v54, %v12766_v23  ;;  %v12886_v37 = vmul.f32 %v12758_v41, %v16477_v18  ;;  %v4179_v54 = vmul.f32 %v16481_v39, %v12766_v23  ;;  %v16510_v39 = vld [vmem:[#allocation31_spill] sm:$0xff] }
 0x728   : > { %8243 = vrot.lane.b32.xlu0 %v8242_v61, %s9263_s5  ;;  %v16478_v61 = vld [vmem:[#allocation45_spill] sm:$0xff]  ;;  %16508 = vst [vmem:[#allocation46_spill] sm:$0xff] %v13010_v35  ;;  %16509 = vst [vmem:[#allocation49_spill] sm:$0xff] %v13014_v47  ;;  %v13021_v44 = vmul.f32 %v16510_v39, %v12755_v34  ;;  %v16521_v47 = vld [vmem:[#allocation7_spill] sm:$0xff] }
 0x729   : > { %v12890_v62 = vmul.f32 %v16478_v61, %v12763_v63  ;;  %v8407_v42 = vpack.i.bf16 %v4155_v19, %v4154_v21  ;;  %v12924_v21 = vmul.f32 %v12770_v30, %v16480_v11  ;;  %v8267_v19 = vpack.i.bf16 %v4165_v14, %v4164_v27 }
 0x72a   : > { %v12964_v11 = vmul.f32 %v12770_v30, %v16487_v24  ;;  %16511 = vst [vmem:[#allocation11_spill] sm:$0xff] %v13021_v44  ;;  %v13072_v1 = vmul.f32 %v16521_v47, %v12766_v23 }
 0x72b   : > { %8388 = vrot.lane.b32.xlu1 %v12827_v52, %s9263_s5  ;;  %16486 = vst [vmem:[#allocation62_spill] sm:$0xff] %v12924_v21  ;;  %v16501_v52 = vld [vmem:[#allocation15_spill] sm:$0xff]  ;;  %v16524_v21 = vld [vmem:[#allocation28_spill] sm:$0xff] }
 0x72c   : > { %8248 = vrot.lane.b32.xlu0 %v8247_v31, %s9256_s10  ;;  %v4167_v31 = vmul.f32 %v16474_v28, %v12766_v23  ;;  %16497 = vst [vmem:[#allocation72_spill] sm:$0xff] %v12964_v11  ;;  %v12984_v28 = vmul.f32 %v16495_v9, %v12815_v0  ;;  %v4178_v45 = vmul.f32 %v16501_v52, %v12763_v63 }
 0x72e   : > { %16500 = vst [vmem:[#allocation2_spill] sm:$0xff] %v12984_v28  ;;  %v13025_v28 = vmul.f32 %v16510_v39, %v12766_v23  ;;  %v8417_v11 = vpack.i.bf16 %v4179_v54, %v4178_v45  ;;  %v16515_v45 = vld [vmem:[#allocation34_spill] sm:$0xff] }
 0x72f   : > { %8393 = vrot.lane.b32.xlu1 %v8392_v2, %s9256_s10  ;;  %v16482_v2 = vld [vmem:[#allocation44_spill] sm:$0xff]  ;;  %v4201_v39 = vmul.f32 %v12758_v41, %v16515_v45  ;;  %16523 = vst [vmem:[#allocation34_spill] sm:$0xff] %v13072_v1  ;;  %v13154_v1 = vmul.f32 %v16501_v52, %v12815_v0  ;;  %v16547_v52 = vld [vmem:[#allocation26_spill] sm:$0xff] }
 0x730   : > { %8253 = vrot.lane.b32.xlu0 %v8252_v51, %s9258_s24  ;;  %v12910_v43 = vmul.f32 %v16482_v2, %v12763_v63  ;;  %v16484_v51 = vld [vmem:[#allocation64_spill] sm:$0xff]  ;;  %v12930_v46 = vmul.f32 %v16482_v2, %v12815_v0  ;;  %v12960_v2 = vmul.f32 %v16495_v9, %v12763_v63  ;;  %16512 = vst [vmem:[#allocation23_spill] sm:$0xff] %v13025_v28 }
 0x731   : > { %v12945_v27 = vmul.f32 %v12770_v30, %v16484_v51  ;;  %16538 = vst [vmem:[#allocation81_spill] sm:$0xff] %v13154_v1 }
 0x732   : > { %16496 = vst [vmem:[#allocation73_spill] sm:$0xff] %v12960_v2  ;;  %v16502_v2 = vld [vmem:[#allocation27_spill] sm:$0xff] }
 0x733   : > { %8398 = vrot.lane.b32.xlu1 %v8397_v22, %s9258_s24  ;;  %v12916_v22 = vmul.f32 %v12758_v41, %v16484_v51  ;;  %16491 = vst [vmem:[#allocation66_spill] sm:$0xff] %v12945_v27  ;;  %v12998_v27 = vmul.f32 %v16502_v2, %v12755_v34 }
 0x734   : > { %8258 = vrot.lane.b32.xlu0 %v8257_v33, %s9259_s25  ;;  %v16485_v33 = vld [vmem:[#allocation6_spill] sm:$0xff] }
 0x735   : > { %v12920_v15 = vmul.f32 %v16485_v33, %v12763_v63  ;;  %v12949_v14 = vmul.f32 %v16485_v33, %v12815_v0  ;;  %16503 = vst [vmem:[#allocation3_spill] sm:$0xff] %v12998_v27  ;;  %v16519_v27 = vld [vmem:[#allocation55_spill] sm:$0xff] }
 0x736   : > { %v4190_v44 = vmul.f32 %v16519_v27, %v12763_v63 }
 0x737   : > { %8403 = vrot.lane.b32.xlu1 %v8402_v49, %s9259_s25  ;;  %16492 = vst [vmem:[#allocation69_spill] sm:$0xff] %v12949_v14  ;;  %v12972_v49 = vmul.f32 %v16489_v36, %v12815_v0 }
 0x738   : > { %8263 = vrot.lane.b32.xlu0 %v8262_v3, %s9249_s18  ;;  %v8412_v3 = vpack.i.bf16 %v4167_v31, %v4166_v60  ;;  %v13002_v60 = vmul.f32 %v16502_v2, %v12766_v23  ;;  %v16505_v31 = vld [vmem:[#allocation48_spill] sm:$0xff] }
 0x739   : > { %16498 = vst [vmem:[#allocation75_spill] sm:$0xff] %v12972_v49  ;;  %v4191_v58 = vmul.f32 %v16505_v31, %v12766_v23  ;;  %v16513_v49 = vld [vmem:[#allocation37_spill] sm:$0xff] }
 0x73a   : > { %16504 = vst [vmem:[#allocation52_spill] sm:$0xff] %v13002_v60  ;;  %v4200_v2 = vmul.f32 %v16513_v49, %v12755_v34  ;;  %v16514_v60 = vld [vmem:[#allocation10_spill] sm:$0xff] }
 0x73b   : > { %8408 = vrot.lane.b32.xlu1 %v8407_v42, %s9249_s18  ;;  %v4188_v42 = vmul.f32 %v16505_v31, %v12755_v34  ;;  %v13038_v14 = vmul.f32 %v16514_v60, %v12755_v34  ;;  %v8422_v5 = vpack.i.bf16 %v4191_v58, %v4190_v44  ;;  %v13090_v44 = vmul.f32 %v12770_v30, %v16463_v16  ;;  %v16532_v58 = vld [vmem:[#allocation16_spill] sm:$0xff] }
 0x73c   : > { %8268 = vrot.lane.b32.xlu0 %v8267_v19, %s9263_s5  ;;  %v16506_v19 = vld [vmem:[#allocation41_spill] sm:$0xff] }
 0x73d   : > { %v4189_v12 = vmul.f32 %v12758_v41, %v16506_v19 }
 0x73f   : > { %8413 = vrot.lane.b32.xlu1 %v8412_v3, %s9263_s5  ;;  %v8277_v54 = vpack.i.bf16 %v4189_v12, %v4188_v42  ;;  %v16516_v3 = vld [vmem:[#allocation56_spill] sm:$0xff]  ;;  %v4203_v42 = vmul.f32 %v16513_v49, %v12766_v23  ;;  %v4212_v12 = vmul.f32 %v16524_v21, %v12755_v34  ;;  %v13082_v49 = vmul.f32 %v16464_v59, %v12815_v0 }
 0x740   : > { %8273 = vrot.lane.b32.xlu0 %v8272_v53, %s9265_s30  ;;  %v13042_v53 = vmul.f32 %v16514_v60, %v12766_v23  ;;  %v13048_v31 = vmul.f32 %v16516_v3, %v12755_v34  ;;  %v13052_v35 = vmul.f32 %v16516_v3, %v12766_v23  ;;  %v16520_v60 = vld [vmem:[#allocation38_spill] sm:$0xff]  ;;  %v8282_v3 = vpack.i.bf16 %v4201_v39, %v4200_v2 }
 0x741   : > { %v4202_v28 = vmul.f32 %v16520_v60, %v12763_v63  ;;  %16526 = vst [vmem:[#allocation77_spill] sm:$0xff] %v13082_v49  ;;  %v13097_v59 = vmul.f32 %v16467_v17, %v12815_v0  ;;  %v13102_v2 = vmul.f32 %v12770_v30, %v16466_v10 }
 0x742   : > { %16517 = vst [vmem:[#allocation45_spill] sm:$0xff] %v13048_v31  ;;  %16518 = vst [vmem:[#allocation47_spill] sm:$0xff] %v13052_v35  ;;  %v16527_v31 = vld [vmem:[#allocation42_spill] sm:$0xff] }
 0x743   : > { %8418 = vrot.lane.b32.xlu1 %v8417_v11, %s9265_s30  ;;  %v13068_v11 = vmul.f32 %v16521_v47, %v12755_v34  ;;  %v4213_v35 = vmul.f32 %v12758_v41, %v16527_v31  ;;  %16528 = vst [vmem:[#allocation42_spill] sm:$0xff] %v13090_v44  ;;  %16529 = vst [vmem:[#allocation78_spill] sm:$0xff] %v13097_v59  ;;  %v8427_v39 = vpack.i.bf16 %v4203_v42, %v4202_v28  ;;  %v16533_v42 = vld [vmem:[#allocation35_spill] sm:$0xff]  ;;  %v16537_v59 = vld [vmem:[#allocation32_spill] sm:$0xff] }
 0x744   : > { %8278 = vrot.lane.b32.xlu0 %v8277_v54, %s9266_s23  ;;  %v13078_v54 = vmul.f32 %v12770_v30, %v11514_v26  ;;  %16530 = vst [vmem:[#allocation79_spill] sm:$0xff] %v13102_v2  ;;  %v13106_v47 = vmul.f32 %v16470_v48, %v12815_v0  ;;  %v13116_v28 = vmul.f32 %v12770_v30, %v16469_v6 }
 0x745   : > { %16522 = vst [vmem:[#allocation41_spill] sm:$0xff] %v13068_v11  ;;  %v4225_v49 = vmul.f32 %v12758_v41, %v16533_v42  ;;  %v16534_v11 = vld [vmem:[#allocation21_spill] sm:$0xff]  ;;  %v13131_v44 = vmul.f32 %v12770_v30, %v16476_v7  ;;  %v13146_v2 = vmul.f32 %v12770_v30, %v16483_v56 }
 0x746   : > { %16525 = vst [vmem:[#allocation76_spill] sm:$0xff] %v13078_v54  ;;  %16531 = vst [vmem:[#allocation80_spill] sm:$0xff] %v13106_v47  ;;  %v4224_v54 = vmul.f32 %v16532_v58, %v12755_v34  ;;  %v4214_v17 = vmul.f32 %v16534_v11, %v12763_v63 }
 0x747   : > { %8423 = vrot.lane.b32.xlu1 %v8422_v5, %s9266_s23  ;;  %v4215_v5 = vmul.f32 %v16524_v21, %v12766_v23  ;;  %v13124_v21 = vmul.f32 %v16471_v50, %v12815_v0  ;;  %v4227_v50 = vmul.f32 %v16532_v58, %v12766_v23  ;;  %16536 = vst [vmem:[#allocation35_spill] sm:$0xff] %v13146_v2  ;;  %v16539_v58 = vld [vmem:[#allocation20_spill] sm:$0xff]  ;;  %v16545_v2 = vld [vmem:[#allocation9_spill] sm:$0xff] }
 0x748   : > { %8283 = vrot.lane.b32.xlu0 %v8282_v3, %s16321_s8  ;;  %v8287_v3 = vpack.i.bf16 %v4213_v35, %v4212_v12  ;;  %v13135_v35 = vmul.f32 %v16479_v25, %v12815_v0  ;;  %v16535_v12 = vld [vmem:[#allocation29_spill] sm:$0xff]  ;;  %v4236_v25 = vmul.f32 %v16537_v59, %v12755_v34  ;;  %v8292_v7 = vpack.i.bf16 %v4225_v49, %v4224_v54 }
 0x749   : > { %v4226_v48 = vmul.f32 %v16535_v12, %v12763_v63  ;;  %v8432_v47 = vpack.i.bf16 %v4215_v5, %v4214_v17  ;;  %v4237_v6 = vmul.f32 %v12758_v41, %v16539_v58  ;;  %v13164_v17 = vmul.f32 %v16519_v27, %v12815_v0 }
 0x74a   : > { %v4239_v54 = vmul.f32 %v16537_v59, %v12766_v23  ;;  %v13180_v27 = vmul.f32 %v16520_v60, %v12815_v0  ;;  %v4249_v1 = vmul.f32 %v12758_v41, %v16545_v2  ;;  %v13204_v59 = vsel %vm16548_vm10, %v12783_v8, 0.0  ;;  %vm16742_vm10 = vmmov %vm16731_vm8 }
 0x74b   : > { %8428 = vrot.lane.b32.xlu1 %v8427_v39, %s16321_s8  ;;  %v13160_v39 = vmul.f32 %v12770_v30, %v16506_v19  ;;  %16541 = vst [vmem:[#allocation82_spill] sm:$0xff] %v13164_v17  ;;  %v8437_v49 = vpack.i.bf16 %v4227_v50, %v4226_v48  ;;  %v13192_v48 = vmul.f32 %v16534_v11, %v12815_v0 }
 0x74c   : > { %8288 = vrot.lane.b32.xlu0 %v8287_v3, %s9280_s7  ;;  %v13171_v3 = vmul.f32 %v12770_v30, %v16515_v45  ;;  %16543 = vst [vmem:[#allocation84_spill] sm:$0xff] %v13180_v27  ;;  %v8297_v50 = vpack.i.bf16 %v4237_v6, %v4236_v25  ;;  %v13200_v17 = vmul.f32 %v12770_v30, %v16533_v42  ;;  %v16550_v6 = vld [vmem:[#allocation12_spill] sm:$0xff] }
 0x74d   : > { %16540 = vst [vmem:[#allocation20_spill] sm:$0xff] %v13160_v39  ;;  %v4238_v39 = vmul.f32 %v16547_v52, %v12763_v63  ;;  %v13213_v25 = vmul.f32 %v16535_v12, %v12815_v0  ;;  %v13220_v8 = vmul.f32 %v12770_v30, %v16539_v58 }
 0x74e   : > { %16542 = vst [vmem:[#allocation83_spill] sm:$0xff] %v13171_v3  ;;  %v16549_v3 = vld [vmem:[#allocation24_spill] sm:$0xff] }
 0x74f   : > { %8433 = vrot.lane.b32.xlu1 %v8432_v47, %s9280_s7  ;;  %v16544_v47 = vld [vmem:[#allocation33_spill] sm:$0xff]  ;;  %v8442_v60 = vpack.i.bf16 %v4239_v54, %v4238_v39  ;;  %v4273_v27 = vmul.f32 %v12758_v41, %v16549_v3  ;;  %v13232_v39 = vmul.f32 %v12770_v30, %v16545_v2  ;;  %v16551_v54 = vld [vmem:[#allocation19_spill] sm:$0xff]  ;;  %v13253_v41 = vmul.f32 %v12788_v13, %v16484_v51 }
 0x750   : > { %8293 = vrot.lane.b32.xlu0 %v8292_v7, %s9281_s19  ;;  %v4248_v5 = vmul.f32 %v16544_v47, %v12755_v34  ;;  %v13188_v7 = vmul.f32 %v12770_v30, %v16527_v31  ;;  %v4251_v11 = vmul.f32 %v16544_v47, %v12766_v23  ;;  %v4250_v12 = vmul.f32 %v16551_v54, %v12763_v63 }
 0x752   : > { %16546 = vst [vmem:[#allocation9_spill] sm:$0xff] %v13188_v7  ;;  %v8302_v47 = vpack.i.bf16 %v4249_v1, %v4248_v5  ;;  %v4274_v7 = vmul.f32 %v16550_v6, %v12763_v63  ;;  %v13242_v1 = vmul.f32 %v12788_v13, %v16493_v29  ;;  %v13246_v5 = vmul.f32 %v16495_v9, %v13204_v59 }
 0x753   : > { %8438 = vrot.lane.b32.xlu1 %v8437_v49, %s9281_s19  ;;  %v13224_v49 = vmul.f32 %v16547_v52, %v12815_v0  ;;  %v13257_v52 = vmul.f32 %v16485_v33, %v13204_v59  ;;  %v13270_v63 = vmul.f32 %v16489_v36, %v13204_v59  ;;  %v8447_v51 = vpack.i.bf16 %v4251_v11, %v4250_v12 }
 0x754   : > { %8298 = vrot.lane.b32.xlu0 %v8297_v50, %s9282_s20  ;;  %v13238_v50 = vmul.f32 %v16551_v54, %v12815_v0  ;;  %v8307_v54 = vpack.i.bf16 %v4274_v7, %v4273_v27  ;;  %v4276_v9 = vmul.f32 %v12770_v30, %v16549_v3  ;;  %v4277_v29 = vmul.f32 %v16550_v6, %v12815_v0 }
 0x755   : > { %v16552_v11 = vpack.i.bf16 %v12868_v38, %v12864_v55  ;;  %v16553_v27 = vpack.i.bf16 %v12878_v57, %v12872_v4  ;;  %v4289_v7 = vmul.f32 %v16475_v40, %v12815_v0  ;;  %v4300_v38 = vmul.f32 %v12770_v30, %v16477_v18 }
 0x756   : > { %v8547_v12 = vpack.i.bf16 %v4277_v29, %v4276_v9  ;;  %v4301_v9 = vmul.f32 %v16478_v61, %v12815_v0  ;;  %v16556_v4 = vpack.i.bf16 %v12910_v43, %v12901_v32  ;;  %v16560_v0 = vld [vmem:[#allocation67_spill] sm:$0xff]  ;;  %v16561_v29 = vld [vmem:[#allocation65_spill] sm:$0xff]  ;;  %v16564_v43 = vld [vmem:[#allocation66_spill] sm:$0xff] }
 0x757   : > { %8443 = vrot.lane.b32.xlu1 %v8442_v60, %s9282_s20  ;;  %v13266_v60 = vmul.f32 %v12788_v13, %v16487_v24  ;;  %v16563_v32 = vld [vmem:[#allocation69_spill] sm:$0xff] }
 0x758   : > { %8303 = vrot.lane.b32.xlu0 %v8302_v47, %s16325_s28  ;;  %v8557_v57 = vpack.i.bf16 %v4301_v9, %v4300_v38  ;;  %v16575_v38 = vld [vmem:[#allocation74_spill] sm:$0xff] }
 0x75b   : > { %8448 = vrot.lane.b32.xlu1 %v8447_v51, %s16325_s28  ;;  %v4288_v51 = vmul.f32 %v12770_v30, %v16473_v20  ;;  %v16558_v30 = vld [vmem:[#allocation62_spill] sm:$0xff] }
 0x75c   : > { %8308 = vrot.lane.b32.xlu0 %v8307_v54, %s9257_s26  ;;  %v16555_v54 = vpack.i.bf16 %v12890_v62, %v12886_v37  ;;  %v16557_v37 = vpack.i.bf16 %v12920_v15, %v12916_v22  ;;  %v16559_v62 = vpack.i.bf16 %v12930_v46, %v16558_v30  ;;  %v16570_v15 = vld [vmem:[#allocation75_spill] sm:$0xff] }
 0x75d   : > { %v8552_v55 = vpack.i.bf16 %v4289_v7, %v4288_v51  ;;  %v16568_v51 = vld [vmem:[#allocation68_spill] sm:$0xff]  ;;  %v16581_v30 = vld [vmem:[#allocation3_spill] sm:$0xff] }
 0x75e   : > { %v16571_v7 = vld [vmem:[#allocation72_spill] sm:$0xff] }
 0x75f   : > { %8478 = vrot.lane.b32.xlu1 %v16552_v11, %s9265_s30  ;;  %v16562_v11 = vpack.i.bf16 %v16560_v0, %v16561_v29  ;;  %v16572_v46 = vpack.i.bf16 %v16570_v15, %v16571_v7  ;;  %v8602_v29 = vpack.i.bf16 %v13204_v59, %v12788_v13 }
 0x760   : > { %8313 = vrot.lane.b32.xlu0 %v16553_v27, %s9258_s24  ;;  %v16565_v27 = vpack.i.bf16 %v16563_v32, %v16564_v43  ;;  %v4123_v43 = vmul.f32 %v12788_v13, %v11514_v26 }
 0x763   : > { %8548 = vrot.lane.b32.xlu1 %v8547_v12, %s9257_s26  ;;  %v16567_v12 = vld [vmem:[#allocation73_spill] sm:$0xff] }
 0x764   : > { %8318 = vrot.lane.b32.xlu0 %v16555_v54, %s16554_s6  ;;  %v16569_v22 = vpack.i.bf16 %v16567_v12, %v16568_v51  ;;  %v16573_v54 = vpack.i.bf16 %v12766_v23, %v12755_v34  ;;  %v16580_v23 = vld [vmem:[#allocation52_spill] sm:$0xff]  ;;  %v16586_v12 = vld [vmem:[#allocation49_spill] sm:$0xff]  ;;  %v16587_v51 = vld [vmem:[#allocation46_spill] sm:$0xff] }
 0x767   : > { %8553 = vrot.lane.b32.xlu1 %v8552_v55, %s9258_s24  ;;  %v16574_v55 = vld [vmem:[#allocation2_spill] sm:$0xff] }
 0x768   : > { %8323 = vrot.lane.b32.xlu0 %v16556_v4, %s9249_s18  ;;  %v16576_v9 = vpack.i.bf16 %v16574_v55, %v16575_v38  ;;  %v16577_v4 = vld [vmem:[#allocation63_spill] sm:$0xff]  ;;  %v4135_v55 = vmul.f32 %v12788_v13, %v16463_v16 }
 0x76b   : > { %8558 = vrot.lane.b32.xlu1 %v8557_v57, %s16554_s6  ;;  %v16578_v57 = vld [vmem:[#allocation59_spill] sm:$0xff] }
 0x76c   : > { %8328 = vrot.lane.b32.xlu0 %v16557_v37, %s9264_s29  ;;  %v8582_v37 = vpack.i.bf16 %v12788_v13, %v16578_v57 }
 0x76f   : > { %8563 = vrot.lane.b32.xlu1 %v16559_v62, %s9249_s18  ;;  %v16582_v62 = vpack.i.bf16 %v16580_v23, %v16581_v30 }
 0x770   : > { %8333 = vrot.lane.b32.xlu0 %v16562_v11, %s9265_s30  ;;  %v16584_v11 = vld [vmem:[#allocation51_spill] sm:$0xff] }
 0x771   : > { %v4122_v32 = vmul.f32 %v16584_v11, %v16578_v57 }
 0x773   : > { %8568 = vrot.lane.b32.xlu1 %v16565_v27, %s9264_s29  ;;  %v8607_v7 = vpack.i.bf16 %v4123_v43, %v4122_v32  ;;  %v4147_v32 = vmul.f32 %v12788_v13, %v16466_v10 }
 0x774   : > { %8338 = vrot.lane.b32.xlu0 %v16569_v22, %s16566_s9  ;;  %v16588_v22 = vpack.i.bf16 %v16586_v12, %v16587_v51  ;;  %v16598_v12 = vpack.i.bf16 %v13042_v53, %v13038_v14 }
 0x777   : > { %8573 = vrot.lane.b32.xlu1 %v16572_v46, %s9265_s30  ;;  %v16590_v46 = vld [vmem:[#allocation17_spill] sm:$0xff] }
 0x778   : > { %8363 = vrot.lane.b32.xlu0 %v16573_v54, %s9263_s5  ;;  %v4134_v54 = vmul.f32 %v16590_v46, %v16578_v57 }
 0x77a   : > { %v8612_v30 = vpack.i.bf16 %v4135_v55, %v4134_v54  ;;  %v16600_v55 = vld [vmem:[#allocation13_spill] sm:$0xff] }
 0x77b   : > { %8578 = vrot.lane.b32.xlu1 %v16576_v9, %s16566_s9  ;;  %v16592_v9 = vld [vmem:[#allocation23_spill] sm:$0xff] }
 0x77c   : > { %8368 = vrot.lane.b32.xlu0 %v16577_v4, %s9257_s26 }
 0x77f   : > { %8583 = vrot.lane.b32.xlu1 %v8582_v37, %s9257_s26 }
 0x780   : > { %8373 = vrot.lane.b32.xlu0 %v16577_v4, %s9264_s29 }
 0x783   : > { %8588 = vrot.lane.b32.xlu1 %v8582_v37, %s9264_s29 }
 0x784   : > { %8378 = vrot.lane.b32.xlu0 %v16577_v4, %s9279_s17 }
 0x787   : > { %8593 = vrot.lane.b32.xlu1 %v8582_v37, %s9279_s17 }
 0x788   : > { %8383 = vrot.lane.b32.xlu0 %v16577_v4, %s9256_s10  ;;  %v16593_v4 = vld [vmem:[#allocation11_spill] sm:$0xff] }
 0x78a   : > { %v13354_v34 = vpop.permute.xlu0 %8223 }
 0x78b   : > { %16579 = vst [vmem:[#allocation24_spill] sm:$0xff] %v13354_v34  ;;  %8598 = vrot.lane.b32.xlu1 %v8582_v37, %s9256_s10  ;;  %v16594_v37 = vpack.i.bf16 %v16592_v9, %v16593_v4  ;;  %v4159_v9 = vmul.f32 %v12788_v13, %v16600_v55 }
 0x78c   : > { %8453 = vrot.lane.b32.xlu0 %v16582_v62, %s9257_s26  ;;  %v16596_v62 = vld [vmem:[#allocation22_spill] sm:$0xff] }
 0x78d   : > { %v13361_v0 = vpop.permute.xlu1 %8343 }
 0x78e   : > { %16583 = vst [vmem:[#allocation12_spill] sm:$0xff] %v13361_v0  ;;  %v13369_v27 = vpop.permute.xlu0 %8228 }
 0x78f   : > { %16585 = vst [vmem:[#allocation62_spill] sm:$0xff] %v13369_v27  ;;  %8603 = vrot.lane.b32.xlu1 %v8602_v29, %s9263_s5  ;;  %v4146_v29 = vmul.f32 %v16596_v62, %v16578_v57 }
 0x790   : > { %8458 = vrot.lane.b32.xlu0 %v16588_v22, %s9258_s24 }
 0x791   : > { %v13376_v15 = vpop.permute.xlu1 %8348  ;;  %v8617_v22 = vpack.i.bf16 %v4147_v32, %v4146_v29  ;;  %v16606_v29 = vld [vmem:[#allocation54_spill] sm:$0xff] }
 0x792   : > { %16589 = vst [vmem:[#allocation67_spill] sm:$0xff] %v13376_v15  ;;  %v13382_v38 = vpop.permute.xlu0 %8233  ;;  %v4170_v32 = vmul.f32 %v16606_v29, %v16578_v57  ;;  %v16609_v15 = vld [vmem:[#allocation41_spill] sm:$0xff] }
 0x793   : > { %16591 = vst [vmem:[#allocation65_spill] sm:$0xff] %v13382_v38  ;;  %8608 = vrot.lane.b32.xlu1 %v8607_v7, %s9256_s10  ;;  %v16599_v7 = vld [vmem:[#allocation43_spill] sm:$0xff]  ;;  %v16614_v38 = vld [vmem:[#allocation76_spill] sm:$0xff] }
 0x794   : > { %8463 = vrot.lane.b32.xlu0 %v16594_v37, %s16554_s6  ;;  %v4158_v54 = vmul.f32 %v16599_v7, %v16578_v57  ;;  %v16602_v37 = vld [vmem:[#allocation47_spill] sm:$0xff] }
 0x795   : > { %v13389_v23 = vpop.permute.xlu1 %8353 }
 0x796   : > { %16595 = vst [vmem:[#allocation69_spill] sm:$0xff] %v13389_v23  ;;  %v13395_v43 = vpop.permute.xlu0 %8238  ;;  %v8622_v53 = vpack.i.bf16 %v4159_v9, %v4158_v54  ;;  %v16611_v54 = vld [vmem:[#allocation18_spill] sm:$0xff] }
 0x797   : > { %16597 = vst [vmem:[#allocation66_spill] sm:$0xff] %v13395_v43  ;;  %8613 = vrot.lane.b32.xlu1 %v8612_v30, %s9258_s24  ;;  %v16603_v30 = vld [vmem:[#allocation45_spill] sm:$0xff]  ;;  %v4182_v9 = vmul.f32 %v16611_v54, %v16578_v57 }
 0x798   : > { %8468 = vrot.lane.b32.xlu0 %v16598_v12, %s9249_s18  ;;  %v16604_v47 = vpack.i.bf16 %v16602_v37, %v16603_v30  ;;  %v16607_v12 = vld [vmem:[#allocation30_spill] sm:$0xff]  ;;  %v4183_v30 = vmul.f32 %v12788_v13, %v16483_v56 }
 0x799   : > { %v13402_v51 = vpop.permute.xlu1 %8358  ;;  %v4171_v33 = vmul.f32 %v12788_v13, %v16607_v12 }
 0x79a   : > { %v13408_v4 = vpop.permute.xlu0 %8243 }
 0x79b   : > { %16601 = vst [vmem:[#allocation73_spill] sm:$0xff] %v13408_v4  ;;  %8618 = vrot.lane.b32.xlu1 %v8617_v22, %s9259_s25  ;;  %v16608_v22 = vld [vmem:[#allocation34_spill] sm:$0xff] }
 0x79c   : > { %8473 = vrot.lane.b32.xlu0 %v16604_v47, %s9264_s29  ;;  %v16610_v4 = vpack.i.bf16 %v16608_v22, %v16609_v15  ;;  %v8627_v47 = vpack.i.bf16 %v4171_v33, %v4170_v32  ;;  %v16617_v33 = vld [vmem:[#allocation48_spill] sm:$0xff]  ;;  %v4195_v22 = vmul.f32 %v12788_v13, %v16506_v19 }
 0x79d   : > { %v13415_v14 = vpop.permute.xlu1 %8388  ;;  %v4194_v32 = vmul.f32 %v16617_v33, %v16578_v57 }
 0x79e   : > { %16605 = vst [vmem:[#allocation68_spill] sm:$0xff] %v13415_v14  ;;  %v13421_v23 = vpop.permute.xlu0 %8248 }
 0x79f   : > { %8623 = vrot.lane.b32.xlu1 %v8622_v53, %s9249_s18  ;;  %v16613_v53 = vld [vmem:[#allocation77_spill] sm:$0xff] }
 0x7a0   : > { %8483 = vrot.lane.b32.xlu0 %v16610_v4, %s16566_s9  ;;  %v16615_v27 = vpack.i.bf16 %v16613_v53, %v16614_v38  ;;  %v8632_v4 = vpack.i.bf16 %v4183_v30, %v4182_v9  ;;  %v16623_v9 = vld [vmem:[#allocation37_spill] sm:$0xff]  ;;  %v4207_v53 = vmul.f32 %v12788_v13, %v16515_v45 }
 0x7a1   : > { %v13428_v37 = vpop.permute.xlu1 %8393  ;;  %v4206_v30 = vmul.f32 %v16623_v9, %v16578_v57 }
 0x7a2   : > { %v13434_v14 = vpop.permute.xlu0 %8253 }
 0x7a3   : > { %16612 = vst [vmem:[#allocation75_spill] sm:$0xff] %v13434_v14  ;;  %8628 = vrot.lane.b32.xlu1 %v8627_v47, %s9263_s5  ;;  %v16619_v47 = vld [vmem:[#allocation78_spill] sm:$0xff] }
 0x7a4   : > { %8488 = vrot.lane.b32.xlu0 %v16615_v27, %s9256_s10  ;;  %v16620_v14 = vld [vmem:[#allocation42_spill] sm:$0xff]  ;;  %v8637_v27 = vpack.i.bf16 %v4195_v22, %v4194_v32  ;;  %v16629_v32 = vld [vmem:[#allocation28_spill] sm:$0xff] }
 0x7a5   : > { %v13441_v15 = vpop.permute.xlu1 %8398  ;;  %v16621_v36 = vpack.i.bf16 %v16619_v47, %v16620_v14  ;;  %v4218_v22 = vmul.f32 %v16629_v32, %v16578_v57  ;;  %v4219_v47 = vmul.f32 %v12788_v13, %v16527_v31 }
 0x7a6   : > { %16616 = vst [vmem:[#allocation72_spill] sm:$0xff] %v13441_v15  ;;  %v13447_v0 = vpop.permute.xlu0 %8258 }
 0x7a7   : > { %16618 = vst [vmem:[#allocation2_spill] sm:$0xff] %v13447_v0  ;;  %8633 = vrot.lane.b32.xlu1 %v8632_v4, %s9265_s30  ;;  %v16625_v4 = vld [vmem:[#allocation80_spill] sm:$0xff]  ;;  %v16626_v0 = vld [vmem:[#allocation79_spill] sm:$0xff] }
 0x7a8   : > { %8493 = vrot.lane.b32.xlu0 %v16621_v36, %s9258_s24  ;;  %v16627_v43 = vpack.i.bf16 %v16625_v4, %v16626_v0  ;;  %v8642_v36 = vpack.i.bf16 %v4207_v53, %v4206_v30  ;;  %v16633_v30 = vld [vmem:[#allocation16_spill] sm:$0xff]  ;;  %v4231_v4 = vmul.f32 %v12788_v13, %v16533_v42 }
 0x7a9   : > { %v13454_v38 = vpop.permute.xlu1 %8403  ;;  %v4230_v53 = vmul.f32 %v16633_v30, %v16578_v57 }
 0x7aa   : > { %16622 = vst [vmem:[#allocation74_spill] sm:$0xff] %v13454_v38  ;;  %v13460_v15 = vpop.permute.xlu0 %8263 }
 0x7ab   : > { %16624 = vst [vmem:[#allocation63_spill] sm:$0xff] %v13460_v15  ;;  %8638 = vrot.lane.b32.xlu1 %v8637_v27, %s9266_s23  ;;  %v16631_v27 = vpack.i.bf16 %v13124_v21, %v13116_v28  ;;  %v8652_v28 = vpack.i.bf16 %v4231_v4, %v4230_v53  ;;  %v16641_v53 = vld [vmem:[#allocation33_spill] sm:$0xff] }
 0x7ac   : > { %8498 = vrot.lane.b32.xlu0 %v16627_v43, %s9259_s25  ;;  %v8647_v43 = vpack.i.bf16 %v4219_v47, %v4218_v22  ;;  %v16635_v22 = vld [vmem:[#allocation32_spill] sm:$0xff]  ;;  %v4254_v4 = vmul.f32 %v16641_v53, %v16578_v57 }
 0x7ad   : > { %v13467_v14 = vpop.permute.xlu1 %8408  ;;  %v4242_v47 = vmul.f32 %v16635_v22, %v16578_v57 }
 0x7ae   : > { %16628 = vst [vmem:[#allocation59_spill] sm:$0xff] %v13467_v14  ;;  %v13473_v38 = vpop.permute.xlu0 %8268 }
 0x7af   : > { %16630 = vst [vmem:[#allocation52_spill] sm:$0xff] %v13473_v38  ;;  %8643 = vrot.lane.b32.xlu1 %v8642_v36, %s16321_s8  ;;  %v16634_v36 = vpack.i.bf16 %v13135_v35, %v13131_v44  ;;  %v16638_v38 = vld [vmem:[#allocation35_spill] sm:$0xff] }
 0x7b0   : > { %8503 = vrot.lane.b32.xlu0 %v16631_v27, %s9249_s18  ;;  %v4243_v27 = vmul.f32 %v12788_v13, %v16539_v58 }
 0x7b1   : > { %v13480_v0 = vpop.permute.xlu1 %8413 }
 0x7b2   : > { %16632 = vst [vmem:[#allocation3_spill] sm:$0xff] %v13480_v0  ;;  %v13486_v14 = vpop.permute.xlu0 %8273  ;;  %v8657_v35 = vpack.i.bf16 %v4243_v27, %v4242_v47  ;;  %v4279_v47 = vmul.f32 %v12788_v13, %v16549_v3  ;;  %v4280_v27 = vmul.f32 %v16550_v6, %v13204_v59 }
 0x7b3   : > { %8648 = vrot.lane.b32.xlu1 %v8647_v43, %s9280_s7  ;;  %v16637_v43 = vld [vmem:[#allocation81_spill] sm:$0xff] }
 0x7b4   : > { %8508 = vrot.lane.b32.xlu0 %v16634_v36, %s9263_s5  ;;  %v16639_v15 = vpack.i.bf16 %v16637_v43, %v16638_v38  ;;  %v4255_v36 = vmul.f32 %v12788_v13, %v16545_v2 }
 0x7b5   : > { %v13493_v21 = vpop.permute.xlu1 %8418 }
 0x7b6   : > { %v13499_v0 = vpop.permute.xlu0 %8278 }
 0x7b7   : > { %16636 = vst [vmem:[#allocation51_spill] sm:$0xff] %v13499_v0  ;;  %8653 = vrot.lane.b32.xlu1 %v8652_v28, %s9281_s19  ;;  %v16643_v28 = vld [vmem:[#allocation82_spill] sm:$0xff]  ;;  %v16644_v0 = vld [vmem:[#allocation20_spill] sm:$0xff] }
 0x7b8   : > { %8513 = vrot.lane.b32.xlu0 %v16639_v15, %s9265_s30  ;;  %v16645_v24 = vpack.i.bf16 %v16643_v28, %v16644_v0  ;;  %v8662_v15 = vpack.i.bf16 %v4255_v36, %v4254_v4  ;;  %v4291_v4 = vmul.f32 %v12788_v13, %v16473_v20  ;;  %v4292_v36 = vmul.f32 %v16475_v40, %v13204_v59 }
 0x7b9   : > { %v13506_v44 = vpop.permute.xlu1 %8423 }
 0x7ba   : > { %16640 = vst [vmem:[#allocation49_spill] sm:$0xff] %v13506_v44  ;;  %v13512_v34 = vpop.permute.xlu0 %8283  ;;  %v16649_v44 = vld [vmem:[#allocation83_spill] sm:$0xff] }
 0x7bb   : > { %16642 = vst [vmem:[#allocation46_spill] sm:$0xff] %v13512_v34  ;;  %8658 = vrot.lane.b32.xlu1 %v8657_v35, %s9282_s20  ;;  %v16648_v35 = vld [vmem:[#allocation84_spill] sm:$0xff] }
 0x7bc   : > { %8518 = vrot.lane.b32.xlu0 %v16645_v24, %s9266_s23  ;;  %v16650_v34 = vpack.i.bf16 %v16648_v35, %v16649_v44  ;;  %v8667_v24 = vpack.i.bf16 %v4280_v27, %v4279_v47  ;;  %v4303_v47 = vmul.f32 %v12788_v13, %v16477_v18  ;;  %v4304_v27 = vmul.f32 %v16478_v61, %v13204_v59 }
 0x7bd   : > { %v13519_v38 = vpop.permute.xlu1 %8428 }
 0x7be   : > { %16646 = vst [vmem:[#allocation17_spill] sm:$0xff] %v13519_v38  ;;  %v13525_v43 = vpop.permute.xlu0 %8288 }
 0x7bf   : > { %16647 = vst [vmem:[#allocation23_spill] sm:$0xff] %v13525_v43  ;;  %8663 = vrot.lane.b32.xlu1 %v8662_v15, %s16325_s28  ;;  %v16653_v15 = vld [vmem:[#allocation9_spill] sm:$0xff] }
 0x7c0   : > { %8523 = vrot.lane.b32.xlu0 %v16650_v34, %s16321_s8  ;;  %v16654_v38 = vpack.i.bf16 %v13192_v48, %v16653_v15  ;;  %v8672_v34 = vpack.i.bf16 %v4292_v36, %v4291_v4  ;;  %v16659_v15 = vld [vmem:[#allocation25_spill] sm:$0xff]  ;;  %v16660_v36 = vld [vmem:[#allocation44_spill] sm:$0xff] }
 0x7c1   : > { %v13532_v0 = vpop.permute.xlu1 %8433  ;;  %v4315_v4 = vmul.f32 %v12788_v13, %v16659_v15  ;;  %v16664_v13 = vpack.i.bf16 %v13238_v50, %v13232_v39  ;;  %v16669_v50 = vld [vmem:[#allocation8_spill] sm:$0xff] }
 0x7c2   : > { %16651 = vst [vmem:[#allocation11_spill] sm:$0xff] %v13532_v0  ;;  %v13538_v28 = vpop.permute.xlu0 %8293 }
 0x7c3   : > { %16652 = vst [vmem:[#allocation22_spill] sm:$0xff] %v13538_v28  ;;  %8668 = vrot.lane.b32.xlu1 %v8667_v24, %s9257_s26  ;;  %v16657_v24 = vpack.i.bf16 %v13213_v25, %v13200_v17 }
 0x7c4   : > { %8528 = vrot.lane.b32.xlu0 %v16654_v38, %s9280_s7  ;;  %v8677_v38 = vpack.i.bf16 %v4304_v27, %v4303_v47 }
 0x7c5   : > { %v13545_v44 = vpop.permute.xlu1 %8438 }
 0x7c6   : > { %16655 = vst [vmem:[#allocation43_spill] sm:$0xff] %v13545_v44  ;;  %v13551_v35 = vpop.permute.xlu0 %8298  ;;  %v4316_v44 = vmul.f32 %v16660_v36, %v13204_v59 }
 0x7c7   : > { %16656 = vst [vmem:[#allocation13_spill] sm:$0xff] %v13551_v35  ;;  %8673 = vrot.lane.b32.xlu1 %v8672_v34, %s9258_s24  ;;  %v16662_v34 = vpack.i.bf16 %v13224_v49, %v13220_v8  ;;  %v16666_v8 = vpack.i.bf16 %v13246_v5, %v13242_v1  ;;  %v16667_v49 = vpack.i.bf16 %v13257_v52, %v13253_v41  ;;  %v16671_v41 = vld [vmem:[#allocation60_spill] sm:$0xff] }
 0x7c8   : > { %8533 = vrot.lane.b32.xlu0 %v16657_v24, %s9281_s19  ;;  %v8682_v25 = vpack.i.bf16 %v4316_v44, %v4315_v4  ;;  %v13598_v4 = vsel %vm16445_vm2, %v16669_v50, 0.0  ;;  %v16670_v1 = vpack.i.bf16 %v13270_v63, %v13266_v60  ;;  %vm16752_vm2 = vmmov %vm16741_vm4 }
 0x7c9   : > { %v13558_v48 = vpop.permute.xlu1 %8443  ;;  %v8722_v5 = vpack.i.bf16 %v13598_v4, %v16671_v41 }
 0x7ca   : > { %16658 = vst [vmem:[#allocation47_spill] sm:$0xff] %v13558_v48  ;;  %v13564_v0 = vpop.permute.xlu0 %8303  ;;  %v8737_v48 = vpack.i.bf16 %v16671_v41, %v13204_v59 }
 0x7cb   : > { %16661 = vst [vmem:[#allocation45_spill] sm:$0xff] %v13564_v0  ;;  %8678 = vrot.lane.b32.xlu1 %v8677_v38, %s16554_s6  ;;  %v16668_v38 = vld [vmem:[#allocation58_spill] sm:$0xff] }
 0x7cc   : > { %8538 = vrot.lane.b32.xlu0 %v16662_v34, %s9282_s20  ;;  %v8717_v39 = vpack.i.bf16 %v16668_v38, %v16578_v57  ;;  %v8742_v50 = vpack.i.bf16 %v16668_v38, %v13598_v4 }
 0x7cd   : > { %v13571_v17 = vpop.permute.xlu1 %8448 }
 0x7ce   : > { %16663 = vst [vmem:[#allocation54_spill] sm:$0xff] %v13571_v17  ;;  %v13573_v24 = vpop.permute.xlu0 %8308 }
 0x7cf   : > { %8683 = vrot.lane.b32.xlu1 %v8682_v25, %s9249_s18 }
 0x7d0   : > { %8543 = vrot.lane.b32.xlu0 %v16664_v13, %s16325_s28  ;;  %v8702_v13 = vpack.i.bf16 %v16668_v38, %v13204_v59 }
 0x7d1   : > { %v13580_v47 = vpop.permute.xlu1 %8478 }
 0x7d2   : > { %16665 = vst [vmem:[#allocation30_spill] sm:$0xff] %v13580_v47  ;;  %v13582_v27 = vpop.permute.xlu0 %8313 }
 0x7d3   : > { %8698 = vrot.lane.b32.xlu1 %v16666_v8, %s16566_s9 }
 0x7d4   : > { %8688 = vrot.lane.b32.xlu0 %v16667_v49, %s9264_s29 }
 0x7d5   : > { %v13592_v44 = vpop.permute.xlu1 %8548 }
 0x7d6   : > { %v13600_v34 = vpop.permute.xlu0 %8318 }
 0x7d7   : > { %8718 = vrot.lane.b32.xlu1 %v8717_v39, %s9263_s5 }
 0x7d8   : > { %8693 = vrot.lane.b32.xlu0 %v16670_v1, %s9265_s30  ;;  %v16675_v1 = vld [vmem:[#allocation27_spill] sm:$0xff] }
 0x7d9   : > { %v13607_v52 = vpop.permute.xlu1 %8553  ;;  %v4281_v47 = vmul.f32 %v16675_v1, %v16668_v38 }
 0x7da   : > { %v13611_v25 = vpop.permute.xlu0 %8323 }
 0x7db   : > { %8723 = vrot.lane.b32.xlu1 %v8722_v5, %s9257_s26 }
 0x7dc   : > { %8703 = vrot.lane.b32.xlu0 %v8702_v13, %s9257_s26 }
 0x7dd   : > { %v13617_v8 = vpop.permute.xlu1 %8558 }
 0x7de   : > { %v13619_v49 = vpop.permute.xlu0 %8328 }
 0x7df   : > { %16672 = vst [vmem:[#allocation34_spill] sm:$0xff] %v13619_v49  ;;  %8728 = vrot.lane.b32.xlu1 %v8722_v5, %s9264_s29  ;;  %v16678_v49 = vld [vmem:[#allocation40_spill] sm:$0xff] }
 0x7e0   : > { %8708 = vrot.lane.b32.xlu0 %v8702_v13, %s9264_s29  ;;  %v4293_v0 = vmul.f32 %v16678_v49, %v16668_v38 }
 0x7e1   : > { %v13623_v60 = vpop.permute.xlu1 %8563 }
 0x7e2   : > { %v13625_v63 = vpop.permute.xlu0 %8333 }
 0x7e3   : > { %16673 = vst [vmem:[#allocation41_spill] sm:$0xff] %v13625_v63  ;;  %8733 = vrot.lane.b32.xlu1 %v8722_v5, %s9279_s17  ;;  %v4278_v63 = vmul.f32 %v16675_v1, %v16578_v57 }
 0x7e4   : > { %8713 = vrot.lane.b32.xlu0 %v8702_v13, %s9279_s17 }
 0x7e5   : > { %v13629_v39 = vpop.permute.xlu1 %8568 }
 0x7e6   : > { %16674 = vst [vmem:[#allocation18_spill] sm:$0xff] %v13629_v39  ;;  %v13635_v17 = vpop.permute.xlu0 %8338  ;;  %v8812_v39 = vpack.i.bf16 %v4281_v47, %v4278_v63  ;;  %v16682_v63 = vld [vmem:[#allocation31_spill] sm:$0xff] }
 0x7e7   : > { %16676 = vst [vmem:[#allocation77_spill] sm:$0xff] %v13635_v17  ;;  %8743 = vrot.lane.b32.xlu1 %v8742_v50, %s9256_s10  ;;  %v4125_v17 = vmul.f32 %v16584_v11, %v16668_v38  ;;  %v4290_v50 = vmul.f32 %v16678_v49, %v16578_v57  ;;  %v4305_v28 = vmul.f32 %v16682_v63, %v16668_v38  ;;  %v16684_v49 = vld [vmem:[#allocation14_spill] sm:$0xff] }
 0x7e8   : > { %8738 = vrot.lane.b32.xlu0 %v8737_v48, %s9256_s10  ;;  %v16680_v48 = vld [vmem:[#allocation50_spill] sm:$0xff]  ;;  %v4137_v11 = vmul.f32 %v16590_v46, %v16668_v38  ;;  %v4149_v46 = vmul.f32 %v16596_v62, %v16668_v38  ;;  %v4161_v62 = vmul.f32 %v16599_v7, %v16668_v38  ;;  %v4173_v7 = vmul.f32 %v16606_v29, %v16668_v38 }
 0x7e9   : > { %v13643_v13 = vpop.permute.xlu1 %8573  ;;  %v4124_v1 = vmul.f32 %v16680_v48, %v13204_v59  ;;  %v8817_v47 = vpack.i.bf16 %v4293_v0, %v4290_v50 }
 0x7ea   : > { %16677 = vst [vmem:[#allocation76_spill] sm:$0xff] %v13643_v13  ;;  %v13647_v35 = vpop.permute.xlu0 %8363 }
 0x7eb   : > { %16679 = vst [vmem:[#allocation48_spill] sm:$0xff] %v13647_v35  ;;  %8813 = vrot.lane.b32.xlu1 %v8812_v39, %s9257_s26  ;;  %v8752_v43 = vpack.i.bf16 %v4125_v17, %v4124_v1  ;;  %v4136_v39 = vmul.f32 %v16684_v49, %v13204_v59 }
 0x7ec   : > { %8748 = vrot.lane.b32.xlu0 %v8722_v5, %s9263_s5  ;;  %v4302_v5 = vmul.f32 %v16682_v63, %v16578_v57 }
 0x7ed   : > { %v13657_v13 = vpop.permute.xlu1 %8578  ;;  %v8757_v1 = vpack.i.bf16 %v4137_v11, %v4136_v39 }
 0x7ee   : > { %16681 = vst [vmem:[#allocation78_spill] sm:$0xff] %v13657_v13  ;;  %v13661_v35 = vpop.permute.xlu0 %8368  ;;  %v8822_v50 = vpack.i.bf16 %v4305_v28, %v4302_v5  ;;  %v16686_v13 = vld [vmem:[#allocation10_spill] sm:$0xff] }
 0x7ef   : > { %16683 = vst [vmem:[#allocation42_spill] sm:$0xff] %v13661_v35  ;;  %8818 = vrot.lane.b32.xlu1 %v8817_v47, %s9258_s24  ;;  %v4317_v35 = vmul.f32 %v16686_v13, %v16668_v38  ;;  %v16688_v47 = vld [vmem:[#allocation36_spill] sm:$0xff] }
 0x7f0   : > { %8753 = vrot.lane.b32.xlu0 %v8752_v43, %s9256_s10  ;;  %v4314_v43 = vmul.f32 %v16686_v13, %v16578_v57  ;;  %v4148_v63 = vmul.f32 %v16688_v47, %v13204_v59 }
 0x7f1   : > { %v13671_v0 = vpop.permute.xlu1 %8583 }
 0x7f2   : > { %16685 = vst [vmem:[#allocation37_spill] sm:$0xff] %v13671_v0  ;;  %v13675_v17 = vpop.permute.xlu0 %8373  ;;  %v8827_v5 = vpack.i.bf16 %v4317_v35, %v4314_v43  ;;  %v16690_v0 = vld [vmem:[#allocation56_spill] sm:$0xff]  ;;  %v8762_v39 = vpack.i.bf16 %v4149_v46, %v4148_v63 }
 0x7f3   : > { %16687 = vst [vmem:[#allocation80_spill] sm:$0xff] %v13675_v17  ;;  %8823 = vrot.lane.b32.xlu1 %v8822_v50, %s16554_s6  ;;  %v4329_v17 = vmul.f32 %v16690_v0, %v16668_v38  ;;  %v4326_v13 = vmul.f32 %v16690_v0, %v16578_v57  ;;  %v16692_v50 = vld [vmem:[#allocation39_spill] sm:$0xff] }
 0x7f4   : > { %8758 = vrot.lane.b32.xlu0 %v8757_v1, %s9258_s24  ;;  %v4160_v1 = vmul.f32 %v16692_v50, %v13204_v59 }
 0x7f5   : > { %v13685_v28 = vpop.permute.xlu1 %8588  ;;  %v8832_v43 = vpack.i.bf16 %v4329_v17, %v4326_v13 }
 0x7f6   : > { %16689 = vst [vmem:[#allocation79_spill] sm:$0xff] %v13685_v28  ;;  %v13689_v11 = vpop.permute.xlu0 %8378  ;;  %v16694_v28 = vld [vmem:[#allocation7_spill] sm:$0xff]  ;;  %v8767_v63 = vpack.i.bf16 %v4161_v62, %v4160_v1  ;;  %v4127_v62 = vmul.f32 %v16680_v48, %v13598_v4  ;;  %v4139_v48 = vmul.f32 %v16684_v49, %v13598_v4  ;;  %v4151_v49 = vmul.f32 %v16688_v47, %v13598_v4 }
 0x7f7   : > { %16691 = vst [vmem:[#allocation28_spill] sm:$0xff] %v13689_v11  ;;  %8828 = vrot.lane.b32.xlu1 %v8827_v5, %s9249_s18  ;;  %v4269_v11 = vmul.f32 %v16694_v28, %v16668_v38  ;;  %v4266_v0 = vmul.f32 %v16694_v28, %v16578_v57  ;;  %v16695_v5 = vld [vmem:[#allocation53_spill] sm:$0xff]  ;;  %v4185_v28 = vmul.f32 %v16611_v54, %v16668_v38 }
 0x7f8   : > { %8763 = vrot.lane.b32.xlu0 %v8762_v39, %s9259_s25  ;;  %v4172_v39 = vmul.f32 %v16695_v5, %v13204_v59  ;;  %v4197_v54 = vmul.f32 %v16617_v33, %v16668_v38  ;;  %v4209_v33 = vmul.f32 %v16623_v9, %v16668_v38  ;;  %v4163_v47 = vmul.f32 %v16692_v50, %v13598_v4 }
 0x7f9   : > { %v13699_v35 = vpop.permute.xlu1 %8593  ;;  %v8842_v13 = vpack.i.bf16 %v4269_v11, %v4266_v0  ;;  %v4221_v9 = vmul.f32 %v16629_v32, %v16668_v38  ;;  %v4175_v50 = vmul.f32 %v16695_v5, %v13598_v4  ;;  %v4233_v32 = vmul.f32 %v16633_v30, %v16668_v38 }
 0x7fa   : > { %16693 = vst [vmem:[#allocation16_spill] sm:$0xff] %v13699_v35  ;;  %v13703_v46 = vpop.permute.xlu0 %8383  ;;  %v4126_v35 = vmul.f32 %v16671_v41, %v11514_v26  ;;  %v8772_v1 = vpack.i.bf16 %v4173_v7, %v4172_v39  ;;  %v4138_v26 = vmul.f32 %v16671_v41, %v16463_v16  ;;  %v4150_v16 = vmul.f32 %v16671_v41, %v16466_v10 }
 0x7fb   : > { %8833 = vrot.lane.b32.xlu1 %v8832_v43, %s9264_s29  ;;  %v16696_v43 = vld [vmem:[#allocation15_spill] sm:$0xff]  ;;  %v4162_v10 = vmul.f32 %v16671_v41, %v16600_v55  ;;  %v4174_v55 = vmul.f32 %v16671_v41, %v16607_v12  ;;  %v4186_v12 = vmul.f32 %v16671_v41, %v16483_v56  ;;  %v4245_v30 = vmul.f32 %v16635_v22, %v16668_v38 }
 0x7fc   : > { %8768 = vrot.lane.b32.xlu0 %v8767_v63, %s9249_s18  ;;  %v4184_v63 = vmul.f32 %v16696_v43, %v13204_v59  ;;  %v8847_v0 = vpack.i.bf16 %v4127_v62, %v4126_v35  ;;  %v8852_v62 = vpack.i.bf16 %v4139_v48, %v4138_v26  ;;  %v8857_v48 = vpack.i.bf16 %v4151_v49, %v4150_v16 }
 0x7fd   : > { %v13713_v17 = vpop.permute.xlu1 %8598  ;;  %v8862_v49 = vpack.i.bf16 %v4163_v47, %v4162_v10  ;;  %v8867_v47 = vpack.i.bf16 %v4175_v50, %v4174_v55  ;;  %v4187_v5 = vmul.f32 %v16696_v43, %v13598_v4  ;;  %v4198_v55 = vmul.f32 %v16671_v41, %v16506_v19 }
 0x7fe   : > { %v13719_v29 = vpop.permute.xlu0 %8453  ;;  %v8777_v39 = vpack.i.bf16 %v4185_v28, %v4184_v63  ;;  %v8251_v43 = vunpack.i.h.bf16 %v13421_v23  ;;  %v8250_v50 = vunpack.i.l.bf16 %v13421_v23  ;;  %v16708_v23 = vld [vmem:[#allocation19_spill] sm:$0xff] }
 0x7ff   : > { %8843 = vrot.lane.b32.xlu1 %v8842_v13, %s16566_s9  ;;  %v16697_v13 = vld [vmem:[#allocation55_spill] sm:$0xff] }
 0x800   : > { %8773 = vrot.lane.b32.xlu0 %v8772_v1, %s9263_s5  ;;  %v4196_v1 = vmul.f32 %v16697_v13, %v13204_v59  ;;  %v4199_v56 = vmul.f32 %v16697_v13, %v13598_v4 }
 0x801   : > { %v13727_v11 = vpop.permute.xlu1 %8603 }
 0x802   : > { %v13733_v7 = vpop.permute.xlu0 %8458  ;;  %v8782_v63 = vpack.i.bf16 %v4197_v54, %v4196_v1  ;;  %v8877_v13 = vpack.i.bf16 %v4199_v56, %v4198_v55 }
 0x803   : > { %8848 = vrot.lane.b32.xlu1 %v8847_v0, %s9256_s10  ;;  %v16698_v0 = vld [vmem:[#allocation38_spill] sm:$0xff] }
 0x804   : > { %8778 = vrot.lane.b32.xlu0 %v8777_v39, %s9265_s30  ;;  %v4208_v39 = vmul.f32 %v16698_v0, %v13204_v59 }
 0x805   : > { %v13741_v35 = vpop.permute.xlu1 %8608 }
 0x806   : > { %v13747_v28 = vpop.permute.xlu0 %8463  ;;  %v8787_v1 = vpack.i.bf16 %v4209_v33, %v4208_v39 }
 0x807   : > { %8853 = vrot.lane.b32.xlu1 %v8852_v62, %s9258_s24  ;;  %v16700_v62 = vld [vmem:[#allocation21_spill] sm:$0xff] }
 0x808   : > { %8783 = vrot.lane.b32.xlu0 %v8782_v63, %s9266_s23  ;;  %v4220_v63 = vmul.f32 %v16700_v62, %v13204_v59 }
 0x809   : > { %v13755_v26 = vpop.permute.xlu1 %8613 }
 0x80a   : > { %16699 = vst [vmem:[#allocation32_spill] sm:$0xff] %v13755_v26  ;;  %v13761_v54 = vpop.permute.xlu0 %8468  ;;  %v8792_v39 = vpack.i.bf16 %v4221_v9, %v4220_v63 }
 0x80b   : > { %8858 = vrot.lane.b32.xlu1 %v8857_v48, %s9259_s25  ;;  %v16703_v48 = vld [vmem:[#allocation29_spill] sm:$0xff] }
 0x80c   : > { %8788 = vrot.lane.b32.xlu0 %v8787_v1, %s16321_s8  ;;  %v4232_v1 = vmul.f32 %v16703_v48, %v13204_v59 }
 0x80d   : > { %v13769_v16 = vpop.permute.xlu1 %8618 }
 0x80e   : > { %16701 = vst [vmem:[#allocation81_spill] sm:$0xff] %v13769_v16  ;;  %v13775_v33 = vpop.permute.xlu0 %8473  ;;  %v8797_v63 = vpack.i.bf16 %v4233_v32, %v4232_v1  ;;  %v8395_v32 = vunpack.i.l.bf16 %v13428_v37  ;;  %v8872_v1 = vpack.i.bf16 %v4187_v5, %v4186_v12  ;;  %v4256_v16 = vmul.f32 %v16708_v23, %v13204_v59 }
 0x80f   : > { %16702 = vst [vmem:[#allocation35_spill] sm:$0xff] %v13775_v33  ;;  %8863 = vrot.lane.b32.xlu1 %v8862_v49, %s9249_s18  ;;  %v16706_v49 = vld [vmem:[#allocation26_spill] sm:$0xff]  ;;  %v4210_v12 = vmul.f32 %v16671_v41, %v16515_v45  ;;  %v4211_v5 = vmul.f32 %v16698_v0, %v13598_v4  ;;  %v16711_v45 = vld [vmem:[#allocation61_spill] sm:$0xff] }
 0x810   : > { %8793 = vrot.lane.b32.xlu0 %v8792_v39, %s9280_s7  ;;  %v4244_v39 = vmul.f32 %v16706_v49, %v13204_v59  ;;  %v4338_v0 = vmul.f32 %v16711_v45, %v16578_v57 }
 0x811   : > { %v13783_v10 = vpop.permute.xlu1 %8623 }
 0x812   : > { %16704 = vst [vmem:[#allocation33_spill] sm:$0xff] %v13783_v10  ;;  %v13789_v9 = vpop.permute.xlu0 %8483  ;;  %v8396_v10 = vunpack.i.h.bf16 %v13428_v37 }
 0x813   : > { %16705 = vst [vmem:[#allocation82_spill] sm:$0xff] %v13789_v9  ;;  %8868 = vrot.lane.b32.xlu1 %v8867_v47, %s9263_s5  ;;  %v4257_v9 = vmul.f32 %v16641_v53, %v16668_v38  ;;  %v4380_v53 = vsel %vm1149_vm3, %v8250_v50, %v8251_v43  ;;  %v4282_v50 = vmul.f32 %v16671_v41, %v16549_v3 }
 0x814   : > { %8798 = vrot.lane.b32.xlu0 %v8797_v63, %s9281_s19  ;;  %v8802_v63 = vpack.i.bf16 %v4245_v30, %v4244_v39  ;;  %v4381_v39 = vsel %vm1149_vm3, %v8251_v43, %v8395_v32  ;;  %v4283_v32 = vmul.f32 %v16550_v6, %v13598_v4  ;;  %v4294_v3 = vmul.f32 %v16671_v41, %v16473_v20 }
 0x815   : > { %v13804_v22 = vpop.permute.xlu1 %8628  ;;  %v8807_v56 = vpack.i.bf16 %v4257_v9, %v4256_v16  ;;  %v4222_v16 = vmul.f32 %v16671_v41, %v16527_v31  ;;  %v4223_v9 = vmul.f32 %v16700_v62, %v13598_v4  ;;  %v4234_v31 = vmul.f32 %v16671_v41, %v16533_v42 }
 0x816   : > { %16707 = vst [vmem:[#allocation20_spill] sm:$0xff] %v13804_v22  ;;  %v8489_v47 = vpop.permute.xlu0 %8488  ;;  %v4235_v62 = vmul.f32 %v16703_v48, %v13598_v4  ;;  %v4295_v6 = vmul.f32 %v16475_v40, %v13598_v4  ;;  %v4246_v42 = vmul.f32 %v16671_v41, %v16539_v58  ;;  %v4247_v48 = vmul.f32 %v16706_v49, %v13598_v4 }
 0x817   : > { %v8491_v19 = vunpack.i.h.bf16 %v8489_v47  ;;  %v8490_v33 = vunpack.i.l.bf16 %v8489_v47  ;;  %8873 = vrot.lane.b32.xlu1 %v8872_v1, %s9265_s30  ;;  %v4306_v20 = vmul.f32 %v16671_v41, %v16477_v18  ;;  %v4307_v40 = vmul.f32 %v16478_v61, %v13598_v4 }
 0x818   : > { %8803 = vrot.lane.b32.xlu0 %v8802_v63, %s9282_s20  ;;  %v4341_v63 = vmul.f32 %v16711_v45, %v16668_v38  ;;  %v4259_v58 = vmul.f32 %v16708_v23, %v13598_v4  ;;  %v8276_v49 = vunpack.i.h.bf16 %v13486_v14 }
 0x819   : > { %v4382_v37 = vsel %vm1149_vm3, %v8396_v10, %v8490_v33  ;;  %v13819_v30 = vpop.permute.xlu1 %8633  ;;  %v4383_v1 = vsel %vm1149_vm3, %v8490_v33, %v8491_v19  ;;  %v8882_v33 = vpack.i.bf16 %v4211_v5, %v4210_v12  ;;  %v8887_v19 = vpack.i.bf16 %v4223_v9, %v4222_v16 }
 0x81a   : > { %16709 = vst [vmem:[#allocation84_spill] sm:$0xff] %v13819_v30  ;;  %v13823_v55 = vpop.permute.xlu0 %8493  ;;  %v6383_v59 = vpack.c.bf16 %v4383_v1, %v4381_v39  ;;  %v6385_v47 = vpack.c.bf16 %v4382_v37, %v4380_v53  ;;  %v8837_v38 = vpack.i.bf16 %v4341_v63, %v4338_v0  ;;  %v8907_v12 = vpack.i.bf16 %v4283_v32, %v4282_v50  ;;  %v16721_v32 = vld [vmem:[#allocation71_spill] sm:$0xff] }
 0x81b   : > { %16710 = vst [vmem:[#allocation83_spill] sm:$0xff] %v13823_v55  ;;  %8878 = vrot.lane.b32.xlu1 %v8877_v13, %s9266_s23  ;;  %v8892_v53 = vpack.i.bf16 %v4235_v62, %v4234_v31  ;;  %v8912_v39 = vpack.i.bf16 %v4295_v6, %v4294_v3  ;;  %v4258_v1 = vmul.f32 %v16671_v41, %v16545_v2  ;;  %v8421_v0 = vunpack.i.h.bf16 %v13493_v21 }
 0x81c   : > { %8808 = vrot.lane.b32.xlu0 %v8807_v56, %s16325_s28  ;;  %6384 = vmatprep.subr.bf16.mxu1 %v6383_v59  ;;  %v8275_v56 = vunpack.i.l.bf16 %v13486_v14  ;;  %v8420_v59 = vunpack.i.l.bf16 %v13493_v21  ;;  %v8917_v45 = vpack.i.bf16 %v4307_v40, %v4306_v20  ;;  %v4318_v63 = vmul.f32 %v16671_v41, %v16659_v15  ;;  %v16719_v14 = vld [vmem:[#allocation64_spill] sm:$0xff]  ;;  %v16725_v20 = vld [vmem:[#allocation70_spill] sm:$0xff] }
 0x81d   : > { %v13831_v10 = vpop.permute.xlu1 %8638  ;;  %6386 = vmatpush1.bf16.msra.mxu1 %v6385_v47  ;;  %v8897_v47 = vpack.i.bf16 %v4247_v48, %v4246_v42  ;;  %v4319_v2 = vmul.f32 %v16660_v36, %v13598_v4  ;;  %v4330_v16 = vmul.f32 %v16671_v41, %v16719_v14  ;;  %v8902_v9 = vpack.i.bf16 %v4259_v58, %v4258_v1  ;;  %v16722_v36 = vld [vmem:[#allocation4_spill] sm:$0xff] }
 0x81e   : > { %16712 = vst [vmem:[#allocation9_spill] sm:$0xff] %v13831_v10  ;;  %v13837_v43 = vpop.permute.xlu0 %8498  ;;  %v4270_v15 = vmul.f32 %v16671_v41, %v16721_v32  ;;  %v4728_v21 = vsel %vm1324_vm1, %v8275_v56, %v8276_v49  ;;  %v8360_v6 = vunpack.i.l.bf16 %v13402_v51  ;;  %v4342_v40 = vmul.f32 %v16671_v41, %v16725_v20  ;;  %v16726_v1 = vld [vmem:[#allocation24_spill] sm:$0xff]  ;;  %v16737_v20 = vld [vmem:[#allocation65_spill] sm:$0xff] }
 0x81f   : > { %16713 = vst [vmem:[#allocation25_spill] sm:$0xff] %v13837_v43  ;;  %8883 = vrot.lane.b32.xlu1 %v8882_v33, %s16321_s8  ;;  %v8922_v42 = vpack.i.bf16 %v4319_v2, %v4318_v63  ;;  %v15855_v58 = vunpack.i.h.bf16 %v16726_v1  ;;  %v8225_v56 = vunpack.i.l.bf16 %v16726_v1  ;;  %v15856_v63 = vunpack.i.l.bf16 %v13573_v24 }
 0x820   : > { %8838 = vrot.lane.b32.xlu0 %v8837_v38, %s9265_s30  ;;  %v16720_v38 = vld [vmem:[#allocation6_spill] sm:$0xff] }
 0x821   : > { %v13845_v57 = vpop.permute.xlu1 %8643  ;;  %v4331_v50 = vmul.f32 %v16720_v38, %v13598_v4  ;;  %v16732_v38 = vld [vmem:[#allocation12_spill] sm:$0xff] }
 0x822   : > { %16714 = vst [vmem:[#allocation44_spill] sm:$0xff] %v13845_v57  ;;  %v13851_v13 = vpop.permute.xlu0 %8503 }
 0x823   : > { %16715 = vst [vmem:[#allocation58_spill] sm:$0xff] %v13851_v13  ;;  %8888 = vrot.lane.b32.xlu1 %v8887_v19, %s9280_s7  ;;  %v4271_v19 = vmul.f32 %v16722_v36, %v13598_v4  ;;  %v8927_v41 = vpack.i.bf16 %v4331_v50, %v4330_v16  ;;  %v8556_v50 = vunpack.i.h.bf16 %v13607_v52 }
 0x824   : > { %8908 = vrot.lane.b32.xlu0 %v8907_v12, %s9257_s26  ;;  %v4729_v12 = vsel %vm1324_vm1, %v8276_v49, %v8420_v59  ;;  %v16728_v59 = vld [vmem:[#allocation5_spill] sm:$0xff] }
 0x825   : > { %v13859_v5 = vpop.permute.xlu1 %8648 }
 0x826   : > { %16716 = vst [vmem:[#allocation8_spill] sm:$0xff] %v13859_v5  ;;  %v13865_v37 = vpop.permute.xlu0 %8508  ;;  %v8566_v5 = vunpack.i.h.bf16 %v13623_v60 }
 0x827   : > { %16717 = vst [vmem:[#allocation60_spill] sm:$0xff] %v13865_v37  ;;  %8893 = vrot.lane.b32.xlu1 %v8892_v53, %s9281_s19  ;;  %v8456_v37 = vunpack.i.h.bf16 %v13719_v29 }
 0x828   : > { %8913 = vrot.lane.b32.xlu0 %v8912_v39, %s9258_s24  ;;  %s6201_s24 = sshll.u32 %s17122_s16, 1 }
 0x829   : > { %v13880_v18 = vpop.permute.xlu1 %8653  ;;  %s195_s10 = scalar_lea.vmem %s15354_s4, %s6201_s24 }
 0x82a   : > { %16718 = vst [vmem:[#allocation27_spill] sm:$0xff] %v13880_v18  ;;  %v8514_v61 = vpop.permute.xlu0 %8513 }
 0x82b   : > { %v8516_v23 = vunpack.i.h.bf16 %v8514_v61  ;;  %v8515_v33 = vunpack.i.l.bf16 %v8514_v61  ;;  %8898 = vrot.lane.b32.xlu1 %v8897_v47, %s9282_s20  ;;  %v16727_v47 = vld [vmem:[#allocation66_spill] sm:$0xff]  ;;  %v4343_v61 = vmul.f32 %v16728_v59, %v13598_v4  ;;  %v13930_v4 = vsel %vm16731_vm8, %v8225_v56, %v15855_v58  ;;  %v16738_v59 = vld [vmem:[#allocation73_spill] sm:$0xff]  ;;  %vm16763_vm8 = vmmov %vm16752_vm2 }
 0x82c   : > { %8918 = vrot.lane.b32.xlu0 %v8917_v45, %s16554_s6  ;;  %v15858_v49 = vunpack.i.h.bf16 %v16727_v47  ;;  %v8311_v45 = vunpack.i.h.bf16 %v13573_v24  ;;  %v8235_v56 = vunpack.i.l.bf16 %v16737_v20 }
 0x82d   : > { %v4730_v31 = vsel %vm1324_vm1, %v8421_v0, %v8515_v33  ;;  %v13899_v62 = vpop.permute.xlu1 %8658  ;;  %v4731_v3 = vsel %vm1324_vm1, %v8515_v33, %v8516_v23  ;;  %v8386_v23 = vunpack.i.h.bf16 %v13703_v46  ;;  %v15857_v33 = vunpack.i.l.bf16 %v13703_v46 }
 0x82e   : > { %16723 = vst [vmem:[#allocation40_spill] sm:$0xff] %v13899_v62  ;;  %v13904_v53 = vpop.permute.xlu0 %8518  ;;  %v6439_v48 = vpack.c.bf16 %v4731_v3, %v4729_v12  ;;  %v6441_v39 = vpack.c.bf16 %v4730_v31, %v4728_v21  ;;  %v5121_v0 = vsel %vm1149_vm3, %v15858_v49, %v8360_v6  ;;  %v8932_v16 = vpack.i.bf16 %v4343_v61, %v4342_v40 }
 0x82f   : > { %16724 = vst [vmem:[#allocation50_spill] sm:$0xff] %v13904_v53  ;;  %8903 = vrot.lane.b32.xlu1 %v8902_v9, %s16325_s28  ;;  %v8937_v9 = vpack.i.bf16 %v4271_v19, %v4270_v15  ;;  %v8942_v32 = vpack.i.bf16 %v8360_v6, %v5121_v0  ;;  %v5165_v36 = vsel %vm16733_vm11, %v15856_v63, %v8311_v45  ;;  %v8316_v21 = vunpack.i.h.bf16 %v13582_v27  ;;  %v16736_v6 = vld [vmem:[#allocation62_spill] sm:$0xff]  ;;  %v16739_v0 = vld [vmem:[#allocation68_spill] sm:$0xff] }
 0x830   : > { %8923 = vrot.lane.b32.xlu0 %v8922_v42, %s9249_s18  ;;  %6440 = vmatprep.subr.bf16.mxu0 %v6439_v48  ;;  %v15859_v19 = vunpack.i.l.bf16 %v13582_v27  ;;  %v8551_v31 = vunpack.i.h.bf16 %v13592_v44  ;;  %v15860_v12 = vunpack.i.l.bf16 %v13592_v44  ;;  %v5123_v3 = vsel %vm1149_vm3, %v15857_v33, %v8386_v23 }
 0x831   : > { %v13917_v2 = vpop.permute.xlu1 %8663  ;;  %6442 = vmatpush1.bf16.msra.mxu0 %v6441_v39  ;;  %v15863_v48 = vunpack.i.h.bf16 %v16736_v6  ;;  %v8230_v39 = vunpack.i.l.bf16 %v16736_v6  ;;  %v8246_v61 = vunpack.i.h.bf16 %v16738_v59  ;;  %v8947_v58 = vpack.i.bf16 %v8311_v45, %v5165_v36 }
 0x832   : > { %16729 = vst [vmem:[#allocation31_spill] sm:$0xff] %v13917_v2  ;;  %v13924_v14 = vpop.permute.xlu0 %8523  ;;  %v8321_v63 = vunpack.i.h.bf16 %v13600_v34  ;;  %v8967_v49 = vpack.i.bf16 %v8386_v23, %v5123_v3  ;;  %v16745_v3 = vld [vmem:[#allocation67_spill] sm:$0xff]  ;;  %v16748_v36 = vunpack.i.l.bf16 %v16738_v59  ;;  %vm16768_vm11 = vcmask 1014784  }
 0x833   : > { %16730 = vst [vmem:[#allocation14_spill] sm:$0xff] %v13924_v14  ;;  %8928 = vrot.lane.b32.xlu1 %v8927_v41, %s9264_s29  ;;  %v5167_v41 = vsel %vm16742_vm10, %v15860_v12, %v8551_v31  ;;  %v13976_v23 = vsel %vm1310_vm13, %v8230_v39, %v15863_v48  ;;  %v16746_v12 = vunpack.i.h.bf16 %v16737_v20  ;;  %v16749_v39 = vunpack.i.l.bf16 %v16739_v0 }
 0x834   : > { %8938 = vrot.lane.b32.xlu0 %v8937_v9, %s16566_s9  ;;  %v8391_v9 = vunpack.i.h.bf16 %v16739_v0  ;;  %16744 = vst [vmem:[#allocation7_spill] sm:$0xff] %v13976_v23  ;;  %v5329_v62 = vsel %vm1293_vm15, %v16748_v36, %v8246_v61  ;;  %v8361_v14 = vunpack.i.h.bf16 %v13402_v51  ;;  %v16760_v51 = vunpack.i.l.bf16 %v13617_v8 }
 0x835   : > { %v13938_v15 = vpop.permute.xlu1 %8668  ;;  %v13984_v2 = vsel %vm3408_vm5, %v8235_v56, %v16746_v12  ;;  %v8326_v12 = vunpack.i.h.bf16 %v13611_v25 }
 0x836   : > { %16734 = vst [vmem:[#allocation10_spill] sm:$0xff] %v13938_v15  ;;  %v13946_v42 = vpop.permute.xlu0 %8528  ;;  %16747 = vst [vmem:[#allocation53_spill] sm:$0xff] %v13984_v2  ;;  %v5331_v48 = vsel %vm1293_vm15, %v16749_v39, %v8391_v9  ;;  %v16751_v2 = vunpack.i.l.bf16 %v13607_v52  ;;  %v8561_v39 = vunpack.i.h.bf16 %v13617_v8 }
 0x837   : > { %16735 = vst [vmem:[#allocation36_spill] sm:$0xff] %v13946_v42  ;;  %8933 = vrot.lane.b32.xlu1 %v8932_v16, %s9265_s30  ;;  %v5209_v16 = vsel %vm16741_vm4, %v15859_v19, %v8316_v21  ;;  %v8977_v19 = vpack.i.bf16 %v8551_v31, %v5167_v41  ;;  %v16754_v31 = vld [vmem:[#allocation69_spill] sm:$0xff]  ;;  %v14022_v41 = vpack.i.bf16 %v8246_v61, %v5329_v62  ;;  %vm16786_vm4 = vmmov %vm16742_vm10 }
 0x838   : > { %8943 = vrot.lane.b32.xlu0 %v8942_v32, %s16566_s9  ;;  %v8240_v32 = vunpack.i.l.bf16 %v16727_v47  ;;  %v8952_v33 = vpack.i.bf16 %v8316_v21, %v5209_v16  ;;  %v5211_v36 = vsel %vm16752_vm2, %v16751_v2, %v8556_v50  ;;  %v16756_v2 = vunpack.i.h.bf16 %v16727_v47  ;;  %vm16788_vm10 = vmmov %vm16786_vm4 }
 0x839   : > { %v13960_v40 = vpop.permute.xlu1 %8673  ;;  %v14024_v16 = vpack.i.bf16 %v8391_v9, %v5331_v48  ;;  %v8987_v53 = vpack.i.bf16 %v8556_v50, %v5211_v36  ;;  %v16759_v47 = vunpack.i.l.bf16 %v13611_v25  ;;  %v16765_v50 = vld [vmem:[#allocation72_spill] sm:$0xff]  ;;  %v16766_v9 = vld [vmem:[#allocation63_spill] sm:$0xff]  ;;  %vm16791_vm2 = vcmask 883712  }
 0x83a   : > { %16740 = vst [vmem:[#allocation56_spill] sm:$0xff] %v13960_v40  ;;  %v13970_v45 = vpop.permute.xlu0 %8533  ;;  %v14016_v23 = vsel %vm1149_vm3, %v8240_v32, %v16756_v2  ;;  %v5255_v2 = vsel %vm1034_vm6, %v16760_v51, %v8561_v39  ;;  %v8265_v36 = vunpack.i.l.bf16 %v16766_v9  ;;  %v16776_v61 = vunpack.i.h.bf16 %v16766_v9 }
 0x83b   : > { %16743 = vst [vmem:[#allocation39_spill] sm:$0xff] %v13970_v45  ;;  %8968 = vrot.lane.b32.xlu1 %v8967_v49, %s16566_s9  ;;  %v16750_v49 = vunpack.i.l.bf16 %v13600_v34  ;;  %16758 = vst [vmem:[#allocation55_spill] sm:$0xff] %v14024_v16  ;;  %v5297_v32 = vsel %vm1022_vm0, %v16759_v47, %v8326_v12  ;;  %v8997_v13 = vpack.i.bf16 %v8561_v39, %v5255_v2  ;;  %v16773_v47 = vunpack.i.l.bf16 %v13623_v60  ;;  %v16778_v39 = vld [vmem:[#allocation59_spill] sm:$0xff]  ;;  %v16855_v16 = vld [vmem:[#allocation54_spill] sm:$0xff] }
 0x83c   : > { %8948 = vrot.lane.b32.xlu0 %v8947_v58, %s16566_s9  ;;  %v16757_v58 = vld [vmem:[#allocation2_spill] sm:$0xff]  ;;  %v16779_v2 = vld [vmem:[#allocation51_spill] sm:$0xff]  ;;  %v8676_v22 = vunpack.i.h.bf16 %v13960_v40 }
 0x83d   : > { %v5253_v45 = vsel %vm1034_vm6, %v16750_v49, %v8321_v63  ;;  %v13998_v56 = vpop.permute.xlu1 %8678  ;;  %v16755_v49 = vld [vmem:[#allocation75_spill] sm:$0xff]  ;;  %v16767_v51 = vunpack.i.h.bf16 %v16757_v58  ;;  %v5299_v57 = vsel %vm1022_vm0, %v16773_v47, %v8566_v5  ;;  %v8280_v47 = vunpack.i.l.bf16 %v16779_v2 }
 0x83e   : > { %v14006_v21 = vpop.permute.xlu0 %8538  ;;  %v8255_v42 = vunpack.i.l.bf16 %v16755_v49  ;;  %v8957_v18 = vpack.i.bf16 %v8321_v63, %v5253_v45  ;;  %v16762_v48 = vunpack.i.h.bf16 %v16755_v49 }
 0x83f   : > { %16753 = vst [vmem:[#allocation15_spill] sm:$0xff] %v14006_v21  ;;  %8978 = vrot.lane.b32.xlu1 %v8977_v19, %s16566_s9  ;;  %v8260_v21 = vunpack.i.l.bf16 %v16757_v58 }
 0x840   : > { %8953 = vrot.lane.b32.xlu0 %v8952_v33, %s16566_s9  ;;  %v14041_v63 = vsel %vm16763_vm8, %v8255_v42, %v16762_v48  ;;  %v16771_v48 = vld [vmem:[#allocation74_spill] sm:$0xff]  ;;  %vm16796_vm8 = vcmask 785408  }
 0x841   : > { %v14026_v19 = vpop.permute.xlu1 %8683  ;;  %16764 = vst [vmem:[#allocation21_spill] sm:$0xff] %v14041_v63  ;;  %v14051_v33 = vsel %vm16768_vm11, %v8260_v21, %v16767_v51  ;;  %v8962_v63 = vpack.i.bf16 %v8326_v12, %v5297_v32  ;;  %v16774_v21 = vunpack.i.l.bf16 %v13703_v46  ;;  %v14073_v12 = vsel %vm1022_vm0, %v8265_v36, %v16776_v61  ;;  %v16783_v36 = vld [vmem:[#allocation3_spill] sm:$0xff] }
 0x842   : > { %v14036_v62 = vpop.permute.xlu0 %8543  ;;  %16769 = vst [vmem:[#allocation29_spill] sm:$0xff] %v14051_v33  ;;  %16777 = vst [vmem:[#allocation61_spill] sm:$0xff] %v14073_v12  ;;  %v9007_v12 = vpack.i.bf16 %v8566_v5, %v5299_v57  ;;  %v16785_v46 = vunpack.i.l.bf16 %v13573_v24  ;;  %v16790_v57 = vunpack.i.h.bf16 %v16779_v2  ;;  %v16794_v24 = vld [vmem:[#allocation23_spill] sm:$0xff]  ;;  %vm16802_vm11 = vcmask 1022976  }
 0x843   : > { %16761 = vst [vmem:[#allocation38_spill] sm:$0xff] %v14036_v62  ;;  %8988 = vrot.lane.b32.xlu1 %v8987_v53, %s16566_s9  ;;  %v16770_v62 = vld [vmem:[#allocation52_spill] sm:$0xff]  ;;  %v5122_v51 = vsel %vm1149_vm3, %v8361_v14, %v16774_v21  ;;  %v16782_v21 = vld [vmem:[#allocation46_spill] sm:$0xff]  ;;  %v16808_v45 = vunpack.i.h.bf16 %v16794_v24 }
 0x844   : > { %v8270_v42 = vunpack.i.l.bf16 %v16770_v62  ;;  %8958 = vrot.lane.b32.xlu0 %v8957_v18, %s16566_s9  ;;  %v8455_v18 = vunpack.i.l.bf16 %v13719_v29  ;;  %v16780_v14 = vunpack.i.h.bf16 %v16770_v62  ;;  %v8285_v61 = vunpack.i.l.bf16 %v16782_v21 }
 0x845   : > { %v14058_v53 = vpop.permute.xlu1 %8698  ;;  %v14106_v5 = vsel %vm16791_vm2, %v8280_v47, %v16790_v57  ;;  %v16799_v57 = vld [vmem:[#allocation17_spill] sm:$0xff]  ;;  %vm16844_vm2 = vcmask 654336  }
 0x846   : > { %16772 = vst [vmem:[#allocation26_spill] sm:$0xff] %v14058_v53  ;;  %v14068_v33 = vpop.permute.xlu0 %8688  ;;  %v14083_v29 = vsel %vm1293_vm15, %v8270_v42, %v16780_v14  ;;  %v5164_v42 = vsel %vm16786_vm4, %v8455_v18, %v16785_v46  ;;  %v16787_v14 = vunpack.i.l.bf16 %v13592_v44  ;;  %16792 = vst [vmem:[#allocation4_spill] sm:$0xff] %v14106_v5  ;;  %v8290_v18 = vunpack.i.l.bf16 %v16794_v24  ;;  %v16798_v46 = vld [vmem:[#allocation22_spill] sm:$0xff] }
 0x847   : > { %16775 = vst [vmem:[#allocation19_spill] sm:$0xff] %v14068_v33  ;;  %8998 = vrot.lane.b32.xlu1 %v8997_v13, %s16566_s9  ;;  %16781 = vst [vmem:[#allocation64_spill] sm:$0xff] %v14083_v29  ;;  %v8972_v13 = vpack.i.bf16 %v5122_v51, %v14016_v23  ;;  %v8461_v29 = vunpack.i.h.bf16 %v13733_v7  ;;  %v16793_v23 = vld [vmem:[#allocation49_spill] sm:$0xff]  ;;  %v8295_v47 = vunpack.i.l.bf16 %v16798_v46  ;;  %v16806_v51 = vlaneseq }
 0x848   : > { %8963 = vrot.lane.b32.xlu0 %v8962_v63, %s16566_s9  ;;  %v5166_v53 = vsel %vm16788_vm10, %v8456_v37, %v16787_v14  ;;  %v8460_v63 = vunpack.i.l.bf16 %v13733_v7  ;;  %v16795_v37 = vunpack.i.h.bf16 %v16782_v21  ;;  %vm16804_vm4 = vmmov %vm16802_vm11  ;;  %v14141_v30 = vsel %vm3387_vm12, %v8290_v18, %v16808_v45 }
 0x849   : > { %v14090_v10 = vpop.permute.xlu1 %8718  ;;  %v8982_v44 = vpack.i.bf16 %v5166_v53, %v5164_v42  ;;  %v14136_v5 = vshrl.u32 %v16806_v51, 7  ;;  %16809 = vst [vmem:[#allocation12_spill] sm:$0xff] %v14141_v30  ;;  %v16810_v53 = vld [vmem:[#allocation11_spill] sm:$0xff]  ;;  %v16813_v42 = vunpack.i.h.bf16 %v16798_v46  ;;  %v16816_v45 = vunpack.i.l.bf16 %v16745_v3 }
 0x84a   : > { %16784 = vst [vmem:[#allocation6_spill] sm:$0xff] %v14090_v10  ;;  %v14101_v32 = vpop.permute.xlu0 %8693  ;;  %v14116_v7 = vsel %vm16796_vm8, %v8285_v61, %v16795_v37  ;;  %v16801_v10 = vunpack.i.l.bf16 %v13582_v27  ;;  %v16803_v37 = vunpack.i.l.bf16 %v13607_v52  ;;  %v16811_v52 = vunpack.i.l.bf16 %v16732_v38  ;;  %vm16854_vm8 = vmmov %vm16788_vm10 }
 0x84b   : > { %16789 = vst [vmem:[#allocation71_spill] sm:$0xff] %v14101_v32  ;;  %9008 = vrot.lane.b32.xlu1 %v9007_v12, %s16566_s9  ;;  %16797 = vst [vmem:[#allocation70_spill] sm:$0xff] %v14116_v7  ;;  %v8465_v32 = vunpack.i.l.bf16 %v13747_v28  ;;  %v8466_v7 = vunpack.i.h.bf16 %v13747_v28  ;;  %v16817_v18 = vunpack.i.h.bf16 %v16736_v6  ;;  %v16820_v51 = vunpack.i.l.bf16 %v13600_v34 }
 0x84c   : > { %8973 = vrot.lane.b32.xlu0 %v8972_v13, %s16566_s9  ;;  %v5208_v61 = vsel %vm16802_vm11, %v8460_v63, %v16801_v10  ;;  %v5210_v14 = vsel %vm16804_vm4, %v8461_v29, %v16803_v37  ;;  %16807 = vst [vmem:[#allocation5_spill] sm:$0xff] %v14136_v5  ;;  %v16812_v29 = vunpack.i.h.bf16 %v16726_v1  ;;  %v14155_v63 = vsel %vm3435_vm9, %v8295_v47, %v16813_v42  ;;  %v16815_v37 = vld [vmem:[#allocation43_spill] sm:$0xff]  ;;  %v5796_v1 = vld [vmem:[%s15353_s3] sm:$0x7f]  ;;  %vm16860_vm11 = vmmov %vm16804_vm4 }
 0x84d   : > { %v14124_v12 = vpop.permute.xlu1 %8723  ;;  %16814 = vst [vmem:[#allocation62_spill] sm:$0xff] %v14155_v63  ;;  %v14164_v27 = vsel %vm1310_vm13, %v16817_v18, %v16816_v45  ;;  %v8992_v63 = vpack.i.bf16 %v5210_v14, %v5208_v61  ;;  %v16821_v6 = vunpack.i.l.bf16 %v13617_v8  ;;  %v8471_v18 = vunpack.i.h.bf16 %v13761_v54 }
 0x84e   : > { %16800 = vst [vmem:[#allocation24_spill] sm:$0xff] %v14124_v12  ;;  %v14133_v13 = vpop.permute.xlu0 %8703  ;;  %v14150_v28 = vsel %vm16788_vm10, %v16812_v29, %v16811_v52  ;;  %16818 = vst [vmem:[#allocation65_spill] sm:$0xff] %v14164_v27  ;;  %v5812_v52 = vsub.s32 3, %v14136_v5  ;;  %v16819_v29 = vld [vmem:[#allocation79_spill] sm:$0xff]  ;;  %v8470_v5 = vunpack.i.l.bf16 %v13761_v54  ;;  %v16827_v54 = vld [vmem:[#allocation45_spill] sm:$0xff]  ;;  %vm16863_vm4 = vcmask 1014784  }
 0x84f   : > { %16805 = vst [vmem:[#allocation66_spill] sm:$0xff] %v14133_v13  ;;  %v5254_v45 = vsel %vm1034_vm6, %v8466_v7, %v16821_v6  ;;  %v16822_v13 = vld [vmem:[#allocation13_spill] sm:$0xff]  ;;  %v16825_v7 = vunpack.i.h.bf16 %v16737_v20  ;;  %vm16871_vm10 = vmmov %vm16860_vm11 }
 0x850   : > { %8983 = vrot.lane.b32.xlu0 %v8982_v44, %s16566_s9  ;;  %v5252_v44 = vsel %vm1034_vm6, %v8465_v32, %v16820_v51  ;;  %v5813_v42 = vrot.slane %v5796_v1, %v5812_v52  ;;  %v8300_v32 = vunpack.i.l.bf16 %v16822_v13  ;;  %v16824_v51 = vunpack.i.l.bf16 %v16754_v31 }
 0x851   : > { %v8729_v10 = vpop.permute.xlu1 %8728  ;;  %v9002_v12 = vpack.i.bf16 %v5254_v45, %v5252_v44  ;;  %v16848_v45 = vld [vmem:[#allocation18_spill] sm:$0xff] }
 0x852   : > { %v8731_v30 = vunpack.i.h.bf16 %v8729_v10  ;;  %v8730_v27 = vunpack.i.l.bf16 %v8729_v10  ;;  %v8709_v43 = vpop.permute.xlu0 %8708  ;;  %v14191_v14 = vsel %vm3408_vm5, %v16825_v7, %v16824_v51  ;;  %5969 = vmatprep.mubr.f32.mxu0 %v5813_v42  ;;  %v16832_v7 = vunpack.i.l.bf16 %v13611_v25  ;;  %v16834_v42 = vld [vmem:[#allocation34_spill] sm:$0xff] }
 0x853   : > { %v8711_v47 = vunpack.i.h.bf16 %v8709_v43  ;;  %v8710_v55 = vunpack.i.l.bf16 %v8709_v43  ;;  %16826 = vst [vmem:[#allocation68_spill] sm:$0xff] %v14191_v14  ;;  %v16828_v43 = vld [vmem:[#allocation16_spill] sm:$0xff]  ;;  %v16836_v25 = vunpack.i.h.bf16 %v16822_v13 }
 0x854   : > { %8993 = vrot.lane.b32.xlu0 %v8992_v63, %s16566_s9  ;;  %v14184_v8 = vsel %vm1310_vm13, %v8730_v27, %v8731_v30  ;;  %v16830_v63 = vunpack.i.h.bf16 %v16819_v29  ;;  %v5296_v61 = vsel %vm1022_vm0, %v8470_v5, %v16832_v7  ;;  %v16840_v7 = vunpack.i.h.bf16 %v16828_v43 }
 0x855   : > { %16823 = vst [vmem:[#allocation73_spill] sm:$0xff] %v14184_v8  ;;  %v14196_v1 = vsel %vm1310_vm13, %v8711_v47, %v8730_v27  ;;  %v8734_v52 = vpop.permute.xlu1 %8733  ;;  %v16833_v27 = vunpack.i.l.bf16 %v13623_v60  ;;  %v14221_v5 = vsel %vm3462_vm7, %v8300_v32, %v16836_v25  ;;  %v16838_v60 = vld [vmem:[#allocation47_spill] sm:$0xff]  ;;  %v16847_v25 = vld [vmem:[#allocation41_spill] sm:$0xff] }
 0x856   : > { %16829 = vst [vmem:[#allocation67_spill] sm:$0xff] %v14196_v1  ;;  %v14201_v30 = vsel %vm1310_vm13, %v16830_v63, %v8710_v55  ;;  %v8736_v6 = vunpack.i.h.bf16 %v8734_v52  ;;  %v8735_v34 = vunpack.i.l.bf16 %v8734_v52  ;;  %v8714_v20 = vpop.permute.xlu0 %8713  ;;  %v8305_v55 = vunpack.i.l.bf16 %v16827_v54  ;;  %16837 = vst [vmem:[#allocation2_spill] sm:$0xff] %v14221_v5 }
 0x857   : > { %16831 = vst [vmem:[#allocation69_spill] sm:$0xff] %v14201_v30  ;;  %v5298_v47 = vsel %vm1022_vm0, %v8471_v18, %v16833_v27  ;;  %v8716_v10 = vunpack.i.h.bf16 %v8714_v20  ;;  %v8715_v1 = vunpack.i.l.bf16 %v8714_v20  ;;  %v8331_v63 = vunpack.i.h.bf16 %v16834_v42 }
 0x858   : > { %9003 = vrot.lane.b32.xlu0 %v9002_v12, %s16566_s9  ;;  %v14216_v44 = vsel %vm3408_vm5, %v8735_v34, %v8736_v6  ;;  %v9012_v32 = vpack.i.bf16 %v5298_v47, %v5296_v61  ;;  %v16846_v61 = vunpack.i.l.bf16 %v16834_v42  ;;  %v8336_v5 = vunpack.i.h.bf16 %v16847_v25 }
 0x859   : > { %16835 = vst [vmem:[#allocation75_spill] sm:$0xff] %v14216_v44  ;;  %v14225_v18 = vsel %vm3408_vm5, %v8716_v10, %v8735_v34  ;;  %v14227_v20 = vpop.permute.xlu1 %8743  ;;  %v14232_v27 = vsel %vm3408_vm5, %v16840_v7, %v8715_v1  ;;  %v8671_v34 = vunpack.i.h.bf16 %v13938_v15  ;;  %v16843_v7 = vunpack.i.h.bf16 %v16827_v54 }
 0x85a   : > { %16839 = vst [vmem:[#allocation72_spill] sm:$0xff] %v14225_v18  ;;  %16841 = vst [vmem:[#allocation63_spill] sm:$0xff] %v14232_v27  ;;  %v8745_v6 = vunpack.i.l.bf16 %v14227_v20  ;;  %v14236_v51 = vpop.permute.xlu0 %8738  ;;  %v5373_v47 = vsel %vm1310_vm13, %v16846_v61, %v8331_v63  ;;  %v8335_v10 = vunpack.i.l.bf16 %v16847_v25  ;;  %v8571_v27 = vunpack.i.h.bf16 %v16848_v45 }
 0x85b   : > { %16842 = vst [vmem:[#allocation52_spill] sm:$0xff] %v14236_v51  ;;  %v8740_v52 = vunpack.i.l.bf16 %v14236_v51  ;;  %v14248_v12 = vsel %vm16844_vm2, %v8305_v55, %v16843_v7  ;;  %v16849_v44 = vunpack.i.h.bf16 %v14236_v51  ;;  %v16850_v18 = vunpack.i.h.bf16 %v13713_v17  ;;  %v16856_v51 = vld [vmem:[#allocation30_spill] sm:$0xff] }
 0x85c   : > { %16845 = vst [vmem:[#allocation74_spill] sm:$0xff] %v14248_v12  ;;  %9013 = vrot.lane.b32.xlu0 %v9012_v32, %s16566_s9  ;;  %v16852_v12 = vld [vmem:[#allocation76_spill] sm:$0xff]  ;;  %v16853_v42 = vunpack.i.l.bf16 %v13938_v15  ;;  %v8481_v26 = vunpack.i.h.bf16 %v16856_v51  ;;  %v16862_v61 = vunpack.i.h.bf16 %v16757_v58  ;;  %v16868_v58 = vunpack.i.l.bf16 %v16783_v36 }
 0x85d   : > { %v5127_v1 = vsel %vm1149_vm3, %v16849_v44, %v8745_v6  ;;  %v5125_v55 = vsel %vm1149_vm3, %v16850_v18, %v8740_v52  ;;  %v14263_v7 = vpop.permute.xlu1 %8813  ;;  %v8576_v30 = vunpack.i.h.bf16 %v16852_v12  ;;  %v8575_v25 = vunpack.i.l.bf16 %v16852_v12 }
 0x85e   : > { %16851 = vst [vmem:[#allocation59_spill] sm:$0xff] %v14263_v7  ;;  %v9042_v8 = vpack.i.bf16 %v8745_v6, %v5127_v1  ;;  %v9017_v32 = vpack.i.bf16 %v8740_v52, %v5125_v55  ;;  %v14267_v14 = vpop.permute.xlu0 %8748  ;;  %v5169_v44 = vsel %vm16854_vm8, %v16853_v42, %v8671_v34  ;;  %v8480_v52 = vunpack.i.l.bf16 %v16856_v51 }
 0x85f   : > { %v5417_v12 = vsel %vm1324_vm1, %v8335_v10, %v8336_v5  ;;  %v16858_v42 = vunpack.i.l.bf16 %v16765_v50  ;;  %v16859_v1 = vunpack.i.h.bf16 %v16755_v49  ;;  %v16861_v7 = vunpack.i.l.bf16 %v16771_v48 }
 0x860   : > { %9018 = vrot.lane.b32.xlu1 %v9017_v32, %s16566_s9  ;;  %9043 = vrot.lane.b32.xlu0 %v9042_v8, %s16566_s9  ;;  %v16864_v8 = vunpack.i.l.bf16 %v16778_v39  ;;  %v16865_v32 = vunpack.i.h.bf16 %v16766_v9  ;;  %v16867_v49 = vunpack.i.l.bf16 %v16848_v45  ;;  %v5419_v9 = vsel %vm1324_vm1, %v8575_v25, %v8576_v30 }
 0x861   : > { %v14282_v6 = vpop.permute.xlu1 %8818  ;;  %v14289_v55 = vsel %vm16860_vm11, %v16859_v1, %v16858_v42  ;;  %v14296_v51 = vsel %vm16863_vm4, %v16862_v61, %v16861_v7  ;;  %v9022_v1 = vpack.i.bf16 %v8671_v34, %v5169_v44  ;;  %v16869_v7 = vunpack.i.h.bf16 %v16770_v62 }
 0x862   : > { %16857 = vst [vmem:[#allocation51_spill] sm:$0xff] %v14282_v6  ;;  %v14303_v18 = vsel %vm1022_vm0, %v16865_v32, %v16864_v8  ;;  %v14305_v6 = vpack.i.bf16 %v8331_v63, %v5373_v47  ;;  %v5375_v42 = vsel %vm1310_vm13, %v16867_v49, %v8571_v27  ;;  %v14310_v15 = vpop.permute.xlu0 %8753  ;;  %v16870_v8 = vunpack.i.l.bf16 %v13960_v40 }
 0x863   : > { %v14317_v61 = vsel %vm1293_vm15, %v16869_v7, %v16868_v58  ;;  %v8681_v47 = vunpack.i.h.bf16 %v13998_v56  ;;  %v8680_v32 = vunpack.i.l.bf16 %v13998_v56  ;;  %v14325_v34 = vpack.i.bf16 %v8336_v5, %v5417_v12 }
 0x864   : > { %16866 = vst [vmem:[#allocation46_spill] sm:$0xff] %v14305_v6  ;;  %v5213_v63 = vsel %vm16871_vm10, %v16870_v8, %v8676_v22  ;;  %v14328_v44 = vsel %vm1324_vm1, %v8480_v52, %v8335_v10  ;;  %v16875_v6 = vld [vmem:[#allocation48_spill] sm:$0xff]  ;;  %9023 = vrot.lane.b32.xlu1 %v9022_v1, %s16566_s9  ;;  %9048 = vrot.lane.b32.xlu0 %v14022_v41, %s16566_s9  ;;  %v16877_v10 = vunpack.i.l.bf16 %v16793_v23  ;;  %v16878_v52 = vunpack.i.h.bf16 %v16779_v2 }
 0x865   : > { %16872 = vst [vmem:[#allocation3_spill] sm:$0xff] %v14325_v34  ;;  %16873 = vst [vmem:[#allocation49_spill] sm:$0xff] %v14328_v44  ;;  %v8365_v58 = vunpack.i.l.bf16 %v16875_v6  ;;  %v14335_v7 = vpack.i.bf16 %v8571_v27, %v5375_v42  ;;  %v8366_v56 = vunpack.i.h.bf16 %v16875_v6  ;;  %v14339_v5 = vpop.permute.xlu1 %8823  ;;  %vm16879_vm2 = vcmask 883712   ;;  %v16882_v6 = vld [vmem:[#allocation42_spill] sm:$0xff] }
 0x866   : > { %v14346_v12 = vsel %vm16879_vm2, %v16878_v52, %v16877_v10  ;;  %v14348_v62 = vpack.i.bf16 %v8576_v30, %v5419_v9  ;;  %v14351_v1 = vsel %vm1324_vm1, %v8481_v26, %v8575_v25  ;;  %v9027_v41 = vpack.i.bf16 %v8676_v22, %v5213_v63  ;;  %v14354_v42 = vpop.permute.xlu0 %8758  ;;  %v16884_v26 = vld [vmem:[#allocation37_spill] sm:$0xff] }
 0x867   : > { %16876 = vst [vmem:[#allocation23_spill] sm:$0xff] %v14335_v7  ;;  %16881 = vst [vmem:[#allocation17_spill] sm:$0xff] %v14351_v1  ;;  %v8825_v27 = vunpack.i.l.bf16 %v14339_v5  ;;  %v8370_v8 = vunpack.i.l.bf16 %v16882_v6  ;;  %v5257_v34 = vsel %vm1034_vm6, %v8680_v32, %v8681_v47  ;;  %v8686_v44 = vunpack.i.h.bf16 %v14026_v19 }
 0x868   : > { %16880 = vst [vmem:[#allocation22_spill] sm:$0xff] %v14348_v62  ;;  %v8685_v2 = vunpack.i.l.bf16 %v14026_v19  ;;  %v16883_v10 = vunpack.i.l.bf16 %v16738_v59  ;;  %v8585_v22 = vunpack.i.l.bf16 %v16884_v26  ;;  %9028 = vrot.lane.b32.xlu1 %v9027_v41, %s16566_s9  ;;  %v16886_v63 = vunpack.i.l.bf16 %v16739_v0 }
 0x869   : > { %v14368_v9 = vsel %vm1034_vm6, %v8825_v27, %v8680_v32  ;;  %v14379_v1 = vpop.permute.xlu1 %8828  ;;  %v8371_v25 = vunpack.i.h.bf16 %v16882_v6  ;;  %v9032_v7 = vpack.i.bf16 %v8681_v47, %v5257_v34  ;;  %v16890_v0 = vunpack.i.l.bf16 %v16799_v57 }
 0x86a   : > { %v14363_v30 = vsel %vm1293_vm15, %v8365_v58, %v16883_v10  ;;  %16885 = vst [vmem:[#allocation11_spill] sm:$0xff] %v14368_v9  ;;  %v14374_v52 = vsel %vm1293_vm15, %v8366_v56, %v16886_v63  ;;  %v16888_v58 = vld [vmem:[#allocation80_spill] sm:$0xff]  ;;  %16889 = vst [vmem:[#allocation79_spill] sm:$0xff] %v14379_v1  ;;  %v8830_v32 = vunpack.i.l.bf16 %v14379_v1  ;;  %v14383_v27 = vpop.permute.xlu0 %8763  ;;  %v16891_v56 = vunpack.i.h.bf16 %v16782_v21 }
 0x86b   : > { %vm16892_vm8 = vcmask 785408   ;;  %v16893_v63 = vunpack.i.h.bf16 %v16732_v38  ;;  %vm16894_vm11 = vcmask 1031168   ;;  %v5301_v47 = vsel %vm1022_vm0, %v8685_v2, %v8686_v44 }
 0x86c   : > { %v14390_v41 = vsel %vm16892_vm8, %v16891_v56, %v16890_v0  ;;  %v16895_v34 = vunpack.i.l.bf16 %v16810_v53  ;;  %v16896_v6 = vunpack.i.h.bf16 %v16794_v24  ;;  %v16897_v21 = vunpack.i.h.bf16 %v16884_v26  ;;  %vm16898_vm4 = vmmov %vm16894_vm11  ;;  %9033 = vrot.lane.b32.xlu1 %v9032_v7, %s16566_s9 }
 0x86d   : > { %v14395_v62 = vsel %vm16894_vm11, %v16893_v63, %v8370_v8  ;;  %v8606_v38 = vunpack.i.h.bf16 %v13727_v11  ;;  %v14414_v63 = vsel %vm1022_vm0, %v8830_v32, %v8685_v2  ;;  %v16900_v59 = vunpack.i.l.bf16 %v16888_v58  ;;  %v14427_v49 = vpop.permute.xlu1 %8833  ;;  %vm16905_vm10 = vmmov %vm16898_vm4 }
 0x86e   : > { %v14404_v10 = vsel %vm3387_vm12, %v16896_v6, %v16895_v34  ;;  %v14409_v0 = vsel %vm16898_vm4, %v8585_v22, %v16897_v21  ;;  %16899 = vst [vmem:[#allocation13_spill] sm:$0xff] %v14414_v63  ;;  %v16901_v24 = vunpack.i.h.bf16 %v16745_v3  ;;  %v8590_v6 = vunpack.i.l.bf16 %v16819_v29  ;;  %v16903_v22 = vld [vmem:[#allocation28_spill] sm:$0xff]  ;;  %16904 = vst [vmem:[#allocation16_spill] sm:$0xff] %v14427_v49  ;;  %v14432_v63 = vpop.permute.xlu0 %8768 }
 0x86f   : > { %v8595_v19 = vunpack.i.l.bf16 %v16828_v43  ;;  %v8600_v2 = vunpack.i.l.bf16 %v13713_v17  ;;  %v9037_v32 = vpack.i.bf16 %v8686_v44, %v5301_v47  ;;  %v15909_v7 = vunpack.i.l.bf16 %v14068_v33 }
 0x870   : > { %v14422_v34 = vsel %vm1310_vm13, %v16901_v24, %v16900_v59  ;;  %v8835_v56 = vunpack.i.l.bf16 %v14427_v49  ;;  %v8611_v3 = vunpack.i.h.bf16 %v13741_v35  ;;  %v8610_v59 = vunpack.i.l.bf16 %v13741_v35 }
 0x871   : > { %16902 = vst [vmem:[#allocation45_spill] sm:$0xff] %v14422_v34  ;;  %v8746_v24 = vunpack.i.h.bf16 %v14227_v20  ;;  %v14438_v21 = vsel %vm16905_vm10, %v8370_v8, %v8371_v25  ;;  %v16906_v9 = vunpack.i.l.bf16 %v13727_v11  ;;  %9038 = vrot.lane.b32.xlu1 %v9037_v32, %s16566_s9  ;;  %v16908_v35 = vunpack.i.l.bf16 %v16815_v37  ;;  %v16935_v37 = vld [vmem:[#allocation24_spill] sm:$0xff] }
 0x872   : > { %v14447_v47 = vsel %vm1310_vm13, %v8835_v56, %v15909_v7  ;;  %v16909_v20 = vunpack.i.h.bf16 %v16798_v46  ;;  %v16911_v25 = vunpack.i.h.bf16 %v16819_v29  ;;  %v16914_v33 = vunpack.i.h.bf16 %v16754_v31  ;;  %v14474_v46 = vpop.permute.xlu1 %8843 }
 0x873   : > { %v5333_v44 = vsel %vm1293_vm15, %v16906_v9, %v8606_v38  ;;  %16907 = vst [vmem:[#allocation41_spill] sm:$0xff] %v14447_v47  ;;  %v16913_v9 = vunpack.i.l.bf16 %v16903_v22  ;;  %v16916_v32 = vunpack.i.h.bf16 %v16828_v43  ;;  %16918 = vst [vmem:[#allocation42_spill] sm:$0xff] %v14474_v46  ;;  %v16920_v29 = vunpack.i.h.bf16 %v16822_v13 }
 0x874   : > { %v14455_v8 = vsel %vm3435_vm9, %v16909_v20, %v16908_v35  ;;  %v14460_v34 = vsel %vm1310_vm13, %v8590_v6, %v16911_v25  ;;  %v16919_v35 = vunpack.i.l.bf16 %v16838_v60  ;;  %v16922_v20 = vunpack.i.h.bf16 %v13713_v17 }
 0x875   : > { %16910 = vst [vmem:[#allocation18_spill] sm:$0xff] %v14455_v8  ;;  %16912 = vst [vmem:[#allocation76_spill] sm:$0xff] %v14460_v34  ;;  %v14467_v56 = vsel %vm3408_vm5, %v16914_v33, %v16913_v9  ;;  %v14472_v7 = vsel %vm3408_vm5, %v8595_v19, %v16916_v32  ;;  %v14486_v33 = vpop.permute.xlu0 %8773  ;;  %v6391_v43 = vpack.c.bf16 %v14438_v21, %v14150_v28  ;;  %v16923_v25 = vunpack.i.l.bf16 %v16855_v16  ;;  %v16930_v21 = vld [vmem:[#allocation81_spill] sm:$0xff] }
 0x876   : > { %16915 = vst [vmem:[#allocation30_spill] sm:$0xff] %v14467_v56  ;;  %16917 = vst [vmem:[#allocation48_spill] sm:$0xff] %v14472_v7  ;;  %v14481_v6 = vsel %vm3462_vm7, %v16920_v29, %v16919_v35  ;;  %v5124_v31 = vsel %vm1149_vm3, %v8600_v2, %v16922_v20  ;;  %v16924_v9 = vunpack.i.h.bf16 %v16827_v54  ;;  %vm16925_vm2 = vcmask 654336   ;;  %v16927_v35 = vld [vmem:[#allocation32_spill] sm:$0xff]  ;;  %v16936_v56 = vld [vmem:[#allocation66_spill] sm:$0xff] }
 0x877   : > { %16921 = vst [vmem:[#allocation37_spill] sm:$0xff] %v14481_v6  ;;  %v9072_v32 = vpack.i.bf16 %v8606_v38, %v5333_v44  ;;  %v4384_v17 = vsel %vm1149_vm3, %v8610_v59, %v8611_v3  ;;  %v16928_v29 = vld [vmem:[#allocation52_spill] sm:$0xff]  ;;  %v8615_v28 = vunpack.i.l.bf16 %v16927_v35  ;;  %v8620_v16 = vunpack.i.l.bf16 %v16930_v21  ;;  %v16932_v38 = vld [vmem:[#allocation35_spill] sm:$0xff] }
 0x878   : > { %v14497_v13 = vsel %vm16925_vm2, %v16924_v9, %v16923_v25  ;;  %v16929_v20 = vunpack.i.h.bf16 %v16928_v29  ;;  %v8755_v54 = vunpack.i.l.bf16 %v14310_v15  ;;  %v16931_v25 = vld [vmem:[#allocation55_spill] sm:$0xff]  ;;  %v8476_v44 = vunpack.i.h.bf16 %v16932_v38  ;;  %v16933_v9 = vld [vmem:[#allocation33_spill] sm:$0xff]  ;;  %v16934_v7 = vld [vmem:[#allocation20_spill] sm:$0xff] }
 0x879   : > { %16926 = vst [vmem:[#allocation80_spill] sm:$0xff] %v14497_v13  ;;  %9053 = vrot.lane.b32.xlu1 %v16931_v25, %s16566_s9  ;;  %v8475_v59 = vunpack.i.l.bf16 %v16932_v38  ;;  %v8625_v29 = vunpack.i.l.bf16 %v16933_v9  ;;  %v8756_v13 = vunpack.i.h.bf16 %v14310_v15  ;;  %v14515_v8 = vpop.permute.xlu0 %8778  ;;  %v8630_v25 = vunpack.i.l.bf16 %v16934_v7 }
 0x87a   : > { %v5126_v46 = vsel %vm1149_vm3, %v8746_v24, %v16929_v20  ;;  %v8849_v24 = vpop.permute.xlu1 %8848  ;;  %v8726_v34 = vunpack.i.h.bf16 %v16935_v37  ;;  %v8725_v38 = vunpack.i.l.bf16 %v16935_v37  ;;  %v8705_v2 = vunpack.i.l.bf16 %v16936_v56 }
 0x87b   : > { %v9057_v20 = vpack.i.bf16 %v5126_v46, %v5124_v31  ;;  %v8851_v19 = vunpack.i.h.bf16 %v8849_v24  ;;  %v8850_v6 = vunpack.i.l.bf16 %v8849_v24  ;;  %v4385_v15 = vsel %vm1149_vm3, %v8611_v3, %v8755_v54  ;;  %v16937_v31 = vld [vmem:[#allocation83_spill] sm:$0xff]  ;;  %v16942_v3 = vld [vmem:[#allocation25_spill] sm:$0xff] }
 0x87c   : > { %v8496_v24 = vunpack.i.h.bf16 %v16937_v31  ;;  %v8495_v60 = vunpack.i.l.bf16 %v16937_v31  ;;  %v16938_v37 = vunpack.i.h.bf16 %v16927_v35  ;;  %vm16939_vm8 = vcmask 1022976  }
 0x87d   : > { %v4386_v47 = vsel %vm1149_vm3, %v8756_v13, %v8850_v6  ;;  %9058 = vrot.lane.b32.xlu1 %v9057_v20, %s16566_s9  ;;  %v4387_v46 = vsel %vm1149_vm3, %v8850_v6, %v8851_v19  ;;  %v16940_v13 = vunpack.i.h.bf16 %v16930_v21  ;;  %vm16941_vm11 = vcmask 1014784   ;;  %v14542_v54 = vpop.permute.xlu0 %8783  ;;  %vm16953_vm3 = vmmov %vm16898_vm4 }
 0x87e   : > { %v6389_v49 = vpack.c.bf16 %v4386_v47, %v4384_v17  ;;  %v14528_v22 = vpop.permute.xlu1 %8853  ;;  %v6387_v1 = vpack.c.bf16 %v4387_v46, %v4385_v15  ;;  %v14533_v40 = vsel %vm16939_vm8, %v8615_v28, %v16938_v37  ;;  %v8501_v6 = vunpack.i.h.bf16 %v16942_v3  ;;  %v16943_v47 = vld [vmem:[#allocation34_spill] sm:$0xff]  ;;  %vm16954_vm4 = vmmov %vm16953_vm3 }
 0x87f   : > { %v14538_v20 = vsel %vm16941_vm11, %v8620_v16, %v16940_v13  ;;  %v8500_v19 = vunpack.i.l.bf16 %v16942_v3  ;;  %v16944_v17 = vunpack.i.l.bf16 %v16943_v47  ;;  %v16946_v46 = vunpack.i.l.bf16 %v16848_v45  ;;  %vm16957_vm10 = vmmov %vm16939_vm8 }
 0x880   : > { %v16948_v31 = vunpack.i.h.bf16 %v16933_v9  ;;  %v8706_v37 = vunpack.i.h.bf16 %v16936_v56  ;;  %6388 = vmatprep.subr.bf16.mxu1 %v6387_v1  ;;  %v16950_v47 = vunpack.i.h.bf16 %v16934_v7  ;;  %v16952_v45 = vunpack.i.h.bf16 %v16884_v26  ;;  %vm16958_vm2 = vmmov %vm16939_vm8 }
 0x881   : > { %v14547_v15 = vsel %vm1310_vm13, %v8475_v59, %v16944_v17  ;;  %v14552_v28 = vsel %vm1310_vm13, %v8476_v44, %v16946_v46  ;;  %6390 = vmatpush1.bf16.msra.mxu1 %v6389_v49  ;;  %9073 = vrot.lane.b32.xlu1 %v9072_v32, %s16566_s9  ;;  %v16955_v17 = vld [vmem:[#allocation84_spill] sm:$0xff]  ;;  %v16956_v56 = vunpack.i.h.bf16 %v16765_v50  ;;  %v4483_v49 = vsel %vm16958_vm2, %v8495_v60, %v8496_v24  ;;  %v16959_v32 = vld [vmem:[#allocation9_spill] sm:$0xff]  ;;  %vm16961_vm8 = vmmov %vm16941_vm11 }
 0x882   : > { %16945 = vst [vmem:[#allocation32_spill] sm:$0xff] %v14547_v15  ;;  %16947 = vst [vmem:[#allocation52_spill] sm:$0xff] %v14552_v28  ;;  %v14557_v16 = vsel %vm1022_vm0, %v8625_v29, %v16948_v31  ;;  %v14564_v59 = vsel %vm1293_vm15, %v8630_v25, %v16950_v47  ;;  %v4433_v44 = vsel %vm16953_vm3, %v16952_v45, %v8705_v2  ;;  %v8635_v1 = vunpack.i.l.bf16 %v16955_v17  ;;  %v14576_v3 = vpop.permute.xlu1 %8858  ;;  %v14586_v47 = vpop.permute.xlu0 %8788  ;;  %v16963_v45 = vld [vmem:[#allocation44_spill] sm:$0xff]  ;;  %v16964_v25 = vld [vmem:[#allocation58_spill] sm:$0xff] }
 0x883   : > { %16951 = vst [vmem:[#allocation81_spill] sm:$0xff] %v14564_v59  ;;  %v4435_v29 = vsel %vm16954_vm4, %v8725_v38, %v8726_v34  ;;  %v4482_v31 = vsel %vm16957_vm10, %v16956_v56, %v8495_v60  ;;  %6392 = vmatprep.subr.bf16.mxu1 %v6391_v43  ;;  %v8640_v26 = vunpack.i.l.bf16 %v16959_v32  ;;  %v16960_v2 = vunpack.i.h.bf16 %v16771_v48  ;;  %vm16962_vm11 = vmmov %vm16961_vm8 }
 0x884   : > { %v14589_v50 = vsel %vm16962_vm11, %v8500_v19, %v8501_v6  ;;  %v8645_v43 = vunpack.i.l.bf16 %v16963_v45  ;;  %v4434_v60 = vsel %vm16953_vm3, %v8706_v37, %v8725_v38  ;;  %v6395_v24 = vpack.c.bf16 %v4435_v29, %v4433_v44  ;;  %vm16984_vm11 = vmmov %vm16958_vm2 }
 0x885   : > { %v14584_v34 = vsel %vm16961_vm8, %v16960_v2, %v8500_v19  ;;  %v8506_v46 = vunpack.i.h.bf16 %v16964_v25  ;;  %v8505_v28 = vunpack.i.l.bf16 %v16964_v25  ;;  %v8856_v48 = vunpack.i.h.bf16 %v14528_v22  ;;  %vm16983_vm8 = vmmov %vm16958_vm2 }
 0x886   : > { %v8855_v2 = vunpack.i.l.bf16 %v14528_v22  ;;  %v16965_v15 = vpack.c.bf16 %v14395_v62, %v13930_v4  ;;  %v16966_v6 = vunpack.i.h.bf16 %v16955_v17  ;;  %v14606_v56 = vpop.permute.xlu1 %8863  ;;  %v6399_v38 = vpack.c.bf16 %v4483_v49, %v14289_v55  ;;  %v16970_v62 = vld [vmem:[#allocation60_spill] sm:$0xff] }
 0x887   : > { %v16967_v44 = vunpack.i.h.bf16 %v16888_v58  ;;  %v16968_v22 = vunpack.i.l.bf16 %v16888_v58  ;;  %v8510_v29 = vunpack.i.l.bf16 %v16970_v62  ;;  %v8760_v25 = vunpack.i.l.bf16 %v14354_v42 }
 0x888   : > { %6394 = vmatpush1.bf16.msra.mxu1 %v16965_v15  ;;  %v14604_v19 = vsel %vm1324_vm1, %v8635_v1, %v16966_v6  ;;  %v8511_v15 = vunpack.i.h.bf16 %v16970_v62  ;;  %v6397_v1 = vpack.c.bf16 %v4434_v60, %v14409_v0  ;;  %v16971_v55 = vunpack.i.h.bf16 %v16959_v32  ;;  %v16973_v6 = vld [vmem:[#allocation21_spill] sm:$0xff] }
 0x889   : > { %6396 = vmatprep.subr.bf16.mxu1 %v6395_v24  ;;  %v14616_v4 = vsel %vm1310_vm13, %v16968_v22, %v16967_v44  ;;  %v14622_v24 = vpop.permute.xlu0 %8793  ;;  %vm16972_vm4 = vcmask 883712   ;;  %v6401_v58 = vpack.c.bf16 %v4482_v31, %v16973_v6  ;;  %v6407_v44 = vpack.c.bf16 %v14589_v50, %v14296_v51  ;;  %v16974_v22 = vld [vmem:[#allocation29_spill] sm:$0xff]  ;;  %v16978_v51 = vld [vmem:[#allocation50_spill] sm:$0xff] }
 0x88a   : > { %16969 = vst [vmem:[#allocation55_spill] sm:$0xff] %v14616_v4  ;;  %v14627_v49 = vsel %vm16972_vm4, %v8640_v26, %v16971_v55  ;;  %v16975_v62 = vunpack.i.h.bf16 %v16963_v45  ;;  %vm16976_vm10 = vcmask 785408   ;;  %v16977_v60 = vunpack.i.h.bf16 %v16778_v39  ;;  %v14651_v37 = vpop.permute.xlu1 %8868  ;;  %v16985_v39 = vld [vmem:[#allocation61_spill] sm:$0xff]  ;;  %vm16988_vm3 = vmmov %vm16972_vm4 }
 0x88b   : > { %v4487_v26 = vsel %vm16958_vm2, %v8855_v2, %v8856_v48  ;;  %v14646_v31 = vsel %vm1022_vm0, %v8505_v28, %v8506_v46  ;;  %v8521_v50 = vunpack.i.h.bf16 %v16978_v51  ;;  %v8520_v55 = vunpack.i.l.bf16 %v16978_v51  ;;  %vm16989_vm4 = vmmov %vm16988_vm3 }
 0x88c   : > { %v14637_v0 = vsel %vm16976_vm10, %v8645_v43, %v16975_v62  ;;  %v14642_v13 = vsel %vm1022_vm0, %v16977_v60, %v8505_v28  ;;  %6398 = vmatpush1.bf16.msra.mxu1 %v6397_v1  ;;  %v8761_v6 = vunpack.i.h.bf16 %v14354_v42  ;;  %v16982_v28 = vunpack.i.h.bf16 %v16927_v35  ;;  %v16992_v43 = vld [vmem:[#allocation36_spill] sm:$0xff] }
 0x88d   : > { %6400 = vmatprep.subr.bf16.mxu1 %v6399_v38  ;;  %v14657_v48 = vpop.permute.xlu0 %8798  ;;  %v14663_v51 = vsel %vm1293_vm15, %v8510_v29, %v8511_v15  ;;  %v16986_v1 = vunpack.i.h.bf16 %v16783_v36  ;;  %v8780_v35 = vunpack.i.l.bf16 %v14515_v8  ;;  %v8860_v15 = vunpack.i.l.bf16 %v14576_v3 }
 0x88e   : > { %16981 = vst [vmem:[#allocation35_spill] sm:$0xff] %v14657_v48  ;;  %v4485_v46 = vsel %vm16983_vm8, %v16982_v28, %v8760_v25  ;;  %v4486_v42 = vsel %vm16984_vm11, %v8761_v6, %v8855_v2  ;;  %v8861_v25 = vunpack.i.h.bf16 %v14576_v3  ;;  %v16987_v2 = vunpack.i.h.bf16 %v16793_v23  ;;  %v8874_v28 = vpop.permute.xlu1 %8873  ;;  %v16991_v23 = vld [vmem:[#allocation14_spill] sm:$0xff] }
 0x88f   : > { %v6403_v59 = vpack.c.bf16 %v4487_v26, %v4485_v46  ;;  %v14673_v48 = vsel %vm1293_vm15, %v16986_v1, %v8510_v29  ;;  %v8765_v6 = vunpack.i.l.bf16 %v14383_v27  ;;  %v4783_v36 = vsel %vm16989_vm4, %v8520_v55, %v8521_v50 }
 0x890   : > { %6402 = vmatpush1.bf16.msra.mxu1 %v6401_v58  ;;  %v4782_v26 = vsel %vm16988_vm3, %v16987_v2, %v8520_v55  ;;  %v8781_v1 = vunpack.i.h.bf16 %v14515_v8  ;;  %v6405_v46 = vpack.c.bf16 %v4486_v42, %v14533_v40  ;;  %v8876_v60 = vunpack.i.h.bf16 %v8874_v28 }
 0x891   : > { %6404 = vmatprep.subr.bf16.mxu1 %v6403_v59  ;;  %v8875_v3 = vunpack.i.l.bf16 %v8874_v28  ;;  %v14687_v58 = vpop.permute.xlu0 %8803  ;;  %v8526_v38 = vunpack.i.h.bf16 %v16991_v23  ;;  %v8525_v2 = vunpack.i.l.bf16 %v16991_v23  ;;  %v8531_v4 = vunpack.i.h.bf16 %v16992_v43 }
 0x892   : > { %16990 = vst [vmem:[#allocation33_spill] sm:$0xff] %v14687_v58  ;;  %v8530_v59 = vunpack.i.l.bf16 %v16992_v43  ;;  %v16993_v55 = vunpack.i.h.bf16 %v16955_v17  ;;  %vm16994_vm10 = vcmask 1014784   ;;  %v8766_v28 = vunpack.i.h.bf16 %v14383_v27  ;;  %v8879_v23 = vpop.permute.xlu1 %8878 }
 0x893   : > { %v4734_v50 = vsel %vm1324_vm1, %v8781_v1, %v8875_v3  ;;  %v4735_v40 = vsel %vm1324_vm1, %v8875_v3, %v8876_v60  ;;  %v4539_v42 = vsel %vm16994_vm10, %v8860_v15, %v8861_v25  ;;  %v6447_v43 = vpack.c.bf16 %v4783_v36, %v14346_v12  ;;  %vm16996_vm2 = vmmov %vm16994_vm10 }
 0x894   : > { %6406 = vmatpush1.bf16.msra.mxu1 %v6405_v46  ;;  %v4733_v8 = vsel %vm1324_vm1, %v16993_v55, %v8780_v35  ;;  %v6445_v29 = vpack.c.bf16 %v4734_v50, %v14604_v19  ;;  %v8785_v1 = vunpack.i.l.bf16 %v14542_v54  ;;  %v8881_v46 = vunpack.i.h.bf16 %v8879_v23  ;;  %vm16999_vm11 = vmmov %vm16996_vm2 }
 0x895   : > { %6408 = vmatprep.subr.bf16.mxu1 %v6407_v44  ;;  %v6443_v58 = vpack.c.bf16 %v4735_v40, %v4733_v8  ;;  %v8880_v62 = vunpack.i.l.bf16 %v8879_v23  ;;  %v14703_v17 = vpop.permute.xlu0 %8808  ;;  %v16995_v35 = vunpack.i.h.bf16 %v16930_v21  ;;  %v16997_v25 = vunpack.i.h.bf16 %v16799_v57  ;;  %vm17006_vm10 = vmmov %vm16989_vm4  ;;  %v17009_v23 = vld [vmem:[#allocation6_spill] sm:$0xff] }
 0x896   : > { %vm16998_vm8 = vcmask 785408   ;;  %v4538_v19 = vsel %vm16999_vm11, %v8766_v28, %v8860_v15  ;;  %v8866_v36 = vunpack.i.h.bf16 %v14606_v56  ;;  %v8865_v3 = vunpack.i.l.bf16 %v14606_v56  ;;  %v17003_v56 = vld [vmem:[#allocation4_spill] sm:$0xff] }
 0x897   : > { %v4537_v60 = vsel %vm16996_vm2, %v16995_v35, %v8765_v6  ;;  %v14711_v27 = vsel %vm16998_vm8, %v16997_v25, %v8525_v2  ;;  %6444 = vmatprep.subr.bf16.mxu0 %v6443_v58  ;;  %vm17000_vm3 = vmmov %vm16998_vm8  ;;  %v17001_v21 = vpack.c.bf16 %v14584_v34, %v16974_v22  ;;  %v4787_v57 = vsel %vm16989_vm4, %v8880_v62, %v8881_v46  ;;  %v17004_v34 = vld [vmem:[#allocation64_spill] sm:$0xff] }
 0x898   : > { %v6411_v44 = vpack.c.bf16 %v4539_v42, %v4537_v60  ;;  %v4835_v12 = vsel %vm17000_vm3, %v8525_v2, %v8526_v38  ;;  %6446 = vmatpush1.bf16.msra.mxu0 %v6445_v29  ;;  %v14722_v6 = vsel %vm3387_vm12, %v8530_v59, %v8531_v4  ;;  %v17002_v15 = vunpack.i.h.bf16 %v16810_v53  ;;  %v8884_v2 = vpop.permute.xlu1 %8883  ;;  %vm17007_vm2 = vmmov %vm16989_vm4  ;;  %v17008_v42 = vld [vmem:[#allocation70_spill] sm:$0xff] }
 0x899   : > { %6410 = vmatpush1.bf16.msra.mxu1 %v17001_v21  ;;  %v8786_v38 = vunpack.i.h.bf16 %v14542_v54  ;;  %6448 = vmatprep.subr.bf16.mxu0 %v6447_v43  ;;  %v6449_v50 = vpack.c.bf16 %v4782_v26, %v17003_v56  ;;  %v6425_v22 = vpack.c.bf16 %v14673_v48, %v17004_v34  ;;  %v8770_v29 = vunpack.i.l.bf16 %v14432_v63  ;;  %v14735_v55 = vpop.permute.xlu0 %8838 }
 0x89a   : > { %v14727_v58 = vsel %vm3387_vm12, %v17002_v15, %v8530_v59  ;;  %6412 = vmatprep.subr.bf16.mxu1 %v6411_v44  ;;  %v6413_v4 = vpack.c.bf16 %v4538_v19, %v14538_v20  ;;  %v17005_v53 = vunpack.i.h.bf16 %v16959_v32  ;;  %v6455_v54 = vpack.c.bf16 %v4835_v12, %v14390_v41  ;;  %v17010_v20 = vld [vmem:[#allocation59_spill] sm:$0xff] }
 0x89b   : > { %v4786_v8 = vsel %vm17007_vm2, %v8786_v38, %v8880_v62  ;;  %v6457_v26 = vpack.c.bf16 %v14711_v27, %v17008_v42  ;;  %v6463_v28 = vpack.c.bf16 %v14722_v6, %v14404_v10  ;;  %v8721_v43 = vunpack.i.h.bf16 %v17009_v23 }
 0x89c   : > { %v4785_v59 = vsel %vm17006_vm10, %v17005_v53, %v8785_v1  ;;  %v8815_v46 = vunpack.i.l.bf16 %v17010_v20  ;;  %6450 = vmatpush1.bf16.msra.mxu0 %v6449_v50  ;;  %v4591_v32 = vsel %vm1022_vm0, %v8865_v3, %v8866_v36  ;;  %v17011_v1 = vld [vmem:[#allocation12_spill] sm:$0xff]  ;;  %v8720_v62 = vunpack.i.l.bf16 %v17009_v23  ;;  %v14753_v27 = vpop.permute.xlu1 %8888 }
 0x89d   : > { %v6451_v40 = vpack.c.bf16 %v4787_v57, %v4785_v59  ;;  %6414 = vmatpush1.bf16.msra.mxu1 %v6413_v4  ;;  %v6465_v41 = vpack.c.bf16 %v14727_v58, %v17011_v1  ;;  %v8816_v35 = vunpack.i.h.bf16 %v17010_v20  ;;  %v8886_v60 = vunpack.i.h.bf16 %v8884_v2  ;;  %v8909_v21 = vpop.permute.xlu0 %8908  ;;  %v17014_v4 = vld [vmem:[#allocation10_spill] sm:$0xff] }
 0x89e   : > { %v8885_v25 = vunpack.i.l.bf16 %v8884_v2  ;;  %v17012_v19 = vpack.c.bf16 %v14646_v31, %v14303_v18  ;;  %v8750_v44 = vunpack.i.l.bf16 %v14267_v14  ;;  %v8771_v12 = vunpack.i.h.bf16 %v14432_v63 }
 0x89f   : > { %6452 = vmatprep.subr.bf16.mxu0 %v6451_v40  ;;  %v6453_v36 = vpack.c.bf16 %v4786_v8, %v14627_v49  ;;  %v17013_v57 = vunpack.i.h.bf16 %v16933_v9  ;;  %v8790_v38 = vunpack.i.l.bf16 %v14586_v47  ;;  %v8911_v2 = vunpack.i.h.bf16 %v8909_v21 }
 0x8a0   : > { %6416 = vmatprep.subr.bf16.mxu1 %v17012_v19  ;;  %v8910_v56 = vunpack.i.l.bf16 %v8909_v21  ;;  %v17015_v18 = vunpack.i.l.bf16 %v17014_v4  ;;  %vm17016_vm8 = vcmask 1031168   ;;  %v8791_v53 = vunpack.i.h.bf16 %v14586_v47  ;;  %v14777_v40 = vpop.permute.xlu1 %8893  ;;  %v17025_v19 = vld [vmem:[#allocation51_spill] sm:$0xff] }
 0x8a1   : > { %v4589_v15 = vsel %vm1022_vm0, %v17013_v57, %v8770_v29  ;;  %v4590_v63 = vsel %vm1022_vm0, %v8771_v12, %v8865_v3  ;;  %v8871_v49 = vunpack.i.h.bf16 %v14651_v37  ;;  %v17017_v9 = vpack.c.bf16 %v14642_v13, %v16985_v39  ;;  %6454 = vmatpush1.bf16.msra.mxu0 %v6453_v36  ;;  %vm17018_vm11 = vmmov %vm17016_vm8  ;;  %v8914_v23 = vpop.permute.xlu0 %8913 }
 0x8a2   : > { %v6419_v50 = vpack.c.bf16 %v4591_v32, %v4589_v15  ;;  %v5168_v31 = vsel %vm17016_vm8, %v8815_v46, %v17015_v18  ;;  %v8870_v29 = vunpack.i.l.bf16 %v14651_v37  ;;  %v5171_v59 = vsel %vm17018_vm11, %v8910_v56, %v8911_v2  ;;  %vm17019_vm3 = vmmov %vm17016_vm8  ;;  %6456 = vmatprep.subr.bf16.mxu0 %v6455_v54 }
 0x8a3   : > { %6418 = vmatpush1.bf16.msra.mxu1 %v17017_v9  ;;  %v5170_v8 = vsel %vm17019_vm3, %v8816_v35, %v8910_v56  ;;  %vm17020_vm4 = vcmask 785408   ;;  %v5334_v3 = vsel %vm1293_vm15, %v8721_v43, %v8750_v44  ;;  %v8775_v13 = vunpack.i.l.bf16 %v14486_v33 }
 0x8a4   : > { %6420 = vmatprep.subr.bf16.mxu1 %v6419_v50  ;;  %v4839_v47 = vsel %vm17020_vm4, %v8885_v25, %v8886_v60  ;;  %v9062_v39 = vpack.i.bf16 %v8911_v2, %v5171_v59  ;;  %v9077_v42 = vpack.i.bf16 %v5170_v8, %v5168_v31  ;;  %v6421_v37 = vpack.c.bf16 %v4590_v63, %v14557_v16  ;;  %vm17021_vm10 = vmmov %vm17020_vm4  ;;  %v17030_v31 = vld [vmem:[#allocation56_spill] sm:$0xff]  ;;  %v17034_v59 = vld [vmem:[#allocation79_spill] sm:$0xff] }
 0x8a5   : > { %v4838_v20 = vsel %vm17021_vm10, %v8791_v53, %v8885_v25  ;;  %v8915_v46 = vunpack.i.l.bf16 %v8914_v23  ;;  %v17022_v32 = vunpack.i.h.bf16 %v16963_v45  ;;  %vm17023_vm2 = vmmov %vm17020_vm4  ;;  %v17024_v35 = vunpack.i.l.bf16 %v13727_v11  ;;  %6458 = vmatpush1.bf16.msra.mxu0 %v6457_v26  ;;  %v14798_v45 = vpop.permute.xlu1 %8898 }
 0x8a6   : > { %v8821_v43 = vunpack.i.h.bf16 %v17025_v19  ;;  %v8916_v12 = vunpack.i.h.bf16 %v8914_v23  ;;  %9078 = vrot.lane.b32.xlu1 %v9077_v42, %s16566_s9  ;;  %v8820_v16 = vunpack.i.l.bf16 %v17025_v19  ;;  %v8891_v25 = vunpack.i.h.bf16 %v14753_v27  ;;  %9063 = vrot.lane.b32.xlu0 %v9062_v39, %s16566_s9 }
 0x8a7   : > { %v4837_v54 = vsel %vm17023_vm2, %v17022_v32, %v8790_v38  ;;  %v5332_v60 = vsel %vm1293_vm15, %v8720_v62, %v17024_v35  ;;  %v8890_v21 = vunpack.i.l.bf16 %v14753_v27  ;;  %6422 = vmatpush1.bf16.msra.mxu1 %v6421_v37  ;;  %v4643_v11 = vsel %vm1293_vm15, %v8870_v29, %v8871_v49  ;;  %v14807_v27 = vpop.permute.xlu0 %8918 }
 0x8a8   : > { %v6459_v36 = vpack.c.bf16 %v4839_v47, %v4837_v54  ;;  %v9092_v62 = vpack.i.bf16 %v5334_v3, %v5332_v60  ;;  %v8776_v57 = vunpack.i.h.bf16 %v14486_v33  ;;  %v8795_v26 = vunpack.i.l.bf16 %v14622_v24  ;;  %v17042_v54 = vld [vmem:[#allocation82_spill] sm:$0xff] }
 0x8a9   : > { %v6461_v15 = vpack.c.bf16 %v4838_v20, %v14637_v0  ;;  %v17026_v38 = vpack.c.bf16 %v14663_v51, %v14317_v61  ;;  %v8826_v2 = vunpack.i.h.bf16 %v14339_v5  ;;  %vm17027_vm8 = vcmask 1022976   ;;  %v14833_v9 = vpop.permute.xlu1 %8903 }
 0x8aa   : > { %6460 = vmatprep.subr.bf16.mxu0 %v6459_v36  ;;  %v5214_v56 = vsel %vm17027_vm8, %v8821_v43, %v8915_v46  ;;  %v8920_v50 = vunpack.i.l.bf16 %v14807_v27  ;;  %v17028_v4 = vunpack.i.h.bf16 %v16934_v7  ;;  %v8751_v18 = vunpack.i.h.bf16 %v14267_v14  ;;  %vm17029_vm11 = vmmov %vm17027_vm8  ;;  %9093 = vrot.lane.b32.xlu1 %v9092_v62, %s16566_s9  ;;  %v17043_v14 = vld [vmem:[#allocation77_spill] sm:$0xff]  ;;  %v17048_v36 = vld [vmem:[#allocation16_spill] sm:$0xff] }
 0x8ab   : > { %6424 = vmatprep.subr.bf16.mxu1 %v17026_v38  ;;  %v4642_v0 = vsel %vm1293_vm15, %v8776_v57, %v8870_v29  ;;  %v5215_v61 = vsel %vm17029_vm11, %v8915_v46, %v8916_v12  ;;  %6462 = vmatpush1.bf16.msra.mxu0 %v6461_v15  ;;  %v17031_v5 = vunpack.i.l.bf16 %v17030_v31  ;;  %vm17032_vm3 = vmmov %vm17027_vm8  ;;  %v8796_v63 = vunpack.i.h.bf16 %v14622_v24  ;;  %v17035_v24 = vld [vmem:[#allocation11_spill] sm:$0xff] }
 0x8ac   : > { %v4641_v33 = vsel %vm1293_vm15, %v17028_v4, %v8775_v13  ;;  %v14824_v7 = vsel %vm1034_vm6, %v8826_v2, %v8920_v50  ;;  %v17033_v49 = vpack.i.bf16 %v14374_v52, %v14363_v30  ;;  %6426 = vmatpush1.bf16.msra.mxu1 %v6425_v22  ;;  %v4891_v29 = vsel %vm3387_vm12, %v8890_v21, %v8891_v25  ;;  %v14842_v30 = vpop.permute.xlu0 %8923  ;;  %v17036_v52 = vld [vmem:[#allocation8_spill] sm:$0xff]  ;;  %v17038_v22 = vld [vmem:[#allocation81_spill] sm:$0xff]  ;;  %v17050_v57 = vld [vmem:[#allocation55_spill] sm:$0xff] }
 0x8ad   : > { %v6427_v51 = vpack.c.bf16 %v4643_v11, %v4641_v33  ;;  %v5212_v53 = vsel %vm17032_vm3, %v8820_v16, %v17031_v5  ;;  %v8831_v8 = vunpack.i.h.bf16 %v17034_v59  ;;  %v9117_v3 = vpack.i.bf16 %v14824_v7, %v17035_v24  ;;  %6464 = vmatprep.subr.bf16.mxu0 %v6463_v28  ;;  %v17039_v28 = vld [vmem:[#allocation28_spill] sm:$0xff]  ;;  %v17054_v4 = vld [vmem:[#allocation7_spill] sm:$0xff]  ;;  %v17055_v33 = vld [vmem:[#allocation45_spill] sm:$0xff] }
 0x8ae   : > { %9068 = vrot.lane.b32.xlu0 %v17033_v49, %s16566_s9  ;;  %v9097_v47 = vpack.i.bf16 %v5214_v56, %v5212_v53  ;;  %v17037_v48 = vunpack.i.h.bf16 %v17036_v52  ;;  %v6429_v13 = vpack.c.bf16 %v4642_v0, %v17038_v22  ;;  %v4890_v39 = vsel %vm3387_vm12, %v8796_v63, %v8890_v21  ;;  %v17049_v21 = vld [vmem:[#allocation13_spill] sm:$0xff]  ;;  %v17057_v31 = vld [vmem:[#allocation39_spill] sm:$0xff] }
 0x8af   : > { %6428 = vmatprep.subr.bf16.mxu1 %v6427_v51  ;;  %v9082_v42 = vpack.i.bf16 %v8916_v12, %v5215_v61  ;;  %v8925_v23 = vunpack.i.l.bf16 %v14842_v30  ;;  %v5335_v37 = vsel %vm1293_vm15, %v8750_v44, %v8751_v18  ;;  %v8921_v10 = vunpack.i.h.bf16 %v14807_v27  ;;  %6466 = vmatpush1.bf16.msra.mxu0 %v6465_v41  ;;  %v14882_v12 = vpop.permute.xlu1 %8928  ;;  %v17053_v27 = vld [vmem:[#allocation27_spill] sm:$0xff]  ;;  %v17056_v61 = vld [vmem:[#allocation68_spill] sm:$0xff] }
 0x8b0   : > { %v4889_v34 = vsel %vm3387_vm12, %v17037_v48, %v8795_v26  ;;  %9098 = vrot.lane.b32.xlu1 %v9097_v47, %s16566_s9  ;;  %v17040_v20 = vunpack.i.h.bf16 %v17039_v28  ;;  %v17041_v46 = vunpack.i.l.bf16 %v17039_v28  ;;  %v8486_v35 = vunpack.i.h.bf16 %v17042_v54  ;;  %6430 = vmatpush1.bf16.msra.mxu1 %v6429_v13  ;;  %v17051_v26 = vld [vmem:[#allocation65_spill] sm:$0xff]  ;;  %v14891_v38 = vpop.permute.xlu0 %8938  ;;  %v17058_v49 = vld [vmem:[#allocation23_spill] sm:$0xff] }
 0x8b1   : > { %v6467_v6 = vpack.c.bf16 %v4891_v29, %v4889_v34  ;;  %v17044_v60 = vunpack.i.l.bf16 %v17043_v14  ;;  %v17045_v44 = vunpack.i.l.bf16 %v17042_v54  ;;  %v17046_v58 = vmov %v17037_v48  ;;  %v17059_v29 = vld [vmem:[#allocation40_spill] sm:$0xff]  ;;  %v17060_v47 = vld [vmem:[#allocation41_spill] sm:$0xff]  ;;  %v17063_v22 = vld [vmem:[#allocation15_spill] sm:$0xff] }
 0x8b2   : > { %v4927_v32 = vsel %vm3408_vm5, %v17041_v46, %v17040_v20  ;;  %v17047_v1 = vunpack.i.l.bf16 %v17036_v52  ;;  %v14879_v43 = vsel %vm1022_vm0, %v8831_v8, %v8925_v23  ;;  %9083 = vrot.lane.b32.xlu0 %v9082_v42, %s16566_s9  ;;  %v8836_v16 = vunpack.i.h.bf16 %v17048_v36  ;;  %v17061_v52 = vld [vmem:[#allocation78_spill] sm:$0xff]  ;;  %v17064_v42 = vld [vmem:[#allocation73_spill] sm:$0xff]  ;;  %v17069_v54 = vld [vmem:[#allocation76_spill] sm:$0xff] }
 0x8b3   : > { %v14869_v19 = vsel %vm3778_vm14, %v17045_v44, %v17044_v60  ;;  %v9142_v11 = vpack.i.bf16 %v14879_v43, %v17049_v21  ;;  %v8930_v62 = vunpack.i.l.bf16 %v14882_v12  ;;  %v17052_v15 = vpack.c.bf16 %v17050_v57, %v17051_v26  ;;  %6468 = vmatprep.subr.bf16.mxu0 %v6467_v6  ;;  %v17067_v20 = vld [vmem:[#allocation53_spill] sm:$0xff]  ;;  %v17068_v46 = vld [vmem:[#allocation30_spill] sm:$0xff]  ;;  %v17070_v60 = vld [vmem:[#allocation67_spill] sm:$0xff] }
 0x8b4   : > { %v4888_v41 = vsel %vm3387_vm12, %v17047_v1, %v17046_v58  ;;  %v8656_v2 = vunpack.i.h.bf16 %v17053_v27  ;;  %v9087_v56 = vpack.i.bf16 %v8751_v18, %v5335_v37  ;;  %v6433_v0 = vpack.c.bf16 %v17055_v33, %v17054_v4  ;;  %9113 = vrot.lane.b32.xlu1 %v17058_v49, %s16566_s9  ;;  %v17065_v37 = vld [vmem:[#allocation69_spill] sm:$0xff]  ;;  %v14925_v28 = vpop.permute.xlu0 %8943  ;;  %v17081_v49 = vld [vmem:[#allocation48_spill] sm:$0xff]  ;;  %v15031_v43 = vld [vmem:[%s15353_s3] sm:$0x7f] }
 0x8b5   : > { %v6469_v25 = vpack.c.bf16 %v4890_v39, %v4888_v41  ;;  %6432 = vmatprep.subr.bf16.mxu1 %v17052_v15  ;;  %v6471_v51 = vpack.c.bf16 %v4927_v32, %v17056_v61  ;;  %v8536_v5 = vunpack.i.h.bf16 %v17057_v31  ;;  %v8535_v53 = vunpack.i.l.bf16 %v17057_v31  ;;  %v17071_v41 = vld [vmem:[#allocation43_spill] sm:$0xff]  ;;  %v17073_v26 = vld [vmem:[#allocation49_spill] sm:$0xff] }
 0x8b6   : > { %v5259_v63 = vsel %vm1034_vm6, %v8920_v50, %v8921_v10  ;;  %v14903_v7 = vsel %vm1310_vm13, %v8836_v16, %v8930_v62  ;;  %v8655_v18 = vunpack.i.l.bf16 %v17053_v27  ;;  %v8661_v59 = vunpack.i.h.bf16 %v17059_v29  ;;  %9088 = vrot.lane.b32.xlu0 %v9087_v56, %s16566_s9  ;;  %6434 = vmatpush1.bf16.msra.mxu1 %v6433_v0  ;;  %v14913_v50 = vpop.permute.xlu1 %8933  ;;  %v17074_v15 = vld [vmem:[#allocation17_spill] sm:$0xff] }
 0x8b7   : > { %6470 = vmatpush1.bf16.msra.mxu0 %v6469_v25  ;;  %v8660_v8 = vunpack.i.l.bf16 %v17059_v29  ;;  %v9172_v24 = vpack.i.bf16 %v14903_v7, %v17060_v47  ;;  %v17062_v48 = vunpack.i.l.bf16 %v17061_v52  ;;  %v8541_v13 = vunpack.i.h.bf16 %v17063_v22 }
 0x8b8   : > { %v8540_v39 = vunpack.i.l.bf16 %v17063_v22  ;;  %v17066_v6 = vpack.c.bf16 %v17064_v42, %v17065_v37  ;;  %6472 = vmatprep.subr.bf16.mxu0 %v6471_v51  ;;  %v6473_v32 = vpack.c.bf16 %v17068_v46, %v17067_v20  ;;  %v6437_v44 = vpack.c.bf16 %v17070_v60, %v17069_v54  ;;  %9118 = vrot.lane.b32.xlu1 %v9117_v3, %s16566_s9  ;;  %v17078_v51 = vld [vmem:[#allocation31_spill] sm:$0xff]  ;;  %v14971_v37 = vpop.permute.xlu0 %8948  ;;  %v17087_v46 = vld [vmem:[#allocation62_spill] sm:$0xff]  ;;  %v17088_v60 = vld [vmem:[#allocation32_spill] sm:$0xff] }
 0x8b9   : > { %v14918_v34 = vsel %vm3778_vm14, %v8486_v35, %v17062_v48  ;;  %v8896_v35 = vunpack.i.h.bf16 %v14777_v40  ;;  %v8895_v58 = vunpack.i.l.bf16 %v14777_v40  ;;  %v9102_v1 = vpack.i.bf16 %v8921_v10, %v5259_v63  ;;  %v17075_v10 = vld [vmem:[#allocation35_spill] sm:$0xff] }
 0x8ba   : > { %6436 = vmatprep.subr.bf16.mxu1 %v17066_v6  ;;  %v17072_v36 = vunpack.i.h.bf16 %v17071_v41  ;;  %v8926_v25 = vunpack.i.h.bf16 %v14842_v30  ;;  %v4979_v57 = vsel %vm3435_vm9, %v8535_v53, %v8536_v5  ;;  %v9147_v27 = vpack.i.bf16 %v17074_v15, %v17073_v26  ;;  %v14951_v3 = vpop.permute.xlu1 %8968  ;;  %v17079_v5 = vld [vmem:[#allocation47_spill] sm:$0xff]  ;;  %v17086_v6 = vld [vmem:[#allocation18_spill] sm:$0xff] }
 0x8bb   : > { %6474 = vmatpush1.bf16.msra.mxu0 %v6473_v32  ;;  %v14942_v56 = vsel %vm3435_vm9, %v8655_v18, %v8656_v2  ;;  %v14947_v40 = vsel %vm3462_vm7, %v8660_v8, %v8661_v59  ;;  %v8800_v4 = vunpack.i.l.bf16 %v17075_v10  ;;  %9103 = vrot.lane.b32.xlu0 %v9102_v1, %s16566_s9  ;;  %v17076_v33 = vunpack.i.h.bf16 %v17061_v52  ;;  %v17082_v18 = vld [vmem:[#allocation72_spill] sm:$0xff]  ;;  %v17084_v22 = vld [vmem:[#allocation63_spill] sm:$0xff]  ;;  %v17090_v41 = vld [vmem:[#allocation38_spill] sm:$0xff] }
 0x8bc   : > { %v4978_v16 = vsel %vm3435_vm9, %v17072_v36, %v8535_v53  ;;  %6438 = vmatpush1.bf16.msra.mxu1 %v6437_v44  ;;  %v17077_v0 = vmov %v17062_v48  ;;  %v8666_v31 = vunpack.i.h.bf16 %v17078_v51  ;;  %v17080_v53 = vunpack.i.h.bf16 %v17079_v5  ;;  %v17083_v48 = vld [vmem:[#allocation75_spill] sm:$0xff]  ;;  %v17089_v44 = vld [vmem:[#allocation52_spill] sm:$0xff] }
 0x8bd   : > { %v14958_v61 = vsel %vm3778_vm14, %v17077_v0, %v17076_v33  ;;  %v6477_v8 = vpack.c.bf16 %v17082_v18, %v17081_v49  ;;  %v17085_v42 = vpack.c.bf16 %v17083_v48, %v17084_v22  ;;  %v5031_v52 = vsel %vm3462_vm7, %v8540_v39, %v8541_v13  ;;  %v17091_v13 = vld [vmem:[#allocation22_spill] sm:$0xff]  ;;  %v17094_v49 = vld [vmem:[#allocation37_spill] sm:$0xff]  ;;  %v14999_v22 = vpop.permute.xlu0 %8953 }
 0x8be   : > { %v14964_v63 = vsel %vm3462_vm7, %v17080_v53, %v8540_v39  ;;  %v6479_v20 = vpack.c.bf16 %v4979_v57, %v17086_v6  ;;  %v6481_v32 = vpack.c.bf16 %v4978_v16, %v17087_v46  ;;  %v4983_v54 = vsel %vm3435_vm9, %v8895_v58, %v8896_v35  ;;  %9133 = vrot.lane.b32.xlu1 %v17091_v13, %s16566_s9  ;;  %v17092_v39 = vld [vmem:[#allocation19_spill] sm:$0xff]  ;;  %v17093_v35 = vld [vmem:[#allocation46_spill] sm:$0xff]  ;;  %v14990_v57 = vpop.permute.xlu1 %8978 }
 0x8bf   : > { %6476 = vmatprep.subr.bf16.mxu0 %v17085_v42  ;;  %v9137_v1 = vpack.i.bf16 %v17089_v44, %v17088_v60  ;;  %v8546_v36 = vunpack.i.h.bf16 %v17090_v41  ;;  %v8545_v33 = vunpack.i.l.bf16 %v17090_v41  ;;  %v8801_v0 = vunpack.i.h.bf16 %v17075_v10  ;;  %9108 = vrot.lane.b32.xlu0 %v17093_v35, %s16566_s9  ;;  %v17095_v18 = vld [vmem:[#allocation2_spill] sm:$0xff] }
 0x8c0   : > { %v5303_v5 = vsel %vm1022_vm0, %v8925_v23, %v8926_v25  ;;  %6478 = vmatpush1.bf16.msra.mxu0 %v6477_v8  ;;  %v8691_v16 = vunpack.i.h.bf16 %v17092_v39  ;;  %v4981_v53 = vsel %vm3435_vm9, %v8656_v2, %v8800_v4  ;;  %v6487_v10 = vpack.c.bf16 %v5031_v52, %v17094_v49  ;;  %v17097_v4 = vld [vmem:[#allocation54_spill] sm:$0xff] }
 0x8c1   : > { %6480 = vmatprep.subr.bf16.mxu0 %v6479_v20  ;;  %v6489_v30 = vpack.c.bf16 %v14964_v63, %v17095_v18  ;;  %v4982_v23 = vsel %vm3435_vm9, %v8801_v0, %v8895_v58  ;;  %v8901_v48 = vunpack.i.h.bf16 %v14798_v45  ;;  %v8900_v8 = vunpack.i.l.bf16 %v14798_v45  ;;  %v17096_v20 = vld [vmem:[#allocation5_spill] sm:$0xff] }
 0x8c2   : > { %v6483_v42 = vpack.c.bf16 %v4983_v54, %v4981_v53  ;;  %v9122_v6 = vpack.i.bf16 %v8926_v25, %v5303_v5  ;;  %v8931_v46 = vunpack.i.h.bf16 %v14882_v12  ;;  %v5804_v41 = vsub.s32 1, %v17096_v20  ;;  %9143 = vrot.lane.b32.xlu1 %v9142_v11, %s16566_s9  ;;  %v17102_v5 = vld [vmem:[#allocation33_spill] sm:$0xff]  ;;  %v15026_v53 = vpop.permute.xlu1 %8988 }
 0x8c3   : > { %v5800_v2 = vsub.s32 0, %v17096_v20  ;;  %v17098_v52 = vunpack.i.h.bf16 %v17097_v4  ;;  %vm17099_vm0 = vcmask 654336   ;;  %v8956_v58 = vunpack.i.h.bf16 %v14999_v22  ;;  %v17104_v4 = vld [vmem:[#allocation3_spill] sm:$0xff] }
 0x8c4   : > { %v8955_v0 = vunpack.i.l.bf16 %v14999_v22  ;;  %6482 = vmatpush1.bf16.msra.mxu0 %v6481_v32  ;;  %vm17100_vm15 = vmmov %vm17099_vm0  ;;  %v17101_v25 = vunpack.i.l.bf16 %v17092_v39  ;;  %v8806_v13 = vunpack.i.h.bf16 %v17102_v5  ;;  %v8805_v35 = vunpack.i.l.bf16 %v17102_v5  ;;  %9123 = vrot.lane.b32.xlu0 %v9122_v6, %s16566_s9 }
 0x8c5   : > { %v15007_v63 = vsel %vm17099_vm0, %v17098_v52, %v8545_v33  ;;  %v15016_v45 = vsel %vm17100_vm15, %v8545_v33, %v8546_v36  ;;  %6484 = vmatprep.subr.bf16.mxu0 %v6483_v42  ;;  %v5805_v21 = vrot.slane %v15031_v43, %v5804_v41  ;;  %v6485_v11 = vpack.c.bf16 %v4982_v23, %v14942_v56  ;;  %v15037_v33 = vpop.permute.xlu0 %8958  ;;  %vm17109_vm6 = vmmov %vm17099_vm0 }
 0x8c6   : > { %v5377_v54 = vsel %vm1310_vm13, %v17101_v25, %v8691_v16  ;;  %v8991_v32 = vunpack.i.h.bf16 %v15026_v53  ;;  %v8990_v36 = vunpack.i.l.bf16 %v15026_v53  ;;  %v5801_v49 = vrot.slane %v15031_v43, %v5800_v2  ;;  %9148 = vrot.lane.b32.xlu1 %v9147_v27, %s16566_s9  ;;  %v15066_v26 = vpop.permute.xlu1 %8998  ;;  %vm17114_vm5 = vmmov %vm17099_vm0 }
 0x8c7   : > { %v5379_v18 = vsel %vm1310_vm13, %v8930_v62, %v8931_v46  ;;  %v8936_v42 = vunpack.i.h.bf16 %v14913_v50  ;;  %v8935_v6 = vunpack.i.l.bf16 %v14913_v50  ;;  %v5035_v41 = vsel %vm3462_vm7, %v8900_v8, %v8901_v48  ;;  %5898 = vmatprep.mubr.f32.mxu1 %v5805_v21  ;;  %v17103_v50 = vld [vmem:[#allocation71_spill] sm:$0xff]  ;;  %vm17107_vm13 = vmmov %vm17099_vm0 }
 0x8c8   : > { %v8961_v56 = vunpack.i.h.bf16 %v15037_v33  ;;  %v8960_v23 = vunpack.i.l.bf16 %v15037_v33  ;;  %6486 = vmatpush1.bf16.msra.mxu0 %v6485_v11  ;;  %v15055_v12 = vsel %vm3778_vm14, %v8955_v0, %v8956_v58  ;;  %v15060_v62 = vsel %vm3778_vm14, %v8990_v36, %v8991_v32  ;;  %9128 = vrot.lane.b32.xlu0 %v17104_v4, %s16566_s9 }
 0x8c9   : > { %v8696_v48 = vunpack.i.h.bf16 %v17103_v50  ;;  %v8695_v2 = vunpack.i.l.bf16 %v17103_v50  ;;  %6488 = vmatprep.subr.bf16.mxu0 %v6487_v10  ;;  %v5033_v15 = vsel %vm3462_vm7, %v8661_v59, %v8805_v35  ;;  %v6527_v27 = vpack.c.bf16 %v15060_v62, %v15055_v12  ;;  %v15076_v21 = vpop.permute.xlu0 %8963  ;;  %5899 = vmatmul.mubr.f32.vlgmr.msra.gmra.mrb[8].mxu1 %v5801_v49 }
 0x8ca   : > { %v5034_v52 = vsel %vm3462_vm7, %v8806_v13, %v8900_v8  ;;  %v9162_v58 = vpack.i.bf16 %v8931_v46, %v5379_v18  ;;  %v9001_v25 = vunpack.i.h.bf16 %v15066_v26  ;;  %v9000_v5 = vunpack.i.l.bf16 %v15066_v26 }
 0x8cb   : > { %v8906_v11 = vunpack.i.h.bf16 %v14833_v9  ;;  %v8905_v10 = vunpack.i.l.bf16 %v14833_v9  ;;  %v5423_v29 = vsel %vm1324_vm1, %v8935_v6, %v8936_v42  ;;  %v6491_v59 = vpack.c.bf16 %v5035_v41, %v5033_v15 }
 0x8cc   : > { %v17105_v35 = vmov 0.0   ;;  %v8966_v32 = vunpack.i.h.bf16 %v15076_v21  ;;  %v8965_v8 = vunpack.i.l.bf16 %v15076_v21  ;;  %9163 = vrot.lane.b32.xlu1 %v9162_v58, %s16566_s9  ;;  %6490 = vmatpush1.bf16.msra.mxu0 %v6489_v30  ;;  %v15088_v46 = vsel %vm3778_vm14, %v8960_v23, %v8961_v56  ;;  %v15102_v30 = vpop.permute.xlu1 %9008 }
 0x8cd   : > { %6111 = vmatprep.mubr.f32.mxu1 %v17105_v35  ;;  %v15093_v9 = vsel %vm3778_vm14, %v9000_v5, %v9001_v25  ;;  %v8810_v13 = vunpack.i.l.bf16 %v14703_v17  ;;  %v8841_v49 = vunpack.i.h.bf16 %v14735_v55  ;;  %v8840_v18 = vunpack.i.l.bf16 %v14735_v55  ;;  %9138 = vrot.lane.b32.xlu0 %v9137_v1, %s16566_s9  ;;  %v15109_v58 = vpop.permute.xlu0 %8973  ;;  %v17106_v1 = vld [vmem:[#allocation80_spill] sm:$0xff] }
 0x8ce   : > { %6492 = vmatprep.subr.bf16.mxu0 %v6491_v59  ;;  %v6535_v41 = vpack.c.bf16 %v15093_v9, %v15088_v46  ;;  %v6493_v56 = vpack.c.bf16 %v5034_v52, %v14947_v40  ;;  %v9167_v50 = vpack.i.bf16 %v8936_v42, %v5423_v29  ;;  %v9011_v4 = vunpack.i.h.bf16 %v15102_v30 }
 0x8cf   : > { %v9010_v15 = vunpack.i.l.bf16 %v15102_v30  ;;  %v9152_v55 = vpack.i.bf16 %v8691_v16, %v5377_v54  ;;  %v5421_v60 = vsel %vm1324_vm1, %v8695_v2, %v8696_v48  ;;  %v5422_v44 = vsel %vm1324_vm1, %v8841_v49, %v8935_v6  ;;  %v17108_v54 = vld [vmem:[#allocation74_spill] sm:$0xff] }
 0x8d0   : > { %v6495_v25 = vpack.c.bf16 %v15016_v45, %v17106_v1  ;;  %v8665_v59 = vunpack.i.l.bf16 %v17078_v51  ;;  %9168 = vrot.lane.b32.xlu1 %v9167_v50, %s16566_s9  ;;  %6494 = vmatpush1.bf16.msra.mxu0 %v6493_v56  ;;  %v5087_v40 = vsel %vm17107_vm13, %v8905_v10, %v8906_v11  ;;  %v15123_v42 = vsel %vm3778_vm14, %v8965_v8, %v8966_v32  ;;  %v17111_v56 = vld [vmem:[#allocation26_spill] sm:$0xff] }
 0x8d1   : > { %v15128_v39 = vsel %vm3778_vm14, %v9010_v15, %v9011_v4  ;;  %v8811_v16 = vunpack.i.h.bf16 %v14703_v17  ;;  %v5420_v45 = vsel %vm1324_vm1, %v8840_v18, %v8695_v2  ;;  %9153 = vrot.lane.b32.xlu0 %v9152_v55, %s16566_s9  ;;  %v6497_v6 = vpack.c.bf16 %v15007_v63, %v17108_v54  ;;  %v15137_v35 = vpop.permute.xlu0 %8983  ;;  %vm17110_vm1 = vmmov %vm17099_vm0 }
 0x8d2   : > { %6496 = vmatprep.subr.bf16.mxu0 %v6495_v25  ;;  %v6543_v52 = vpack.c.bf16 %v15128_v39, %v15123_v42  ;;  %v9157_v11 = vpack.i.bf16 %v8696_v48, %v5421_v60  ;;  %v9177_v29 = vpack.i.bf16 %v5422_v44, %v5420_v45  ;;  %v5085_v32 = vsel %vm17109_vm6, %v8666_v31, %v8810_v13 }
 0x8d3   : > { %v5808_v17 = vsub.s32 2, %v17096_v20  ;;  %v5086_v2 = vsel %vm17110_vm1, %v8811_v16, %v8905_v10  ;;  %v8941_v49 = vunpack.i.h.bf16 %v14891_v38  ;;  %v8940_v18 = vunpack.i.l.bf16 %v14891_v38 }
 0x8d4   : > { %v6499_v63 = vpack.c.bf16 %v5087_v40, %v5085_v32  ;;  %v8701_v50 = vunpack.i.h.bf16 %v17111_v56  ;;  %v8700_v48 = vunpack.i.l.bf16 %v17111_v56  ;;  %9178 = vrot.lane.b32.xlu1 %v9177_v29, %s16566_s9  ;;  %6498 = vmatpush1.bf16.msra.mxu0 %v6497_v6  ;;  %v17112_v4 = vunpack.i.h.bf16 %v17043_v14 }
 0x8d5   : > { %v17113_v13 = vunpack.i.l.bf16 %v17043_v14  ;;  %v5820_v10 = vsub.s32 5, %v17096_v20  ;;  %v5084_v38 = vsel %vm17114_vm5, %v8665_v59, %v8666_v31  ;;  %9158 = vrot.lane.b32.xlu0 %v9157_v11, %s16566_s9  ;;  %v8971_v1 = vunpack.i.h.bf16 %v14951_v3  ;;  %v8994_v40 = vpop.permute.xlu0 %8993  ;;  %v17115_v59 = vld [vmem:[#allocation42_spill] sm:$0xff] }
 0x8d6   : > { %6500 = vmatprep.subr.bf16.mxu0 %v6499_v63  ;;  %v6501_v44 = vpack.c.bf16 %v5086_v2, %v5084_v38  ;;  %v8970_v25 = vunpack.i.l.bf16 %v14951_v3  ;;  %v6505_v14 = vpack.c.bf16 %v14918_v34, %v14869_v19  ;;  %v8996_v16 = vunpack.i.h.bf16 %v8994_v40 }
 0x8d7   : > { %v5653_v55 = vsel %vm3778_vm14, %v17113_v13, %v17112_v4  ;;  %v8995_v45 = vunpack.i.l.bf16 %v8994_v40  ;;  %v5809_v51 = vrot.slane %v15031_v43, %v5808_v17  ;;  %v5659_v31 = vsel %vm3778_vm14, %v8940_v18, %v8941_v49 }
 0x8d8   : > { %v6503_v60 = vpack.c.bf16 %v14958_v61, %v5653_v55  ;;  %v8846_v54 = vunpack.i.h.bf16 %v17115_v59  ;;  %v8845_v6 = vunpack.i.l.bf16 %v17115_v59  ;;  %6502 = vmatpush1.bf16.msra.mxu0 %v6501_v44  ;;  %v5657_v61 = vsel %vm3778_vm14, %v8700_v48, %v8701_v50 }
 0x8d9   : > { %v5821_v11 = vrot.slane %v15031_v43, %v5820_v10  ;;  %v8946_v3 = vunpack.i.h.bf16 %v14925_v28  ;;  %v8945_v29 = vunpack.i.l.bf16 %v14925_v28  ;;  %v15175_v19 = vsel %vm3778_vm14, %v8996_v16, %v8990_v36  ;;  %9173 = vrot.lane.b32.xlu0 %v9172_v24, %s16566_s9  ;;  %v9004_v53 = vpop.permute.xlu0 %9003  ;;  %v9019_v10 = vpop.permute.xlu1 %9018 }
 0x8da   : > { %v15180_v34 = vsel %vm3778_vm14, %v8995_v45, %v8955_v0  ;;  %6504 = vmatprep.subr.bf16.mxu0 %v6503_v60  ;;  %v5658_v32 = vsel %vm3778_vm14, %v8846_v54, %v8940_v18  ;;  %v6507_v17 = vpack.c.bf16 %v5659_v31, %v5657_v61  ;;  %v5663_v36 = vsel %vm3778_vm14, %v8970_v25, %v8971_v1 }
 0x8db   : > { %v6529_v28 = vpack.c.bf16 %v15175_v19, %v15180_v34  ;;  %v8976_v22 = vunpack.i.h.bf16 %v15109_v58  ;;  %v8975_v0 = vunpack.i.l.bf16 %v15109_v58  ;;  %v9006_v2 = vunpack.i.h.bf16 %v9004_v53  ;;  %5970 = vmatmul.mubr.f32.vlgmr.msra.gmra.mrb[4].mxu0 %v5809_v51 }
 0x8dc   : > { %v9005_v49 = vunpack.i.l.bf16 %v9004_v53  ;;  %6506 = vmatpush1.bf16.msra.mxu0 %v6505_v14  ;;  %6040 = vmatprep.mubr.f32.mxu0 %v5821_v11  ;;  %v5656_v7 = vsel %vm3778_vm14, %v8845_v6, %v8700_v48  ;;  %v5661_v58 = vsel %vm3778_vm14, %v8945_v29, %v8946_v3  ;;  %v9021_v60 = vunpack.i.h.bf16 %v9019_v10 }
 0x8dd   : > { %v15196_v47 = vsel %vm3778_vm14, %v9006_v2, %v9000_v5  ;;  %6508 = vmatprep.subr.bf16.mxu0 %v6507_v17  ;;  %v6509_v18 = vpack.c.bf16 %v5658_v32, %v5656_v7  ;;  %v9014_v56 = vpop.permute.xlu0 %9013  ;;  %v6511_v50 = vpack.c.bf16 %v5663_v36, %v5661_v58  ;;  %v5662_v48 = vsel %vm3778_vm14, %v8976_v22, %v8970_v25  ;;  %v9024_v21 = vpop.permute.xlu1 %9023 }
 0x8de   : > { %v15201_v24 = vsel %vm3778_vm14, %v9005_v49, %v8960_v23  ;;  %v5660_v26 = vsel %vm3778_vm14, %v8975_v0, %v8945_v29  ;;  %v9016_v5 = vunpack.i.h.bf16 %v9014_v56  ;;  %v9015_v4 = vunpack.i.l.bf16 %v9014_v56 }
 0x8df   : > { %v6537_v63 = vpack.c.bf16 %v15196_v47, %v15201_v24  ;;  %v6513_v13 = vpack.c.bf16 %v5662_v48, %v5660_v26  ;;  %v9020_v44 = vunpack.i.l.bf16 %v9019_v10  ;;  %v8981_v51 = vunpack.i.h.bf16 %v14990_v57 }
 0x8e0   : > { %6510 = vmatpush1.bf16.msra.mxu0 %v6509_v18  ;;  %v15211_v33 = vsel %vm3778_vm14, %v9016_v5, %v9010_v15  ;;  %v15216_v23 = vsel %vm3778_vm14, %v9015_v4, %v8965_v8  ;;  %v8980_v31 = vunpack.i.l.bf16 %v14990_v57  ;;  %v8951_v59 = vunpack.i.h.bf16 %v14971_v37 }
 0x8e1   : > { %6512 = vmatprep.subr.bf16.mxu0 %v6511_v50  ;;  %v6545_v55 = vpack.c.bf16 %v15211_v33, %v15216_v23  ;;  %v9044_v38 = vpop.permute.xlu0 %9043  ;;  %v5665_v30 = vsel %vm3778_vm14, %v9020_v44, %v9021_v60  ;;  %v9029_v8 = vpop.permute.xlu1 %9028  ;;  %v8950_v54 = vunpack.i.l.bf16 %v14971_v37  ;;  %v8986_v61 = vunpack.i.h.bf16 %v15137_v35 }
 0x8e2   : > { %v9046_v1 = vunpack.i.h.bf16 %v9044_v38  ;;  %v9045_v25 = vunpack.i.l.bf16 %v9044_v38  ;;  %v8985_v11 = vunpack.i.l.bf16 %v15137_v35  ;;  %v5671_v32 = vsel %vm3778_vm14, %v8980_v31, %v8981_v51 }
 0x8e3   : > { %v5669_v57 = vsel %vm3778_vm14, %v8950_v54, %v8951_v59  ;;  %v5670_v22 = vsel %vm3778_vm14, %v8986_v61, %v8980_v31  ;;  %v9026_v7 = vunpack.i.h.bf16 %v9024_v21  ;;  %v9025_v58 = vunpack.i.l.bf16 %v9024_v21 }
 0x8e4   : > { %6514 = vmatpush1.bf16.msra.mxu0 %v6513_v13  ;;  %v5667_v15 = vsel %vm3778_vm14, %v9045_v25, %v9046_v1  ;;  %v5668_v37 = vsel %vm3778_vm14, %v8985_v11, %v8950_v54  ;;  %v6519_v0 = vpack.c.bf16 %v5671_v32, %v5669_v57  ;;  %vm17117_vm12 = vcmask 1040384  }
 0x8e5   : > { %v6515_v40 = vpack.c.bf16 %v5667_v15, %v5665_v30  ;;  %v15222_v14 = vpop.permute.xlu1 %9033  ;;  %v6521_v2 = vpack.c.bf16 %v5670_v22, %v5668_v37  ;;  %v15242_v49 = vpop.permute.xlu0 %9048  ;;  %v5673_v38 = vsel %vm3778_vm14, %v9025_v58, %v9026_v7  ;;  %v9031_v30 = vunpack.i.h.bf16 %v9029_v8  ;;  %vm17118_vm9 = vmmov %vm17117_vm12 }
 0x8e6   : > { %v9030_v15 = vunpack.i.l.bf16 %v9029_v8  ;;  %v9036_v62 = vunpack.i.h.bf16 %v15222_v14  ;;  %v9051_v37 = vunpack.i.h.bf16 %v15242_v49  ;;  %vm17119_vm7 = vcmask 269312  }
 0x8e7   : > { %6516 = vmatprep.subr.bf16.mxu0 %v6515_v40 }
 0x8e8   : > { %v5681_v11 = vsel %vm3778_vm14, %v9030_v15, %v9031_v30 }
 0x8e9   : > { %v15224_v16 = vpop.permute.xlu1 %9038 }
 0x8ea   : > { %v9041_v7 = vunpack.i.h.bf16 %v15224_v16 }
 0x8ed   : > { %v15226_v45 = vpop.permute.xlu1 %9053 }
 0x8ee   : > { %v9056_v19 = vunpack.i.h.bf16 %v15226_v45  ;;  %v9055_v34 = vunpack.i.l.bf16 %v15226_v45  ;;  %v9040_v45 = vunpack.i.l.bf16 %v15224_v16 }
 0x8f1   : > { %v9059_v6 = vpop.permute.xlu1 %9058 }
 0x8f2   : > { %v9061_v3 = vunpack.i.h.bf16 %v9059_v6  ;;  %v9060_v29 = vunpack.i.l.bf16 %v9059_v6 }
 0x8f4   : > { %v5664_v53 = vsel %vm3778_vm14, %v9060_v29, %v9020_v44  ;;  %v5666_v17 = vsel %vm3778_vm14, %v9061_v3, %v9045_v25 }
 0x8f5   : > { %v6517_v36 = vpack.c.bf16 %v5666_v17, %v5664_v53  ;;  %v15240_v35 = vpop.permute.xlu1 %9073 }
 0x8f6   : > { %v9076_v47 = vunpack.i.h.bf16 %v15240_v35  ;;  %v9075_v24 = vunpack.i.l.bf16 %v15240_v35 }
 0x8f7   : > { %6518 = vmatpush1.bf16.msra.mxu0 %v6517_v36 }
 0x8f8   : > { %6520 = vmatprep.subr.bf16.mxu0 %v6519_v0 }
 0x8fb   : > { %6522 = vmatpush1.bf16.msra.mxu0 %v6521_v2 }
 0x918   : > { %v9079_v18 = vpop.permute.xlu1 %9078  ;;  %v9064_v48 = vpop.permute.xlu0 %9063 }
 0x919   : > { %v9081_v56 = vunpack.i.h.bf16 %v9079_v18  ;;  %v9080_v50 = vunpack.i.l.bf16 %v9079_v18  ;;  %v9066_v26 = vunpack.i.h.bf16 %v9064_v48  ;;  %v9065_v5 = vunpack.i.l.bf16 %v9064_v48 }
 0x91a   : > { %v5697_v48 = vsel %vm3778_vm14, %v9040_v45, %v9041_v7 }
 0x91b   : > { %v5672_v4 = vsel %vm3778_vm14, %v9080_v50, %v9025_v58  ;;  %v5674_v13 = vsel %vm3778_vm14, %v9081_v56, %v9065_v5  ;;  %v5675_v60 = vsel %vm3778_vm14, %v9065_v5, %v9066_v26  ;;  %v5703_v56 = vsel %vm3778_vm14, %v9055_v34, %v9056_v19 }
 0x91c   : > { %v15246_v10 = vpop.permute.xlu1 %9093  ;;  %v6525_v44 = vpack.c.bf16 %v5674_v13, %v5672_v4  ;;  %v6523_v25 = vpack.c.bf16 %v5675_v60, %v5673_v38 }
 0x91d   : > { %v9096_v13 = vunpack.i.h.bf16 %v15246_v10 }
 0x91e   : > { %6524 = vmatprep.subr.bf16.mxu0 %v6523_v25 }
 0x91f   : > { %6526 = vmatpush1.bf16.msra.mxu0 %v6525_v44 }
 0x920   : > { %v15250_v1 = vpop.permute.xlu0 %9068  ;;  %6528 = vmatprep.subr.bf16.mxu0 %v6527_v27  ;;  %v9035_v27 = vunpack.i.l.bf16 %v15222_v14  ;;  %v9050_v14 = vunpack.i.l.bf16 %v15242_v49 }
 0x921   : > { %v9071_v38 = vunpack.i.h.bf16 %v15250_v1  ;;  %v9070_v25 = vunpack.i.l.bf16 %v15250_v1 }
 0x922   : > { %v9099_v21 = vpop.permute.xlu1 %9098  ;;  %v5689_v2 = vsel %vm3778_vm14, %v9035_v27, %v9036_v62  ;;  %v5701_v50 = vsel %vm3778_vm14, %v9050_v14, %v9051_v37 }
 0x923   : > { %v9101_v40 = vunpack.i.h.bf16 %v9099_v21  ;;  %v9100_v51 = vunpack.i.l.bf16 %v9099_v21  ;;  %6530 = vmatpush1.bf16.msra.mxu0 %v6529_v28  ;;  %v6551_v26 = vpack.c.bf16 %v5703_v56, %v5701_v50 }
 0x924   : > { %v9084_v31 = vpop.permute.xlu0 %9083 }
 0x925   : > { %v9086_v59 = vunpack.i.h.bf16 %v9084_v31  ;;  %v9085_v54 = vunpack.i.l.bf16 %v9084_v31  ;;  %v5680_v6 = vsel %vm3778_vm14, %v9100_v51, %v9030_v15 }
 0x926   : > { %v15260_v8 = vpop.permute.xlu1 %9113 }
 0x927   : > { %v5682_v61 = vsel %vm3778_vm14, %v9101_v40, %v9085_v54  ;;  %v5683_v3 = vsel %vm3778_vm14, %v9085_v54, %v9086_v59  ;;  %v9115_v19 = vunpack.i.l.bf16 %v15260_v8 }
 0x928   : > { %v6533_v29 = vpack.c.bf16 %v5682_v61, %v5680_v6  ;;  %v15264_v32 = vpop.permute.xlu0 %9088  ;;  %v6531_v12 = vpack.c.bf16 %v5683_v3, %v5681_v11  ;;  %v9095_v6 = vunpack.i.l.bf16 %v15246_v10  ;;  %v5702_v61 = vsel %vm3778_vm14, %v9071_v38, %v9055_v34 }
 0x929   : > { %v9091_v30 = vunpack.i.h.bf16 %v15264_v32  ;;  %v9090_v15 = vunpack.i.l.bf16 %v15264_v32 }
 0x92a   : > { %6532 = vmatprep.subr.bf16.mxu0 %v6531_v12  ;;  %v9119_v53 = vpop.permute.xlu1 %9118 }
 0x92b   : > { %6534 = vmatpush1.bf16.msra.mxu0 %v6533_v29  ;;  %v9121_v28 = vunpack.i.h.bf16 %v9119_v53  ;;  %v9120_v17 = vunpack.i.l.bf16 %v9119_v53  ;;  %v5700_v29 = vsel %vm3778_vm14, %v9070_v25, %v9050_v14  ;;  %v5707_v23 = vsel %vm3778_vm14, %v9090_v15, %v9091_v30 }
 0x92c   : > { %6536 = vmatprep.subr.bf16.mxu0 %v6535_v41  ;;  %v9116_v53 = vunpack.i.h.bf16 %v15260_v8 }
 0x92d   : > { %v9104_v36 = vpop.permute.xlu0 %9103  ;;  %v5688_v0 = vsel %vm3778_vm14, %v9120_v17, %v9035_v27 }
 0x92e   : > { %v9106_v57 = vunpack.i.h.bf16 %v9104_v36  ;;  %v9105_v22 = vunpack.i.l.bf16 %v9104_v36  ;;  %v6553_v36 = vpack.c.bf16 %v5702_v61, %v5700_v29  ;;  %v17116_v61 = vld [vmem:[#allocation57_spill] sm:$0xff] }
 0x92f   : > { %6538 = vmatpush1.bf16.msra.mxu0 %v6537_v63 }
 0x930   : > { %v5690_v58 = vsel %vm3778_vm14, %v9121_v28, %v9105_v22  ;;  %v9134_v46 = vpop.permute.xlu1 %9133  ;;  %v5691_v9 = vsel %vm3778_vm14, %v9105_v22, %v9106_v57  ;;  %v5706_v57 = vsel %vm3778_vm14, %v9096_v13, %v9090_v15  ;;  %v5705_v22 = vsel %vm3778_vm14, %v9075_v24, %v9076_v47 }
 0x931   : > { %v6541_v41 = vpack.c.bf16 %v5690_v58, %v5688_v0  ;;  %v15284_v18 = vpop.permute.xlu0 %9108  ;;  %v6539_v49 = vpack.c.bf16 %v5691_v9, %v5689_v2  ;;  %v9136_v21 = vunpack.i.h.bf16 %v9134_v46  ;;  %v9135_v40 = vunpack.i.l.bf16 %v9134_v46 }
 0x932   : > { %v9111_v32 = vunpack.i.h.bf16 %v15284_v18  ;;  %v6555_v0 = vpack.c.bf16 %v5707_v23, %v5705_v22  ;;  %v5704_v2 = vsel %vm3778_vm14, %v9095_v6, %v9075_v24  ;;  %v5711_v46 = vsel %vm3778_vm14, %v9115_v19, %v9116_v53 }
 0x933   : > { %6540 = vmatprep.subr.bf16.mxu0 %v6539_v49  ;;  %v5719_v27 = vsel %vm3778_vm14, %v9135_v40, %v9136_v21 }
 0x934   : > { %6542 = vmatpush1.bf16.msra.mxu0 %v6541_v41  ;;  %v9144_v16 = vpop.permute.xlu1 %9143 }
 0x935   : > { %v9146_v63 = vunpack.i.h.bf16 %v9144_v16  ;;  %v9145_v5 = vunpack.i.l.bf16 %v9144_v16  ;;  %6544 = vmatprep.subr.bf16.mxu0 %v6543_v52 }
 0x936   : > { %v9124_v4 = vpop.permute.xlu0 %9123 }
 0x937   : > { %v9126_v60 = vunpack.i.h.bf16 %v9124_v4  ;;  %v9125_v44 = vunpack.i.l.bf16 %v9124_v4  ;;  %v5696_v35 = vsel %vm3778_vm14, %v9145_v5, %v9040_v45  ;;  %v6557_v45 = vpack.c.bf16 %v5706_v57, %v5704_v2 }
 0x938   : > { %6546 = vmatpush1.bf16.msra.mxu0 %v6545_v55  ;;  %v9149_v42 = vpop.permute.xlu1 %9148  ;;  %v9110_v55 = vunpack.i.l.bf16 %v15284_v18  ;;  %v17120_v57 = vlaneseq }
 0x939   : > { %v5698_v51 = vsel %vm3778_vm14, %v9146_v63, %v9125_v44  ;;  %v5699_v39 = vsel %vm3778_vm14, %v9125_v44, %v9126_v60  ;;  %v9151_v31 = vunpack.i.h.bf16 %v9149_v42  ;;  %v9150_v1 = vunpack.i.l.bf16 %v9149_v42 }
 0x93a   : > { %v6549_v52 = vpack.c.bf16 %v5698_v51, %v5696_v35  ;;  %v9129_v59 = vpop.permute.xlu0 %9128  ;;  %v6547_v54 = vpack.c.bf16 %v5699_v39, %v5697_v48  ;;  %v5709_v8 = vsel %vm3778_vm14, %v9110_v55, %v9111_v32  ;;  %v5824_v39 = vsub.s32 6, %v17096_v20 }
 0x93b   : > { %v9131_v11 = vunpack.i.h.bf16 %v9129_v59  ;;  %v9130_v3 = vunpack.i.l.bf16 %v9129_v59  ;;  %v5718_v33 = vsel %vm3778_vm14, %v9151_v31, %v9135_v40  ;;  %v6559_v16 = vpack.c.bf16 %v5711_v46, %v5709_v8 }
 0x93c   : > { %6548 = vmatprep.subr.bf16.mxu0 %v6547_v54 }
 0x93d   : > { %v5716_v12 = vsel %vm3778_vm14, %v9150_v1, %v9130_v3  ;;  %6550 = vmatpush1.bf16.msra.mxu0 %v6549_v52  ;;  %v5717_v10 = vsel %vm3778_vm14, %v9130_v3, %v9131_v11  ;;  %v5816_v1 = vsub.s32 4, %v17096_v20  ;;  %v5825_v11 = vrot.slane %v15031_v43, %v5824_v39 }
 0x93e   : > { %v9164_v62 = vpop.permute.xlu1 %9163  ;;  %v6569_v34 = vpack.c.bf16 %v5718_v33, %v5716_v12  ;;  %6552 = vmatprep.subr.bf16.mxu0 %v6551_v26  ;;  %v6567_v17 = vpack.c.bf16 %v5719_v27, %v5717_v10  ;;  %v9285_v33 = vmov 1966171168  }
 0x93f   : > { %v9139_v28 = vpop.permute.xlu0 %9138  ;;  %v9166_v9 = vunpack.i.h.bf16 %v9164_v62  ;;  %v9165_v41 = vunpack.i.l.bf16 %v9164_v62  ;;  %v5817_v3 = vrot.slane %v15031_v43, %v5816_v1  ;;  %v6122_v23 = vunpack.c.l.s4 %v9285_v33 }
 0x940   : > { %v9141_v37 = vunpack.i.h.bf16 %v9139_v28  ;;  %v9140_v14 = vunpack.i.l.bf16 %v9139_v28  ;;  %6568 = vmatprep.subr.bf16.mxu1 %v6567_v17 }
 0x941   : > { %6554 = vmatpush1.bf16.msra.mxu0 %v6553_v36  ;;  %6570 = vmatpush1.bf16.msra.mxu1 %v6569_v34  ;;  %v5715_v44 = vsel %vm3778_vm14, %v9165_v41, %v9166_v9  ;;  %v6123_v10 = vunpack.c.0.s8 %v6122_v23 }
 0x942   : > { %v9169_v7 = vpop.permute.xlu1 %9168  ;;  %6556 = vmatprep.subr.bf16.mxu0 %v6555_v0  ;;  %v5710_v56 = vsel %vm3778_vm14, %v9141_v37, %v9115_v19  ;;  %v5708_v50 = vsel %vm3778_vm14, %v9140_v14, %v9110_v55 }
 0x943   : > { %v9154_v58 = vpop.permute.xlu0 %9153  ;;  %v9171_v48 = vunpack.i.h.bf16 %v9169_v7  ;;  %v9170_v26 = vunpack.i.l.bf16 %v9169_v7  ;;  %v6561_v13 = vpack.c.bf16 %v5710_v56, %v5708_v50  ;;  %v6126_v28 = vsub.s32 %v6123_v10, %v17096_v20 }
 0x944   : > { %v9156_v18 = vunpack.i.h.bf16 %v9154_v58  ;;  %v9155_v49 = vunpack.i.l.bf16 %v9154_v58 }
 0x945   : > { %6558 = vmatpush1.bf16.msra.mxu0 %v6557_v45  ;;  %v5723_v21 = vsel %vm3778_vm14, %v9170_v26, %v9171_v48 }
 0x946   : > { %v9179_v47 = vpop.permute.xlu1 %9178  ;;  %v5713_v24 = vsel %vm3778_vm14, %v9155_v49, %v9156_v18  ;;  %6560 = vmatprep.subr.bf16.mxu0 %v6559_v16 }
 0x947   : > { %v9181_v63 = vunpack.i.h.bf16 %v9179_v47  ;;  %v9180_v5 = vunpack.i.l.bf16 %v9179_v47  ;;  %v9159_v4 = vpop.permute.xlu0 %9158  ;;  %v6563_v30 = vpack.c.bf16 %v5715_v44, %v5713_v24 }
 0x948   : > { %v9161_v38 = vunpack.i.h.bf16 %v9159_v4  ;;  %v9160_v60 = vunpack.i.l.bf16 %v9159_v4 }
 0x949   : > { %v5722_v25 = vsel %vm3778_vm14, %v9181_v63, %v9170_v26  ;;  %6562 = vmatpush1.bf16.msra.mxu0 %v6561_v13 }
 0x94a   : > { %v5720_v15 = vsel %vm3778_vm14, %v9180_v5, %v9160_v60  ;;  %v5721_v35 = vsel %vm3778_vm14, %v9160_v60, %v9161_v38  ;;  %6564 = vmatprep.subr.bf16.mxu0 %v6563_v30 }
 0x94b   : > { %v6573_v40 = vpack.c.bf16 %v5722_v25, %v5720_v15  ;;  %v9174_v51 = vpop.permute.xlu0 %9173  ;;  %v6571_v42 = vpack.c.bf16 %v5723_v21, %v5721_v35 }
 0x94c   : > { %v9176_v52 = vunpack.i.h.bf16 %v9174_v51  ;;  %v9175_v31 = vunpack.i.l.bf16 %v9174_v51 }
 0x94d   : > { %6572 = vmatprep.subr.bf16.mxu1 %v6571_v42 }
 0x94e   : > { %v5714_v59 = vsel %vm3778_vm14, %v9176_v52, %v9165_v41  ;;  %v5712_v54 = vsel %vm3778_vm14, %v9175_v31, %v9155_v49  ;;  %6574 = vmatpush1.bf16.msra.mxu1 %v6573_v40  ;;  %vm6138_vm14 = vcmp.lt.s32.totalorder %v17120_v57, 256 }
 0x94f   : > { %v6565_v6 = vpack.c.bf16 %v5714_v59, %v5712_v54  ;;  %6229 = vmatprep.subr.msk.mxu1 %vm17117_vm12, %v17116_v61 }
 0x951   : > { %6566 = vmatpush1.bf16.msra.mxu0 %v6565_v6 }
 0x952   : > { %6230 = vmatpush1.msk.msra.mxu1 %vm17118_vm9, %v17116_v61 }
 0x953   : > { %6231 = vmatmul.mubr.msk.f32.vlgmr.msra.gmra.mrb[10].mxu1 %vm17119_vm7, %v5825_v11 }
 0x954   : > { %6041 = vmatmul.mubr.f32.vlgmr.msra.gmra.mrb[4].mxu0 %v5817_v3 }
 0x99c   : > { %v5900_v29 = vpop.f32.mrb[8].mxu1 }
 0x99d   : > { %v5902_v32 = vpop.f32.mrb[9].mxu1 }
 0xa26   : > { %v6113_v55 = vpop.f32.mrb[10].mxu1 }
 0xa27   : > { %v6042_v12 = vpop.f32.mrb[4].mxu0  ;;  %v6115_v62 = vpop.f32.mrb[11].mxu1 }
 0xa28   : > { %v6575_v27 = vadd.f32 %v6042_v12, %v5900_v29  ;;  %v6044_v53 = vpop.f32.mrb[5].mxu0 }
 0xa29   : > { %v6577_v19 = vadd.f32 %v6044_v53, %v5902_v32 }
 0xa2a   : > { %v6576_v43 = vadd.f32 %v6575_v27, %v6113_v55 }
 0xa2b   : > { %v6578_v34 = vadd.f32 %v6577_v19, %v6115_v62 }
 0xa2d   : > { %v6120_v17 = vcombine.low %v6576_v43, %v6578_v34 }
 0xa2f   : > { %v6127_v36 = vrot.slane %v6120_v17, %v6126_v28 }
 0xa31   : > { %v6134_v22 = vrot.slane %v6127_v36, %v6126_v28 }
 0xa33   : > { %6140 = vst.msk [vmem:[%s195_s10] sm:$0x3] %vm6138_vm14, %v6134_v22 }
 0xa34 PF: > { %s14_s15 = sadd.s32 1, %s9189_s15  }
 0xa35   : > { %p11_p4 = scmp.ge.s32.totalorder %s14_s15, 4  }
 0xa37   :  { %13 = sbr.rel (!%p11_p4) target bundleno = 1 (0x1), region = 66 }

</bundles_post_ra>
